<compile_context>
chip_gen: v7x
topology: tpu7x:2x2x1
jax: 0.10.0
libtpu: 0.0.40
codegen_flags: <defaults>
</compile_context>

<pallas_src>
import functools
import math

import jax
import jax.numpy as jnp
from jax.experimental import pallas as pl
from jax.experimental.pallas import tpu as pltpu

# Hyperparameters from the PyTorch module.
IMAGE_SIZE = 28
PATCH_SIZE = 7
NUM_CLASSES = 10
HIDDEN_DIM = 64
NUM_HEADS = 4
NUM_LAYERS = 4
FF_DIM = 2048                      # nn.TransformerEncoderLayer default
HEAD_DIM = HIDDEN_DIM // NUM_HEADS
NUM_PATCHES = (IMAGE_SIZE // PATCH_SIZE) ** 2   # 16
PATCH_DIM = PATCH_SIZE * PATCH_SIZE             # 49
PATCH_DIM_PAD = 64                              # lane-pad 49 -> 64 (bf16 input)
OUT_PAD = 128                                   # lane-dense classifier output
LN_EPS = 1e-5
FF_CHUNK = 256                     # only used for the large-M fallback
NEG_INF = -1e9                     # additive mask for cross-patch attention


def _layer_norm(x, w, b):
    mu = jnp.mean(x, axis=-1, keepdims=True)
    var = jnp.mean((x - mu) ** 2, axis=-1, keepdims=True)
    return (x - mu) * jax.lax.rsqrt(var + LN_EPS) * w + b


def vit_kernel(patches_ref, pid_col_ref, pid_row_ref, bid_row_ref,
               wp_ref, bp_ref,
               ipw_ref, ipb_ref, opw_ref, opb_ref,
               ln1w_ref, ln1b_ref, ff1w_ref, ff1b_ref,
               ff2w_ref, ff2b_ref, ln2w_ref, ln2b_ref,
               wc_ref, out_ref, *, batch):
    D, H, HD = HIDDEN_DIM, NUM_HEADS, HEAD_DIM
    B = batch
    M = patches_ref.shape[0]
    scale = 1.0 / math.sqrt(HD)
    bf16 = jnp.bfloat16

    # Block-diagonal additive attention bias (0 within a patch position, -1e9
    # across patch positions), built in-kernel from O(M) int vectors instead
    # of DMA-ing an O(M^2) f32 matrix.  Hoisted out of the layer loop.
    attn_bias = jnp.where(pid_col_ref[...] == pid_row_ref[...],
                          0.0, NEG_INF).astype(jnp.float32)          # (M, M)

    # Patch embedding, lane-dense: (M, 64) bf16 @ (64, 64) bf16 -> f32.
    h = jnp.dot(patches_ref[...], wp_ref[...],
                preferred_element_type=jnp.float32) + bp_ref[...]

    for l in range(NUM_LAYERS):                       # static unroll (4 layers)
        # ---- fused multi-head self-attention (over the batch axis) ----
        hb = h.astype(bf16)
        qkv = jnp.dot(hb, ipw_ref[l], preferred_element_type=jnp.float32)
        qkvb = (qkv + ipb_ref[l]).astype(bf16)        # single (M, 3D) cast

        attn = jnp.zeros((M, D), jnp.float32)
        for hh in range(H):
            lo = hh * HD
            q = qkvb[:, lo:lo + HD]                   # (M, HD) bf16
            k = qkvb[:, D + lo:D + lo + HD]
            v = qkvb[:, 2 * D + lo:2 * D + lo + HD]

            s = jnp.einsum('se,te->st', q, k,
                           preferred_element_type=jnp.float32) * scale
            s = s + attn_bias                         # mask cross-patch rows
            s = s - jnp.max(s, axis=-1, keepdims=True)
            p = jnp.exp(s)
            p = p * pl.reciprocal(jnp.sum(p, axis=-1, keepdims=True),
                                  approx=True)
            head = jnp.dot(p.astype(bf16), v,
                           preferred_element_type=jnp.float32)       # (M, HD)
            # Per-head partial out-projection: no sub-128-lane concat needed.
            attn = attn + jnp.dot(head.astype(bf16),
                                  opw_ref[l, lo:lo + HD, :],
                                  preferred_element_type=jnp.float32)
        attn = attn + opb_ref[l]
        h = _layer_norm(h + attn, ln1w_ref[l], ln1b_ref[l])

        # ---- feed-forward (ReLU) ----
        hb = h.astype(bf16)
        if M <= 128:
            # Small-M regime: single-shot (M,64)@(64,2048) + (M,2048)@(2048,64).
            t = jnp.dot(hb, ff1w_ref[l],
                        preferred_element_type=jnp.float32) + ff1b_ref[l]
            t = jnp.maximum(t, 0.0).astype(bf16)
            ff = jnp.dot(t, ff2w_ref[l], preferred_element_type=jnp.float32)
        else:
            # Large-M regime: chunk over FF_DIM with bounded live ranges.
            def body(c, acc):
                c0 = pl.multiple_of(c * FF_CHUNK, FF_CHUNK)
                t = jnp.dot(hb, ff1w_ref[l, :, pl.ds(c0, FF_CHUNK)],
                            preferred_element_type=jnp.float32)
                t = t + ff1b_ref[l, :, pl.ds(c0, FF_CHUNK)]
                t = jnp.maximum(t, 0.0).astype(bf16)
                return acc + jnp.dot(t, ff2w_ref[l, pl.ds(c0, FF_CHUNK), :],
                                     preferred_element_type=jnp.float32)
            ff = jax.lax.fori_loop(0, FF_DIM // FF_CHUNK, body,
                                   jnp.zeros((M, D), jnp.float32), unroll=True)
        h = _layer_norm(h + ff + ff2b_ref[l], ln2w_ref[l], ln2b_ref[l])

    # Mean-pool over patch positions via a one-hot bf16 matmul, then the
    # classifier head; bf16 operands, f32 accumulation, lane-dense output.
    row_ids = jax.lax.broadcasted_iota(jnp.int32, (B, M), 0)
    pool = jnp.where(bid_row_ref[...] == row_ids,
                     1.0 / NUM_PATCHES, 0.0).astype(bf16)            # (B, M)
    pooled = jnp.dot(pool, h.astype(bf16),
                     preferred_element_type=jnp.float32)             # (B, D)
    out_ref[...] = jnp.dot(pooled.astype(bf16), wc_ref[...],
                           preferred_element_type=jnp.float32)       # (B, 128)


def patchify(x):
    """(B, 1, 28, 28) NCHW -> (NUM_PATCHES*B, 64) bf16, rows ordered (patch, batch)."""
    B = x.shape[0]
    g = IMAGE_SIZE // PATCH_SIZE
    p = x.reshape(B, g, PATCH_SIZE, g, PATCH_SIZE)
    p = p.transpose(0, 1, 3, 2, 4).reshape(B, NUM_PATCHES, PATCH_DIM)
    p = p.transpose(1, 0, 2).reshape(NUM_PATCHES * B, PATCH_DIM)
    p = jnp.pad(p, ((0, 0), (0, PATCH_DIM_PAD - PATCH_DIM)))
    return p.astype(jnp.bfloat16)


@jax.jit
def vit_forward(x, kp):
    B = x.shape[0]
    M = NUM_PATCHES * B                 # all patch positions in one fat step

    patches = patchify(x.astype(jnp.float32))          # (M, 64) bf16

    # O(M) index vectors (patch id / batch id per row, rows ordered
    # (patch, batch)) used to build the attention bias and pool in-kernel.
    rows = jnp.arange(M, dtype=jnp.int32)
    pid = rows // B
    bid = rows % B
    pid_col = pid.reshape(M, 1)
    pid_row = pid.reshape(1, M)
    bid_row = bid.reshape(1, M)

    def resident(a):
        nd = a.ndim
        return pl.BlockSpec(a.shape, lambda i, _nd=nd: (0,) * _nd)

    args = (patches, pid_col, pid_row, bid_row,
            kp['wp'], kp['bp'], kp['ipw'], kp['ipb'], kp['opw'], kp['opb'],
            kp['ln1w'], kp['ln1b'], kp['ff1w'], kp['ff1b'],
            kp['ff2w'], kp['ff2b'], kp['ln2w'], kp['ln2b'], kp['wc'])
    in_specs = [resident(a) for a in args]

    out = pl.pallas_call(
        functools.partial(vit_kernel, batch=B),
        grid=(1,),
        in_specs=in_specs,
        out_specs=pl.BlockSpec((B, OUT_PAD), lambda i: (0, 0)),
        out_shape=jax.ShapeDtypeStruct((B, OUT_PAD), jnp.float32),
        compiler_params=pltpu.CompilerParams(
            dimension_semantics=("arbitrary",),
            vmem_limit_bytes=16 * 1024 * 1024),
    )(*args)

    return out[:, :NUM_CLASSES] + kp['bc']


def init_params(key):
    """Parameters in PyTorch layout (f32)."""
    ks = jax.random.split(key, 12)

    def nrm(k, shape, scl=0.05):
        return (scl * jax.random.normal(k, shape)).astype(jnp.float32)

    L, D, F, C = NUM_LAYERS, HIDDEN_DIM, FF_DIM, NUM_CLASSES
    return dict(
        conv_w=nrm(ks[0], (D, 1, PATCH_SIZE, PATCH_SIZE)),
        conv_b=nrm(ks[1], (D,)),
        in_proj_w=nrm(ks[2], (L, 3 * D, D)),
        in_proj_b=nrm(ks[3], (L, 3 * D)),
        out_proj_w=nrm(ks[4], (L, D, D)),
        out_proj_b=nrm(ks[5], (L, D)),
        ln1_w=jnp.ones((L, D), jnp.float32),
        ln1_b=jnp.zeros((L, D), jnp.float32),
        lin1_w=nrm(ks[6], (L, F, D)),
        lin1_b=nrm(ks[7], (L, F)),
        lin2_w=nrm(ks[8], (L, D, F)),
        lin2_b=nrm(ks[9], (L, D)),
        ln2_w=jnp.ones((L, D), jnp.float32),
        ln2_b=jnp.zeros((L, D), jnp.float32),
        cls_w=nrm(ks[10], (C, D)),
        cls_b=nrm(ks[11], (C,)),
    )


def prepare_kernel_params(p):
    """Pre-transpose to (in, out) layouts, cast matmul weights to bf16."""
    bf16, f32 = jnp.bfloat16, jnp.float32
    L, D, F, C = NUM_LAYERS, HIDDEN_DIM, FF_DIM, NUM_CLASSES
    wp = p['conv_w'].reshape(D, PATCH_DIM).T                      # (49, 64)
    wp = jnp.pad(wp, ((0, PATCH_DIM_PAD - PATCH_DIM), (0, 0)))    # (64, 64)
    wc = jnp.pad(p['cls_w'].T, ((0, 0), (0, OUT_PAD - C)))        # (64, 128)
    return dict(
        wp=wp.astype(bf16),
        bp=p['conv_b'].reshape(1, D).astype(f32),
        ipw=jnp.transpose(p['in_proj_w'], (0, 2, 1)).astype(bf16),   # (L, D, 3D)
        ipb=p['in_proj_b'].reshape(L, 1, 3 * D).astype(f32),
        opw=jnp.transpose(p['out_proj_w'], (0, 2, 1)).astype(bf16),  # (L, D, D)
        opb=p['out_proj_b'].reshape(L, 1, D).astype(f32),
        ln1w=p['ln1_w'].reshape(L, 1, D).astype(f32),
        ln1b=p['ln1_b'].reshape(L, 1, D).astype(f32),
        ff1w=jnp.transpose(p['lin1_w'], (0, 2, 1)).astype(bf16),     # (L, D, F)
        ff1b=p['lin1_b'].reshape(L, 1, F).astype(f32),
        ff2w=jnp.transpose(p['lin2_w'], (0, 2, 1)).astype(bf16),     # (L, F, D)
        ff2b=p['lin2_b'].reshape(L, 1, D).astype(f32),
        ln2w=p['ln2_w'].reshape(L, 1, D).astype(f32),
        ln2b=p['ln2_b'].reshape(L, 1, D).astype(f32),
        wc=wc.astype(bf16),                                          # (D, 128)
        bc=p['cls_b'].reshape(1, C).astype(f32),
    )


def vit_reference(x, p):
    """Pure-JAX f32 reference with identical semantics (sanity check)."""
    D, H, HD = HIDDEN_DIM, NUM_HEADS, HEAD_DIM
    scale = 1.0 / math.sqrt(HD)
    B = x.shape[0]
    g = IMAGE_SIZE // PATCH_SIZE
    pt = x.reshape(B, g, PATCH_SIZE, g, PATCH_SIZE)
    pt = pt.transpose(0, 1, 3, 2, 4).reshape(B, NUM_PATCHES, PATCH_DIM)
    patches = pt.transpose(1, 0, 2)                              # (N, B, 49)
    wp = p['conv_w'].reshape(D, PATCH_DIM)
    h = jnp.einsum('nbp,dp->nbd', patches, wp) + p['conv_b']
    for l in range(NUM_LAYERS):
        qkv = jnp.einsum('nbd,ed->nbe', h, p['in_proj_w'][l]) + p['in_proj_b'][l]
        q, k, v = qkv[..., :D], qkv[..., D:2 * D], qkv[..., 2 * D:]
        N = q.shape[0]
        qh = q.reshape(N, B, H, HD).transpose(0, 2, 1, 3)
        kh = k.reshape(N, B, H, HD).transpose(0, 2, 1, 3)
        vh = v.reshape(N, B, H, HD).transpose(0, 2, 1, 3)
        s = jnp.einsum('nhse,nhte->nhst', qh, kh) * scale
        pr = jax.nn.softmax(s, axis=-1)
        o = jnp.einsum('nhst,nhte->nhse', pr, vh)
        o = o.transpose(0, 2, 1, 3).reshape(N, B, D)
        attn = jnp.einsum('nbd,ed->nbe', o, p['out_proj_w'][l]) + p['out_proj_b'][l]
        h = _layer_norm(h + attn, p['ln1_w'][l], p['ln1_b'][l])
        ff = jax.nn.relu(
            jnp.einsum('nbd,fd->nbf', h, p['lin1_w'][l]) + p['lin1_b'][l])
        ff = jnp.einsum('nbf,df->nbd', ff, p['lin2_w'][l]) + p['lin2_b'][l]
        h = _layer_norm(h + ff, p['ln2_w'][l], p['ln2_b'][l])
    pooled = jnp.mean(h, axis=0)
    return pooled @ p['cls_w'].T + p['cls_b']


if __name__ == "__main__":
    key = jax.random.PRNGKey(0)
    pkey, xkey = jax.random.split(key)
    params = init_params(pkey)
    kparams = prepare_kernel_params(params)
    x = jax.random.normal(xkey, (2, 1, IMAGE_SIZE, IMAGE_SIZE), dtype=jnp.float32)

    out = jax.block_until_ready(vit_forward(x, kparams))
    assert out.shape == (2, NUM_CLASSES), out.shape

    ref = vit_reference(x, params)
    max_diff = float(jnp.max(jnp.abs(out - ref)))
    if not bool(jnp.allclose(out, ref, atol=5e-2, rtol=5e-2)):
        raise AssertionError(f"kernel/reference mismatch, max abs diff = {max_diff}")

    print("KERNEL_OK")
</pallas_src>

<mosaic_0001>
module attributes {stable_mosaic.version = 11 : i64} {
  func.func @vit_kernel(%arg0: i32, %arg1: memref<32x64xbf16, #tpu.memory_space<vmem>>, %arg2: memref<32x1xi32, #tpu.memory_space<vmem>>, %arg3: memref<1x32xi32, #tpu.memory_space<vmem>>, %arg4: memref<1x32xi32, #tpu.memory_space<vmem>>, %arg5: memref<64x64xbf16, #tpu.memory_space<vmem>>, %arg6: memref<1x64xf32, #tpu.memory_space<vmem>>, %arg7: memref<4x64x192xbf16, #tpu.memory_space<vmem>>, %arg8: memref<4x1x192xf32, #tpu.memory_space<vmem>>, %arg9: memref<4x64x64xbf16, #tpu.memory_space<vmem>>, %arg10: memref<4x1x64xf32, #tpu.memory_space<vmem>>, %arg11: memref<4x1x64xf32, #tpu.memory_space<vmem>>, %arg12: memref<4x1x64xf32, #tpu.memory_space<vmem>>, %arg13: memref<4x64x2048xbf16, #tpu.memory_space<vmem>>, %arg14: memref<4x1x2048xf32, #tpu.memory_space<vmem>>, %arg15: memref<4x2048x64xbf16, #tpu.memory_space<vmem>>, %arg16: memref<4x1x64xf32, #tpu.memory_space<vmem>>, %arg17: memref<4x1x64xf32, #tpu.memory_space<vmem>>, %arg18: memref<4x1x64xf32, #tpu.memory_space<vmem>>, %arg19: memref<64x128xbf16, #tpu.memory_space<vmem>>, %arg20: memref<2x128xf32, #tpu.memory_space<vmem>>) attributes {dimension_semantics = [#tpu.dimension_semantics<arbitrary>], iteration_bounds = array<i64: 1>, scalar_prefetch = 0 : i64, scratch_operands = 0 : i64, tpu.core_type = #tpu.core_type<tc>, window_params = [{pipeline_mode = #tpu.pipeline_mode<synchronous>, transform_indices = @transform_0, window_bounds = array<i64: 32, 64>}, {pipeline_mode = #tpu.pipeline_mode<synchronous>, transform_indices = @transform_1, window_bounds = array<i64: 32, 1>}, {pipeline_mode = #tpu.pipeline_mode<synchronous>, transform_indices = @transform_2, window_bounds = array<i64: 1, 32>}, {pipeline_mode = #tpu.pipeline_mode<synchronous>, transform_indices = @transform_3, window_bounds = array<i64: 1, 32>}, {pipeline_mode = #tpu.pipeline_mode<synchronous>, transform_indices = @transform_4, window_bounds = array<i64: 64, 64>}, {pipeline_mode = #tpu.pipeline_mode<synchronous>, transform_indices = @transform_5, window_bounds = array<i64: 1, 64>}, {pipeline_mode = #tpu.pipeline_mode<synchronous>, transform_indices = @transform_6, window_bounds = array<i64: 4, 64, 192>}, {pipeline_mode = #tpu.pipeline_mode<synchronous>, transform_indices = @transform_7, window_bounds = array<i64: 4, 1, 192>}, {pipeline_mode = #tpu.pipeline_mode<synchronous>, transform_indices = @transform_8, window_bounds = array<i64: 4, 64, 64>}, {pipeline_mode = #tpu.pipeline_mode<synchronous>, transform_indices = @transform_9, window_bounds = array<i64: 4, 1, 64>}, {pipeline_mode = #tpu.pipeline_mode<synchronous>, transform_indices = @transform_10, window_bounds = array<i64: 4, 1, 64>}, {pipeline_mode = #tpu.pipeline_mode<synchronous>, transform_indices = @transform_11, window_bounds = array<i64: 4, 1, 64>}, {pipeline_mode = #tpu.pipeline_mode<synchronous>, transform_indices = @transform_12, window_bounds = array<i64: 4, 64, 2048>}, {pipeline_mode = #tpu.pipeline_mode<synchronous>, transform_indices = @transform_13, window_bounds = array<i64: 4, 1, 2048>}, {pipeline_mode = #tpu.pipeline_mode<synchronous>, transform_indices = @transform_14, window_bounds = array<i64: 4, 2048, 64>}, {pipeline_mode = #tpu.pipeline_mode<synchronous>, transform_indices = @transform_15, window_bounds = array<i64: 4, 1, 64>}, {pipeline_mode = #tpu.pipeline_mode<synchronous>, transform_indices = @transform_16, window_bounds = array<i64: 4, 1, 64>}, {pipeline_mode = #tpu.pipeline_mode<synchronous>, transform_indices = @transform_17, window_bounds = array<i64: 4, 1, 64>}, {pipeline_mode = #tpu.pipeline_mode<synchronous>, transform_indices = @transform_18, window_bounds = array<i64: 64, 128>}, {pipeline_mode = #tpu.pipeline_mode<synchronous>, transform_indices = @transform_19, window_bounds = array<i64: 2, 128>}]} {
    %c0 = arith.constant 0 : index
    %c0_0 = arith.constant 0 : index
    %0 = vector.load %arg2[%c0, %c0_0] : memref<32x1xi32, #tpu.memory_space<vmem>>, vector<32x1xi32>
    %c0_1 = arith.constant 0 : index
    %c0_2 = arith.constant 0 : index
    %1 = vector.load %arg3[%c0_1, %c0_2] : memref<1x32xi32, #tpu.memory_space<vmem>>, vector<1x32xi32>
    %2 = vector.broadcast %0 : vector<32x1xi32> to vector<32x32xi32>
    %3 = vector.broadcast %1 : vector<1x32xi32> to vector<32x32xi32>
    %4 = arith.cmpi eq, %2, %3 : vector<32x32xi32>
    %cst = arith.constant 0.000000e+00 : f32
    %cst_3 = arith.constant -1.000000e+09 : f32
    %5 = vector.broadcast %cst : f32 to vector<32x32xf32>
    %6 = vector.broadcast %cst_3 : f32 to vector<32x32xf32>
    %7 = arith.select %4, %5, %6 : vector<32x32xi1>, vector<32x32xf32>
    %c0_4 = arith.constant 0 : index
    %c0_5 = arith.constant 0 : index
    %8 = vector.load %arg1[%c0_4, %c0_5] : memref<32x64xbf16, #tpu.memory_space<vmem>>, vector<32x64xbf16>
    %c0_6 = arith.constant 0 : index
    %c0_7 = arith.constant 0 : index
    %9 = vector.load %arg5[%c0_6, %c0_7] : memref<64x64xbf16, #tpu.memory_space<vmem>>, vector<64x64xbf16>
    %cst_8 = arith.constant dense<0.000000e+00> : vector<32x64xf32>
    %10 = tpu.matmul %8, %9, %cst_8 {dimension_numbers = #tpu.dot_dimension_numbers<[1], [0], [0], [1], [0, 0, 1, 1], [], []>} : vector<32x64xbf16>, vector<64x64xbf16>, vector<32x64xf32> -> vector<32x64xf32>
    %c0_9 = arith.constant 0 : index
    %c0_10 = arith.constant 0 : index
    %11 = vector.load %arg6[%c0_9, %c0_10] : memref<1x64xf32, #tpu.memory_space<vmem>>, vector<1x64xf32>
    %12 = vector.broadcast %11 : vector<1x64xf32> to vector<32x64xf32>
    %13 = arith.addf %10, %12 : vector<32x64xf32>
    %14 = arith.truncf %13 : vector<32x64xf32> to vector<32x64xbf16>
    %c0_11 = arith.constant 0 : index
    %c0_12 = arith.constant 0 : index
    %c0_13 = arith.constant 0 : index
    %15 = vector.load %arg7[%c0_11, %c0_12, %c0_13] : memref<4x64x192xbf16, #tpu.memory_space<vmem>>, vector<1x64x192xbf16>
    %16 = vector.shape_cast %15 : vector<1x64x192xbf16> to vector<64x192xbf16>
    %cst_14 = arith.constant dense<0.000000e+00> : vector<32x192xf32>
    %17 = tpu.matmul %14, %16, %cst_14 {dimension_numbers = #tpu.dot_dimension_numbers<[1], [0], [0], [1], [0, 0, 1, 1], [], []>} : vector<32x64xbf16>, vector<64x192xbf16>, vector<32x192xf32> -> vector<32x192xf32>
    %c0_15 = arith.constant 0 : index
    %c0_16 = arith.constant 0 : index
    %c0_17 = arith.constant 0 : index
    %18 = vector.load %arg8[%c0_15, %c0_16, %c0_17] : memref<4x1x192xf32, #tpu.memory_space<vmem>>, vector<1x1x192xf32>
    %19 = vector.shape_cast %18 : vector<1x1x192xf32> to vector<1x192xf32>
    %20 = vector.broadcast %19 : vector<1x192xf32> to vector<32x192xf32>
    %21 = arith.addf %17, %20 : vector<32x192xf32>
    %22 = arith.truncf %21 : vector<32x192xf32> to vector<32x192xbf16>
    %cst_18 = arith.constant 0.000000e+00 : f32
    %23 = vector.broadcast %cst_18 : f32 to vector<32x64xf32>
    %24 = vector.extract_strided_slice %22 {offsets = [0, 0], sizes = [32, 16], strides = [1, 1]} : vector<32x192xbf16> to vector<32x16xbf16>
    %25 = vector.extract_strided_slice %22 {offsets = [0, 64], sizes = [32, 16], strides = [1, 1]} : vector<32x192xbf16> to vector<32x16xbf16>
    %26 = vector.extract_strided_slice %22 {offsets = [0, 128], sizes = [32, 16], strides = [1, 1]} : vector<32x192xbf16> to vector<32x16xbf16>
    "tpu.trace_start"() <{level = 10 : i32, message = "se,te->st"}> : () -> ()
    %cst_19 = arith.constant dense<0.000000e+00> : vector<32x32xf32>
    %27 = tpu.matmul %24, %25, %cst_19 {dimension_numbers = #tpu.dot_dimension_numbers<[1], [1], [0], [0], [0, 0, 1, 0], [], []>} : vector<32x16xbf16>, vector<32x16xbf16>, vector<32x32xf32> -> vector<32x32xf32>
    "tpu.trace_stop"() : () -> ()
    %cst_20 = arith.constant 2.500000e-01 : f32
    %28 = vector.broadcast %cst_20 : f32 to vector<32x32xf32>
    %29 = arith.mulf %27, %28 : vector<32x32xf32>
    %30 = arith.addf %29, %7 : vector<32x32xf32>
    %cst_21 = arith.constant dense<0xFF800000> : vector<32xf32>
    %31 = vector.multi_reduction <maximumf>, %30, %cst_21 [1] : vector<32x32xf32> to vector<32xf32>
    %32 = vector.shape_cast %31 : vector<32xf32> to vector<32x1xf32>
    %33 = vector.broadcast %32 : vector<32x1xf32> to vector<32x32xf32>
    %34 = arith.subf %30, %33 : vector<32x32xf32>
    %35 = math.exp %34 : vector<32x32xf32>
    %cst_22 = arith.constant dense<0.000000e+00> : vector<32xf32>
    %36 = vector.multi_reduction <add>, %35, %cst_22 [1] : vector<32x32xf32> to vector<32xf32>
    %37 = vector.shape_cast %36 : vector<32xf32> to vector<32x1xf32>
    %38 = tpu.reciprocal %37 {approx = true} : vector<32x1xf32> -> vector<32x1xf32>
    %39 = vector.broadcast %38 : vector<32x1xf32> to vector<32x32xf32>
    %40 = arith.mulf %35, %39 : vector<32x32xf32>
    %41 = arith.truncf %40 : vector<32x32xf32> to vector<32x32xbf16>
    %cst_23 = arith.constant dense<0.000000e+00> : vector<32x16xf32>
    %42 = tpu.matmul %41, %26, %cst_23 {dimension_numbers = #tpu.dot_dimension_numbers<[1], [0], [0], [1], [0, 0, 1, 1], [], []>} : vector<32x32xbf16>, vector<32x16xbf16>, vector<32x16xf32> -> vector<32x16xf32>
    %43 = arith.truncf %42 : vector<32x16xf32> to vector<32x16xbf16>
    %c0_24 = arith.constant 0 : index
    %c0_25 = arith.constant 0 : index
    %c0_26 = arith.constant 0 : index
    %44 = vector.load %arg9[%c0_24, %c0_25, %c0_26] : memref<4x64x64xbf16, #tpu.memory_space<vmem>>, vector<1x16x64xbf16>
    %45 = vector.shape_cast %44 : vector<1x16x64xbf16> to vector<16x64xbf16>
    %cst_27 = arith.constant dense<0.000000e+00> : vector<32x64xf32>
    %46 = tpu.matmul %43, %45, %cst_27 {dimension_numbers = #tpu.dot_dimension_numbers<[1], [0], [0], [1], [0, 0, 1, 1], [], []>} : vector<32x16xbf16>, vector<16x64xbf16>, vector<32x64xf32> -> vector<32x64xf32>
    %47 = arith.addf %23, %46 : vector<32x64xf32>
    %48 = vector.extract_strided_slice %22 {offsets = [0, 16], sizes = [32, 16], strides = [1, 1]} : vector<32x192xbf16> to vector<32x16xbf16>
    %49 = vector.extract_strided_slice %22 {offsets = [0, 80], sizes = [32, 16], strides = [1, 1]} : vector<32x192xbf16> to vector<32x16xbf16>
    %50 = vector.extract_strided_slice %22 {offsets = [0, 144], sizes = [32, 16], strides = [1, 1]} : vector<32x192xbf16> to vector<32x16xbf16>
    "tpu.trace_start"() <{level = 10 : i32, message = "se,te->st"}> : () -> ()
    %cst_28 = arith.constant dense<0.000000e+00> : vector<32x32xf32>
    %51 = tpu.matmul %48, %49, %cst_28 {dimension_numbers = #tpu.dot_dimension_numbers<[1], [1], [0], [0], [0, 0, 1, 0], [], []>} : vector<32x16xbf16>, vector<32x16xbf16>, vector<32x32xf32> -> vector<32x32xf32>
    "tpu.trace_stop"() : () -> ()
    %cst_29 = arith.constant 2.500000e-01 : f32
    %52 = vector.broadcast %cst_29 : f32 to vector<32x32xf32>
    %53 = arith.mulf %51, %52 : vector<32x32xf32>
    %54 = arith.addf %53, %7 : vector<32x32xf32>
    %cst_30 = arith.constant dense<0xFF800000> : vector<32xf32>
    %55 = vector.multi_reduction <maximumf>, %54, %cst_30 [1] : vector<32x32xf32> to vector<32xf32>
    %56 = vector.shape_cast %55 : vector<32xf32> to vector<32x1xf32>
    %57 = vector.broadcast %56 : vector<32x1xf32> to vector<32x32xf32>
    %58 = arith.subf %54, %57 : vector<32x32xf32>
    %59 = math.exp %58 : vector<32x32xf32>
    %cst_31 = arith.constant dense<0.000000e+00> : vector<32xf32>
    %60 = vector.multi_reduction <add>, %59, %cst_31 [1] : vector<32x32xf32> to vector<32xf32>
    %61 = vector.shape_cast %60 : vector<32xf32> to vector<32x1xf32>
    %62 = tpu.reciprocal %61 {approx = true} : vector<32x1xf32> -> vector<32x1xf32>
    %63 = vector.broadcast %62 : vector<32x1xf32> to vector<32x32xf32>
    %64 = arith.mulf %59, %63 : vector<32x32xf32>
    %65 = arith.truncf %64 : vector<32x32xf32> to vector<32x32xbf16>
    %cst_32 = arith.constant dense<0.000000e+00> : vector<32x16xf32>
    %66 = tpu.matmul %65, %50, %cst_32 {dimension_numbers = #tpu.dot_dimension_numbers<[1], [0], [0], [1], [0, 0, 1, 1], [], []>} : vector<32x32xbf16>, vector<32x16xbf16>, vector<32x16xf32> -> vector<32x16xf32>
    %67 = arith.truncf %66 : vector<32x16xf32> to vector<32x16xbf16>
    %c0_33 = arith.constant 0 : index
    %c16 = arith.constant 16 : index
    %c0_34 = arith.constant 0 : index
    %68 = vector.load %arg9[%c0_33, %c16, %c0_34] : memref<4x64x64xbf16, #tpu.memory_space<vmem>>, vector<1x16x64xbf16>
    %69 = vector.shape_cast %68 : vector<1x16x64xbf16> to vector<16x64xbf16>
    %cst_35 = arith.constant dense<0.000000e+00> : vector<32x64xf32>
    %70 = tpu.matmul %67, %69, %cst_35 {dimension_numbers = #tpu.dot_dimension_numbers<[1], [0], [0], [1], [0, 0, 1, 1], [], []>} : vector<32x16xbf16>, vector<16x64xbf16>, vector<32x64xf32> -> vector<32x64xf32>
    %71 = arith.addf %47, %70 : vector<32x64xf32>
    %72 = vector.extract_strided_slice %22 {offsets = [0, 32], sizes = [32, 16], strides = [1, 1]} : vector<32x192xbf16> to vector<32x16xbf16>
    %73 = vector.extract_strided_slice %22 {offsets = [0, 96], sizes = [32, 16], strides = [1, 1]} : vector<32x192xbf16> to vector<32x16xbf16>
    %74 = vector.extract_strided_slice %22 {offsets = [0, 160], sizes = [32, 16], strides = [1, 1]} : vector<32x192xbf16> to vector<32x16xbf16>
    "tpu.trace_start"() <{level = 10 : i32, message = "se,te->st"}> : () -> ()
    %cst_36 = arith.constant dense<0.000000e+00> : vector<32x32xf32>
    %75 = tpu.matmul %72, %73, %cst_36 {dimension_numbers = #tpu.dot_dimension_numbers<[1], [1], [0], [0], [0, 0, 1, 0], [], []>} : vector<32x16xbf16>, vector<32x16xbf16>, vector<32x32xf32> -> vector<32x32xf32>
    "tpu.trace_stop"() : () -> ()
    %cst_37 = arith.constant 2.500000e-01 : f32
    %76 = vector.broadcast %cst_37 : f32 to vector<32x32xf32>
    %77 = arith.mulf %75, %76 : vector<32x32xf32>
    %78 = arith.addf %77, %7 : vector<32x32xf32>
    %cst_38 = arith.constant dense<0xFF800000> : vector<32xf32>
    %79 = vector.multi_reduction <maximumf>, %78, %cst_38 [1] : vector<32x32xf32> to vector<32xf32>
    %80 = vector.shape_cast %79 : vector<32xf32> to vector<32x1xf32>
    %81 = vector.broadcast %80 : vector<32x1xf32> to vector<32x32xf32>
    %82 = arith.subf %78, %81 : vector<32x32xf32>
    %83 = math.exp %82 : vector<32x32xf32>
    %cst_39 = arith.constant dense<0.000000e+00> : vector<32xf32>
    %84 = vector.multi_reduction <add>, %83, %cst_39 [1] : vector<32x32xf32> to vector<32xf32>
    %85 = vector.shape_cast %84 : vector<32xf32> to vector<32x1xf32>
    %86 = tpu.reciprocal %85 {approx = true} : vector<32x1xf32> -> vector<32x1xf32>
    %87 = vector.broadcast %86 : vector<32x1xf32> to vector<32x32xf32>
    %88 = arith.mulf %83, %87 : vector<32x32xf32>
    %89 = arith.truncf %88 : vector<32x32xf32> to vector<32x32xbf16>
    %cst_40 = arith.constant dense<0.000000e+00> : vector<32x16xf32>
    %90 = tpu.matmul %89, %74, %cst_40 {dimension_numbers = #tpu.dot_dimension_numbers<[1], [0], [0], [1], [0, 0, 1, 1], [], []>} : vector<32x32xbf16>, vector<32x16xbf16>, vector<32x16xf32> -> vector<32x16xf32>
    %91 = arith.truncf %90 : vector<32x16xf32> to vector<32x16xbf16>
    %c0_41 = arith.constant 0 : index
    %c32 = arith.constant 32 : index
    %c0_42 = arith.constant 0 : index
    %92 = vector.load %arg9[%c0_41, %c32, %c0_42] : memref<4x64x64xbf16, #tpu.memory_space<vmem>>, vector<1x16x64xbf16>
    %93 = vector.shape_cast %92 : vector<1x16x64xbf16> to vector<16x64xbf16>
    %cst_43 = arith.constant dense<0.000000e+00> : vector<32x64xf32>
    %94 = tpu.matmul %91, %93, %cst_43 {dimension_numbers = #tpu.dot_dimension_numbers<[1], [0], [0], [1], [0, 0, 1, 1], [], []>} : vector<32x16xbf16>, vector<16x64xbf16>, vector<32x64xf32> -> vector<32x64xf32>
    %95 = arith.addf %71, %94 : vector<32x64xf32>
    %96 = vector.extract_strided_slice %22 {offsets = [0, 48], sizes = [32, 16], strides = [1, 1]} : vector<32x192xbf16> to vector<32x16xbf16>
    %97 = vector.extract_strided_slice %22 {offsets = [0, 112], sizes = [32, 16], strides = [1, 1]} : vector<32x192xbf16> to vector<32x16xbf16>
    %98 = vector.extract_strided_slice %22 {offsets = [0, 176], sizes = [32, 16], strides = [1, 1]} : vector<32x192xbf16> to vector<32x16xbf16>
    "tpu.trace_start"() <{level = 10 : i32, message = "se,te->st"}> : () -> ()
    %cst_44 = arith.constant dense<0.000000e+00> : vector<32x32xf32>
    %99 = tpu.matmul %96, %97, %cst_44 {dimension_numbers = #tpu.dot_dimension_numbers<[1], [1], [0], [0], [0, 0, 1, 0], [], []>} : vector<32x16xbf16>, vector<32x16xbf16>, vector<32x32xf32> -> vector<32x32xf32>
    "tpu.trace_stop"() : () -> ()
    %cst_45 = arith.constant 2.500000e-01 : f32
    %100 = vector.broadcast %cst_45 : f32 to vector<32x32xf32>
    %101 = arith.mulf %99, %100 : vector<32x32xf32>
    %102 = arith.addf %101, %7 : vector<32x32xf32>
    %cst_46 = arith.constant dense<0xFF800000> : vector<32xf32>
    %103 = vector.multi_reduction <maximumf>, %102, %cst_46 [1] : vector<32x32xf32> to vector<32xf32>
    %104 = vector.shape_cast %103 : vector<32xf32> to vector<32x1xf32>
    %105 = vector.broadcast %104 : vector<32x1xf32> to vector<32x32xf32>
    %106 = arith.subf %102, %105 : vector<32x32xf32>
    %107 = math.exp %106 : vector<32x32xf32>
    %cst_47 = arith.constant dense<0.000000e+00> : vector<32xf32>
    %108 = vector.multi_reduction <add>, %107, %cst_47 [1] : vector<32x32xf32> to vector<32xf32>
    %109 = vector.shape_cast %108 : vector<32xf32> to vector<32x1xf32>
    %110 = tpu.reciprocal %109 {approx = true} : vector<32x1xf32> -> vector<32x1xf32>
    %111 = vector.broadcast %110 : vector<32x1xf32> to vector<32x32xf32>
    %112 = arith.mulf %107, %111 : vector<32x32xf32>
    %113 = arith.truncf %112 : vector<32x32xf32> to vector<32x32xbf16>
    %cst_48 = arith.constant dense<0.000000e+00> : vector<32x16xf32>
    %114 = tpu.matmul %113, %98, %cst_48 {dimension_numbers = #tpu.dot_dimension_numbers<[1], [0], [0], [1], [0, 0, 1, 1], [], []>} : vector<32x32xbf16>, vector<32x16xbf16>, vector<32x16xf32> -> vector<32x16xf32>
    %115 = arith.truncf %114 : vector<32x16xf32> to vector<32x16xbf16>
    %c0_49 = arith.constant 0 : index
    %c48 = arith.constant 48 : index
    %c0_50 = arith.constant 0 : index
    %116 = vector.load %arg9[%c0_49, %c48, %c0_50] : memref<4x64x64xbf16, #tpu.memory_space<vmem>>, vector<1x16x64xbf16>
    %117 = vector.shape_cast %116 : vector<1x16x64xbf16> to vector<16x64xbf16>
    %cst_51 = arith.constant dense<0.000000e+00> : vector<32x64xf32>
    %118 = tpu.matmul %115, %117, %cst_51 {dimension_numbers = #tpu.dot_dimension_numbers<[1], [0], [0], [1], [0, 0, 1, 1], [], []>} : vector<32x16xbf16>, vector<16x64xbf16>, vector<32x64xf32> -> vector<32x64xf32>
    %119 = arith.addf %95, %118 : vector<32x64xf32>
    %c0_52 = arith.constant 0 : index
    %c0_53 = arith.constant 0 : index
    %c0_54 = arith.constant 0 : index
    %120 = vector.load %arg10[%c0_52, %c0_53, %c0_54] : memref<4x1x64xf32, #tpu.memory_space<vmem>>, vector<1x1x64xf32>
    %121 = vector.shape_cast %120 : vector<1x1x64xf32> to vector<1x64xf32>
    %122 = vector.broadcast %121 : vector<1x64xf32> to vector<32x64xf32>
    %123 = arith.addf %119, %122 : vector<32x64xf32>
    %124 = arith.addf %13, %123 : vector<32x64xf32>
    %c0_55 = arith.constant 0 : index
    %c0_56 = arith.constant 0 : index
    %c0_57 = arith.constant 0 : index
    %125 = vector.load %arg11[%c0_55, %c0_56, %c0_57] : memref<4x1x64xf32, #tpu.memory_space<vmem>>, vector<1x1x64xf32>
    %126 = vector.shape_cast %125 : vector<1x1x64xf32> to vector<1x64xf32>
    %c0_58 = arith.constant 0 : index
    %c0_59 = arith.constant 0 : index
    %c0_60 = arith.constant 0 : index
    %127 = vector.load %arg12[%c0_58, %c0_59, %c0_60] : memref<4x1x64xf32, #tpu.memory_space<vmem>>, vector<1x1x64xf32>
    %128 = vector.shape_cast %127 : vector<1x1x64xf32> to vector<1x64xf32>
    %cst_61 = arith.constant dense<0.000000e+00> : vector<32xf32>
    %129 = vector.multi_reduction <add>, %124, %cst_61 [1] : vector<32x64xf32> to vector<32xf32>
    %130 = vector.shape_cast %129 : vector<32xf32> to vector<32x1xf32>
    %cst_62 = arith.constant 6.400000e+01 : f32
    %131 = vector.broadcast %cst_62 : f32 to vector<32x1xf32>
    %132 = arith.divf %130, %131 : vector<32x1xf32>
    %133 = vector.broadcast %132 : vector<32x1xf32> to vector<32x64xf32>
    %134 = arith.subf %124, %133 : vector<32x64xf32>
    %135 = arith.mulf %134, %134 : vector<32x64xf32>
    %cst_63 = arith.constant dense<0.000000e+00> : vector<32xf32>
    %136 = vector.multi_reduction <add>, %135, %cst_63 [1] : vector<32x64xf32> to vector<32xf32>
    %137 = vector.shape_cast %136 : vector<32xf32> to vector<32x1xf32>
    %cst_64 = arith.constant 6.400000e+01 : f32
    %138 = vector.broadcast %cst_64 : f32 to vector<32x1xf32>
    %139 = arith.divf %137, %138 : vector<32x1xf32>
    %140 = vector.broadcast %132 : vector<32x1xf32> to vector<32x64xf32>
    %141 = arith.subf %124, %140 : vector<32x64xf32>
    %cst_65 = arith.constant 9.99999974E-6 : f32
    %142 = vector.broadcast %cst_65 : f32 to vector<32x1xf32>
    %143 = arith.addf %139, %142 : vector<32x1xf32>
    %144 = math.rsqrt %143 : vector<32x1xf32>
    %145 = vector.broadcast %144 : vector<32x1xf32> to vector<32x64xf32>
    %146 = arith.mulf %141, %145 : vector<32x64xf32>
    %147 = vector.broadcast %126 : vector<1x64xf32> to vector<32x64xf32>
    %148 = arith.mulf %146, %147 : vector<32x64xf32>
    %149 = vector.broadcast %128 : vector<1x64xf32> to vector<32x64xf32>
    %150 = arith.addf %148, %149 : vector<32x64xf32>
    %151 = arith.truncf %150 : vector<32x64xf32> to vector<32x64xbf16>
    %c0_66 = arith.constant 0 : index
    %c0_67 = arith.constant 0 : index
    %c0_68 = arith.constant 0 : index
    %152 = vector.load %arg13[%c0_66, %c0_67, %c0_68] : memref<4x64x2048xbf16, #tpu.memory_space<vmem>>, vector<1x64x2048xbf16>
    %153 = vector.shape_cast %152 : vector<1x64x2048xbf16> to vector<64x2048xbf16>
    %cst_69 = arith.constant dense<0.000000e+00> : vector<32x2048xf32>
    %154 = tpu.matmul %151, %153, %cst_69 {dimension_numbers = #tpu.dot_dimension_numbers<[1], [0], [0], [1], [0, 0, 1, 1], [], []>} : vector<32x64xbf16>, vector<64x2048xbf16>, vector<32x2048xf32> -> vector<32x2048xf32>
    %c0_70 = arith.constant 0 : index
    %c0_71 = arith.constant 0 : index
    %c0_72 = arith.constant 0 : index
    %155 = vector.load %arg14[%c0_70, %c0_71, %c0_72] : memref<4x1x2048xf32, #tpu.memory_space<vmem>>, vector<1x1x2048xf32>
    %156 = vector.shape_cast %155 : vector<1x1x2048xf32> to vector<1x2048xf32>
    %157 = vector.broadcast %156 : vector<1x2048xf32> to vector<32x2048xf32>
    %158 = arith.addf %154, %157 : vector<32x2048xf32>
    %cst_73 = arith.constant 0.000000e+00 : f32
    %159 = vector.broadcast %cst_73 : f32 to vector<32x2048xf32>
    %160 = arith.maximumf %158, %159 : vector<32x2048xf32>
    %161 = arith.truncf %160 : vector<32x2048xf32> to vector<32x2048xbf16>
    %c0_74 = arith.constant 0 : index
    %c0_75 = arith.constant 0 : index
    %c0_76 = arith.constant 0 : index
    %162 = vector.load %arg15[%c0_74, %c0_75, %c0_76] : memref<4x2048x64xbf16, #tpu.memory_space<vmem>>, vector<1x2048x64xbf16>
    %163 = vector.shape_cast %162 : vector<1x2048x64xbf16> to vector<2048x64xbf16>
    %cst_77 = arith.constant dense<0.000000e+00> : vector<32x64xf32>
    %164 = tpu.matmul %161, %163, %cst_77 {dimension_numbers = #tpu.dot_dimension_numbers<[1], [0], [0], [1], [0, 0, 1, 1], [], []>} : vector<32x2048xbf16>, vector<2048x64xbf16>, vector<32x64xf32> -> vector<32x64xf32>
    %165 = arith.addf %150, %164 : vector<32x64xf32>
    %c0_78 = arith.constant 0 : index
    %c0_79 = arith.constant 0 : index
    %c0_80 = arith.constant 0 : index
    %166 = vector.load %arg16[%c0_78, %c0_79, %c0_80] : memref<4x1x64xf32, #tpu.memory_space<vmem>>, vector<1x1x64xf32>
    %167 = vector.shape_cast %166 : vector<1x1x64xf32> to vector<1x64xf32>
    %168 = vector.broadcast %167 : vector<1x64xf32> to vector<32x64xf32>
    %169 = arith.addf %165, %168 : vector<32x64xf32>
    %c0_81 = arith.constant 0 : index
    %c0_82 = arith.constant 0 : index
    %c0_83 = arith.constant 0 : index
    %170 = vector.load %arg17[%c0_81, %c0_82, %c0_83] : memref<4x1x64xf32, #tpu.memory_space<vmem>>, vector<1x1x64xf32>
    %171 = vector.shape_cast %170 : vector<1x1x64xf32> to vector<1x64xf32>
    %c0_84 = arith.constant 0 : index
    %c0_85 = arith.constant 0 : index
    %c0_86 = arith.constant 0 : index
    %172 = vector.load %arg18[%c0_84, %c0_85, %c0_86] : memref<4x1x64xf32, #tpu.memory_space<vmem>>, vector<1x1x64xf32>
    %173 = vector.shape_cast %172 : vector<1x1x64xf32> to vector<1x64xf32>
    %cst_87 = arith.constant dense<0.000000e+00> : vector<32xf32>
    %174 = vector.multi_reduction <add>, %169, %cst_87 [1] : vector<32x64xf32> to vector<32xf32>
    %175 = vector.shape_cast %174 : vector<32xf32> to vector<32x1xf32>
    %cst_88 = arith.constant 6.400000e+01 : f32
    %176 = vector.broadcast %cst_88 : f32 to vector<32x1xf32>
    %177 = arith.divf %175, %176 : vector<32x1xf32>
    %178 = vector.broadcast %177 : vector<32x1xf32> to vector<32x64xf32>
    %179 = arith.subf %169, %178 : vector<32x64xf32>
    %180 = arith.mulf %179, %179 : vector<32x64xf32>
    %cst_89 = arith.constant dense<0.000000e+00> : vector<32xf32>
    %181 = vector.multi_reduction <add>, %180, %cst_89 [1] : vector<32x64xf32> to vector<32xf32>
    %182 = vector.shape_cast %181 : vector<32xf32> to vector<32x1xf32>
    %cst_90 = arith.constant 6.400000e+01 : f32
    %183 = vector.broadcast %cst_90 : f32 to vector<32x1xf32>
    %184 = arith.divf %182, %183 : vector<32x1xf32>
    %185 = vector.broadcast %177 : vector<32x1xf32> to vector<32x64xf32>
    %186 = arith.subf %169, %185 : vector<32x64xf32>
    %cst_91 = arith.constant 9.99999974E-6 : f32
    %187 = vector.broadcast %cst_91 : f32 to vector<32x1xf32>
    %188 = arith.addf %184, %187 : vector<32x1xf32>
    %189 = math.rsqrt %188 : vector<32x1xf32>
    %190 = vector.broadcast %189 : vector<32x1xf32> to vector<32x64xf32>
    %191 = arith.mulf %186, %190 : vector<32x64xf32>
    %192 = vector.broadcast %171 : vector<1x64xf32> to vector<32x64xf32>
    %193 = arith.mulf %191, %192 : vector<32x64xf32>
    %194 = vector.broadcast %173 : vector<1x64xf32> to vector<32x64xf32>
    %195 = arith.addf %193, %194 : vector<32x64xf32>
    %196 = arith.truncf %195 : vector<32x64xf32> to vector<32x64xbf16>
    %c1 = arith.constant 1 : index
    %c0_92 = arith.constant 0 : index
    %c0_93 = arith.constant 0 : index
    %197 = vector.load %arg7[%c1, %c0_92, %c0_93] : memref<4x64x192xbf16, #tpu.memory_space<vmem>>, vector<1x64x192xbf16>
    %198 = vector.shape_cast %197 : vector<1x64x192xbf16> to vector<64x192xbf16>
    %cst_94 = arith.constant dense<0.000000e+00> : vector<32x192xf32>
    %199 = tpu.matmul %196, %198, %cst_94 {dimension_numbers = #tpu.dot_dimension_numbers<[1], [0], [0], [1], [0, 0, 1, 1], [], []>} : vector<32x64xbf16>, vector<64x192xbf16>, vector<32x192xf32> -> vector<32x192xf32>
    %c1_95 = arith.constant 1 : index
    %c0_96 = arith.constant 0 : index
    %c0_97 = arith.constant 0 : index
    %200 = vector.load %arg8[%c1_95, %c0_96, %c0_97] : memref<4x1x192xf32, #tpu.memory_space<vmem>>, vector<1x1x192xf32>
    %201 = vector.shape_cast %200 : vector<1x1x192xf32> to vector<1x192xf32>
    %202 = vector.broadcast %201 : vector<1x192xf32> to vector<32x192xf32>
    %203 = arith.addf %199, %202 : vector<32x192xf32>
    %204 = arith.truncf %203 : vector<32x192xf32> to vector<32x192xbf16>
    %cst_98 = arith.constant 0.000000e+00 : f32
    %205 = vector.broadcast %cst_98 : f32 to vector<32x64xf32>
    %206 = vector.extract_strided_slice %204 {offsets = [0, 0], sizes = [32, 16], strides = [1, 1]} : vector<32x192xbf16> to vector<32x16xbf16>
    %207 = vector.extract_strided_slice %204 {offsets = [0, 64], sizes = [32, 16], strides = [1, 1]} : vector<32x192xbf16> to vector<32x16xbf16>
    %208 = vector.extract_strided_slice %204 {offsets = [0, 128], sizes = [32, 16], strides = [1, 1]} : vector<32x192xbf16> to vector<32x16xbf16>
    "tpu.trace_start"() <{level = 10 : i32, message = "se,te->st"}> : () -> ()
    %cst_99 = arith.constant dense<0.000000e+00> : vector<32x32xf32>
    %209 = tpu.matmul %206, %207, %cst_99 {dimension_numbers = #tpu.dot_dimension_numbers<[1], [1], [0], [0], [0, 0, 1, 0], [], []>} : vector<32x16xbf16>, vector<32x16xbf16>, vector<32x32xf32> -> vector<32x32xf32>
    "tpu.trace_stop"() : () -> ()
    %cst_100 = arith.constant 2.500000e-01 : f32
    %210 = vector.broadcast %cst_100 : f32 to vector<32x32xf32>
    %211 = arith.mulf %209, %210 : vector<32x32xf32>
    %212 = arith.addf %211, %7 : vector<32x32xf32>
    %cst_101 = arith.constant dense<0xFF800000> : vector<32xf32>
    %213 = vector.multi_reduction <maximumf>, %212, %cst_101 [1] : vector<32x32xf32> to vector<32xf32>
    %214 = vector.shape_cast %213 : vector<32xf32> to vector<32x1xf32>
    %215 = vector.broadcast %214 : vector<32x1xf32> to vector<32x32xf32>
    %216 = arith.subf %212, %215 : vector<32x32xf32>
    %217 = math.exp %216 : vector<32x32xf32>
    %cst_102 = arith.constant dense<0.000000e+00> : vector<32xf32>
    %218 = vector.multi_reduction <add>, %217, %cst_102 [1] : vector<32x32xf32> to vector<32xf32>
    %219 = vector.shape_cast %218 : vector<32xf32> to vector<32x1xf32>
    %220 = tpu.reciprocal %219 {approx = true} : vector<32x1xf32> -> vector<32x1xf32>
    %221 = vector.broadcast %220 : vector<32x1xf32> to vector<32x32xf32>
    %222 = arith.mulf %217, %221 : vector<32x32xf32>
    %223 = arith.truncf %222 : vector<32x32xf32> to vector<32x32xbf16>
    %cst_103 = arith.constant dense<0.000000e+00> : vector<32x16xf32>
    %224 = tpu.matmul %223, %208, %cst_103 {dimension_numbers = #tpu.dot_dimension_numbers<[1], [0], [0], [1], [0, 0, 1, 1], [], []>} : vector<32x32xbf16>, vector<32x16xbf16>, vector<32x16xf32> -> vector<32x16xf32>
    %225 = arith.truncf %224 : vector<32x16xf32> to vector<32x16xbf16>
    %c1_104 = arith.constant 1 : index
    %c0_105 = arith.constant 0 : index
    %c0_106 = arith.constant 0 : index
    %226 = vector.load %arg9[%c1_104, %c0_105, %c0_106] : memref<4x64x64xbf16, #tpu.memory_space<vmem>>, vector<1x16x64xbf16>
    %227 = vector.shape_cast %226 : vector<1x16x64xbf16> to vector<16x64xbf16>
    %cst_107 = arith.constant dense<0.000000e+00> : vector<32x64xf32>
    %228 = tpu.matmul %225, %227, %cst_107 {dimension_numbers = #tpu.dot_dimension_numbers<[1], [0], [0], [1], [0, 0, 1, 1], [], []>} : vector<32x16xbf16>, vector<16x64xbf16>, vector<32x64xf32> -> vector<32x64xf32>
    %229 = arith.addf %205, %228 : vector<32x64xf32>
    %230 = vector.extract_strided_slice %204 {offsets = [0, 16], sizes = [32, 16], strides = [1, 1]} : vector<32x192xbf16> to vector<32x16xbf16>
    %231 = vector.extract_strided_slice %204 {offsets = [0, 80], sizes = [32, 16], strides = [1, 1]} : vector<32x192xbf16> to vector<32x16xbf16>
    %232 = vector.extract_strided_slice %204 {offsets = [0, 144], sizes = [32, 16], strides = [1, 1]} : vector<32x192xbf16> to vector<32x16xbf16>
    "tpu.trace_start"() <{level = 10 : i32, message = "se,te->st"}> : () -> ()
    %cst_108 = arith.constant dense<0.000000e+00> : vector<32x32xf32>
    %233 = tpu.matmul %230, %231, %cst_108 {dimension_numbers = #tpu.dot_dimension_numbers<[1], [1], [0], [0], [0, 0, 1, 0], [], []>} : vector<32x16xbf16>, vector<32x16xbf16>, vector<32x32xf32> -> vector<32x32xf32>
    "tpu.trace_stop"() : () -> ()
    %cst_109 = arith.constant 2.500000e-01 : f32
    %234 = vector.broadcast %cst_109 : f32 to vector<32x32xf32>
    %235 = arith.mulf %233, %234 : vector<32x32xf32>
    %236 = arith.addf %235, %7 : vector<32x32xf32>
    %cst_110 = arith.constant dense<0xFF800000> : vector<32xf32>
    %237 = vector.multi_reduction <maximumf>, %236, %cst_110 [1] : vector<32x32xf32> to vector<32xf32>
    %238 = vector.shape_cast %237 : vector<32xf32> to vector<32x1xf32>
    %239 = vector.broadcast %238 : vector<32x1xf32> to vector<32x32xf32>
    %240 = arith.subf %236, %239 : vector<32x32xf32>
    %241 = math.exp %240 : vector<32x32xf32>
    %cst_111 = arith.constant dense<0.000000e+00> : vector<32xf32>
    %242 = vector.multi_reduction <add>, %241, %cst_111 [1] : vector<32x32xf32> to vector<32xf32>
    %243 = vector.shape_cast %242 : vector<32xf32> to vector<32x1xf32>
    %244 = tpu.reciprocal %243 {approx = true} : vector<32x1xf32> -> vector<32x1xf32>
    %245 = vector.broadcast %244 : vector<32x1xf32> to vector<32x32xf32>
    %246 = arith.mulf %241, %245 : vector<32x32xf32>
    %247 = arith.truncf %246 : vector<32x32xf32> to vector<32x32xbf16>
    %cst_112 = arith.constant dense<0.000000e+00> : vector<32x16xf32>
    %248 = tpu.matmul %247, %232, %cst_112 {dimension_numbers = #tpu.dot_dimension_numbers<[1], [0], [0], [1], [0, 0, 1, 1], [], []>} : vector<32x32xbf16>, vector<32x16xbf16>, vector<32x16xf32> -> vector<32x16xf32>
    %249 = arith.truncf %248 : vector<32x16xf32> to vector<32x16xbf16>
    %c1_113 = arith.constant 1 : index
    %c16_114 = arith.constant 16 : index
    %c0_115 = arith.constant 0 : index
    %250 = vector.load %arg9[%c1_113, %c16_114, %c0_115] : memref<4x64x64xbf16, #tpu.memory_space<vmem>>, vector<1x16x64xbf16>
    %251 = vector.shape_cast %250 : vector<1x16x64xbf16> to vector<16x64xbf16>
    %cst_116 = arith.constant dense<0.000000e+00> : vector<32x64xf32>
    %252 = tpu.matmul %249, %251, %cst_116 {dimension_numbers = #tpu.dot_dimension_numbers<[1], [0], [0], [1], [0, 0, 1, 1], [], []>} : vector<32x16xbf16>, vector<16x64xbf16>, vector<32x64xf32> -> vector<32x64xf32>
    %253 = arith.addf %229, %252 : vector<32x64xf32>
    %254 = vector.extract_strided_slice %204 {offsets = [0, 32], sizes = [32, 16], strides = [1, 1]} : vector<32x192xbf16> to vector<32x16xbf16>
    %255 = vector.extract_strided_slice %204 {offsets = [0, 96], sizes = [32, 16], strides = [1, 1]} : vector<32x192xbf16> to vector<32x16xbf16>
    %256 = vector.extract_strided_slice %204 {offsets = [0, 160], sizes = [32, 16], strides = [1, 1]} : vector<32x192xbf16> to vector<32x16xbf16>
    "tpu.trace_start"() <{level = 10 : i32, message = "se,te->st"}> : () -> ()
    %cst_117 = arith.constant dense<0.000000e+00> : vector<32x32xf32>
    %257 = tpu.matmul %254, %255, %cst_117 {dimension_numbers = #tpu.dot_dimension_numbers<[1], [1], [0], [0], [0, 0, 1, 0], [], []>} : vector<32x16xbf16>, vector<32x16xbf16>, vector<32x32xf32> -> vector<32x32xf32>
    "tpu.trace_stop"() : () -> ()
    %cst_118 = arith.constant 2.500000e-01 : f32
    %258 = vector.broadcast %cst_118 : f32 to vector<32x32xf32>
    %259 = arith.mulf %257, %258 : vector<32x32xf32>
    %260 = arith.addf %259, %7 : vector<32x32xf32>
    %cst_119 = arith.constant dense<0xFF800000> : vector<32xf32>
    %261 = vector.multi_reduction <maximumf>, %260, %cst_119 [1] : vector<32x32xf32> to vector<32xf32>
    %262 = vector.shape_cast %261 : vector<32xf32> to vector<32x1xf32>
    %263 = vector.broadcast %262 : vector<32x1xf32> to vector<32x32xf32>
    %264 = arith.subf %260, %263 : vector<32x32xf32>
    %265 = math.exp %264 : vector<32x32xf32>
    %cst_120 = arith.constant dense<0.000000e+00> : vector<32xf32>
    %266 = vector.multi_reduction <add>, %265, %cst_120 [1] : vector<32x32xf32> to vector<32xf32>
    %267 = vector.shape_cast %266 : vector<32xf32> to vector<32x1xf32>
    %268 = tpu.reciprocal %267 {approx = true} : vector<32x1xf32> -> vector<32x1xf32>
    %269 = vector.broadcast %268 : vector<32x1xf32> to vector<32x32xf32>
    %270 = arith.mulf %265, %269 : vector<32x32xf32>
    %271 = arith.truncf %270 : vector<32x32xf32> to vector<32x32xbf16>
    %cst_121 = arith.constant dense<0.000000e+00> : vector<32x16xf32>
    %272 = tpu.matmul %271, %256, %cst_121 {dimension_numbers = #tpu.dot_dimension_numbers<[1], [0], [0], [1], [0, 0, 1, 1], [], []>} : vector<32x32xbf16>, vector<32x16xbf16>, vector<32x16xf32> -> vector<32x16xf32>
    %273 = arith.truncf %272 : vector<32x16xf32> to vector<32x16xbf16>
    %c1_122 = arith.constant 1 : index
    %c32_123 = arith.constant 32 : index
    %c0_124 = arith.constant 0 : index
    %274 = vector.load %arg9[%c1_122, %c32_123, %c0_124] : memref<4x64x64xbf16, #tpu.memory_space<vmem>>, vector<1x16x64xbf16>
    %275 = vector.shape_cast %274 : vector<1x16x64xbf16> to vector<16x64xbf16>
    %cst_125 = arith.constant dense<0.000000e+00> : vector<32x64xf32>
    %276 = tpu.matmul %273, %275, %cst_125 {dimension_numbers = #tpu.dot_dimension_numbers<[1], [0], [0], [1], [0, 0, 1, 1], [], []>} : vector<32x16xbf16>, vector<16x64xbf16>, vector<32x64xf32> -> vector<32x64xf32>
    %277 = arith.addf %253, %276 : vector<32x64xf32>
    %278 = vector.extract_strided_slice %204 {offsets = [0, 48], sizes = [32, 16], strides = [1, 1]} : vector<32x192xbf16> to vector<32x16xbf16>
    %279 = vector.extract_strided_slice %204 {offsets = [0, 112], sizes = [32, 16], strides = [1, 1]} : vector<32x192xbf16> to vector<32x16xbf16>
    %280 = vector.extract_strided_slice %204 {offsets = [0, 176], sizes = [32, 16], strides = [1, 1]} : vector<32x192xbf16> to vector<32x16xbf16>
    "tpu.trace_start"() <{level = 10 : i32, message = "se,te->st"}> : () -> ()
    %cst_126 = arith.constant dense<0.000000e+00> : vector<32x32xf32>
    %281 = tpu.matmul %278, %279, %cst_126 {dimension_numbers = #tpu.dot_dimension_numbers<[1], [1], [0], [0], [0, 0, 1, 0], [], []>} : vector<32x16xbf16>, vector<32x16xbf16>, vector<32x32xf32> -> vector<32x32xf32>
    "tpu.trace_stop"() : () -> ()
    %cst_127 = arith.constant 2.500000e-01 : f32
    %282 = vector.broadcast %cst_127 : f32 to vector<32x32xf32>
    %283 = arith.mulf %281, %282 : vector<32x32xf32>
    %284 = arith.addf %283, %7 : vector<32x32xf32>
    %cst_128 = arith.constant dense<0xFF800000> : vector<32xf32>
    %285 = vector.multi_reduction <maximumf>, %284, %cst_128 [1] : vector<32x32xf32> to vector<32xf32>
    %286 = vector.shape_cast %285 : vector<32xf32> to vector<32x1xf32>
    %287 = vector.broadcast %286 : vector<32x1xf32> to vector<32x32xf32>
    %288 = arith.subf %284, %287 : vector<32x32xf32>
    %289 = math.exp %288 : vector<32x32xf32>
    %cst_129 = arith.constant dense<0.000000e+00> : vector<32xf32>
    %290 = vector.multi_reduction <add>, %289, %cst_129 [1] : vector<32x32xf32> to vector<32xf32>
    %291 = vector.shape_cast %290 : vector<32xf32> to vector<32x1xf32>
    %292 = tpu.reciprocal %291 {approx = true} : vector<32x1xf32> -> vector<32x1xf32>
    %293 = vector.broadcast %292 : vector<32x1xf32> to vector<32x32xf32>
    %294 = arith.mulf %289, %293 : vector<32x32xf32>
    %295 = arith.truncf %294 : vector<32x32xf32> to vector<32x32xbf16>
    %cst_130 = arith.constant dense<0.000000e+00> : vector<32x16xf32>
    %296 = tpu.matmul %295, %280, %cst_130 {dimension_numbers = #tpu.dot_dimension_numbers<[1], [0], [0], [1], [0, 0, 1, 1], [], []>} : vector<32x32xbf16>, vector<32x16xbf16>, vector<32x16xf32> -> vector<32x16xf32>
    %297 = arith.truncf %296 : vector<32x16xf32> to vector<32x16xbf16>
    %c1_131 = arith.constant 1 : index
    %c48_132 = arith.constant 48 : index
    %c0_133 = arith.constant 0 : index
    %298 = vector.load %arg9[%c1_131, %c48_132, %c0_133] : memref<4x64x64xbf16, #tpu.memory_space<vmem>>, vector<1x16x64xbf16>
    %299 = vector.shape_cast %298 : vector<1x16x64xbf16> to vector<16x64xbf16>
    %cst_134 = arith.constant dense<0.000000e+00> : vector<32x64xf32>
    %300 = tpu.matmul %297, %299, %cst_134 {dimension_numbers = #tpu.dot_dimension_numbers<[1], [0], [0], [1], [0, 0, 1, 1], [], []>} : vector<32x16xbf16>, vector<16x64xbf16>, vector<32x64xf32> -> vector<32x64xf32>
    %301 = arith.addf %277, %300 : vector<32x64xf32>
    %c1_135 = arith.constant 1 : index
    %c0_136 = arith.constant 0 : index
    %c0_137 = arith.constant 0 : index
    %302 = vector.load %arg10[%c1_135, %c0_136, %c0_137] : memref<4x1x64xf32, #tpu.memory_space<vmem>>, vector<1x1x64xf32>
    %303 = vector.shape_cast %302 : vector<1x1x64xf32> to vector<1x64xf32>
    %304 = vector.broadcast %303 : vector<1x64xf32> to vector<32x64xf32>
    %305 = arith.addf %301, %304 : vector<32x64xf32>
    %306 = arith.addf %195, %305 : vector<32x64xf32>
    %c1_138 = arith.constant 1 : index
    %c0_139 = arith.constant 0 : index
    %c0_140 = arith.constant 0 : index
    %307 = vector.load %arg11[%c1_138, %c0_139, %c0_140] : memref<4x1x64xf32, #tpu.memory_space<vmem>>, vector<1x1x64xf32>
    %308 = vector.shape_cast %307 : vector<1x1x64xf32> to vector<1x64xf32>
    %c1_141 = arith.constant 1 : index
    %c0_142 = arith.constant 0 : index
    %c0_143 = arith.constant 0 : index
    %309 = vector.load %arg12[%c1_141, %c0_142, %c0_143] : memref<4x1x64xf32, #tpu.memory_space<vmem>>, vector<1x1x64xf32>
    %310 = vector.shape_cast %309 : vector<1x1x64xf32> to vector<1x64xf32>
    %cst_144 = arith.constant dense<0.000000e+00> : vector<32xf32>
    %311 = vector.multi_reduction <add>, %306, %cst_144 [1] : vector<32x64xf32> to vector<32xf32>
    %312 = vector.shape_cast %311 : vector<32xf32> to vector<32x1xf32>
    %cst_145 = arith.constant 6.400000e+01 : f32
    %313 = vector.broadcast %cst_145 : f32 to vector<32x1xf32>
    %314 = arith.divf %312, %313 : vector<32x1xf32>
    %315 = vector.broadcast %314 : vector<32x1xf32> to vector<32x64xf32>
    %316 = arith.subf %306, %315 : vector<32x64xf32>
    %317 = arith.mulf %316, %316 : vector<32x64xf32>
    %cst_146 = arith.constant dense<0.000000e+00> : vector<32xf32>
    %318 = vector.multi_reduction <add>, %317, %cst_146 [1] : vector<32x64xf32> to vector<32xf32>
    %319 = vector.shape_cast %318 : vector<32xf32> to vector<32x1xf32>
    %cst_147 = arith.constant 6.400000e+01 : f32
    %320 = vector.broadcast %cst_147 : f32 to vector<32x1xf32>
    %321 = arith.divf %319, %320 : vector<32x1xf32>
    %322 = vector.broadcast %314 : vector<32x1xf32> to vector<32x64xf32>
    %323 = arith.subf %306, %322 : vector<32x64xf32>
    %cst_148 = arith.constant 9.99999974E-6 : f32
    %324 = vector.broadcast %cst_148 : f32 to vector<32x1xf32>
    %325 = arith.addf %321, %324 : vector<32x1xf32>
    %326 = math.rsqrt %325 : vector<32x1xf32>
    %327 = vector.broadcast %326 : vector<32x1xf32> to vector<32x64xf32>
    %328 = arith.mulf %323, %327 : vector<32x64xf32>
    %329 = vector.broadcast %308 : vector<1x64xf32> to vector<32x64xf32>
    %330 = arith.mulf %328, %329 : vector<32x64xf32>
    %331 = vector.broadcast %310 : vector<1x64xf32> to vector<32x64xf32>
    %332 = arith.addf %330, %331 : vector<32x64xf32>
    %333 = arith.truncf %332 : vector<32x64xf32> to vector<32x64xbf16>
    %c1_149 = arith.constant 1 : index
    %c0_150 = arith.constant 0 : index
    %c0_151 = arith.constant 0 : index
    %334 = vector.load %arg13[%c1_149, %c0_150, %c0_151] : memref<4x64x2048xbf16, #tpu.memory_space<vmem>>, vector<1x64x2048xbf16>
    %335 = vector.shape_cast %334 : vector<1x64x2048xbf16> to vector<64x2048xbf16>
    %cst_152 = arith.constant dense<0.000000e+00> : vector<32x2048xf32>
    %336 = tpu.matmul %333, %335, %cst_152 {dimension_numbers = #tpu.dot_dimension_numbers<[1], [0], [0], [1], [0, 0, 1, 1], [], []>} : vector<32x64xbf16>, vector<64x2048xbf16>, vector<32x2048xf32> -> vector<32x2048xf32>
    %c1_153 = arith.constant 1 : index
    %c0_154 = arith.constant 0 : index
    %c0_155 = arith.constant 0 : index
    %337 = vector.load %arg14[%c1_153, %c0_154, %c0_155] : memref<4x1x2048xf32, #tpu.memory_space<vmem>>, vector<1x1x2048xf32>
    %338 = vector.shape_cast %337 : vector<1x1x2048xf32> to vector<1x2048xf32>
    %339 = vector.broadcast %338 : vector<1x2048xf32> to vector<32x2048xf32>
    %340 = arith.addf %336, %339 : vector<32x2048xf32>
    %cst_156 = arith.constant 0.000000e+00 : f32
    %341 = vector.broadcast %cst_156 : f32 to vector<32x2048xf32>
    %342 = arith.maximumf %340, %341 : vector<32x2048xf32>
    %343 = arith.truncf %342 : vector<32x2048xf32> to vector<32x2048xbf16>
    %c1_157 = arith.constant 1 : index
    %c0_158 = arith.constant 0 : index
    %c0_159 = arith.constant 0 : index
    %344 = vector.load %arg15[%c1_157, %c0_158, %c0_159] : memref<4x2048x64xbf16, #tpu.memory_space<vmem>>, vector<1x2048x64xbf16>
    %345 = vector.shape_cast %344 : vector<1x2048x64xbf16> to vector<2048x64xbf16>
    %cst_160 = arith.constant dense<0.000000e+00> : vector<32x64xf32>
    %346 = tpu.matmul %343, %345, %cst_160 {dimension_numbers = #tpu.dot_dimension_numbers<[1], [0], [0], [1], [0, 0, 1, 1], [], []>} : vector<32x2048xbf16>, vector<2048x64xbf16>, vector<32x64xf32> -> vector<32x64xf32>
    %347 = arith.addf %332, %346 : vector<32x64xf32>
    %c1_161 = arith.constant 1 : index
    %c0_162 = arith.constant 0 : index
    %c0_163 = arith.constant 0 : index
    %348 = vector.load %arg16[%c1_161, %c0_162, %c0_163] : memref<4x1x64xf32, #tpu.memory_space<vmem>>, vector<1x1x64xf32>
    %349 = vector.shape_cast %348 : vector<1x1x64xf32> to vector<1x64xf32>
    %350 = vector.broadcast %349 : vector<1x64xf32> to vector<32x64xf32>
    %351 = arith.addf %347, %350 : vector<32x64xf32>
    %c1_164 = arith.constant 1 : index
    %c0_165 = arith.constant 0 : index
    %c0_166 = arith.constant 0 : index
    %352 = vector.load %arg17[%c1_164, %c0_165, %c0_166] : memref<4x1x64xf32, #tpu.memory_space<vmem>>, vector<1x1x64xf32>
    %353 = vector.shape_cast %352 : vector<1x1x64xf32> to vector<1x64xf32>
    %c1_167 = arith.constant 1 : index
    %c0_168 = arith.constant 0 : index
    %c0_169 = arith.constant 0 : index
    %354 = vector.load %arg18[%c1_167, %c0_168, %c0_169] : memref<4x1x64xf32, #tpu.memory_space<vmem>>, vector<1x1x64xf32>
    %355 = vector.shape_cast %354 : vector<1x1x64xf32> to vector<1x64xf32>
    %cst_170 = arith.constant dense<0.000000e+00> : vector<32xf32>
    %356 = vector.multi_reduction <add>, %351, %cst_170 [1] : vector<32x64xf32> to vector<32xf32>
    %357 = vector.shape_cast %356 : vector<32xf32> to vector<32x1xf32>
    %cst_171 = arith.constant 6.400000e+01 : f32
    %358 = vector.broadcast %cst_171 : f32 to vector<32x1xf32>
    %359 = arith.divf %357, %358 : vector<32x1xf32>
    %360 = vector.broadcast %359 : vector<32x1xf32> to vector<32x64xf32>
    %361 = arith.subf %351, %360 : vector<32x64xf32>
    %362 = arith.mulf %361, %361 : vector<32x64xf32>
    %cst_172 = arith.constant dense<0.000000e+00> : vector<32xf32>
    %363 = vector.multi_reduction <add>, %362, %cst_172 [1] : vector<32x64xf32> to vector<32xf32>
    %364 = vector.shape_cast %363 : vector<32xf32> to vector<32x1xf32>
    %cst_173 = arith.constant 6.400000e+01 : f32
    %365 = vector.broadcast %cst_173 : f32 to vector<32x1xf32>
    %366 = arith.divf %364, %365 : vector<32x1xf32>
    %367 = vector.broadcast %359 : vector<32x1xf32> to vector<32x64xf32>
    %368 = arith.subf %351, %367 : vector<32x64xf32>
    %cst_174 = arith.constant 9.99999974E-6 : f32
    %369 = vector.broadcast %cst_174 : f32 to vector<32x1xf32>
    %370 = arith.addf %366, %369 : vector<32x1xf32>
    %371 = math.rsqrt %370 : vector<32x1xf32>
    %372 = vector.broadcast %371 : vector<32x1xf32> to vector<32x64xf32>
    %373 = arith.mulf %368, %372 : vector<32x64xf32>
    %374 = vector.broadcast %353 : vector<1x64xf32> to vector<32x64xf32>
    %375 = arith.mulf %373, %374 : vector<32x64xf32>
    %376 = vector.broadcast %355 : vector<1x64xf32> to vector<32x64xf32>
    %377 = arith.addf %375, %376 : vector<32x64xf32>
    %378 = arith.truncf %377 : vector<32x64xf32> to vector<32x64xbf16>
    %c2 = arith.constant 2 : index
    %c0_175 = arith.constant 0 : index
    %c0_176 = arith.constant 0 : index
    %379 = vector.load %arg7[%c2, %c0_175, %c0_176] : memref<4x64x192xbf16, #tpu.memory_space<vmem>>, vector<1x64x192xbf16>
    %380 = vector.shape_cast %379 : vector<1x64x192xbf16> to vector<64x192xbf16>
    %cst_177 = arith.constant dense<0.000000e+00> : vector<32x192xf32>
    %381 = tpu.matmul %378, %380, %cst_177 {dimension_numbers = #tpu.dot_dimension_numbers<[1], [0], [0], [1], [0, 0, 1, 1], [], []>} : vector<32x64xbf16>, vector<64x192xbf16>, vector<32x192xf32> -> vector<32x192xf32>
    %c2_178 = arith.constant 2 : index
    %c0_179 = arith.constant 0 : index
    %c0_180 = arith.constant 0 : index
    %382 = vector.load %arg8[%c2_178, %c0_179, %c0_180] : memref<4x1x192xf32, #tpu.memory_space<vmem>>, vector<1x1x192xf32>
    %383 = vector.shape_cast %382 : vector<1x1x192xf32> to vector<1x192xf32>
    %384 = vector.broadcast %383 : vector<1x192xf32> to vector<32x192xf32>
    %385 = arith.addf %381, %384 : vector<32x192xf32>
    %386 = arith.truncf %385 : vector<32x192xf32> to vector<32x192xbf16>
    %cst_181 = arith.constant 0.000000e+00 : f32
    %387 = vector.broadcast %cst_181 : f32 to vector<32x64xf32>
    %388 = vector.extract_strided_slice %386 {offsets = [0, 0], sizes = [32, 16], strides = [1, 1]} : vector<32x192xbf16> to vector<32x16xbf16>
    %389 = vector.extract_strided_slice %386 {offsets = [0, 64], sizes = [32, 16], strides = [1, 1]} : vector<32x192xbf16> to vector<32x16xbf16>
    %390 = vector.extract_strided_slice %386 {offsets = [0, 128], sizes = [32, 16], strides = [1, 1]} : vector<32x192xbf16> to vector<32x16xbf16>
    "tpu.trace_start"() <{level = 10 : i32, message = "se,te->st"}> : () -> ()
    %cst_182 = arith.constant dense<0.000000e+00> : vector<32x32xf32>
    %391 = tpu.matmul %388, %389, %cst_182 {dimension_numbers = #tpu.dot_dimension_numbers<[1], [1], [0], [0], [0, 0, 1, 0], [], []>} : vector<32x16xbf16>, vector<32x16xbf16>, vector<32x32xf32> -> vector<32x32xf32>
    "tpu.trace_stop"() : () -> ()
    %cst_183 = arith.constant 2.500000e-01 : f32
    %392 = vector.broadcast %cst_183 : f32 to vector<32x32xf32>
    %393 = arith.mulf %391, %392 : vector<32x32xf32>
    %394 = arith.addf %393, %7 : vector<32x32xf32>
    %cst_184 = arith.constant dense<0xFF800000> : vector<32xf32>
    %395 = vector.multi_reduction <maximumf>, %394, %cst_184 [1] : vector<32x32xf32> to vector<32xf32>
    %396 = vector.shape_cast %395 : vector<32xf32> to vector<32x1xf32>
    %397 = vector.broadcast %396 : vector<32x1xf32> to vector<32x32xf32>
    %398 = arith.subf %394, %397 : vector<32x32xf32>
    %399 = math.exp %398 : vector<32x32xf32>
    %cst_185 = arith.constant dense<0.000000e+00> : vector<32xf32>
    %400 = vector.multi_reduction <add>, %399, %cst_185 [1] : vector<32x32xf32> to vector<32xf32>
    %401 = vector.shape_cast %400 : vector<32xf32> to vector<32x1xf32>
    %402 = tpu.reciprocal %401 {approx = true} : vector<32x1xf32> -> vector<32x1xf32>
    %403 = vector.broadcast %402 : vector<32x1xf32> to vector<32x32xf32>
    %404 = arith.mulf %399, %403 : vector<32x32xf32>
    %405 = arith.truncf %404 : vector<32x32xf32> to vector<32x32xbf16>
    %cst_186 = arith.constant dense<0.000000e+00> : vector<32x16xf32>
    %406 = tpu.matmul %405, %390, %cst_186 {dimension_numbers = #tpu.dot_dimension_numbers<[1], [0], [0], [1], [0, 0, 1, 1], [], []>} : vector<32x32xbf16>, vector<32x16xbf16>, vector<32x16xf32> -> vector<32x16xf32>
    %407 = arith.truncf %406 : vector<32x16xf32> to vector<32x16xbf16>
    %c2_187 = arith.constant 2 : index
    %c0_188 = arith.constant 0 : index
    %c0_189 = arith.constant 0 : index
    %408 = vector.load %arg9[%c2_187, %c0_188, %c0_189] : memref<4x64x64xbf16, #tpu.memory_space<vmem>>, vector<1x16x64xbf16>
    %409 = vector.shape_cast %408 : vector<1x16x64xbf16> to vector<16x64xbf16>
    %cst_190 = arith.constant dense<0.000000e+00> : vector<32x64xf32>
    %410 = tpu.matmul %407, %409, %cst_190 {dimension_numbers = #tpu.dot_dimension_numbers<[1], [0], [0], [1], [0, 0, 1, 1], [], []>} : vector<32x16xbf16>, vector<16x64xbf16>, vector<32x64xf32> -> vector<32x64xf32>
    %411 = arith.addf %387, %410 : vector<32x64xf32>
    %412 = vector.extract_strided_slice %386 {offsets = [0, 16], sizes = [32, 16], strides = [1, 1]} : vector<32x192xbf16> to vector<32x16xbf16>
    %413 = vector.extract_strided_slice %386 {offsets = [0, 80], sizes = [32, 16], strides = [1, 1]} : vector<32x192xbf16> to vector<32x16xbf16>
    %414 = vector.extract_strided_slice %386 {offsets = [0, 144], sizes = [32, 16], strides = [1, 1]} : vector<32x192xbf16> to vector<32x16xbf16>
    "tpu.trace_start"() <{level = 10 : i32, message = "se,te->st"}> : () -> ()
    %cst_191 = arith.constant dense<0.000000e+00> : vector<32x32xf32>
    %415 = tpu.matmul %412, %413, %cst_191 {dimension_numbers = #tpu.dot_dimension_numbers<[1], [1], [0], [0], [0, 0, 1, 0], [], []>} : vector<32x16xbf16>, vector<32x16xbf16>, vector<32x32xf32> -> vector<32x32xf32>
    "tpu.trace_stop"() : () -> ()
    %cst_192 = arith.constant 2.500000e-01 : f32
    %416 = vector.broadcast %cst_192 : f32 to vector<32x32xf32>
    %417 = arith.mulf %415, %416 : vector<32x32xf32>
    %418 = arith.addf %417, %7 : vector<32x32xf32>
    %cst_193 = arith.constant dense<0xFF800000> : vector<32xf32>
    %419 = vector.multi_reduction <maximumf>, %418, %cst_193 [1] : vector<32x32xf32> to vector<32xf32>
    %420 = vector.shape_cast %419 : vector<32xf32> to vector<32x1xf32>
    %421 = vector.broadcast %420 : vector<32x1xf32> to vector<32x32xf32>
    %422 = arith.subf %418, %421 : vector<32x32xf32>
    %423 = math.exp %422 : vector<32x32xf32>
    %cst_194 = arith.constant dense<0.000000e+00> : vector<32xf32>
    %424 = vector.multi_reduction <add>, %423, %cst_194 [1] : vector<32x32xf32> to vector<32xf32>
    %425 = vector.shape_cast %424 : vector<32xf32> to vector<32x1xf32>
    %426 = tpu.reciprocal %425 {approx = true} : vector<32x1xf32> -> vector<32x1xf32>
    %427 = vector.broadcast %426 : vector<32x1xf32> to vector<32x32xf32>
    %428 = arith.mulf %423, %427 : vector<32x32xf32>
    %429 = arith.truncf %428 : vector<32x32xf32> to vector<32x32xbf16>
    %cst_195 = arith.constant dense<0.000000e+00> : vector<32x16xf32>
    %430 = tpu.matmul %429, %414, %cst_195 {dimension_numbers = #tpu.dot_dimension_numbers<[1], [0], [0], [1], [0, 0, 1, 1], [], []>} : vector<32x32xbf16>, vector<32x16xbf16>, vector<32x16xf32> -> vector<32x16xf32>
    %431 = arith.truncf %430 : vector<32x16xf32> to vector<32x16xbf16>
    %c2_196 = arith.constant 2 : index
    %c16_197 = arith.constant 16 : index
    %c0_198 = arith.constant 0 : index
    %432 = vector.load %arg9[%c2_196, %c16_197, %c0_198] : memref<4x64x64xbf16, #tpu.memory_space<vmem>>, vector<1x16x64xbf16>
    %433 = vector.shape_cast %432 : vector<1x16x64xbf16> to vector<16x64xbf16>
    %cst_199 = arith.constant dense<0.000000e+00> : vector<32x64xf32>
    %434 = tpu.matmul %431, %433, %cst_199 {dimension_numbers = #tpu.dot_dimension_numbers<[1], [0], [0], [1], [0, 0, 1, 1], [], []>} : vector<32x16xbf16>, vector<16x64xbf16>, vector<32x64xf32> -> vector<32x64xf32>
    %435 = arith.addf %411, %434 : vector<32x64xf32>
    %436 = vector.extract_strided_slice %386 {offsets = [0, 32], sizes = [32, 16], strides = [1, 1]} : vector<32x192xbf16> to vector<32x16xbf16>
    %437 = vector.extract_strided_slice %386 {offsets = [0, 96], sizes = [32, 16], strides = [1, 1]} : vector<32x192xbf16> to vector<32x16xbf16>
    %438 = vector.extract_strided_slice %386 {offsets = [0, 160], sizes = [32, 16], strides = [1, 1]} : vector<32x192xbf16> to vector<32x16xbf16>
    "tpu.trace_start"() <{level = 10 : i32, message = "se,te->st"}> : () -> ()
    %cst_200 = arith.constant dense<0.000000e+00> : vector<32x32xf32>
    %439 = tpu.matmul %436, %437, %cst_200 {dimension_numbers = #tpu.dot_dimension_numbers<[1], [1], [0], [0], [0, 0, 1, 0], [], []>} : vector<32x16xbf16>, vector<32x16xbf16>, vector<32x32xf32> -> vector<32x32xf32>
    "tpu.trace_stop"() : () -> ()
    %cst_201 = arith.constant 2.500000e-01 : f32
    %440 = vector.broadcast %cst_201 : f32 to vector<32x32xf32>
    %441 = arith.mulf %439, %440 : vector<32x32xf32>
    %442 = arith.addf %441, %7 : vector<32x32xf32>
    %cst_202 = arith.constant dense<0xFF800000> : vector<32xf32>
    %443 = vector.multi_reduction <maximumf>, %442, %cst_202 [1] : vector<32x32xf32> to vector<32xf32>
    %444 = vector.shape_cast %443 : vector<32xf32> to vector<32x1xf32>
    %445 = vector.broadcast %444 : vector<32x1xf32> to vector<32x32xf32>
    %446 = arith.subf %442, %445 : vector<32x32xf32>
    %447 = math.exp %446 : vector<32x32xf32>
    %cst_203 = arith.constant dense<0.000000e+00> : vector<32xf32>
    %448 = vector.multi_reduction <add>, %447, %cst_203 [1] : vector<32x32xf32> to vector<32xf32>
    %449 = vector.shape_cast %448 : vector<32xf32> to vector<32x1xf32>
    %450 = tpu.reciprocal %449 {approx = true} : vector<32x1xf32> -> vector<32x1xf32>
    %451 = vector.broadcast %450 : vector<32x1xf32> to vector<32x32xf32>
    %452 = arith.mulf %447, %451 : vector<32x32xf32>
    %453 = arith.truncf %452 : vector<32x32xf32> to vector<32x32xbf16>
    %cst_204 = arith.constant dense<0.000000e+00> : vector<32x16xf32>
    %454 = tpu.matmul %453, %438, %cst_204 {dimension_numbers = #tpu.dot_dimension_numbers<[1], [0], [0], [1], [0, 0, 1, 1], [], []>} : vector<32x32xbf16>, vector<32x16xbf16>, vector<32x16xf32> -> vector<32x16xf32>
    %455 = arith.truncf %454 : vector<32x16xf32> to vector<32x16xbf16>
    %c2_205 = arith.constant 2 : index
    %c32_206 = arith.constant 32 : index
    %c0_207 = arith.constant 0 : index
    %456 = vector.load %arg9[%c2_205, %c32_206, %c0_207] : memref<4x64x64xbf16, #tpu.memory_space<vmem>>, vector<1x16x64xbf16>
    %457 = vector.shape_cast %456 : vector<1x16x64xbf16> to vector<16x64xbf16>
    %cst_208 = arith.constant dense<0.000000e+00> : vector<32x64xf32>
    %458 = tpu.matmul %455, %457, %cst_208 {dimension_numbers = #tpu.dot_dimension_numbers<[1], [0], [0], [1], [0, 0, 1, 1], [], []>} : vector<32x16xbf16>, vector<16x64xbf16>, vector<32x64xf32> -> vector<32x64xf32>
    %459 = arith.addf %435, %458 : vector<32x64xf32>
    %460 = vector.extract_strided_slice %386 {offsets = [0, 48], sizes = [32, 16], strides = [1, 1]} : vector<32x192xbf16> to vector<32x16xbf16>
    %461 = vector.extract_strided_slice %386 {offsets = [0, 112], sizes = [32, 16], strides = [1, 1]} : vector<32x192xbf16> to vector<32x16xbf16>
    %462 = vector.extract_strided_slice %386 {offsets = [0, 176], sizes = [32, 16], strides = [1, 1]} : vector<32x192xbf16> to vector<32x16xbf16>
    "tpu.trace_start"() <{level = 10 : i32, message = "se,te->st"}> : () -> ()
    %cst_209 = arith.constant dense<0.000000e+00> : vector<32x32xf32>
    %463 = tpu.matmul %460, %461, %cst_209 {dimension_numbers = #tpu.dot_dimension_numbers<[1], [1], [0], [0], [0, 0, 1, 0], [], []>} : vector<32x16xbf16>, vector<32x16xbf16>, vector<32x32xf32> -> vector<32x32xf32>
    "tpu.trace_stop"() : () -> ()
    %cst_210 = arith.constant 2.500000e-01 : f32
    %464 = vector.broadcast %cst_210 : f32 to vector<32x32xf32>
    %465 = arith.mulf %463, %464 : vector<32x32xf32>
    %466 = arith.addf %465, %7 : vector<32x32xf32>
    %cst_211 = arith.constant dense<0xFF800000> : vector<32xf32>
    %467 = vector.multi_reduction <maximumf>, %466, %cst_211 [1] : vector<32x32xf32> to vector<32xf32>
    %468 = vector.shape_cast %467 : vector<32xf32> to vector<32x1xf32>
    %469 = vector.broadcast %468 : vector<32x1xf32> to vector<32x32xf32>
    %470 = arith.subf %466, %469 : vector<32x32xf32>
    %471 = math.exp %470 : vector<32x32xf32>
    %cst_212 = arith.constant dense<0.000000e+00> : vector<32xf32>
    %472 = vector.multi_reduction <add>, %471, %cst_212 [1] : vector<32x32xf32> to vector<32xf32>
    %473 = vector.shape_cast %472 : vector<32xf32> to vector<32x1xf32>
    %474 = tpu.reciprocal %473 {approx = true} : vector<32x1xf32> -> vector<32x1xf32>
    %475 = vector.broadcast %474 : vector<32x1xf32> to vector<32x32xf32>
    %476 = arith.mulf %471, %475 : vector<32x32xf32>
    %477 = arith.truncf %476 : vector<32x32xf32> to vector<32x32xbf16>
    %cst_213 = arith.constant dense<0.000000e+00> : vector<32x16xf32>
    %478 = tpu.matmul %477, %462, %cst_213 {dimension_numbers = #tpu.dot_dimension_numbers<[1], [0], [0], [1], [0, 0, 1, 1], [], []>} : vector<32x32xbf16>, vector<32x16xbf16>, vector<32x16xf32> -> vector<32x16xf32>
    %479 = arith.truncf %478 : vector<32x16xf32> to vector<32x16xbf16>
    %c2_214 = arith.constant 2 : index
    %c48_215 = arith.constant 48 : index
    %c0_216 = arith.constant 0 : index
    %480 = vector.load %arg9[%c2_214, %c48_215, %c0_216] : memref<4x64x64xbf16, #tpu.memory_space<vmem>>, vector<1x16x64xbf16>
    %481 = vector.shape_cast %480 : vector<1x16x64xbf16> to vector<16x64xbf16>
    %cst_217 = arith.constant dense<0.000000e+00> : vector<32x64xf32>
    %482 = tpu.matmul %479, %481, %cst_217 {dimension_numbers = #tpu.dot_dimension_numbers<[1], [0], [0], [1], [0, 0, 1, 1], [], []>} : vector<32x16xbf16>, vector<16x64xbf16>, vector<32x64xf32> -> vector<32x64xf32>
    %483 = arith.addf %459, %482 : vector<32x64xf32>
    %c2_218 = arith.constant 2 : index
    %c0_219 = arith.constant 0 : index
    %c0_220 = arith.constant 0 : index
    %484 = vector.load %arg10[%c2_218, %c0_219, %c0_220] : memref<4x1x64xf32, #tpu.memory_space<vmem>>, vector<1x1x64xf32>
    %485 = vector.shape_cast %484 : vector<1x1x64xf32> to vector<1x64xf32>
    %486 = vector.broadcast %485 : vector<1x64xf32> to vector<32x64xf32>
    %487 = arith.addf %483, %486 : vector<32x64xf32>
    %488 = arith.addf %377, %487 : vector<32x64xf32>
    %c2_221 = arith.constant 2 : index
    %c0_222 = arith.constant 0 : index
    %c0_223 = arith.constant 0 : index
    %489 = vector.load %arg11[%c2_221, %c0_222, %c0_223] : memref<4x1x64xf32, #tpu.memory_space<vmem>>, vector<1x1x64xf32>
    %490 = vector.shape_cast %489 : vector<1x1x64xf32> to vector<1x64xf32>
    %c2_224 = arith.constant 2 : index
    %c0_225 = arith.constant 0 : index
    %c0_226 = arith.constant 0 : index
    %491 = vector.load %arg12[%c2_224, %c0_225, %c0_226] : memref<4x1x64xf32, #tpu.memory_space<vmem>>, vector<1x1x64xf32>
    %492 = vector.shape_cast %491 : vector<1x1x64xf32> to vector<1x64xf32>
    %cst_227 = arith.constant dense<0.000000e+00> : vector<32xf32>
    %493 = vector.multi_reduction <add>, %488, %cst_227 [1] : vector<32x64xf32> to vector<32xf32>
    %494 = vector.shape_cast %493 : vector<32xf32> to vector<32x1xf32>
    %cst_228 = arith.constant 6.400000e+01 : f32
    %495 = vector.broadcast %cst_228 : f32 to vector<32x1xf32>
    %496 = arith.divf %494, %495 : vector<32x1xf32>
    %497 = vector.broadcast %496 : vector<32x1xf32> to vector<32x64xf32>
    %498 = arith.subf %488, %497 : vector<32x64xf32>
    %499 = arith.mulf %498, %498 : vector<32x64xf32>
    %cst_229 = arith.constant dense<0.000000e+00> : vector<32xf32>
    %500 = vector.multi_reduction <add>, %499, %cst_229 [1] : vector<32x64xf32> to vector<32xf32>
    %501 = vector.shape_cast %500 : vector<32xf32> to vector<32x1xf32>
    %cst_230 = arith.constant 6.400000e+01 : f32
    %502 = vector.broadcast %cst_230 : f32 to vector<32x1xf32>
    %503 = arith.divf %501, %502 : vector<32x1xf32>
    %504 = vector.broadcast %496 : vector<32x1xf32> to vector<32x64xf32>
    %505 = arith.subf %488, %504 : vector<32x64xf32>
    %cst_231 = arith.constant 9.99999974E-6 : f32
    %506 = vector.broadcast %cst_231 : f32 to vector<32x1xf32>
    %507 = arith.addf %503, %506 : vector<32x1xf32>
    %508 = math.rsqrt %507 : vector<32x1xf32>
    %509 = vector.broadcast %508 : vector<32x1xf32> to vector<32x64xf32>
    %510 = arith.mulf %505, %509 : vector<32x64xf32>
    %511 = vector.broadcast %490 : vector<1x64xf32> to vector<32x64xf32>
    %512 = arith.mulf %510, %511 : vector<32x64xf32>
    %513 = vector.broadcast %492 : vector<1x64xf32> to vector<32x64xf32>
    %514 = arith.addf %512, %513 : vector<32x64xf32>
    %515 = arith.truncf %514 : vector<32x64xf32> to vector<32x64xbf16>
    %c2_232 = arith.constant 2 : index
    %c0_233 = arith.constant 0 : index
    %c0_234 = arith.constant 0 : index
    %516 = vector.load %arg13[%c2_232, %c0_233, %c0_234] : memref<4x64x2048xbf16, #tpu.memory_space<vmem>>, vector<1x64x2048xbf16>
    %517 = vector.shape_cast %516 : vector<1x64x2048xbf16> to vector<64x2048xbf16>
    %cst_235 = arith.constant dense<0.000000e+00> : vector<32x2048xf32>
    %518 = tpu.matmul %515, %517, %cst_235 {dimension_numbers = #tpu.dot_dimension_numbers<[1], [0], [0], [1], [0, 0, 1, 1], [], []>} : vector<32x64xbf16>, vector<64x2048xbf16>, vector<32x2048xf32> -> vector<32x2048xf32>
    %c2_236 = arith.constant 2 : index
    %c0_237 = arith.constant 0 : index
    %c0_238 = arith.constant 0 : index
    %519 = vector.load %arg14[%c2_236, %c0_237, %c0_238] : memref<4x1x2048xf32, #tpu.memory_space<vmem>>, vector<1x1x2048xf32>
    %520 = vector.shape_cast %519 : vector<1x1x2048xf32> to vector<1x2048xf32>
    %521 = vector.broadcast %520 : vector<1x2048xf32> to vector<32x2048xf32>
    %522 = arith.addf %518, %521 : vector<32x2048xf32>
    %cst_239 = arith.constant 0.000000e+00 : f32
    %523 = vector.broadcast %cst_239 : f32 to vector<32x2048xf32>
    %524 = arith.maximumf %522, %523 : vector<32x2048xf32>
    %525 = arith.truncf %524 : vector<32x2048xf32> to vector<32x2048xbf16>
    %c2_240 = arith.constant 2 : index
    %c0_241 = arith.constant 0 : index
    %c0_242 = arith.constant 0 : index
    %526 = vector.load %arg15[%c2_240, %c0_241, %c0_242] : memref<4x2048x64xbf16, #tpu.memory_space<vmem>>, vector<1x2048x64xbf16>
    %527 = vector.shape_cast %526 : vector<1x2048x64xbf16> to vector<2048x64xbf16>
    %cst_243 = arith.constant dense<0.000000e+00> : vector<32x64xf32>
    %528 = tpu.matmul %525, %527, %cst_243 {dimension_numbers = #tpu.dot_dimension_numbers<[1], [0], [0], [1], [0, 0, 1, 1], [], []>} : vector<32x2048xbf16>, vector<2048x64xbf16>, vector<32x64xf32> -> vector<32x64xf32>
    %529 = arith.addf %514, %528 : vector<32x64xf32>
    %c2_244 = arith.constant 2 : index
    %c0_245 = arith.constant 0 : index
    %c0_246 = arith.constant 0 : index
    %530 = vector.load %arg16[%c2_244, %c0_245, %c0_246] : memref<4x1x64xf32, #tpu.memory_space<vmem>>, vector<1x1x64xf32>
    %531 = vector.shape_cast %530 : vector<1x1x64xf32> to vector<1x64xf32>
    %532 = vector.broadcast %531 : vector<1x64xf32> to vector<32x64xf32>
    %533 = arith.addf %529, %532 : vector<32x64xf32>
    %c2_247 = arith.constant 2 : index
    %c0_248 = arith.constant 0 : index
    %c0_249 = arith.constant 0 : index
    %534 = vector.load %arg17[%c2_247, %c0_248, %c0_249] : memref<4x1x64xf32, #tpu.memory_space<vmem>>, vector<1x1x64xf32>
    %535 = vector.shape_cast %534 : vector<1x1x64xf32> to vector<1x64xf32>
    %c2_250 = arith.constant 2 : index
    %c0_251 = arith.constant 0 : index
    %c0_252 = arith.constant 0 : index
    %536 = vector.load %arg18[%c2_250, %c0_251, %c0_252] : memref<4x1x64xf32, #tpu.memory_space<vmem>>, vector<1x1x64xf32>
    %537 = vector.shape_cast %536 : vector<1x1x64xf32> to vector<1x64xf32>
    %cst_253 = arith.constant dense<0.000000e+00> : vector<32xf32>
    %538 = vector.multi_reduction <add>, %533, %cst_253 [1] : vector<32x64xf32> to vector<32xf32>
    %539 = vector.shape_cast %538 : vector<32xf32> to vector<32x1xf32>
    %cst_254 = arith.constant 6.400000e+01 : f32
    %540 = vector.broadcast %cst_254 : f32 to vector<32x1xf32>
    %541 = arith.divf %539, %540 : vector<32x1xf32>
    %542 = vector.broadcast %541 : vector<32x1xf32> to vector<32x64xf32>
    %543 = arith.subf %533, %542 : vector<32x64xf32>
    %544 = arith.mulf %543, %543 : vector<32x64xf32>
    %cst_255 = arith.constant dense<0.000000e+00> : vector<32xf32>
    %545 = vector.multi_reduction <add>, %544, %cst_255 [1] : vector<32x64xf32> to vector<32xf32>
    %546 = vector.shape_cast %545 : vector<32xf32> to vector<32x1xf32>
    %cst_256 = arith.constant 6.400000e+01 : f32
    %547 = vector.broadcast %cst_256 : f32 to vector<32x1xf32>
    %548 = arith.divf %546, %547 : vector<32x1xf32>
    %549 = vector.broadcast %541 : vector<32x1xf32> to vector<32x64xf32>
    %550 = arith.subf %533, %549 : vector<32x64xf32>
    %cst_257 = arith.constant 9.99999974E-6 : f32
    %551 = vector.broadcast %cst_257 : f32 to vector<32x1xf32>
    %552 = arith.addf %548, %551 : vector<32x1xf32>
    %553 = math.rsqrt %552 : vector<32x1xf32>
    %554 = vector.broadcast %553 : vector<32x1xf32> to vector<32x64xf32>
    %555 = arith.mulf %550, %554 : vector<32x64xf32>
    %556 = vector.broadcast %535 : vector<1x64xf32> to vector<32x64xf32>
    %557 = arith.mulf %555, %556 : vector<32x64xf32>
    %558 = vector.broadcast %537 : vector<1x64xf32> to vector<32x64xf32>
    %559 = arith.addf %557, %558 : vector<32x64xf32>
    %560 = arith.truncf %559 : vector<32x64xf32> to vector<32x64xbf16>
    %c3 = arith.constant 3 : index
    %c0_258 = arith.constant 0 : index
    %c0_259 = arith.constant 0 : index
    %561 = vector.load %arg7[%c3, %c0_258, %c0_259] : memref<4x64x192xbf16, #tpu.memory_space<vmem>>, vector<1x64x192xbf16>
    %562 = vector.shape_cast %561 : vector<1x64x192xbf16> to vector<64x192xbf16>
    %cst_260 = arith.constant dense<0.000000e+00> : vector<32x192xf32>
    %563 = tpu.matmul %560, %562, %cst_260 {dimension_numbers = #tpu.dot_dimension_numbers<[1], [0], [0], [1], [0, 0, 1, 1], [], []>} : vector<32x64xbf16>, vector<64x192xbf16>, vector<32x192xf32> -> vector<32x192xf32>
    %c3_261 = arith.constant 3 : index
    %c0_262 = arith.constant 0 : index
    %c0_263 = arith.constant 0 : index
    %564 = vector.load %arg8[%c3_261, %c0_262, %c0_263] : memref<4x1x192xf32, #tpu.memory_space<vmem>>, vector<1x1x192xf32>
    %565 = vector.shape_cast %564 : vector<1x1x192xf32> to vector<1x192xf32>
    %566 = vector.broadcast %565 : vector<1x192xf32> to vector<32x192xf32>
    %567 = arith.addf %563, %566 : vector<32x192xf32>
    %568 = arith.truncf %567 : vector<32x192xf32> to vector<32x192xbf16>
    %cst_264 = arith.constant 0.000000e+00 : f32
    %569 = vector.broadcast %cst_264 : f32 to vector<32x64xf32>
    %570 = vector.extract_strided_slice %568 {offsets = [0, 0], sizes = [32, 16], strides = [1, 1]} : vector<32x192xbf16> to vector<32x16xbf16>
    %571 = vector.extract_strided_slice %568 {offsets = [0, 64], sizes = [32, 16], strides = [1, 1]} : vector<32x192xbf16> to vector<32x16xbf16>
    %572 = vector.extract_strided_slice %568 {offsets = [0, 128], sizes = [32, 16], strides = [1, 1]} : vector<32x192xbf16> to vector<32x16xbf16>
    "tpu.trace_start"() <{level = 10 : i32, message = "se,te->st"}> : () -> ()
    %cst_265 = arith.constant dense<0.000000e+00> : vector<32x32xf32>
    %573 = tpu.matmul %570, %571, %cst_265 {dimension_numbers = #tpu.dot_dimension_numbers<[1], [1], [0], [0], [0, 0, 1, 0], [], []>} : vector<32x16xbf16>, vector<32x16xbf16>, vector<32x32xf32> -> vector<32x32xf32>
    "tpu.trace_stop"() : () -> ()
    %cst_266 = arith.constant 2.500000e-01 : f32
    %574 = vector.broadcast %cst_266 : f32 to vector<32x32xf32>
    %575 = arith.mulf %573, %574 : vector<32x32xf32>
    %576 = arith.addf %575, %7 : vector<32x32xf32>
    %cst_267 = arith.constant dense<0xFF800000> : vector<32xf32>
    %577 = vector.multi_reduction <maximumf>, %576, %cst_267 [1] : vector<32x32xf32> to vector<32xf32>
    %578 = vector.shape_cast %577 : vector<32xf32> to vector<32x1xf32>
    %579 = vector.broadcast %578 : vector<32x1xf32> to vector<32x32xf32>
    %580 = arith.subf %576, %579 : vector<32x32xf32>
    %581 = math.exp %580 : vector<32x32xf32>
    %cst_268 = arith.constant dense<0.000000e+00> : vector<32xf32>
    %582 = vector.multi_reduction <add>, %581, %cst_268 [1] : vector<32x32xf32> to vector<32xf32>
    %583 = vector.shape_cast %582 : vector<32xf32> to vector<32x1xf32>
    %584 = tpu.reciprocal %583 {approx = true} : vector<32x1xf32> -> vector<32x1xf32>
    %585 = vector.broadcast %584 : vector<32x1xf32> to vector<32x32xf32>
    %586 = arith.mulf %581, %585 : vector<32x32xf32>
    %587 = arith.truncf %586 : vector<32x32xf32> to vector<32x32xbf16>
    %cst_269 = arith.constant dense<0.000000e+00> : vector<32x16xf32>
    %588 = tpu.matmul %587, %572, %cst_269 {dimension_numbers = #tpu.dot_dimension_numbers<[1], [0], [0], [1], [0, 0, 1, 1], [], []>} : vector<32x32xbf16>, vector<32x16xbf16>, vector<32x16xf32> -> vector<32x16xf32>
    %589 = arith.truncf %588 : vector<32x16xf32> to vector<32x16xbf16>
    %c3_270 = arith.constant 3 : index
    %c0_271 = arith.constant 0 : index
    %c0_272 = arith.constant 0 : index
    %590 = vector.load %arg9[%c3_270, %c0_271, %c0_272] : memref<4x64x64xbf16, #tpu.memory_space<vmem>>, vector<1x16x64xbf16>
    %591 = vector.shape_cast %590 : vector<1x16x64xbf16> to vector<16x64xbf16>
    %cst_273 = arith.constant dense<0.000000e+00> : vector<32x64xf32>
    %592 = tpu.matmul %589, %591, %cst_273 {dimension_numbers = #tpu.dot_dimension_numbers<[1], [0], [0], [1], [0, 0, 1, 1], [], []>} : vector<32x16xbf16>, vector<16x64xbf16>, vector<32x64xf32> -> vector<32x64xf32>
    %593 = arith.addf %569, %592 : vector<32x64xf32>
    %594 = vector.extract_strided_slice %568 {offsets = [0, 16], sizes = [32, 16], strides = [1, 1]} : vector<32x192xbf16> to vector<32x16xbf16>
    %595 = vector.extract_strided_slice %568 {offsets = [0, 80], sizes = [32, 16], strides = [1, 1]} : vector<32x192xbf16> to vector<32x16xbf16>
    %596 = vector.extract_strided_slice %568 {offsets = [0, 144], sizes = [32, 16], strides = [1, 1]} : vector<32x192xbf16> to vector<32x16xbf16>
    "tpu.trace_start"() <{level = 10 : i32, message = "se,te->st"}> : () -> ()
    %cst_274 = arith.constant dense<0.000000e+00> : vector<32x32xf32>
    %597 = tpu.matmul %594, %595, %cst_274 {dimension_numbers = #tpu.dot_dimension_numbers<[1], [1], [0], [0], [0, 0, 1, 0], [], []>} : vector<32x16xbf16>, vector<32x16xbf16>, vector<32x32xf32> -> vector<32x32xf32>
    "tpu.trace_stop"() : () -> ()
    %cst_275 = arith.constant 2.500000e-01 : f32
    %598 = vector.broadcast %cst_275 : f32 to vector<32x32xf32>
    %599 = arith.mulf %597, %598 : vector<32x32xf32>
    %600 = arith.addf %599, %7 : vector<32x32xf32>
    %cst_276 = arith.constant dense<0xFF800000> : vector<32xf32>
    %601 = vector.multi_reduction <maximumf>, %600, %cst_276 [1] : vector<32x32xf32> to vector<32xf32>
    %602 = vector.shape_cast %601 : vector<32xf32> to vector<32x1xf32>
    %603 = vector.broadcast %602 : vector<32x1xf32> to vector<32x32xf32>
    %604 = arith.subf %600, %603 : vector<32x32xf32>
    %605 = math.exp %604 : vector<32x32xf32>
    %cst_277 = arith.constant dense<0.000000e+00> : vector<32xf32>
    %606 = vector.multi_reduction <add>, %605, %cst_277 [1] : vector<32x32xf32> to vector<32xf32>
    %607 = vector.shape_cast %606 : vector<32xf32> to vector<32x1xf32>
    %608 = tpu.reciprocal %607 {approx = true} : vector<32x1xf32> -> vector<32x1xf32>
    %609 = vector.broadcast %608 : vector<32x1xf32> to vector<32x32xf32>
    %610 = arith.mulf %605, %609 : vector<32x32xf32>
    %611 = arith.truncf %610 : vector<32x32xf32> to vector<32x32xbf16>
    %cst_278 = arith.constant dense<0.000000e+00> : vector<32x16xf32>
    %612 = tpu.matmul %611, %596, %cst_278 {dimension_numbers = #tpu.dot_dimension_numbers<[1], [0], [0], [1], [0, 0, 1, 1], [], []>} : vector<32x32xbf16>, vector<32x16xbf16>, vector<32x16xf32> -> vector<32x16xf32>
    %613 = arith.truncf %612 : vector<32x16xf32> to vector<32x16xbf16>
    %c3_279 = arith.constant 3 : index
    %c16_280 = arith.constant 16 : index
    %c0_281 = arith.constant 0 : index
    %614 = vector.load %arg9[%c3_279, %c16_280, %c0_281] : memref<4x64x64xbf16, #tpu.memory_space<vmem>>, vector<1x16x64xbf16>
    %615 = vector.shape_cast %614 : vector<1x16x64xbf16> to vector<16x64xbf16>
    %cst_282 = arith.constant dense<0.000000e+00> : vector<32x64xf32>
    %616 = tpu.matmul %613, %615, %cst_282 {dimension_numbers = #tpu.dot_dimension_numbers<[1], [0], [0], [1], [0, 0, 1, 1], [], []>} : vector<32x16xbf16>, vector<16x64xbf16>, vector<32x64xf32> -> vector<32x64xf32>
    %617 = arith.addf %593, %616 : vector<32x64xf32>
    %618 = vector.extract_strided_slice %568 {offsets = [0, 32], sizes = [32, 16], strides = [1, 1]} : vector<32x192xbf16> to vector<32x16xbf16>
    %619 = vector.extract_strided_slice %568 {offsets = [0, 96], sizes = [32, 16], strides = [1, 1]} : vector<32x192xbf16> to vector<32x16xbf16>
    %620 = vector.extract_strided_slice %568 {offsets = [0, 160], sizes = [32, 16], strides = [1, 1]} : vector<32x192xbf16> to vector<32x16xbf16>
    "tpu.trace_start"() <{level = 10 : i32, message = "se,te->st"}> : () -> ()
    %cst_283 = arith.constant dense<0.000000e+00> : vector<32x32xf32>
    %621 = tpu.matmul %618, %619, %cst_283 {dimension_numbers = #tpu.dot_dimension_numbers<[1], [1], [0], [0], [0, 0, 1, 0], [], []>} : vector<32x16xbf16>, vector<32x16xbf16>, vector<32x32xf32> -> vector<32x32xf32>
    "tpu.trace_stop"() : () -> ()
    %cst_284 = arith.constant 2.500000e-01 : f32
    %622 = vector.broadcast %cst_284 : f32 to vector<32x32xf32>
    %623 = arith.mulf %621, %622 : vector<32x32xf32>
    %624 = arith.addf %623, %7 : vector<32x32xf32>
    %cst_285 = arith.constant dense<0xFF800000> : vector<32xf32>
    %625 = vector.multi_reduction <maximumf>, %624, %cst_285 [1] : vector<32x32xf32> to vector<32xf32>
    %626 = vector.shape_cast %625 : vector<32xf32> to vector<32x1xf32>
    %627 = vector.broadcast %626 : vector<32x1xf32> to vector<32x32xf32>
    %628 = arith.subf %624, %627 : vector<32x32xf32>
    %629 = math.exp %628 : vector<32x32xf32>
    %cst_286 = arith.constant dense<0.000000e+00> : vector<32xf32>
    %630 = vector.multi_reduction <add>, %629, %cst_286 [1] : vector<32x32xf32> to vector<32xf32>
    %631 = vector.shape_cast %630 : vector<32xf32> to vector<32x1xf32>
    %632 = tpu.reciprocal %631 {approx = true} : vector<32x1xf32> -> vector<32x1xf32>
    %633 = vector.broadcast %632 : vector<32x1xf32> to vector<32x32xf32>
    %634 = arith.mulf %629, %633 : vector<32x32xf32>
    %635 = arith.truncf %634 : vector<32x32xf32> to vector<32x32xbf16>
    %cst_287 = arith.constant dense<0.000000e+00> : vector<32x16xf32>
    %636 = tpu.matmul %635, %620, %cst_287 {dimension_numbers = #tpu.dot_dimension_numbers<[1], [0], [0], [1], [0, 0, 1, 1], [], []>} : vector<32x32xbf16>, vector<32x16xbf16>, vector<32x16xf32> -> vector<32x16xf32>
    %637 = arith.truncf %636 : vector<32x16xf32> to vector<32x16xbf16>
    %c3_288 = arith.constant 3 : index
    %c32_289 = arith.constant 32 : index
    %c0_290 = arith.constant 0 : index
    %638 = vector.load %arg9[%c3_288, %c32_289, %c0_290] : memref<4x64x64xbf16, #tpu.memory_space<vmem>>, vector<1x16x64xbf16>
    %639 = vector.shape_cast %638 : vector<1x16x64xbf16> to vector<16x64xbf16>
    %cst_291 = arith.constant dense<0.000000e+00> : vector<32x64xf32>
    %640 = tpu.matmul %637, %639, %cst_291 {dimension_numbers = #tpu.dot_dimension_numbers<[1], [0], [0], [1], [0, 0, 1, 1], [], []>} : vector<32x16xbf16>, vector<16x64xbf16>, vector<32x64xf32> -> vector<32x64xf32>
    %641 = arith.addf %617, %640 : vector<32x64xf32>
    %642 = vector.extract_strided_slice %568 {offsets = [0, 48], sizes = [32, 16], strides = [1, 1]} : vector<32x192xbf16> to vector<32x16xbf16>
    %643 = vector.extract_strided_slice %568 {offsets = [0, 112], sizes = [32, 16], strides = [1, 1]} : vector<32x192xbf16> to vector<32x16xbf16>
    %644 = vector.extract_strided_slice %568 {offsets = [0, 176], sizes = [32, 16], strides = [1, 1]} : vector<32x192xbf16> to vector<32x16xbf16>
    "tpu.trace_start"() <{level = 10 : i32, message = "se,te->st"}> : () -> ()
    %cst_292 = arith.constant dense<0.000000e+00> : vector<32x32xf32>
    %645 = tpu.matmul %642, %643, %cst_292 {dimension_numbers = #tpu.dot_dimension_numbers<[1], [1], [0], [0], [0, 0, 1, 0], [], []>} : vector<32x16xbf16>, vector<32x16xbf16>, vector<32x32xf32> -> vector<32x32xf32>
    "tpu.trace_stop"() : () -> ()
    %cst_293 = arith.constant 2.500000e-01 : f32
    %646 = vector.broadcast %cst_293 : f32 to vector<32x32xf32>
    %647 = arith.mulf %645, %646 : vector<32x32xf32>
    %648 = arith.addf %647, %7 : vector<32x32xf32>
    %cst_294 = arith.constant dense<0xFF800000> : vector<32xf32>
    %649 = vector.multi_reduction <maximumf>, %648, %cst_294 [1] : vector<32x32xf32> to vector<32xf32>
    %650 = vector.shape_cast %649 : vector<32xf32> to vector<32x1xf32>
    %651 = vector.broadcast %650 : vector<32x1xf32> to vector<32x32xf32>
    %652 = arith.subf %648, %651 : vector<32x32xf32>
    %653 = math.exp %652 : vector<32x32xf32>
    %cst_295 = arith.constant dense<0.000000e+00> : vector<32xf32>
    %654 = vector.multi_reduction <add>, %653, %cst_295 [1] : vector<32x32xf32> to vector<32xf32>
    %655 = vector.shape_cast %654 : vector<32xf32> to vector<32x1xf32>
    %656 = tpu.reciprocal %655 {approx = true} : vector<32x1xf32> -> vector<32x1xf32>
    %657 = vector.broadcast %656 : vector<32x1xf32> to vector<32x32xf32>
    %658 = arith.mulf %653, %657 : vector<32x32xf32>
    %659 = arith.truncf %658 : vector<32x32xf32> to vector<32x32xbf16>
    %cst_296 = arith.constant dense<0.000000e+00> : vector<32x16xf32>
    %660 = tpu.matmul %659, %644, %cst_296 {dimension_numbers = #tpu.dot_dimension_numbers<[1], [0], [0], [1], [0, 0, 1, 1], [], []>} : vector<32x32xbf16>, vector<32x16xbf16>, vector<32x16xf32> -> vector<32x16xf32>
    %661 = arith.truncf %660 : vector<32x16xf32> to vector<32x16xbf16>
    %c3_297 = arith.constant 3 : index
    %c48_298 = arith.constant 48 : index
    %c0_299 = arith.constant 0 : index
    %662 = vector.load %arg9[%c3_297, %c48_298, %c0_299] : memref<4x64x64xbf16, #tpu.memory_space<vmem>>, vector<1x16x64xbf16>
    %663 = vector.shape_cast %662 : vector<1x16x64xbf16> to vector<16x64xbf16>
    %cst_300 = arith.constant dense<0.000000e+00> : vector<32x64xf32>
    %664 = tpu.matmul %661, %663, %cst_300 {dimension_numbers = #tpu.dot_dimension_numbers<[1], [0], [0], [1], [0, 0, 1, 1], [], []>} : vector<32x16xbf16>, vector<16x64xbf16>, vector<32x64xf32> -> vector<32x64xf32>
    %665 = arith.addf %641, %664 : vector<32x64xf32>
    %c3_301 = arith.constant 3 : index
    %c0_302 = arith.constant 0 : index
    %c0_303 = arith.constant 0 : index
    %666 = vector.load %arg10[%c3_301, %c0_302, %c0_303] : memref<4x1x64xf32, #tpu.memory_space<vmem>>, vector<1x1x64xf32>
    %667 = vector.shape_cast %666 : vector<1x1x64xf32> to vector<1x64xf32>
    %668 = vector.broadcast %667 : vector<1x64xf32> to vector<32x64xf32>
    %669 = arith.addf %665, %668 : vector<32x64xf32>
    %670 = arith.addf %559, %669 : vector<32x64xf32>
    %c3_304 = arith.constant 3 : index
    %c0_305 = arith.constant 0 : index
    %c0_306 = arith.constant 0 : index
    %671 = vector.load %arg11[%c3_304, %c0_305, %c0_306] : memref<4x1x64xf32, #tpu.memory_space<vmem>>, vector<1x1x64xf32>
    %672 = vector.shape_cast %671 : vector<1x1x64xf32> to vector<1x64xf32>
    %c3_307 = arith.constant 3 : index
    %c0_308 = arith.constant 0 : index
    %c0_309 = arith.constant 0 : index
    %673 = vector.load %arg12[%c3_307, %c0_308, %c0_309] : memref<4x1x64xf32, #tpu.memory_space<vmem>>, vector<1x1x64xf32>
    %674 = vector.shape_cast %673 : vector<1x1x64xf32> to vector<1x64xf32>
    %cst_310 = arith.constant dense<0.000000e+00> : vector<32xf32>
    %675 = vector.multi_reduction <add>, %670, %cst_310 [1] : vector<32x64xf32> to vector<32xf32>
    %676 = vector.shape_cast %675 : vector<32xf32> to vector<32x1xf32>
    %cst_311 = arith.constant 6.400000e+01 : f32
    %677 = vector.broadcast %cst_311 : f32 to vector<32x1xf32>
    %678 = arith.divf %676, %677 : vector<32x1xf32>
    %679 = vector.broadcast %678 : vector<32x1xf32> to vector<32x64xf32>
    %680 = arith.subf %670, %679 : vector<32x64xf32>
    %681 = arith.mulf %680, %680 : vector<32x64xf32>
    %cst_312 = arith.constant dense<0.000000e+00> : vector<32xf32>
    %682 = vector.multi_reduction <add>, %681, %cst_312 [1] : vector<32x64xf32> to vector<32xf32>
    %683 = vector.shape_cast %682 : vector<32xf32> to vector<32x1xf32>
    %cst_313 = arith.constant 6.400000e+01 : f32
    %684 = vector.broadcast %cst_313 : f32 to vector<32x1xf32>
    %685 = arith.divf %683, %684 : vector<32x1xf32>
    %686 = vector.broadcast %678 : vector<32x1xf32> to vector<32x64xf32>
    %687 = arith.subf %670, %686 : vector<32x64xf32>
    %cst_314 = arith.constant 9.99999974E-6 : f32
    %688 = vector.broadcast %cst_314 : f32 to vector<32x1xf32>
    %689 = arith.addf %685, %688 : vector<32x1xf32>
    %690 = math.rsqrt %689 : vector<32x1xf32>
    %691 = vector.broadcast %690 : vector<32x1xf32> to vector<32x64xf32>
    %692 = arith.mulf %687, %691 : vector<32x64xf32>
    %693 = vector.broadcast %672 : vector<1x64xf32> to vector<32x64xf32>
    %694 = arith.mulf %692, %693 : vector<32x64xf32>
    %695 = vector.broadcast %674 : vector<1x64xf32> to vector<32x64xf32>
    %696 = arith.addf %694, %695 : vector<32x64xf32>
    %697 = arith.truncf %696 : vector<32x64xf32> to vector<32x64xbf16>
    %c3_315 = arith.constant 3 : index
    %c0_316 = arith.constant 0 : index
    %c0_317 = arith.constant 0 : index
    %698 = vector.load %arg13[%c3_315, %c0_316, %c0_317] : memref<4x64x2048xbf16, #tpu.memory_space<vmem>>, vector<1x64x2048xbf16>
    %699 = vector.shape_cast %698 : vector<1x64x2048xbf16> to vector<64x2048xbf16>
    %cst_318 = arith.constant dense<0.000000e+00> : vector<32x2048xf32>
    %700 = tpu.matmul %697, %699, %cst_318 {dimension_numbers = #tpu.dot_dimension_numbers<[1], [0], [0], [1], [0, 0, 1, 1], [], []>} : vector<32x64xbf16>, vector<64x2048xbf16>, vector<32x2048xf32> -> vector<32x2048xf32>
    %c3_319 = arith.constant 3 : index
    %c0_320 = arith.constant 0 : index
    %c0_321 = arith.constant 0 : index
    %701 = vector.load %arg14[%c3_319, %c0_320, %c0_321] : memref<4x1x2048xf32, #tpu.memory_space<vmem>>, vector<1x1x2048xf32>
    %702 = vector.shape_cast %701 : vector<1x1x2048xf32> to vector<1x2048xf32>
    %703 = vector.broadcast %702 : vector<1x2048xf32> to vector<32x2048xf32>
    %704 = arith.addf %700, %703 : vector<32x2048xf32>
    %cst_322 = arith.constant 0.000000e+00 : f32
    %705 = vector.broadcast %cst_322 : f32 to vector<32x2048xf32>
    %706 = arith.maximumf %704, %705 : vector<32x2048xf32>
    %707 = arith.truncf %706 : vector<32x2048xf32> to vector<32x2048xbf16>
    %c3_323 = arith.constant 3 : index
    %c0_324 = arith.constant 0 : index
    %c0_325 = arith.constant 0 : index
    %708 = vector.load %arg15[%c3_323, %c0_324, %c0_325] : memref<4x2048x64xbf16, #tpu.memory_space<vmem>>, vector<1x2048x64xbf16>
    %709 = vector.shape_cast %708 : vector<1x2048x64xbf16> to vector<2048x64xbf16>
    %cst_326 = arith.constant dense<0.000000e+00> : vector<32x64xf32>
    %710 = tpu.matmul %707, %709, %cst_326 {dimension_numbers = #tpu.dot_dimension_numbers<[1], [0], [0], [1], [0, 0, 1, 1], [], []>} : vector<32x2048xbf16>, vector<2048x64xbf16>, vector<32x64xf32> -> vector<32x64xf32>
    %711 = arith.addf %696, %710 : vector<32x64xf32>
    %c3_327 = arith.constant 3 : index
    %c0_328 = arith.constant 0 : index
    %c0_329 = arith.constant 0 : index
    %712 = vector.load %arg16[%c3_327, %c0_328, %c0_329] : memref<4x1x64xf32, #tpu.memory_space<vmem>>, vector<1x1x64xf32>
    %713 = vector.shape_cast %712 : vector<1x1x64xf32> to vector<1x64xf32>
    %714 = vector.broadcast %713 : vector<1x64xf32> to vector<32x64xf32>
    %715 = arith.addf %711, %714 : vector<32x64xf32>
    %c3_330 = arith.constant 3 : index
    %c0_331 = arith.constant 0 : index
    %c0_332 = arith.constant 0 : index
    %716 = vector.load %arg17[%c3_330, %c0_331, %c0_332] : memref<4x1x64xf32, #tpu.memory_space<vmem>>, vector<1x1x64xf32>
    %717 = vector.shape_cast %716 : vector<1x1x64xf32> to vector<1x64xf32>
    %c3_333 = arith.constant 3 : index
    %c0_334 = arith.constant 0 : index
    %c0_335 = arith.constant 0 : index
    %718 = vector.load %arg18[%c3_333, %c0_334, %c0_335] : memref<4x1x64xf32, #tpu.memory_space<vmem>>, vector<1x1x64xf32>
    %719 = vector.shape_cast %718 : vector<1x1x64xf32> to vector<1x64xf32>
    %cst_336 = arith.constant dense<0.000000e+00> : vector<32xf32>
    %720 = vector.multi_reduction <add>, %715, %cst_336 [1] : vector<32x64xf32> to vector<32xf32>
    %721 = vector.shape_cast %720 : vector<32xf32> to vector<32x1xf32>
    %cst_337 = arith.constant 6.400000e+01 : f32
    %722 = vector.broadcast %cst_337 : f32 to vector<32x1xf32>
    %723 = arith.divf %721, %722 : vector<32x1xf32>
    %724 = vector.broadcast %723 : vector<32x1xf32> to vector<32x64xf32>
    %725 = arith.subf %715, %724 : vector<32x64xf32>
    %726 = arith.mulf %725, %725 : vector<32x64xf32>
    %cst_338 = arith.constant dense<0.000000e+00> : vector<32xf32>
    %727 = vector.multi_reduction <add>, %726, %cst_338 [1] : vector<32x64xf32> to vector<32xf32>
    %728 = vector.shape_cast %727 : vector<32xf32> to vector<32x1xf32>
    %cst_339 = arith.constant 6.400000e+01 : f32
    %729 = vector.broadcast %cst_339 : f32 to vector<32x1xf32>
    %730 = arith.divf %728, %729 : vector<32x1xf32>
    %731 = vector.broadcast %723 : vector<32x1xf32> to vector<32x64xf32>
    %732 = arith.subf %715, %731 : vector<32x64xf32>
    %cst_340 = arith.constant 9.99999974E-6 : f32
    %733 = vector.broadcast %cst_340 : f32 to vector<32x1xf32>
    %734 = arith.addf %730, %733 : vector<32x1xf32>
    %735 = math.rsqrt %734 : vector<32x1xf32>
    %736 = vector.broadcast %735 : vector<32x1xf32> to vector<32x64xf32>
    %737 = arith.mulf %732, %736 : vector<32x64xf32>
    %738 = vector.broadcast %717 : vector<1x64xf32> to vector<32x64xf32>
    %739 = arith.mulf %737, %738 : vector<32x64xf32>
    %740 = vector.broadcast %719 : vector<1x64xf32> to vector<32x64xf32>
    %741 = arith.addf %739, %740 : vector<32x64xf32>
    %742 = tpu.iota {dimensions = array<i32: 0>} : vector<2x32xi32>
    %c0_341 = arith.constant 0 : index
    %c0_342 = arith.constant 0 : index
    %743 = vector.load %arg4[%c0_341, %c0_342] : memref<1x32xi32, #tpu.memory_space<vmem>>, vector<1x32xi32>
    %744 = vector.broadcast %743 : vector<1x32xi32> to vector<2x32xi32>
    %745 = arith.cmpi eq, %744, %742 : vector<2x32xi32>
    %cst_343 = arith.constant 6.250000e-02 : f32
    %cst_344 = arith.constant 0.000000e+00 : f32
    %746 = vector.broadcast %cst_343 : f32 to vector<2x32xf32>
    %747 = vector.broadcast %cst_344 : f32 to vector<2x32xf32>
    %748 = arith.select %745, %746, %747 : vector<2x32xi1>, vector<2x32xf32>
    %749 = arith.truncf %748 : vector<2x32xf32> to vector<2x32xbf16>
    %750 = arith.truncf %741 : vector<32x64xf32> to vector<32x64xbf16>
    %cst_345 = arith.constant dense<0.000000e+00> : vector<2x64xf32>
    %751 = tpu.matmul %749, %750, %cst_345 {dimension_numbers = #tpu.dot_dimension_numbers<[1], [0], [0], [1], [0, 0, 1, 1], [], []>} : vector<2x32xbf16>, vector<32x64xbf16>, vector<2x64xf32> -> vector<2x64xf32>
    %752 = arith.truncf %751 : vector<2x64xf32> to vector<2x64xbf16>
    %c0_346 = arith.constant 0 : index
    %c0_347 = arith.constant 0 : index
    %753 = vector.load %arg19[%c0_346, %c0_347] : memref<64x128xbf16, #tpu.memory_space<vmem>>, vector<64x128xbf16>
    %cst_348 = arith.constant dense<0.000000e+00> : vector<2x128xf32>
    %754 = tpu.matmul %752, %753, %cst_348 {dimension_numbers = #tpu.dot_dimension_numbers<[1], [0], [0], [1], [0, 0, 1, 1], [], []>} : vector<2x64xbf16>, vector<64x128xbf16>, vector<2x128xf32> -> vector<2x128xf32>
    %c0_349 = arith.constant 0 : index
    %c0_350 = arith.constant 0 : index
    %755 = vector.load %arg20[%c0_349, %c0_350] : memref<2x128xf32, #tpu.memory_space<vmem>>, vector<2x128xf32>
    tpu.vector_store %arg20[%c0_349, %c0_350], %754 {strides = array<i32>} : memref<2x128xf32, #tpu.memory_space<vmem>>, vector<2x128xf32>,
    return
  }
  func.func @transform_0(%arg0: i32) -> (i32, i32) {
    %c0_i32 = arith.constant 0 : i32
    %c0_i32_0 = arith.constant 0 : i32
    %c0_i32_1 = arith.constant 0 : i32
    return %c0_i32, %c0_i32_0 : i32, i32
  }
  func.func @transform_1(%arg0: i32) -> (i32, i32) {
    %c0_i32 = arith.constant 0 : i32
    %c0_i32_0 = arith.constant 0 : i32
    %c0_i32_1 = arith.constant 0 : i32
    return %c0_i32, %c0_i32_0 : i32, i32
  }
  func.func @transform_2(%arg0: i32) -> (i32, i32) {
    %c0_i32 = arith.constant 0 : i32
    %c0_i32_0 = arith.constant 0 : i32
    %c0_i32_1 = arith.constant 0 : i32
    return %c0_i32, %c0_i32_0 : i32, i32
  }
  func.func @transform_3(%arg0: i32) -> (i32, i32) {
    %c0_i32 = arith.constant 0 : i32
    %c0_i32_0 = arith.constant 0 : i32
    %c0_i32_1 = arith.constant 0 : i32
    return %c0_i32, %c0_i32_0 : i32, i32
  }
  func.func @transform_4(%arg0: i32) -> (i32, i32) {
    %c0_i32 = arith.constant 0 : i32
    %c0_i32_0 = arith.constant 0 : i32
    %c0_i32_1 = arith.constant 0 : i32
    return %c0_i32, %c0_i32_0 : i32, i32
  }
  func.func @transform_5(%arg0: i32) -> (i32, i32) {
    %c0_i32 = arith.constant 0 : i32
    %c0_i32_0 = arith.constant 0 : i32
    %c0_i32_1 = arith.constant 0 : i32
    return %c0_i32, %c0_i32_0 : i32, i32
  }
  func.func @transform_6(%arg0: i32) -> (i32, i32, i32) {
    %c0_i32 = arith.constant 0 : i32
    %c0_i32_0 = arith.constant 0 : i32
    %c0_i32_1 = arith.constant 0 : i32
    %c0_i32_2 = arith.constant 0 : i32
    return %c0_i32, %c0_i32_0, %c0_i32_1 : i32, i32, i32
  }
  func.func @transform_7(%arg0: i32) -> (i32, i32, i32) {
    %c0_i32 = arith.constant 0 : i32
    %c0_i32_0 = arith.constant 0 : i32
    %c0_i32_1 = arith.constant 0 : i32
    %c0_i32_2 = arith.constant 0 : i32
    return %c0_i32, %c0_i32_0, %c0_i32_1 : i32, i32, i32
  }
  func.func @transform_8(%arg0: i32) -> (i32, i32, i32) {
    %c0_i32 = arith.constant 0 : i32
    %c0_i32_0 = arith.constant 0 : i32
    %c0_i32_1 = arith.constant 0 : i32
    %c0_i32_2 = arith.constant 0 : i32
    return %c0_i32, %c0_i32_0, %c0_i32_1 : i32, i32, i32
  }
  func.func @transform_9(%arg0: i32) -> (i32, i32, i32) {
    %c0_i32 = arith.constant 0 : i32
    %c0_i32_0 = arith.constant 0 : i32
    %c0_i32_1 = arith.constant 0 : i32
    %c0_i32_2 = arith.constant 0 : i32
    return %c0_i32, %c0_i32_0, %c0_i32_1 : i32, i32, i32
  }
  func.func @transform_10(%arg0: i32) -> (i32, i32, i32) {
    %c0_i32 = arith.constant 0 : i32
    %c0_i32_0 = arith.constant 0 : i32
    %c0_i32_1 = arith.constant 0 : i32
    %c0_i32_2 = arith.constant 0 : i32
    return %c0_i32, %c0_i32_0, %c0_i32_1 : i32, i32, i32
  }
  func.func @transform_11(%arg0: i32) -> (i32, i32, i32) {
    %c0_i32 = arith.constant 0 : i32
    %c0_i32_0 = arith.constant 0 : i32
    %c0_i32_1 = arith.constant 0 : i32
    %c0_i32_2 = arith.constant 0 : i32
    return %c0_i32, %c0_i32_0, %c0_i32_1 : i32, i32, i32
  }
  func.func @transform_12(%arg0: i32) -> (i32, i32, i32) {
    %c0_i32 = arith.constant 0 : i32
    %c0_i32_0 = arith.constant 0 : i32
    %c0_i32_1 = arith.constant 0 : i32
    %c0_i32_2 = arith.constant 0 : i32
    return %c0_i32, %c0_i32_0, %c0_i32_1 : i32, i32, i32
  }
  func.func @transform_13(%arg0: i32) -> (i32, i32, i32) {
    %c0_i32 = arith.constant 0 : i32
    %c0_i32_0 = arith.constant 0 : i32
    %c0_i32_1 = arith.constant 0 : i32
    %c0_i32_2 = arith.constant 0 : i32
    return %c0_i32, %c0_i32_0, %c0_i32_1 : i32, i32, i32
  }
  func.func @transform_14(%arg0: i32) -> (i32, i32, i32) {
    %c0_i32 = arith.constant 0 : i32
    %c0_i32_0 = arith.constant 0 : i32
    %c0_i32_1 = arith.constant 0 : i32
    %c0_i32_2 = arith.constant 0 : i32
    return %c0_i32, %c0_i32_0, %c0_i32_1 : i32, i32, i32
  }
  func.func @transform_15(%arg0: i32) -> (i32, i32, i32) {
    %c0_i32 = arith.constant 0 : i32
    %c0_i32_0 = arith.constant 0 : i32
    %c0_i32_1 = arith.constant 0 : i32
    %c0_i32_2 = arith.constant 0 : i32
    return %c0_i32, %c0_i32_0, %c0_i32_1 : i32, i32, i32
  }
  func.func @transform_16(%arg0: i32) -> (i32, i32, i32) {
    %c0_i32 = arith.constant 0 : i32
    %c0_i32_0 = arith.constant 0 : i32
    %c0_i32_1 = arith.constant 0 : i32
    %c0_i32_2 = arith.constant 0 : i32
    return %c0_i32, %c0_i32_0, %c0_i32_1 : i32, i32, i32
  }
  func.func @transform_17(%arg0: i32) -> (i32, i32, i32) {
    %c0_i32 = arith.constant 0 : i32
    %c0_i32_0 = arith.constant 0 : i32
    %c0_i32_1 = arith.constant 0 : i32
    %c0_i32_2 = arith.constant 0 : i32
    return %c0_i32, %c0_i32_0, %c0_i32_1 : i32, i32, i32
  }
  func.func @transform_18(%arg0: i32) -> (i32, i32) {
    %c0_i32 = arith.constant 0 : i32
    %c0_i32_0 = arith.constant 0 : i32
    %c0_i32_1 = arith.constant 0 : i32
    return %c0_i32, %c0_i32_0 : i32, i32
  }
  func.func @transform_19(%arg0: i32) -> (i32, i32) {
    %c0_i32 = arith.constant 0 : i32
    %c0_i32_0 = arith.constant 0 : i32
    %c0_i32_1 = arith.constant 0 : i32
    return %c0_i32, %c0_i32_0 : i32, i32
  }
}

</mosaic_0001>

<bundles_post_ra>
// kernel: vit_forward.1
= control target key start
LH: loop header
LB: loop body
LE: loop exit
PB: predicated region body
PF: predicated region fallthrough
CT: control target
= control target key end

     0   :  { %vm145_vm0 = vcmask 523264   ;;  %v19757_v14 = vmov 0   ;;  %v213_v26 = vlaneseq  ;;  %vm332_vm1 = vcmask 130048   ;;  %s19758_s23 = smov 48   ;;  %s19759_s24 = smov 64   ;;  %s24554_s4 = inlined_call_operand.vmem [shape: bf16[64,64], index: 4, kind: input, shape index: {}]   ;;  %s24555_s0 = inlined_call_operand.vmem [shape: bf16[32,64], index: 0, kind: input, shape index: {}]   ;;  %s24556_s6 = inlined_call_operand.vmem [shape: bf16[4,64,192], index: 6, kind: input, shape index: {}]   ;;  %s24557_s5 = inlined_call_operand.vmem [shape: f32[1,64], index: 5, kind: input, shape index: {}]   ;;  %s24558_s7 = inlined_call_operand.vmem [shape: f32[4,1,192], index: 7, kind: input, shape index: {}]   ;;  %s24559_s1 = inlined_call_operand.vmem [shape: s32[32,1], index: 1, kind: input, shape index: {}]   ;;  %s24560_s2 = inlined_call_operand.vmem [shape: s32[1,32], index: 2, kind: input, shape index: {}]   ;;  %s24561_s8 = inlined_call_operand.vmem [shape: bf16[4,64,64], index: 8, kind: input, shape index: {}]   ;;  %s24562_s9 = inlined_call_operand.vmem [shape: f32[4,1,64], index: 9, kind: input, shape index: {}]   ;;  %s24563_s12 = inlined_call_operand.vmem [shape: bf16[4,64,2048], index: 12, kind: input, shape index: {}]   ;;  %s24564_s14 = inlined_call_operand.vmem [shape: bf16[4,2048,64], index: 14, kind: input, shape index: {}]   ;;  %s24565_s10 = inlined_call_operand.vmem [shape: f32[4,1,64], index: 10, kind: input, shape index: {}]   ;;  %s24566_s11 = inlined_call_operand.vmem [shape: f32[4,1,64], index: 11, kind: input, shape index: {}]   ;;  %s24567_s13 = inlined_call_operand.vmem [shape: f32[4,1,2048], index: 13, kind: input, shape index: {}]   ;;  %s24568_s15 = inlined_call_operand.vmem [shape: f32[4,1,64], index: 15, kind: input, shape index: {}]   ;;  %s24569_s16 = inlined_call_operand.vmem [shape: f32[4,1,64], index: 16, kind: input, shape index: {}]   ;;  %s24570_s17 = inlined_call_operand.vmem [shape: f32[4,1,64], index: 17, kind: input, shape index: {}]   ;;  %s24571_s18 = inlined_call_operand.vmem [shape: bf16[64,128], index: 18, kind: input, shape index: {}]   ;;  %s24572_s3 = inlined_call_operand.vmem [shape: s32[1,32], index: 3, kind: input, shape index: {}]   ;;  %s24573_s19 = inlined_call_operand.vmem [shape: f32[2,128], index: 19, kind: output, shape index: {}]  }
   0x1   :  { %24583 = sst [smem:[#allocation2_spill]] %s24554_s4  ;;  %301 = vmatprep.mubr.bf16.mxu1 %v19757_v14  ;;  %18850 = vset.pattern.permute.xlu1 %v19757_v14  ;;  %v211_v29 = vld [vmem:[%s24558_s7] sm:$0x3]  ;;  %v64_v53 = vld [vmem:[%s24559_s1 + $0x8] sm:$0xff]  ;;  %v65_v55 = vld [vmem:[%s24559_s1 + $0x10] sm:$0xff]  ;;  %vm402_vm6 = vcmask 261120  }
   0x2   :  { %24584 = sst [smem:[#allocation3_spill]] %s24555_s0  ;;  %s24587_s20 = sld [smem:[#allocation2_spill]]  ;;  %18849 = vset.pattern.permute.xlu0 %v19757_v14  ;;  %v19933_v27 = vshrl.u32 %v213_v26, 7  ;;  %v63_v54 = vld [vmem:[%s24559_s1] sm:$0xff]  ;;  %v66_v56 = vld [vmem:[%s24559_s1 + $0x18] sm:$0xff]  ;;  %vm19767_vm7 = vmmov 0  }
   0x3   :  { %24585 = sst [smem:[#allocation4_spill]] %s24556_s6  ;;  %s24588_s25 = sld [smem:[#allocation3_spill]] }
   0x4   :  { %24586 = sst [smem:[#allocation5_spill]] %s24557_s5  ;;  %s24589_s29 = sld [smem:[#allocation4_spill]]  ;;  %v19936_v28 = vsub.s32 0, %v19933_v27  ;;  %v19942_v30 = vsub.s32 1, %v19933_v27 }
   0x5   :  { %s24590_s22 = sld [smem:[#allocation5_spill]]  ;;  %s19760_s5 = smov 112  }
   0x6   :  { %v216_v31 = vrot.slane %v211_v29, %v19936_v28  ;;  %v220_v33 = vrot.slane %v211_v29, %v19942_v30  ;;  %s24581_s6 = smov 96   ;;  %s24577_s26 = smov 80  }
   0x7   :  { %s24592_s30 = smov 16  }
   0x8   :  { %v18851_v0 = vld [vmem:[%s24587_s20] sm:$0xff]   ;;  %v18852_v1 = vld [vmem:[%s24587_s20 + $0x8] sm:$0xff]   ;;  %v18853_v2 = vld [vmem:[%s24587_s20 + $0x10] sm:$0xff]  }
   0x9   :  { %18374 = vmatprep.subr.bf16.mxu0 %v18851_v0  ;;  %v18855_v3 = vld [vmem:[%s24588_s25] sm:$0xff]   ;;  %v18854_v4 = vld [vmem:[%s24587_s20 + $0x18] sm:$0xff]   ;;  %v18856_v9 = vld [vmem:[%s24588_s25 + $0x8] sm:$0xff]  }
   0xa   :  { %18375 = vmatpush3.bf16.msra.mxu0 %v18851_v0  ;;  %18382 = vmatprep.mubr.msk.bf16.mxu0 %vm145_vm0, %v18855_v3  ;;  %v18857_v5 = vld [vmem:[%s24589_s29 + $0x4] ss:$8 sps:$4 sm:$0xff]   ;;  %v18859_v6 = vld [vmem:[%s24589_s29] ss:$8 sps:$4 sm:$0xff]   ;;  %v18860_v7 = vld [vmem:[%s24589_s29 + $0x14] ss:$8 sps:$4 sm:$0xff]  }
   0xb   :  { %18376 = vmatprep.subr.bf16.mxu0 %v18852_v1  ;;  %269 = vmatprep.subr.bf16.mxu1 %v18857_v5  ;;  %v18862_v8 = vld [vmem:[%s24589_s29 + $0x10] ss:$8 sps:$4 sm:$0xff]   ;;  %v18863_v10 = vld [vmem:[%s24589_s29 + $0x24] ss:$8 sps:$4 sm:$0xff]   ;;  %v18865_v11 = vld [vmem:[%s24589_s29 + $0x20] ss:$8 sps:$4 sm:$0xff]  }
   0xc   :  { %270 = vmatpush1.bf16.msra.mxu1 %v18859_v6  ;;  %v18866_v12 = vld [vmem:[%s24589_s29 + $0x34] ss:$8 sps:$4 sm:$0xff]   ;;  %v18868_v13 = vld [vmem:[%s24589_s29 + $0x30] ss:$8 sps:$4 sm:$0xff]   ;;  %v15229_v16 = vld [vmem:[%s24590_s22] ss:$0 sm:$0xff] }
   0xd   :  { %271 = vmatprep.subr.bf16.mxu1 %v18860_v7  ;;  %s19761_s22 = smov 32  }
   0xe   :  { %18377 = vmatpush3.bf16.msra.mxu0 %v18852_v1 }
   0xf   :  { %18378 = vmatprep.subr.bf16.mxu0 %v18853_v2 }
  0x10   :  { %272 = vmatpush1.bf16.msra.mxu1 %v18862_v8 }
  0x11   :  { %273 = vmatprep.subr.bf16.mxu1 %v18863_v10 }
  0x12   :  { %18379 = vmatpush3.bf16.msra.mxu0 %v18853_v2 }
  0x13   :  { %18380 = vmatprep.subr.bf16.mxu0 %v18854_v4 }
  0x14   :  { %274 = vmatpush1.bf16.msra.mxu1 %v18865_v11 }
  0x15   :  { %275 = vmatprep.subr.bf16.mxu1 %v18866_v12 }
  0x16   :  { %18381 = vmatpush3.bf16.msra.mxu0 %v18854_v4 }
  0x18   :  { %276 = vmatpush1.bf16.msra.mxu1 %v18868_v13  ;;  %v15228_v13 = vld [vmem:[%s24560_s2] ss:$0 sm:$0xff]  ;;  %s24579_s2 = smov 16  }
  0x19   :  { %18383 = vmatmul.mubr.msk.bf16.vlgmr.msra.gmra.mrb[0].mxu0 %vm145_vm0, %v18856_v9 }
  0xec   :  { %v18384_v15 = vpop.f32.mrb[0].mxu0 }
  0xed   :  { %v186_v17 = vpop.f32.mrb[1].mxu0  ;;  %v19928_v24 = vadd.f32 %v18384_v15, %v15229_v16 }
  0xee   :  { %v18385_v18 = vpop.f32.mrb[2].mxu0  ;;  %v19918_v20 = vadd.f32 %v15229_v16, %v186_v17  ;;  %v19763_v17 = vmov -1e+09  }
  0xef   :  { %v189_v19 = vpop.f32.mrb[3].mxu0  ;;  %v19926_v23 = vadd.f32 %v18385_v18, %v15229_v16 }
  0xf0   :  { %v19920_v21 = vadd.f32 %v15229_v16, %v189_v19 }
  0xf1   :  { %v202_v25 = vpack.c.bf16 %v19926_v23, %v19928_v24 }
  0xf2   :  { %v201_v22 = vpack.c.bf16 %v19920_v21, %v19918_v20 }
  0xf4   :  { %15246 = vmatmul.mubr.msk.bf16.vlgmr.msra.gmra.mrb[0].mxu1 %vm145_vm0, %v201_v22 }
  0xf5   :  { %311 = vmatprep.mubr.bf16.mxu1 %v19757_v14 }
  0xfc   :  { %15247 = vmatmul.mubr.msk.bf16.gmra.mrb[4].mxu1 %vm145_vm0, %v202_v25 }
 0x1c7   :  { %v303_v32 = vpop.f32.mrb[0].mxu1 }
 0x1c8   :  { %v305_v34 = vpop.f32.mrb[1].mxu1  ;;  %v304_v36 = vadd.f32 %v303_v32, %v216_v31 }
 0x1c9   :  { %v307_v35 = vpop.f32.mrb[2].mxu1  ;;  %v306_v39 = vadd.f32 %v305_v34, %v220_v33 }
 0x1ca   :  { %v308_v37 = vadd.f32 %v307_v35, %v216_v31  ;;  %v309_v38 = vpop.f32.mrb[3].mxu1 }
 0x1cb   :  { %v310_v40 = vadd.f32 %v309_v38, %v220_v33 }
 0x1cc   :  { %v19946_v41 = vpack.c.bf16 %v308_v37, %v304_v36 }
 0x1cd   :  { %v19948_v42 = vpack.c.bf16 %v310_v40, %v306_v39 }
 0x1ce   :  { %512 = vrot.lane.b32.xlu1 %v19946_v41, %s19758_s23  ;;  %328 = vrot.lane.b32.xlu0 %v19946_v41, %s19759_s24 }
 0x1cf   :  { %18390 = vmatprep.mubr.msk.bf16.mxu1 %vm332_vm1, %v19946_v41  ;;  %v313_v43 = vpop.f32.mrb[4].mxu1 }
 0x1d0   :  { %v315_v44 = vpop.f32.mrb[5].mxu1  ;;  %v314_v46 = vadd.f32 %v313_v43, %v216_v31 }
 0x1d1   :  { %v317_v45 = vpop.f32.mrb[6].mxu1  ;;  %v316_v49 = vadd.f32 %v315_v44, %v220_v33 }
 0x1d2   :  { %v318_v47 = vadd.f32 %v317_v45, %v216_v31  ;;  %v319_v48 = vpop.f32.mrb[7].mxu1 }
 0x1d3   :  { %v320_v50 = vadd.f32 %v319_v48, %v220_v33 }
 0x1d4   :  { %v19956_v51 = vpack.c.bf16 %v318_v47, %v314_v46 }
 0x1d5   :  { %v19958_v52 = vpack.c.bf16 %v320_v50, %v316_v49 }
 0x1d6   :  { %514 = vrot.lane.b32.xlu1 %v19956_v51, %s19758_s23  ;;  %330 = vrot.lane.b32.xlu0 %v19956_v51, %s19759_s24 }
 0x1da   :  { %510 = vrot.lane.b32.xlu1 %v19956_v51, %s19760_s5  ;;  %508 = vrot.lane.b32.xlu0 %v19946_v41, %s19760_s5 }
 0x1de   :  { %72 = vperm.xlu1 %18850, %v64_v53   ;;  %69 = vperm.xlu0 %18849, %v63_v54  }
 0x1e2   :  { %75 = vperm.xlu1 %18850, %v65_v55   ;;  %78 = vperm.xlu0 %18849, %v66_v56  }
 0x1e6   :  { %824 = vrot.lane.b32.xlu1 %v19946_v41, %s19761_s22  ;;  %826 = vrot.lane.b32.xlu0 %v19956_v51, %s19761_s22 }
 0x1ea   :  { %820 = vrot.lane.b32.xlu1 %v19946_v41, %s24581_s6  ;;  %822 = vrot.lane.b32.xlu0 %v19956_v51, %s24581_s6 }
 0x240   :  { %v513_v57 = vpop.permute.xlu1 %512  ;;  %v329_v58 = vpop.permute.xlu0 %328 }
 0x241   :  { %18806 = vmatprep.subr.msk.bf16.mxu1 %vm332_vm1, %v329_v58  ;;  %18808 = vmatprep.subr.msk.bf16.mxu0 %vm332_vm1, %v513_v57  ;;  %v340_v59 = vsel %vm332_vm1, %v329_v58, 0  ;;  %v523_v60 = vsel %vm332_vm1, %v513_v57, 0 }
 0x242   :  { %18387 = vmatpush3.bf16.xpose.msra.mxu1 %v340_v59  ;;  %18403 = vmatpush3.bf16.xpose.msra.mxu0 %v523_v60 }
 0x248   :  { %v515_v61 = vpop.permute.xlu1 %514  ;;  %v331_v62 = vpop.permute.xlu0 %330 }
 0x249   :  { %18807 = vmatprep.subr.msk.bf16.mxu1 %vm332_vm1, %v331_v62  ;;  %18809 = vmatprep.subr.msk.bf16.mxu0 %vm332_vm1, %v515_v61  ;;  %v343_v63 = vsel %vm332_vm1, %v331_v62, 0  ;;  %v526_v0 = vsel %vm332_vm1, %v515_v61, 0 }
 0x24a   :  { %18389 = vmatpush3.bf16.xpose.msra.mxu1 %v343_v63  ;;  %18405 = vmatpush3.bf16.xpose.msra.mxu0 %v526_v0 }
 0x24b   :  { %18394 = vmatprep.subr.bf16.mxu1 %v19948_v42 }
 0x24c   :  { %v509_v1 = vpop.permute.xlu0 %508  ;;  %v511_v2 = vpop.permute.xlu1 %510 }
 0x24d   :  { %18406 = vmatprep.mubr.msk.bf16.mxu0 %vm332_vm1, %v509_v1 }
 0x251   :  { %18391 = vmatmul.mubr.msk.bf16.vlgmr.msra.gmra.mrb[8].mxu1 %vm332_vm1, %v19956_v51  ;;  %18407 = vmatmul.mubr.msk.bf16.vlgmr.msra.gmra.mrb[4].mxu0 %vm332_vm1, %v511_v2 }
 0x252   :  { %18395 = vmatpush3.bf16.msra.mxu1 %v19948_v42 }
 0x253   :  { %18396 = vmatprep.subr.bf16.mxu1 %v19958_v52 }
 0x256   :  { %18397 = vmatpush3.bf16.msra.mxu1 %v19958_v52 }
 0x25d   :  { %v73_v3 = vpop.permute.xlu1 %72  ;;  %v70_v4 = vpop.permute.xlu0 %69 }
 0x25e   :  { %vm84_vm2 = vcmp.eq.s32.totalorder %v70_v4, %v15228_v13  ;;  %vm85_vm3 = vcmp.eq.s32.totalorder %v73_v3, %v15228_v13 }
 0x25f   :  { %v20013_v18 = vsel %vm84_vm2, 0.0, %v19763_v17  ;;  %v20015_v31 = vsel %vm85_vm3, 0.0, %v19763_v17 }
 0x261   :  { %v76_v5 = vpop.permute.xlu1 %75  ;;  %v79_v6 = vpop.permute.xlu0 %78 }
 0x262   :  { %vm87_vm4 = vcmp.eq.s32.totalorder %v79_v6, %v15228_v13  ;;  %vm86_vm5 = vcmp.eq.s32.totalorder %v76_v5, %v15228_v13 }
 0x263   :  { %v20017_v32 = vsel %vm87_vm4, 0.0, %v19763_v17  ;;  %v20020_v39 = vsel %vm86_vm5, 0.0, %v19763_v17 }
 0x265   :  { %v825_v7 = vpop.permute.xlu1 %824  ;;  %v827_v9 = vpop.permute.xlu0 %826 }
 0x266   :  { %18810 = vmatprep.subr.msk.bf16.mxu0 %vm332_vm1, %v825_v7  ;;  %v835_v8 = vsel %vm332_vm1, %v825_v7, 0  ;;  %v838_v11 = vsel %vm332_vm1, %v827_v9, 0 }
 0x267   :  { %18431 = vmatpush3.bf16.xpose.msra.mxu0 %v835_v8 }
 0x268   :  { %18811 = vmatprep.subr.msk.bf16.mxu0 %vm332_vm1, %v827_v9 }
 0x269   :  { %v821_v10 = vpop.permute.xlu1 %820  ;;  %v823_v12 = vpop.permute.xlu0 %822 }
 0x26a   :  { %18434 = vmatprep.mubr.msk.bf16.mxu0 %vm332_vm1, %v821_v10 }
 0x26f   :  { %18433 = vmatpush3.bf16.xpose.msra.mxu0 %v838_v11 }
 0x276   :  { %18435 = vmatmul.mubr.msk.bf16.vlgmr.msra.gmra.mrb[8].mxu0 %vm332_vm1, %v823_v12 }
 0x324   :  { %v18392_v15 = vpop.f32.mrb[8].mxu1  ;;  %v18408_v16 = vpop.f32.mrb[4].mxu0 }
 0x325   :  { %v379_v19 = vpop.f32.mrb[9].mxu1  ;;  %v562_v22 = vpop.f32.mrb[5].mxu0  ;;  %v396_v36 = vmul.f32 0.25, %v18392_v15  ;;  %v579_v54 = vmul.f32 0.25, %v18408_v16 }
 0x326   :  { %v394_v25 = vmul.f32 0.25, %v379_v19  ;;  %v18393_v26 = vpop.f32.mrb[10].mxu1  ;;  %v18409_v29 = vpop.f32.mrb[6].mxu0  ;;  %v577_v46 = vmul.f32 0.25, %v562_v22 }
 0x327   :  { %v397_v33 = vmul.f32 0.25, %v18393_v26  ;;  %v382_v34 = vpop.f32.mrb[11].mxu1  ;;  %v565_v35 = vpop.f32.mrb[7].mxu0  ;;  %v400_v48 = vadd.f32 %v396_v36, %v20020_v39  ;;  %v580_v49 = vmul.f32 0.25, %v18409_v29  ;;  %v583_v60 = vadd.f32 %v579_v54, %v20020_v39 }
 0x328   :  { %v395_v37 = vmul.f32 0.25, %v382_v34  ;;  %v398_v38 = vadd.f32 %v394_v25, %v20013_v18  ;;  %v578_v40 = vmul.f32 0.25, %v565_v35  ;;  %v581_v56 = vadd.f32 %v577_v46, %v20013_v18 }
 0x329   :  { %v401_v45 = vadd.f32 %v397_v33, %v20017_v32  ;;  %v409_v55 = vsel %vm402_vm6, %v400_v48, -inf  ;;  %v584_v58 = vadd.f32 %v580_v49, %v20017_v32  ;;  %v591_v62 = vsel %vm402_vm6, %v583_v60, -inf }
 0x32a   :  { %v403_v43 = vsel %vm402_vm6, %v398_v38, -inf  ;;  %v399_v44 = vadd.f32 %v395_v37, %v20015_v31  ;;  %v582_v53 = vadd.f32 %v578_v40, %v20015_v31  ;;  %v585_v59 = vsel %vm402_vm6, %v581_v56, -inf }
 0x32b   :  { %404 = vmax.xlane.f32.xlu1 %v403_v43  ;;  %v412_v50 = vsel %vm402_vm6, %v401_v45, -inf  ;;  %v594_v61 = vsel %vm402_vm6, %v584_v58, -inf }
 0x32c   :  { %v406_v47 = vsel %vm402_vm6, %v399_v44, -inf  ;;  %v588_v57 = vsel %vm402_vm6, %v582_v53, -inf }
 0x32d   :  { %407 = vmax.xlane.f32.xlu0 %v406_v47 }
 0x32f   :  { %413 = vmax.xlane.f32.xlu1 %v412_v50 }
 0x331   :  { %410 = vmax.xlane.f32.xlu0 %v409_v55 }
 0x333   :  { %589 = vmax.xlane.f32.xlu1 %v588_v57 }
 0x335   :  { %586 = vmax.xlane.f32.xlu0 %v585_v59 }
 0x337   :  { %595 = vmax.xlane.f32.xlu1 %v594_v61 }
 0x339   :  { %592 = vmax.xlane.f32.xlu0 %v591_v62 }
 0x349   :  { %v20037_v63 = vpop.f32.mrb[8].mxu0 }
 0x34a   :  { %v20039_v0 = vpop.f32.mrb[9].mxu0 }
 0x34b   :  { %v20041_v1 = vpop.f32.mrb[10].mxu0  ;;  %v889_v59 = vmul.f32 0.25, %v20039_v0 }
 0x34c   :  { %v20043_v2 = vpop.f32.mrb[11].mxu0  ;;  %v892_v61 = vmul.f32 0.25, %v20041_v1 }
 0x34d   :  { %v20093_v62 = vadd.f32 %v889_v59, %v20013_v18 }
 0x3b8   :  { %v405_v3 = vpop.xlane.xlu1 %404 }
 0x3b9   :  { %v415_v16 = vsub.f32 %v398_v38, %v405_v3  ;;  %v891_v3 = vmul.f32 0.25, %v20037_v63 }
 0x3ba   :  { %v408_v4 = vpop.xlane.xlu0 %407 }
 0x3bb   :  { %v416_v12 = vsub.f32 %v399_v44, %v408_v4  ;;  %v419_v33 = vmul.f32 1.442695, %v415_v16  ;;  %v20107_v0 = vadd.f32 %v891_v3, %v20020_v39 }
 0x3bc   :  { %v414_v5 = vpop.xlane.xlu1 %413 }
 0x3bd   :  { %v418_v6 = vsub.f32 %v401_v45, %v414_v5  ;;  %v421_v19 = vmul.f32 1.442695, %v416_v12  ;;  %v20102_v5 = vadd.f32 %v892_v61, %v20017_v32  ;;  %v903_v1 = vsel %vm402_vm6, %v20107_v0, -inf }
 0x3be   :  { %v411_v7 = vpop.xlane.xlu0 %410 }
 0x3bf   :  { %v425_v8 = vmul.f32 1.442695, %v418_v6  ;;  %v417_v9 = vsub.f32 %v400_v48, %v411_v7  ;;  %v906_v63 = vsel %vm402_vm6, %v20102_v5, -inf }
 0x3c0   :  { %v590_v10 = vpop.xlane.xlu1 %589 }
 0x3c1   :  { %19437 = vpow2.f32 %v425_v8  ;;  %v423_v11 = vmul.f32 1.442695, %v417_v9  ;;  %v598_v25 = vsub.f32 %v582_v53, %v590_v10 }
 0x3c2   :  { %v587_v13 = vpop.xlane.xlu0 %586 }
 0x3c3   :  { %19439 = vpow2.f32 %v423_v11  ;;  %v597_v34 = vsub.f32 %v581_v56, %v587_v13  ;;  %v603_v37 = vmul.f32 1.442695, %v598_v25 }
 0x3c4   :  { %v596_v15 = vpop.xlane.xlu1 %595 }
 0x3c5   :  { %v600_v17 = vsub.f32 %v584_v58, %v596_v15  ;;  %v601_v38 = vmul.f32 1.442695, %v597_v34 }
 0x3c6   :  { %v593_v22 = vpop.xlane.xlu0 %592 }
 0x3c7   :  { %v607_v26 = vmul.f32 1.442695, %v600_v17  ;;  %v599_v29 = vsub.f32 %v583_v60, %v593_v22  ;;  %v890_v60 = vmul.f32 0.25, %v20043_v2 }
 0x3c9   :  { %19441 = vpow2.f32 %v607_v26  ;;  %v605_v35 = vmul.f32 1.442695, %v599_v29  ;;  %v20097_v4 = vadd.f32 %v890_v60, %v20015_v31 }
 0x3ca   :  { %19443 = vpow2.f32 %v421_v19 }
 0x3cb   :  { %v20045_v36 = vpop.eup %19437  ;;  %19445 = vpow2.f32 %v605_v35 }
 0x3cc   :  { %v436_v40 = vsel %vm402_vm6, %v20045_v36, 0.0  ;;  %19447 = vpow2.f32 %v419_v33 }
 0x3cd   :  { %v20049_v43 = vpop.eup %19439  ;;  %437 = vadd.xlane.f32.xlu1 %v436_v40  ;;  %19449 = vpow2.f32 %v603_v37 }
 0x3ce   :  { %v433_v44 = vsel %vm402_vm6, %v20049_v43, 0.0  ;;  %19451 = vpow2.f32 %v601_v38 }
 0x3cf   :  { %434 = vadd.xlane.f32.xlu0 %v433_v44 }
 0x3d3   :  { %v20053_v45 = vpop.eup %19441 }
 0x3d4   :  { %v20055_v46 = vpop.eup %19443  ;;  %v618_v47 = vsel %vm402_vm6, %v20053_v45, 0.0 }
 0x3d5   :  { %v20059_v48 = vpop.eup %19445  ;;  %619 = vadd.xlane.f32.xlu1 %v618_v47  ;;  %v430_v53 = vsel %vm402_vm6, %v20055_v46, 0.0 }
 0x3d6   :  { %v615_v49 = vsel %vm402_vm6, %v20059_v48, 0.0  ;;  %v20063_v50 = vpop.eup %19447 }
 0x3d7   :  { %616 = vadd.xlane.f32.xlu0 %v615_v49  ;;  %v20067_v54 = vpop.eup %19449  ;;  %v427_v55 = vsel %vm402_vm6, %v20063_v50, 0.0 }
 0x3d8   :  { %v20071_v56 = vpop.eup %19451  ;;  %v612_v57 = vsel %vm402_vm6, %v20067_v54, 0.0 }
 0x3d9   :  { %431 = vadd.xlane.f32.xlu1 %v430_v53  ;;  %v609_v58 = vsel %vm402_vm6, %v20071_v56, 0.0 }
 0x3db   :  { %428 = vadd.xlane.f32.xlu0 %v427_v55 }
 0x3dd   :  { %613 = vadd.xlane.f32.xlu1 %v612_v57 }
 0x3df   :  { %610 = vadd.xlane.f32.xlu0 %v609_v58 }
 0x3ee   :  { %635 = vrot.lane.b32.xlu1 %v19958_v52, %s19760_s5 }
 0x3f2   :  { %1077 = vrot.lane.b32.xlu1 %v19946_v41, %s24579_s2 }
 0x3f5   :  { %633 = vrot.lane.b32.xlu0 %v19948_v42, %s19760_s5 }
 0x3f6   :  { %1073 = vrot.lane.b32.xlu1 %v19946_v41, %s24577_s26  ;;  %v897_v41 = vsel %vm402_vm6, %v20093_v62, -inf }
 0x3f9   :  { %1079 = vrot.lane.b32.xlu0 %v19956_v51, %s24579_s2 }
 0x3fd   :  { %1075 = vrot.lane.b32.xlu0 %v19956_v51, %s24577_s26  ;;  %v900_v51 = vsel %vm402_vm6, %v20097_v4, -inf }
 0x41a   :  { %898 = vmax.xlane.f32.xlu1 %v897_v41 }
 0x41c   :  { %901 = vmax.xlane.f32.xlu0 %v900_v51 }
 0x41e   :  { %907 = vmax.xlane.f32.xlu1 %v906_v63 }
 0x420   :  { %904 = vmax.xlane.f32.xlu0 %v903_v1 }
 0x45a   :  { %v438_v2 = vpop.xlane.xlu1 %437 }
 0x45c   :  { %v435_v6 = vpop.xlane.xlu0 %434 }
 0x45d   :  { %19453 = vrcp.f32 %v435_v6 }
 0x462   :  { %v620_v7 = vpop.xlane.xlu1 %619 }
 0x464   :  { %v617_v8 = vpop.xlane.xlu0 %616 }
 0x466   :  { %v432_v9 = vpop.xlane.xlu1 %431 }
 0x467   :  { %19455 = vrcp.f32 %v432_v9  ;;  %v19454_v15 = vpop.eup %19453 }
 0x468   :  { %19457 = vrcp.f32 %v438_v2  ;;  %v429_v10 = vpop.xlane.xlu0 %428  ;;  %v445_v26 = vmul.f32 %v19454_v15, %v20049_v43 }
 0x469   :  { %19459 = vrcp.f32 %v429_v10 }
 0x46a   :  { %v614_v11 = vpop.xlane.xlu1 %613 }
 0x46b   :  { %19461 = vrcp.f32 %v614_v11  ;;  %v18869_v11 = vld [vmem:[%s24561_s8 + $0x8] sm:$0xff]  }
 0x46c   :  { %v611_v12 = vpop.xlane.xlu0 %610 }
 0x46d   :  { %19463 = vrcp.f32 %v611_v12  ;;  %v18870_v12 = vld [vmem:[%s24561_s8] sm:$0xff]  }
 0x46e   :  { %19465 = vrcp.f32 %v617_v8  ;;  %v636_v13 = vpop.permute.xlu1 %635 }
 0x46f   :  { %19467 = vrcp.f32 %v620_v7 }
 0x470   :  { %v634_v16 = vpop.permute.xlu0 %633 }
 0x471   :  { %v19456_v17 = vpop.eup %19455  ;;  %18410 = vmatprep.subr.bf16.mxu1 %v634_v16 }
 0x472   :  { %v19458_v19 = vpop.eup %19457  ;;  %v1078_v22 = vpop.permute.xlu1 %1077  ;;  %v444_v35 = vmul.f32 %v19456_v17, %v20055_v46 }
 0x473   :  { %v19460_v25 = vpop.eup %19459  ;;  %18812 = vmatprep.subr.msk.bf16.mxu0 %vm332_vm1, %v1078_v22  ;;  %v1088_v29 = vsel %vm332_vm1, %v1078_v22, 0  ;;  %v446_v40 = vmul.f32 %v19458_v19, %v20045_v36 }
 0x474   :  { %18453 = vmatpush3.bf16.xpose.msra.mxu0 %v1088_v29  ;;  %v1080_v33 = vpop.permute.xlu0 %1079  ;;  %v443_v34 = vmul.f32 %v19460_v25, %v20063_v50 }
 0x475   :  { %v19462_v37 = vpop.eup %19461  ;;  %18813 = vmatprep.subr.msk.bf16.mxu0 %vm332_vm1, %v1080_v33  ;;  %v448_v43 = vpack.c.bf16 %v446_v40, %v445_v26  ;;  %v1091_v57 = vsel %vm332_vm1, %v1080_v33, 0 }
 0x476   :  { %v1074_v38 = vpop.permute.xlu1 %1073  ;;  %v447_v44 = vpack.c.bf16 %v444_v35, %v443_v34  ;;  %v626_v50 = vmul.f32 %v19462_v37, %v20067_v54 }
 0x477   :  { %v19464_v47 = vpop.eup %19463  ;;  %18456 = vmatprep.mubr.msk.bf16.mxu0 %vm332_vm1, %v1074_v38 }
 0x478   :  { %v19466_v49 = vpop.eup %19465  ;;  %18398 = vmatprep.mubr.msk.bf16.mxu1 %vm402_vm6, %v447_v44  ;;  %v625_v53 = vmul.f32 %v19464_v47, %v20071_v56  ;;  %v1076_v54 = vpop.permute.xlu0 %1075 }
 0x479   :  { %18399 = vmatmul.mubr.msk.bf16.vlgmr.msra.gmra.mrb[12].mxu1 %vm402_vm6, %v448_v43  ;;  %v19468_v46 = vpop.eup %19467  ;;  %v627_v55 = vmul.f32 %v19466_v49, %v20059_v48 }
 0x47a   :  { %18411 = vmatpush3.bf16.msra.mxu1 %v634_v16  ;;  %v629_v36 = vpack.c.bf16 %v626_v50, %v625_v53  ;;  %v628_v58 = vmul.f32 %v19468_v46, %v20053_v45 }
 0x47b   :  { %18412 = vmatprep.subr.bf16.mxu1 %v636_v13 }
 0x47c   :  { %18414 = vmatprep.mubr.msk.bf16.mxu1 %vm402_vm6, %v629_v36  ;;  %18455 = vmatpush3.bf16.xpose.msra.mxu0 %v1091_v57  ;;  %v630_v59 = vpack.c.bf16 %v628_v58, %v627_v55 }
 0x47e   :  { %18413 = vmatpush3.bf16.msra.mxu1 %v636_v13 }
 0x47f   :  { %18418 = vmatprep.subr.bf16.mxu1 %v18869_v11 }
 0x481   :  { %18415 = vmatmul.mubr.msk.bf16.vlgmr.msra.gmra.mrb[16].mxu1 %vm402_vm6, %v630_v59 }
 0x482   :  { %18419 = vmatpush3.bf16.msra.mxu1 %v18869_v11 }
 0x483   :  { %18457 = vmatmul.mubr.msk.bf16.vlgmr.msra.gmra.mrb[12].mxu0 %vm332_vm1, %v1076_v54  ;;  %18424 = vmatprep.subr.bf16.mxu1 %v18870_v12 }
 0x484   :  { %1924 = vmatprep.mubr.bf16.mxu0 %v19757_v14 }
 0x4a7   :  { %v899_v56 = vpop.xlane.xlu1 %898 }
 0x4a8   :  { %v909_v3 = vsub.f32 %v20093_v62, %v899_v56 }
 0x4a9   :  { %v902_v60 = vpop.xlane.xlu0 %901 }
 0x4aa   :  { %v910_v48 = vsub.f32 %v20097_v4, %v902_v60  ;;  %v913_v2 = vmul.f32 1.442695, %v909_v3 }
 0x4ab   :  { %v908_v61 = vpop.xlane.xlu1 %907 }
 0x4ac   :  { %v912_v41 = vsub.f32 %v20102_v5, %v908_v61  ;;  %v915_v51 = vmul.f32 1.442695, %v910_v48 }
 0x4ad   :  { %v905_v45 = vpop.xlane.xlu0 %904 }
 0x4ae   :  { %v919_v63 = vmul.f32 1.442695, %v912_v41  ;;  %v911_v1 = vsub.f32 %v20107_v0, %v905_v45 }
 0x4b0   :  { %19469 = vpow2.f32 %v919_v63  ;;  %v917_v6 = vmul.f32 1.442695, %v911_v1 }
 0x4b1   :  { %19471 = vpow2.f32 %v915_v51 }
 0x4b2   :  { %19473 = vpow2.f32 %v917_v6 }
 0x4b3   :  { %19475 = vpow2.f32 %v913_v2 }
 0x4ba   :  { %v20136_v7 = vpop.eup %19469 }
 0x4bb   :  { %v20138_v8 = vpop.eup %19471  ;;  %v930_v62 = vsel %vm402_vm6, %v20136_v7, 0.0 }
 0x4bc   :  { %v20142_v4 = vpop.eup %19473  ;;  %931 = vadd.xlane.f32.xlu1 %v930_v62  ;;  %v924_v9 = vsel %vm402_vm6, %v20138_v8, 0.0 }
 0x4bd   :  { %v927_v5 = vsel %vm402_vm6, %v20142_v4, 0.0  ;;  %v19476_v0 = vpop.eup %19475 }
 0x4be   :  { %928 = vadd.xlane.f32.xlu0 %v927_v5  ;;  %v921_v10 = vsel %vm402_vm6, %v19476_v0, 0.0 }
 0x4c0   :  { %925 = vadd.xlane.f32.xlu1 %v924_v9 }
 0x4c2   :  { %922 = vadd.xlane.f32.xlu0 %v921_v10 }
 0x4d1   :  { %945 = vrot.lane.b32.xlu1 %v19958_v52, %s24581_s6 }
 0x4d8   :  { %943 = vrot.lane.b32.xlu0 %v19948_v42, %s24581_s6 }
 0x549   :  { %v932_v17 = vpop.xlane.xlu1 %931 }
 0x54b   :  { %v929_v13 = vpop.xlane.xlu0 %928 }
 0x54c   :  { %v18400_v15 = vpop.f32.mrb[12].mxu1 }
 0x54d   :  { %v489_v16 = vpop.f32.mrb[13].mxu1  ;;  %v926_v33 = vpop.xlane.xlu1 %925 }
 0x54e   :  { %v18401_v19 = vpop.f32.mrb[14].mxu1 }
 0x54f   :  { %v505_v22 = vpack.c.bf16 %v18401_v19, %v18400_v15  ;;  %v492_v25 = vpop.f32.mrb[15].mxu1  ;;  %v923_v29 = vpop.xlane.xlu0 %922 }
 0x550   :  { %v504_v26 = vpack.c.bf16 %v492_v25, %v489_v16  ;;  %19477 = vrcp.f32 %v923_v29 }
 0x551   :  { %19479 = vrcp.f32 %v926_v33  ;;  %v946_v62 = vpop.permute.xlu1 %945 }
 0x552   :  { %19481 = vrcp.f32 %v929_v13 }
 0x553   :  { %v944_v58 = vpop.permute.xlu0 %943  ;;  %19483 = vrcp.f32 %v932_v17 }
 0x554   :  { %v18416_v34 = vpop.f32.mrb[16].mxu1 }
 0x555   :  { %v679_v35 = vpop.f32.mrb[17].mxu1 }
 0x556   :  { %v18417_v37 = vpop.f32.mrb[18].mxu1  ;;  %v18458_v40 = vpop.f32.mrb[12].mxu0 }
 0x557   :  { %v695_v38 = vpack.c.bf16 %v18417_v37, %v18416_v34  ;;  %v682_v44 = vpop.f32.mrb[19].mxu1  ;;  %v1127_v47 = vpop.f32.mrb[13].mxu0  ;;  %v1144_v57 = vmul.f32 0.25, %v18458_v40 }
 0x558   :  { %v694_v43 = vpack.c.bf16 %v682_v44, %v679_v35  ;;  %v18459_v49 = vpop.f32.mrb[14].mxu0  ;;  %v1142_v53 = vmul.f32 0.25, %v1127_v47 }
 0x559   :  { %v1130_v50 = vpop.f32.mrb[15].mxu0  ;;  %v1145_v46 = vmul.f32 0.25, %v18459_v49  ;;  %v1148_v48 = vadd.f32 %v1144_v57, %v20020_v39 }
 0x55a   :  { %18420 = vmatprep.mubr.msk.bf16.mxu1 %vm332_vm1, %v694_v43  ;;  %v1146_v36 = vadd.f32 %v1142_v53, %v20013_v18  ;;  %v1143_v55 = vmul.f32 0.25, %v1130_v50  ;;  %v19478_v61 = vpop.eup %19477 }
 0x55b   :  { %18421 = vmatmul.mubr.msk.bf16.vlgmr.msra.gmra.mrb[20].mxu1 %vm332_vm1, %v695_v38  ;;  %v1149_v56 = vadd.f32 %v1145_v46, %v20017_v32  ;;  %v19480_v41 = vpop.eup %19479  ;;  %v1156_v51 = vsel %vm402_vm6, %v1148_v48, -inf  ;;  %v937_v45 = vmul.f32 %v19478_v61, %v19476_v0 }
 0x55c   :  { %18425 = vmatpush3.bf16.msra.mxu1 %v18870_v12  ;;  %18426 = vmatprep.mubr.msk.bf16.mxu1 %vm332_vm1, %v504_v26  ;;  %v1150_v59 = vsel %vm402_vm6, %v1146_v36, -inf  ;;  %v1147_v54 = vadd.f32 %v1143_v55, %v20015_v31  ;;  %v938_v63 = vmul.f32 %v19480_v41, %v20138_v8  ;;  %v19482_v1 = vpop.eup %19481  ;;  %v18871_v8 = vld [vmem:[%s24561_s8 + $0x10] sm:$0xff]  }
 0x55d   :  { %18438 = vmatprep.subr.bf16.mxu1 %v944_v58  ;;  %1151 = vmax.xlane.f32.xlu1 %v1150_v59  ;;  %v1159_v3 = vsel %vm402_vm6, %v1149_v56, -inf  ;;  %v19484_v6 = vpop.eup %19483  ;;  %v939_v5 = vmul.f32 %v19482_v1, %v20142_v4 }
 0x55e   :  { %v1153_v60 = vsel %vm402_vm6, %v1147_v54, -inf  ;;  %v941_v2 = vpack.c.bf16 %v938_v63, %v937_v45  ;;  %v940_v9 = vmul.f32 %v19484_v6, %v20136_v7  ;;  %v18872_v45 = vld [vmem:[%s24561_s8 + $0x18] sm:$0xff]  }
 0x55f   :  { %1154 = vmax.xlane.f32.xlu0 %v1153_v60 }
 0x560   :  { %v942_v10 = vpack.c.bf16 %v940_v9, %v939_v5  ;;  %v15276_v9 = vld [vmem:[%s24562_s9] ss:$0 sm:$0xff] }
 0x561   :  { %1160 = vmax.xlane.f32.xlu1 %v1159_v3 }
 0x563   :  { %1157 = vmax.xlane.f32.xlu0 %v1156_v51 }
 0x567   :  { %18427 = vmatmul.mubr.msk.bf16.vlgmr.msra.gmra.mrb[20].mxu1 %vm332_vm1, %v505_v22 }
 0x568   :  { %18439 = vmatpush3.bf16.msra.mxu1 %v944_v58  ;;  %18442 = vmatprep.mubr.msk.bf16.mxu1 %vm402_vm6, %v941_v2 }
 0x569   :  { %18440 = vmatprep.subr.bf16.mxu1 %v946_v62 }
 0x56c   :  { %18441 = vmatpush3.bf16.msra.mxu1 %v946_v62 }
 0x56d   :  { %18446 = vmatprep.subr.bf16.mxu1 %v18871_v8 }
 0x56f   :  { %18443 = vmatmul.mubr.msk.bf16.vlgmr.msra.gmra.mrb[24].mxu1 %vm402_vm6, %v942_v10 }
 0x570   :  { %18447 = vmatpush3.bf16.msra.mxu1 %v18871_v8 }
 0x5ea   :  { %v1152_v0 = vpop.xlane.xlu1 %1151 }
 0x5eb   :  { %v1162_v15 = vsub.f32 %v1146_v36, %v1152_v0 }
 0x5ec   :  { %v1155_v11 = vpop.xlane.xlu0 %1154 }
 0x5ed   :  { %v1163_v12 = vsub.f32 %v1147_v54, %v1155_v11  ;;  %v1166_v22 = vmul.f32 1.442695, %v1162_v15 }
 0x5ee   :  { %v1161_v13 = vpop.xlane.xlu1 %1160 }
 0x5ef   :  { %v1165_v16 = vsub.f32 %v1149_v56, %v1161_v13  ;;  %v1168_v4 = vmul.f32 1.442695, %v1163_v12 }
 0x5f0   :  { %v1158_v17 = vpop.xlane.xlu0 %1157 }
 0x5f1   :  { %v1172_v19 = vmul.f32 1.442695, %v1165_v16  ;;  %v1164_v7 = vsub.f32 %v1148_v48, %v1158_v17 }
 0x5f3   :  { %19485 = vpow2.f32 %v1172_v19  ;;  %v1170_v25 = vmul.f32 1.442695, %v1164_v7 }
 0x5f4   :  { %19487 = vpow2.f32 %v1168_v4 }
 0x5f5   :  { %19489 = vpow2.f32 %v1170_v25 }
 0x5f6   :  { %19491 = vpow2.f32 %v1166_v22 }
 0x5fd   :  { %v19486_v26 = vpop.eup %19485 }
 0x5fe   :  { %v19488_v29 = vpop.eup %19487  ;;  %v1183_v33 = vsel %vm402_vm6, %v19486_v26, 0.0 }
 0x5ff   :  { %v19490_v34 = vpop.eup %19489  ;;  %1184 = vadd.xlane.f32.xlu1 %v1183_v33  ;;  %v1177_v40 = vsel %vm402_vm6, %v19488_v29, 0.0 }
 0x600   :  { %v1180_v35 = vsel %vm402_vm6, %v19490_v34, 0.0  ;;  %v19492_v37 = vpop.eup %19491 }
 0x601   :  { %1181 = vadd.xlane.f32.xlu0 %v1180_v35  ;;  %v1174_v38 = vsel %vm402_vm6, %v19492_v37, 0.0 }
 0x603   :  { %1178 = vadd.xlane.f32.xlu1 %v1177_v40 }
 0x605   :  { %1175 = vadd.xlane.f32.xlu0 %v1174_v38 }
 0x614   :  { %1198 = vrot.lane.b32.xlu1 %v19958_v52, %s24577_s26 }
 0x61b   :  { %1196 = vrot.lane.b32.xlu0 %v19948_v42, %s24577_s26  ;;  %s24591_s26 = smov 80  }
 0x642   :  { %v18444_v44 = vpop.f32.mrb[24].mxu1 }
 0x643   :  { %v989_v47 = vpop.f32.mrb[25].mxu1 }
 0x644   :  { %v18445_v43 = vpop.f32.mrb[26].mxu1 }
 0x645   :  { %v1005_v49 = vpack.c.bf16 %v18445_v43, %v18444_v44  ;;  %v992_v53 = vpop.f32.mrb[27].mxu1 }
 0x646   :  { %v1004_v50 = vpack.c.bf16 %v992_v53, %v989_v47 }
 0x648   :  { %18448 = vmatprep.mubr.msk.bf16.mxu1 %vm332_vm1, %v1004_v50 }
 0x649   :  { %18449 = vmatmul.mubr.msk.bf16.vlgmr.msra.gmra.mrb[20].mxu1 %vm332_vm1, %v1005_v49 }
 0x68c   :  { %v1185_v46 = vpop.xlane.xlu1 %1184 }
 0x68e   :  { %v1182_v36 = vpop.xlane.xlu0 %1181 }
 0x68f   :  { %19493 = vrcp.f32 %v1182_v36 }
 0x690   :  { %v1179_v55 = vpop.xlane.xlu1 %1178 }
 0x691   :  { %19495 = vrcp.f32 %v1179_v55 }
 0x692   :  { %19497 = vrcp.f32 %v1185_v46  ;;  %v1176_v52 = vpop.xlane.xlu0 %1175 }
 0x693   :  { %19499 = vrcp.f32 %v1176_v52 }
 0x694   :  { %v1199_v42 = vpop.permute.xlu1 %1198 }
 0x696   :  { %v1197_v57 = vpop.permute.xlu0 %1196 }
 0x697   :  { %18460 = vmatprep.subr.bf16.mxu1 %v1197_v57 }
 0x698   :  { %18461 = vmatpush3.bf16.msra.mxu1 %v1197_v57  ;;  %v1418_v57 = vld [vmem:[%s24563_s12] sm:$0xff] }
 0x699   :  { %18462 = vmatprep.subr.bf16.mxu1 %v1199_v42  ;;  %v19494_v58 = vpop.eup %19493 }
 0x69a   :  { %v1192_v60 = vmul.f32 %v19494_v58, %v19490_v34  ;;  %v1419_v58 = vld [vmem:[%s24563_s12 + $0x8] sm:$0xff] }
 0x69b   :  { %v19496_v59 = vpop.eup %19495 }
 0x69c   :  { %v19498_v54 = vpop.eup %19497  ;;  %18463 = vmatpush3.bf16.msra.mxu1 %v1199_v42  ;;  %v1191_v61 = vmul.f32 %v19496_v59, %v19488_v29  ;;  %v1426_v42 = vld [vmem:[%s24563_s12 + $0x40] sm:$0xff] }
 0x69d   :  { %v19500_v56 = vpop.eup %19499  ;;  %v1193_v3 = vmul.f32 %v19498_v54, %v19486_v26  ;;  %18468 = vmatprep.subr.bf16.mxu1 %v18872_v45  ;;  %v15280_v59 = vcombine.high %v1418_v57, %v1426_v42  ;;  %v1427_v54 = vld [vmem:[%s24563_s12 + $0x48] sm:$0xff] }
 0x69e   :  { %v1190_v48 = vmul.f32 %v19500_v56, %v19492_v37  ;;  %v15279_v56 = vcombine.low %v1418_v57, %v1426_v42  ;;  %v15277_v57 = vld [vmem:[%s24565_s10] ss:$0 sm:$0xff] }
 0x69f   :  { %v1195_v51 = vpack.c.bf16 %v1193_v3, %v1192_v60  ;;  %v15281_v60 = vcombine.low %v1419_v58, %v1427_v54  ;;  %1892 = vmatprep.subr.bf16.mxu0 %v15280_v59  ;;  %v1442_v3 = vld [vmem:[%s24563_s12 + $0xc0] sm:$0xff] }
 0x6a0   :  { %v1194_v41 = vpack.c.bf16 %v1191_v61, %v1190_v48  ;;  %v15282_v48 = vcombine.high %v1419_v58, %v1427_v54  ;;  %1893 = vmatpush1.bf16.msra.mxu0 %v15279_v56  ;;  %v1434_v61 = vld [vmem:[%s24563_s12 + $0x80] sm:$0xff] }
 0x6a1   :  { %v15278_v54 = vld [vmem:[%s24566_s11] ss:$0 sm:$0xff] }
 0x6a2   :  { %18464 = vmatprep.mubr.msk.bf16.mxu1 %vm402_vm6, %v1194_v41  ;;  %v1435_v41 = vld [vmem:[%s24563_s12 + $0x88] sm:$0xff] }
 0x6a3   :  { %18465 = vmatmul.mubr.msk.bf16.vlgmr.msra.gmra.mrb[28].mxu1 %vm402_vm6, %v1195_v51  ;;  %v15296_v51 = vcombine.high %v1434_v61, %v1442_v3 }
 0x6a4   :  { %18469 = vmatpush3.bf16.msra.mxu1 %v18872_v45  ;;  %v1443_v45 = vld [vmem:[%s24563_s12 + $0xc8] sm:$0xff] }
 0x6a5   :  { %1945 = vmatprep.subr.bf16.mxu1 %v15282_v48  ;;  %1894 = vmatprep.subr.bf16.mxu0 %v15296_v51  ;;  %v1436_v48 = vld [vmem:[%s24563_s12 + $0x90] sm:$0xff] }
 0x776   :  { %v18466_v63 = vpop.f32.mrb[28].mxu1 }
 0x777   :  { %v1242_v1 = vpop.f32.mrb[29].mxu1 }
 0x778   :  { %v18467_v2 = vpop.f32.mrb[30].mxu1 }
 0x779   :  { %v1258_v6 = vpack.c.bf16 %v18467_v2, %v18466_v63  ;;  %v1245_v62 = vpop.f32.mrb[31].mxu1  ;;  %v15295_v63 = vcombine.low %v1434_v61, %v1442_v3  ;;  %v15298_v2 = vcombine.high %v1435_v41, %v1443_v45  ;;  %v1444_v61 = vld [vmem:[%s24563_s12 + $0xd0] sm:$0xff]  ;;  %v1445_v3 = vld [vmem:[%s24563_s12 + $0xd8] sm:$0xff] }
 0x77a   :  { %v1257_v5 = vpack.c.bf16 %v1245_v62, %v1242_v1  ;;  %v15297_v1 = vcombine.low %v1435_v41, %v1443_v45  ;;  %v1458_v62 = vld [vmem:[%s24563_s12 + $0x140] sm:$0xff] }
 0x77b   :  { %1895 = vmatpush1.bf16.msra.mxu0 %v15295_v63 }
 0x77c   :  { %18470 = vmatprep.mubr.msk.bf16.mxu1 %vm332_vm1, %v1257_v5  ;;  %v1451_v5 = vld [vmem:[%s24563_s12 + $0x108] sm:$0xff] }
 0x77d   :  { %18471 = vmatmul.mubr.msk.bf16.vlgmr.msra.gmra.mrb[20].mxu1 %vm332_vm1, %v1258_v6  ;;  %v1450_v6 = vld [vmem:[%s24563_s12 + $0x100] sm:$0xff] }
 0x77e   :  { %1977 = vmatprep.mubr.bf16.mxu1 %v19757_v14  ;;  %1946 = vmatpush1.bf16.msra.mxu1 %v15281_v60 }
 0x77f   :  { %1947 = vmatprep.subr.bf16.mxu1 %v15298_v2  ;;  %v1452_v2 = vld [vmem:[%s24563_s12 + $0x110] sm:$0xff] }
 0x782   :  { %1948 = vmatpush1.bf16.msra.mxu1 %v15297_v1 }
 0x850   :  { %v18472_v10 = vpop.f32.mrb[20].mxu1 }
 0x851   :  { %v1307_v8 = vpop.f32.mrb[21].mxu1  ;;  %v1335_v15 = vadd.f32 %v18472_v10, %v15276_v9  ;;  %v1459_v10 = vld [vmem:[%s24563_s12 + $0x148] sm:$0xff] }
 0x852   :  { %v1333_v0 = vadd.f32 %v15276_v9, %v1307_v8  ;;  %v18473_v11 = vpop.f32.mrb[22].mxu1  ;;  %v15311_v8 = vcombine.low %v1450_v6, %v1458_v62 }
 0x853   :  { %v1336_v12 = vadd.f32 %v18473_v11, %v15276_v9  ;;  %v1310_v13 = vpop.f32.mrb[23].mxu1  ;;  %v1339_v25 = vadd.f32 %v1335_v15, %v19928_v24  ;;  %v15314_v11 = vcombine.high %v1451_v5, %v1459_v10  ;;  %v1467_v15 = vld [vmem:[%s24563_s12 + $0x188] sm:$0xff] }
 0x854   :  { %v1334_v16 = vadd.f32 %v15276_v9, %v1310_v13  ;;  %v1337_v4 = vadd.f32 %v1333_v0, %v19918_v20  ;;  %v15312_v9 = vcombine.high %v1450_v6, %v1458_v62  ;;  %v15313_v0 = vcombine.low %v1451_v5, %v1459_v10  ;;  %v1474_v13 = vld [vmem:[%s24563_s12 + $0x1c0] sm:$0xff]  ;;  %v1460_v6 = vld [vmem:[%s24563_s12 + $0x150] sm:$0xff]  ;;  %v1453_v5 = vld [vmem:[%s24563_s12 + $0x118] sm:$0xff] }
 0x855   :  { %v1340_v7 = vadd.f32 %v1336_v12, %v19926_v23  ;;  %v1349_v29 = vsel %vm145_vm0, %v1339_v25, 0.0  ;;  %1949 = vmatprep.subr.bf16.mxu1 %v15314_v11  ;;  %v1466_v12 = vld [vmem:[%s24563_s12 + $0x180] sm:$0xff] }
 0x856   :  { %v1343_v17 = vsel %vm145_vm0, %v1337_v4, 0.0  ;;  %v1338_v19 = vadd.f32 %v1334_v16, %v19920_v21  ;;  %1896 = vmatprep.subr.bf16.mxu0 %v15312_v9  ;;  %1950 = vmatpush1.bf16.msra.mxu1 %v15313_v0  ;;  %v15328_v16 = vcombine.high %v1466_v12, %v1474_v13  ;;  %v1461_v9 = vld [vmem:[%s24563_s12 + $0x158] sm:$0xff] }
 0x857   :  { %1344 = vadd.xlane.f32.xlu1 %v1343_v17  ;;  %v1352_v26 = vsel %vm145_vm0, %v1340_v7, 0.0  ;;  %1897 = vmatpush1.bf16.msra.mxu0 %v15311_v8  ;;  %v15327_v17 = vcombine.low %v1466_v12, %v1474_v13  ;;  %v15300_v8 = vcombine.high %v1436_v48, %v1444_v61  ;;  %v15316_v13 = vcombine.high %v1452_v2, %v1460_v6 }
 0x858   :  { %v1346_v22 = vsel %vm145_vm0, %v1338_v19, 0.0  ;;  %1898 = vmatprep.subr.bf16.mxu0 %v15328_v16  ;;  %v1476_v16 = vld [vmem:[%s24563_s12 + $0x1d0] sm:$0xff] }
 0x859   :  { %1347 = vadd.xlane.f32.xlu0 %v1346_v22  ;;  %v1420_v22 = vld [vmem:[%s24563_s12 + $0x10] sm:$0xff] }
 0x85b   :  { %1353 = vadd.xlane.f32.xlu1 %v1352_v26  ;;  %1899 = vmatpush1.bf16.msra.mxu0 %v15327_v17  ;;  %v1421_v26 = vld [vmem:[%s24563_s12 + $0x18] sm:$0xff] }
 0x85c   :  { %v1477_v17 = vld [vmem:[%s24563_s12 + $0x1d8] sm:$0xff] }
 0x85d   :  { %1350 = vadd.xlane.f32.xlu0 %v1349_v29 }
 0x8e4   :  { %v1345_v33 = vpop.xlane.xlu1 %1344 }
 0x8e5   :  { %v1356_v20 = vmul.f32 0.015625, %v1345_v33  ;;  %v1429_v33 = vld [vmem:[%s24563_s12 + $0x58] sm:$0xff] }
 0x8e6   :  { %v1348_v34 = vpop.xlane.xlu0 %1347 }
 0x8e7   :  { %v20208_v35 = vsub.f32 %v1337_v4, %v1356_v20  ;;  %v1357_v21 = vmul.f32 0.015625, %v1348_v34  ;;  %v1475_v4 = vld [vmem:[%s24563_s12 + $0x1c8] sm:$0xff]  ;;  %v15285_v34 = vcombine.low %v1421_v26, %v1429_v33 }
 0x8e8   :  { %v1354_v37 = vpop.xlane.xlu1 %1353 }
 0x8e9   :  { %v20210_v23 = vsub.f32 %v1338_v19, %v1357_v21  ;;  %v1359_v40 = vmul.f32 0.015625, %v1354_v37  ;;  %v1364_v24 = vmul.f32 %v20208_v35, %v20208_v35  ;;  %v15329_v19 = vcombine.low %v1467_v15, %v1475_v4 }
 0x8ea   :  { %v1351_v38 = vpop.xlane.xlu0 %1350  ;;  %v15286_v21 = vcombine.high %v1421_v26, %v1429_v33  ;;  %v15317_v26 = vcombine.low %v1453_v5, %v1461_v9  ;;  %v1430_v33 = vld [vmem:[%s24563_s12 + $0x60] sm:$0xff] }
 0x8eb   :  { %v20214_v44 = vsub.f32 %v1340_v7, %v1359_v40  ;;  %v1358_v47 = vmul.f32 0.015625, %v1351_v38  ;;  %v1368_v43 = vsel %vm145_vm0, %v1364_v24, 0.0  ;;  %v1365_v49 = vmul.f32 %v20210_v23, %v20210_v23 }
 0x8ec   :  { %1369 = vadd.xlane.f32.xlu0 %v1368_v43  ;;  %v15330_v7 = vcombine.high %v1467_v15, %v1475_v4  ;;  %v1468_v15 = vld [vmem:[%s24563_s12 + $0x190] sm:$0xff]  ;;  %v1469_v4 = vld [vmem:[%s24563_s12 + $0x198] sm:$0xff] }
 0x8ed   :  { %v20219_v53 = vsub.f32 %v1339_v25, %v1358_v47  ;;  %v1371_v50 = vsel %vm145_vm0, %v1365_v49, 0.0  ;;  %v1367_v46 = vmul.f32 %v20214_v44, %v20214_v44  ;;  %v1428_v25 = vld [vmem:[%s24563_s12 + $0x50] sm:$0xff] }
 0x8ee   :  { %1372 = vadd.xlane.f32.xlu1 %v1371_v50  ;;  %1951 = vmatprep.subr.bf16.mxu1 %v15330_v7  ;;  %v15284_v29 = vcombine.high %v1420_v22, %v1428_v25  ;;  %v15283_v20 = vcombine.low %v1420_v22, %v1428_v25  ;;  %v15318_v22 = vcombine.high %v1453_v5, %v1461_v9  ;;  %v1425_v5 = vld [vmem:[%s24563_s12 + $0x38] sm:$0xff] }
 0x8ef   :  { %v1366_v36 = vmul.f32 %v20219_v53, %v20219_v53  ;;  %v1377_v55 = vsel %vm145_vm0, %v1367_v46, 0.0  ;;  %1952 = vmatpush1.bf16.msra.mxu1 %v15329_v19  ;;  %v15315_v25 = vcombine.low %v1452_v2, %v1460_v6  ;;  %v1424_v6 = vld [vmem:[%s24563_s12 + $0x30] sm:$0xff]  ;;  %v1433_v9 = vld [vmem:[%s24563_s12 + $0x78] sm:$0xff] }
 0x8f0   :  { %1998 = vmatprep.subr.bf16.mxu0 %v15284_v29  ;;  %2051 = vmatprep.subr.bf16.mxu1 %v15286_v21  ;;  %v1422_v29 = vld [vmem:[%s24563_s12 + $0x20] sm:$0xff] }
 0x8f1   :  { %v1374_v52 = vsel %vm145_vm0, %v1366_v36, 0.0 }
 0x8f2   :  { %1378 = vadd.xlane.f32.xlu1 %v1377_v55  ;;  %1375 = vadd.xlane.f32.xlu0 %v1374_v52 }
 0x979   :  { %v1370_v37 = vpop.xlane.xlu0 %1369 }
 0x97a   :  { %v1380_v40 = vmul.f32 0.015625, %v1370_v37  ;;  %v15332_v37 = vcombine.high %v1468_v15, %v1476_v16 }
 0x97b   :  { %v1373_v24 = vpop.xlane.xlu1 %1372 }
 0x97c   :  { %v1384_v38 = vadd.f32 1e-05, %v1380_v40  ;;  %v1381_v47 = vmul.f32 0.015625, %v1373_v24  ;;  %v15334_v40 = vcombine.high %v1469_v4, %v1477_v17  ;;  %v15331_v24 = vcombine.low %v1468_v15, %v1476_v16  ;;  %v1449_v15 = vld [vmem:[%s24563_s12 + $0xf8] sm:$0xff] }
 0x97e   :  { %19501 = vrsqrt.f32 %v1384_v38  ;;  %v1385_v43 = vadd.f32 1e-05, %v1381_v47  ;;  %v15333_v38 = vcombine.low %v1469_v4, %v1477_v17  ;;  %v1438_v47 = vld [vmem:[%s24563_s12 + $0xa0] sm:$0xff]  ;;  %v15294_v4 = vcombine.high %v1425_v5, %v1433_v9 }
 0x97f   :  { %v1379_v49 = vpop.xlane.xlu1 %1378  ;;  %v1376_v50 = vpop.xlane.xlu0 %1375 }
 0x980   :  { %19503 = vrsqrt.f32 %v1385_v43  ;;  %v1383_v46 = vmul.f32 0.015625, %v1379_v49  ;;  %v1382_v36 = vmul.f32 0.015625, %v1376_v50  ;;  %v1446_v43 = vld [vmem:[%s24563_s12 + $0xe0] sm:$0xff]  ;;  %v1439_v49 = vld [vmem:[%s24563_s12 + $0xa8] sm:$0xff] }
 0x981   :  { %v1447_v50 = vld [vmem:[%s24563_s12 + $0xe8] sm:$0xff] }
 0x982   :  { %v1387_v55 = vadd.f32 1e-05, %v1383_v46  ;;  %v1386_v52 = vadd.f32 1e-05, %v1382_v36  ;;  %v15288_v46 = vcombine.high %v1422_v29, %v1430_v33 }
 0x984   :  { %19505 = vrsqrt.f32 %v1387_v55  ;;  %v15287_v55 = vcombine.low %v1422_v29, %v1430_v33  ;;  %v1457_v29 = vld [vmem:[%s24563_s12 + $0x138] sm:$0xff] }
 0x985   :  { %19507 = vrsqrt.f32 %v1386_v52  ;;  %v1465_v33 = vld [vmem:[%s24563_s12 + $0x178] sm:$0xff] }
 0x988   :  { %v19502_v42 = vpop.eup %19501 }
 0x989   :  { %v1392_v58 = vmul.f32 %v19502_v42, %v20208_v35  ;;  %v1437_v35 = vld [vmem:[%s24563_s12 + $0x98] sm:$0xff]  ;;  %v1462_v42 = vld [vmem:[%s24563_s12 + $0x160] sm:$0xff] }
 0x98a   :  { %v19504_v59 = vpop.eup %19503  ;;  %v15302_v0 = vcombine.high %v1437_v35, %v1445_v3  ;;  %v15301_v12 = vcombine.low %v1437_v35, %v1445_v3  ;;  %v1478_v35 = vld [vmem:[%s24563_s12 + $0x1e0] sm:$0xff]  ;;  %v1471_v3 = vld [vmem:[%s24563_s12 + $0x1a8] sm:$0xff] }
 0x98b   :  { %v1402_v56 = vmul.f32 %v15277_v57, %v1392_v58  ;;  %v1393_v60 = vmul.f32 %v19504_v59, %v20210_v23  ;;  %v1455_v58 = vld [vmem:[%s24563_s12 + $0x128] sm:$0xff] }
 0x98c   :  { %v1463_v59 = vld [vmem:[%s24563_s12 + $0x168] sm:$0xff] }
 0x98d   :  { %v1403_v41 = vmul.f32 %v15277_v57, %v1393_v60  ;;  %v20308_v23 = vadd.f32 %v15278_v54, %v1402_v56  ;;  %v15306_v56 = vcombine.high %v1439_v49, %v1447_v50  ;;  %v15303_v60 = vcombine.low %v1438_v47, %v1446_v43 }
 0x98e   :  { %v19506_v51 = vpop.eup %19505  ;;  %v15321_v2 = vcombine.low %v1455_v58, %v1463_v59 }
 0x98f   :  { %v19508_v45 = vpop.eup %19507  ;;  %v20310_v63 = vadd.f32 %v15278_v54, %v1403_v41  ;;  %v1395_v1 = vmul.f32 %v19506_v51, %v20214_v44  ;;  %v1479_v41 = vld [vmem:[%s24563_s12 + $0x1e8] sm:$0xff] }
 0x990   :  { %v1394_v62 = vmul.f32 %v19508_v45, %v20219_v53  ;;  %v15299_v53 = vcombine.low %v1436_v48, %v1444_v61  ;;  %v15305_v48 = vcombine.low %v1439_v49, %v1447_v50  ;;  %v1470_v61 = vld [vmem:[%s24563_s12 + $0x1a0] sm:$0xff]  ;;  %v15322_v45 = vcombine.high %v1455_v58, %v1463_v59 }
 0x991   :  { %v20328_v44 = vpack.c.bf16 %v20310_v63, %v20308_v23  ;;  %v1405_v10 = vmul.f32 %v15277_v57, %v1395_v1  ;;  %v15326_v50 = vcombine.high %v1457_v29, %v1465_v33 }
 0x992   :  { %v1404_v11 = vmul.f32 %v15277_v57, %v1394_v62  ;;  %v1454_v57 = vld [vmem:[%s24563_s12 + $0x120] sm:$0xff]  ;;  %v1432_v62 = vld [vmem:[%s24563_s12 + $0x70] sm:$0xff] }
 0x993   :  { %15343 = vmatmul.mubr.msk.bf16.vlgmr.msra.gmra.mrb[16].mxu0 %vm145_vm0, %v20328_v44  ;;  %15345 = vmatmul.mubr.msk.bf16.vlgmr.msra.gmra.mrb[32].mxu1 %vm145_vm0, %v20328_v44  ;;  %v20346_v19 = vadd.f32 %v15278_v54, %v1405_v10  ;;  %v15320_v51 = vcombine.high %v1454_v57, %v1462_v42  ;;  %v15319_v1 = vcombine.low %v1454_v57, %v1462_v42  ;;  %v18873_v57 = vld [vmem:[%s24564_s14 + $0x40] sm:$0xff]  }
 0x994   :  { %1999 = vmatpush1.bf16.msra.mxu0 %v15283_v20  ;;  %2052 = vmatpush1.bf16.msra.mxu1 %v15285_v34  ;;  %v20348_v7 = vadd.f32 %v15278_v54, %v1404_v11  ;;  %v1423_v20 = vld [vmem:[%s24563_s12 + $0x28] sm:$0xff]  ;;  %v15304_v54 = vcombine.high %v1438_v47, %v1446_v43  ;;  %v15336_v10 = vcombine.high %v1470_v61, %v1478_v35  ;;  %v1473_v47 = vld [vmem:[%s24563_s12 + $0x1b8] sm:$0xff]  ;;  %v18874_v42 = vld [vmem:[%s24564_s14 + $0xc0] sm:$0xff]  }
 0x995   :  { %2000 = vmatprep.subr.bf16.mxu0 %v15300_v8  ;;  %2053 = vmatprep.subr.bf16.mxu1 %v15302_v0  ;;  %v1431_v34 = vld [vmem:[%s24563_s12 + $0x68] sm:$0xff]  ;;  %v15338_v8 = vcombine.high %v1471_v3, %v1479_v41  ;;  %v15335_v0 = vcombine.low %v1470_v61, %v1478_v35  ;;  %v15337_v11 = vcombine.low %v1471_v3, %v1479_v41  ;;  %v1481_v43 = vld [vmem:[%s24563_s12 + $0x1f8] sm:$0xff]  ;;  %v18881_v3 = vld [vmem:[%s24564_s14 + $0x50] sm:$0xff]  }
 0x996   :  { %1934 = vmatprep.mubr.bf16.mxu0 %v19757_v14  ;;  %1987 = vmatprep.mubr.bf16.mxu1 %v19757_v14  ;;  %v20366_v21 = vpack.c.bf16 %v20346_v19, %v20348_v7  ;;  %v15290_v36 = vcombine.high %v1423_v20, %v1431_v34  ;;  %v15289_v52 = vcombine.low %v1423_v20, %v1431_v34  ;;  %v18879_v61 = vld [vmem:[%s24564_s14 + $0x8] sm:$0xff]   ;;  %v18883_v41 = vld [vmem:[%s24564_s14 + $0x10] sm:$0xff]  }
 0x997   :  { %v15292_v16 = vcombine.high %v1424_v6, %v1432_v62  ;;  %v15291_v17 = vcombine.low %v1424_v6, %v1432_v62  ;;  %v15341_v59 = vcombine.low %v1473_v47, %v1481_v43  ;;  %v18880_v35 = vld [vmem:[%s24564_s14 + $0x88] sm:$0xff]   ;;  %v18888_v6 = vld [vmem:[%s24564_s14 + $0x98] sm:$0xff]   ;;  %v18889_v62 = vld [vmem:[%s24564_s14 + $0x60] sm:$0xff]  }
 0x998   :  { %2001 = vmatpush1.bf16.msra.mxu0 %v15299_v53  ;;  %2054 = vmatpush1.bf16.msra.mxu1 %v15301_v12  ;;  %v1440_v53 = vld [vmem:[%s24563_s12 + $0xb0] sm:$0xff] }
 0x999   :  { %2002 = vmatprep.subr.bf16.mxu0 %v15316_v13  ;;  %2055 = vmatprep.subr.bf16.mxu1 %v15318_v22  ;;  %v1448_v12 = vld [vmem:[%s24563_s12 + $0xf0] sm:$0xff]  ;;  %v1441_v13 = vld [vmem:[%s24563_s12 + $0xb8] sm:$0xff]  ;;  %v15293_v22 = vcombine.low %v1425_v5, %v1433_v9  ;;  %v18890_v5 = vld [vmem:[%s24564_s14 + $0xe0] sm:$0xff]  }
 0x99a   :  { %v15308_v20 = vcombine.high %v1440_v53, %v1448_v12  ;;  %v15310_v34 = vcombine.high %v1441_v13, %v1449_v15  ;;  %v18892_v9 = vld [vmem:[%s24564_s14 + $0xa0] sm:$0xff]  }
 0x99b   :  { %15344 = vmatmul.mubr.msk.bf16.gmra.mrb[20].mxu0 %vm145_vm0, %v20366_v21  ;;  %15346 = vmatmul.mubr.msk.bf16.gmra.mrb[36].mxu1 %vm145_vm0, %v20366_v21 }
 0x99c   :  { %2003 = vmatpush1.bf16.msra.mxu0 %v15315_v25  ;;  %2056 = vmatpush1.bf16.msra.mxu1 %v15317_v26  ;;  %v1456_v25 = vld [vmem:[%s24563_s12 + $0x130] sm:$0xff] }
 0x99d   :  { %2004 = vmatprep.subr.bf16.mxu0 %v15332_v37  ;;  %2057 = vmatprep.subr.bf16.mxu1 %v15334_v40  ;;  %v1464_v26 = vld [vmem:[%s24563_s12 + $0x170] sm:$0xff]  ;;  %v15307_v37 = vcombine.low %v1440_v53, %v1448_v12  ;;  %v15309_v40 = vcombine.low %v1441_v13, %v1449_v15 }
 0x99e   :  { %2030 = vmatprep.mubr.bf16.mxu0 %v19757_v14  ;;  %2083 = vmatprep.mubr.bf16.mxu1 %v19757_v14  ;;  %v15324_v49 = vcombine.high %v1456_v25, %v1464_v26  ;;  %v18897_v53 = vld [vmem:[%s24564_s14 + $0x70] sm:$0xff]  }
 0x99f   :  { %v18898_v12 = vld [vmem:[%s24564_s14 + $0xf0] sm:$0xff]  }
 0x9a0   :  { %2005 = vmatpush1.bf16.msra.mxu0 %v15331_v24  ;;  %2058 = vmatpush1.bf16.msra.mxu1 %v15333_v38  ;;  %v1472_v24 = vld [vmem:[%s24563_s12 + $0x1b0] sm:$0xff] }
 0x9a1   :  { %2104 = vmatprep.subr.bf16.mxu0 %v15288_v46  ;;  %2157 = vmatprep.subr.bf16.mxu1 %v15290_v36  ;;  %v1480_v38 = vld [vmem:[%s24563_s12 + $0x1f0] sm:$0xff]  ;;  %v15323_v46 = vcombine.low %v1456_v25, %v1464_v26  ;;  %v15325_v36 = vcombine.low %v1457_v29, %v1465_v33  ;;  %v18905_v25 = vld [vmem:[%s24564_s14 + $0x140] sm:$0xff]   ;;  %v20595_v29 = vsub.s32 2, %v19933_v27  ;;  %v20598_v33 = vsub.s32 3, %v19933_v27 }
 0x9a2   :  { %v15339_v58 = vcombine.low %v1472_v24, %v1480_v38  ;;  %v18899_v13 = vld [vmem:[%s24564_s14 + $0x30] sm:$0xff]   ;;  %v18906_v26 = vld [vmem:[%s24564_s14 + $0x1c0] sm:$0xff]  }
 0x9a3   :  { %15347 = vmatmul.mubr.msk.bf16.vlgmr.msra.gmra.mrb[24].mxu0 %vm145_vm0, %v20328_v44  ;;  %15349 = vmatmul.mubr.msk.bf16.vlgmr.msra.gmra.mrb[40].mxu1 %vm145_vm0, %v20328_v44  ;;  %v18900_v15 = vld [vmem:[%s24564_s14 + $0xb0] sm:$0xff]  }
 0x9a4   :  { %2105 = vmatpush1.bf16.msra.mxu0 %v15287_v55  ;;  %2158 = vmatpush1.bf16.msra.mxu1 %v15289_v52  ;;  %v15340_v55 = vcombine.high %v1472_v24, %v1480_v38  ;;  %v15342_v52 = vcombine.high %v1473_v47, %v1481_v43  ;;  %v20615_v24 = vld [vmem:[%s24567_s13] sm:$0xff] }
 0x9a5   :  { %2106 = vmatprep.subr.bf16.mxu0 %v15304_v54  ;;  %2159 = vmatprep.subr.bf16.mxu1 %v15306_v56  ;;  %v18875_v54 = vld [vmem:[%s24564_s14] sm:$0xff]   ;;  %v1489_v38 = vrot.slane %v20615_v24, %v19936_v28  ;;  %v1497_v47 = vrot.slane %v20615_v24, %v20595_v29  ;;  %v1493_v43 = vrot.slane %v20615_v24, %v19942_v30 }
 0x9a6   :  { %2040 = vmatprep.mubr.bf16.mxu0 %v19757_v14  ;;  %2093 = vmatprep.mubr.bf16.mxu1 %v19757_v14  ;;  %v18876_v56 = vld [vmem:[%s24564_s14 + $0x80] sm:$0xff]  }
 0x9a8   :  { %2107 = vmatpush1.bf16.msra.mxu0 %v15303_v60  ;;  %2160 = vmatpush1.bf16.msra.mxu1 %v15305_v48  ;;  %v18877_v60 = vld [vmem:[%s24564_s14 + $0x48] sm:$0xff]  }
 0x9a9   :  { %2108 = vmatprep.subr.bf16.mxu0 %v15320_v51  ;;  %2161 = vmatprep.subr.bf16.mxu1 %v15322_v45  ;;  %v18878_v48 = vld [vmem:[%s24564_s14 + $0xc8] sm:$0xff]   ;;  %v18884_v51 = vld [vmem:[%s24564_s14 + $0x90] sm:$0xff]   ;;  %v18885_v45 = vld [vmem:[%s24564_s14 + $0x58] sm:$0xff]  }
 0x9ab   :  { %15348 = vmatmul.mubr.msk.bf16.gmra.mrb[28].mxu0 %vm145_vm0, %v20366_v21  ;;  %15350 = vmatmul.mubr.msk.bf16.gmra.mrb[44].mxu1 %vm145_vm0, %v20366_v21 }
 0x9ac   :  { %2109 = vmatpush1.bf16.msra.mxu0 %v15319_v1  ;;  %2162 = vmatpush1.bf16.msra.mxu1 %v15321_v2  ;;  %v18886_v1 = vld [vmem:[%s24564_s14 + $0xd8] sm:$0xff]  }
 0x9ad   :  { %2110 = vmatprep.subr.bf16.mxu0 %v15336_v10  ;;  %2163 = vmatprep.subr.bf16.mxu1 %v15338_v8  ;;  %v18887_v2 = vld [vmem:[%s24564_s14 + $0x18] sm:$0xff]   ;;  %v18893_v10 = vld [vmem:[%s24564_s14 + $0x68] sm:$0xff]  }
 0x9ae   :  { %2136 = vmatprep.mubr.bf16.mxu0 %v19757_v14  ;;  %2189 = vmatprep.mubr.bf16.mxu1 %v19757_v14  ;;  %v18894_v8 = vld [vmem:[%s24564_s14 + $0xe8] sm:$0xff]  }
 0x9b0   :  { %2111 = vmatpush1.bf16.msra.mxu0 %v15335_v0  ;;  %2164 = vmatpush1.bf16.msra.mxu1 %v15337_v11  ;;  %v18895_v0 = vld [vmem:[%s24564_s14 + $0x28] sm:$0xff]  }
 0x9b1   :  { %2210 = vmatprep.subr.bf16.mxu0 %v15292_v16  ;;  %2263 = vmatprep.subr.bf16.mxu1 %v15294_v4  ;;  %v18896_v11 = vld [vmem:[%s24564_s14 + $0xa8] sm:$0xff]   ;;  %v18901_v16 = vld [vmem:[%s24564_s14 + $0x78] sm:$0xff]  }
 0x9b2   :  { %v18902_v4 = vld [vmem:[%s24564_s14 + $0xf8] sm:$0xff]  }
 0x9b3   :  { %15351 = vmatmul.mubr.msk.bf16.vlgmr.msra.gmra.mrb[32].mxu0 %vm145_vm0, %v20328_v44  ;;  %15353 = vmatmul.mubr.msk.bf16.vlgmr.msra.gmra.mrb[48].mxu1 %vm145_vm0, %v20328_v44 }
 0x9b4   :  { %2211 = vmatpush1.bf16.msra.mxu0 %v15291_v17  ;;  %2264 = vmatpush1.bf16.msra.mxu1 %v15293_v22  ;;  %v18903_v17 = vld [vmem:[%s24564_s14 + $0x38] sm:$0xff]  }
 0x9b5   :  { %2212 = vmatprep.subr.bf16.mxu0 %v15308_v20  ;;  %2265 = vmatprep.subr.bf16.mxu1 %v15310_v34  ;;  %v18904_v22 = vld [vmem:[%s24564_s14 + $0xb8] sm:$0xff]   ;;  %v20601_v20 = vsub.s32 4, %v19933_v27  ;;  %v20604_v34 = vsub.s32 6, %v19933_v27 }
 0x9b6   :  { %2146 = vmatprep.mubr.bf16.mxu0 %v19757_v14  ;;  %2199 = vmatprep.mubr.bf16.mxu1 %v19757_v14 }
 0x9b8   :  { %2213 = vmatpush1.bf16.msra.mxu0 %v15307_v37  ;;  %2266 = vmatpush1.bf16.msra.mxu1 %v15309_v40  ;;  %v20607_v37 = vsub.s32 5, %v19933_v27  ;;  %v20610_v40 = vsub.s32 7, %v19933_v27 }
 0x9b9   :  { %2214 = vmatprep.subr.bf16.mxu0 %v15324_v49  ;;  %2267 = vmatprep.subr.bf16.mxu1 %v15326_v50  ;;  %v1501_v49 = vrot.slane %v20615_v24, %v20598_v33 }
 0x9bb   :  { %15352 = vmatmul.mubr.msk.bf16.gmra.mrb[36].mxu0 %vm145_vm0, %v20366_v21  ;;  %15354 = vmatmul.mubr.msk.bf16.gmra.mrb[52].mxu1 %vm145_vm0, %v20366_v21 }
 0x9bc   :  { %2215 = vmatpush1.bf16.msra.mxu0 %v15323_v46  ;;  %2268 = vmatpush1.bf16.msra.mxu1 %v15325_v36 }
 0x9bd   :  { %2216 = vmatprep.subr.bf16.mxu0 %v15340_v55  ;;  %2269 = vmatprep.subr.bf16.mxu1 %v15342_v52 }
 0x9be   :  { %2242 = vmatprep.mubr.bf16.mxu0 %v19757_v14  ;;  %2295 = vmatprep.mubr.bf16.mxu1 %v19757_v14 }
 0x9c0   :  { %2217 = vmatpush1.bf16.msra.mxu0 %v15339_v58  ;;  %2270 = vmatpush1.bf16.msra.mxu1 %v15341_v59 }
 0x9c1   :  { %17338 = vmatprep.subr.bf16.mxu0 %v18873_v57  ;;  %17366 = vmatprep.subr.bf16.mxu1 %v18874_v42 }
 0x9c3   :  { %15355 = vmatmul.mubr.msk.bf16.vlgmr.msra.gmra.mrb[40].mxu0 %vm145_vm0, %v20328_v44  ;;  %15357 = vmatmul.mubr.msk.bf16.vlgmr.msra.gmra.mrb[56].mxu1 %vm145_vm0, %v20328_v44  ;;  %v18882_v44 = vld [vmem:[%s24564_s14 + $0xd0] sm:$0xff]  }
 0x9c4   :  { %2252 = vmatprep.mubr.bf16.mxu0 %v19757_v14  ;;  %2305 = vmatprep.mubr.bf16.mxu1 %v19757_v14 }
 0x9c5   :  { %17339 = vmatpush3.bf16.msra.mxu0 %v18875_v54  ;;  %17367 = vmatpush3.bf16.msra.mxu1 %v18876_v56 }
 0x9c6   :  { %17340 = vmatprep.subr.bf16.mxu0 %v18877_v60  ;;  %17368 = vmatprep.subr.bf16.mxu1 %v18878_v48 }
 0x9c9   :  { %17341 = vmatpush3.bf16.msra.mxu0 %v18879_v61  ;;  %17369 = vmatpush3.bf16.msra.mxu1 %v18880_v35 }
 0x9ca   :  { %17342 = vmatprep.subr.bf16.mxu0 %v18881_v3  ;;  %17370 = vmatprep.subr.bf16.mxu1 %v18882_v44 }
 0x9cb   :  { %15356 = vmatmul.mubr.msk.bf16.gmra.mrb[44].mxu0 %vm145_vm0, %v20366_v21  ;;  %15358 = vmatmul.mubr.msk.bf16.gmra.mrb[60].mxu1 %vm145_vm0, %v20366_v21  ;;  %v18891_v21 = vld [vmem:[%s24564_s14 + $0x20] sm:$0xff]  }
 0x9cd   :  { %17343 = vmatpush3.bf16.msra.mxu0 %v18883_v41  ;;  %17371 = vmatpush3.bf16.msra.mxu1 %v18884_v51 }
 0x9ce   :  { %17344 = vmatprep.subr.bf16.mxu0 %v18885_v45  ;;  %17372 = vmatprep.subr.bf16.mxu1 %v18886_v1 }
 0x9d1   :  { %17345 = vmatpush3.bf16.msra.mxu0 %v18887_v2  ;;  %17373 = vmatpush3.bf16.msra.mxu1 %v18888_v6 }
 0x9d2   :  { %17346 = vmatprep.subr.bf16.mxu0 %v18889_v62  ;;  %17374 = vmatprep.subr.bf16.mxu1 %v18890_v5  ;;  %v18907_v5 = vld [vmem:[%s24564_s14 + $0x100] sm:$0xff]  }
 0x9d5   :  { %17347 = vmatpush3.bf16.msra.mxu0 %v18891_v21  ;;  %17375 = vmatpush3.bf16.msra.mxu1 %v18892_v9  ;;  %v18908_v21 = vld [vmem:[%s24564_s14 + $0x180] sm:$0xff]  }
 0x9d6   :  { %17348 = vmatprep.subr.bf16.mxu0 %v18893_v10  ;;  %17376 = vmatprep.subr.bf16.mxu1 %v18894_v8  ;;  %v18909_v8 = vld [vmem:[%s24564_s14 + $0x148] sm:$0xff]  }
 0x9d9   :  { %17349 = vmatpush3.bf16.msra.mxu0 %v18895_v0  ;;  %17377 = vmatpush3.bf16.msra.mxu1 %v18896_v11  ;;  %v18910_v0 = vld [vmem:[%s24564_s14 + $0x1c8] sm:$0xff]  }
 0x9da   :  { %17350 = vmatprep.subr.bf16.mxu0 %v18897_v53  ;;  %17378 = vmatprep.subr.bf16.mxu1 %v18898_v12 }
 0x9dd   :  { %17351 = vmatpush3.bf16.msra.mxu0 %v18899_v13  ;;  %17379 = vmatpush3.bf16.msra.mxu1 %v18900_v15 }
 0x9de   :  { %17352 = vmatprep.subr.bf16.mxu0 %v18901_v16  ;;  %17380 = vmatprep.subr.bf16.mxu1 %v18902_v4 }
 0x9e1   :  { %17353 = vmatpush3.bf16.msra.mxu0 %v18903_v17  ;;  %17381 = vmatpush3.bf16.msra.mxu1 %v18904_v22 }
 0x9e2   :  { %17394 = vmatprep.subr.bf16.mxu0 %v18905_v25  ;;  %17422 = vmatprep.subr.bf16.mxu1 %v18906_v26 }
 0xa66   :  { %v1926_v50 = vpop.f32.mrb[16].mxu0  ;;  %v1979_v46 = vpop.f32.mrb[32].mxu1 }
 0xa67   :  { %v1927_v36 = vadd.f32 %v1926_v50, %v1489_v38  ;;  %v1980_v55 = vadd.f32 %v1979_v46, %v1497_v47  ;;  %v1928_v52 = vpop.f32.mrb[17].mxu0  ;;  %v1981_v57 = vpop.f32.mrb[33].mxu1  ;;  %v18911_v46 = vld [vmem:[%s24564_s14 + $0x108] sm:$0xff]  }
 0xa68   :  { %v1929_v42 = vadd.f32 %v1928_v52, %v1493_v43  ;;  %v1982_v58 = vadd.f32 %v1981_v57, %v1501_v49  ;;  %v1930_v59 = vpop.f32.mrb[18].mxu0  ;;  %v1983_v54 = vpop.f32.mrb[34].mxu1 }
 0xa69   :  { %v2316_v56 = vmax.f32 %v1927_v36, 0.0  ;;  %v2318_v60 = vmax.f32 %v1980_v55, 0.0  ;;  %v1931_v48 = vadd.f32 %v1930_v59, %v1489_v38  ;;  %v1984_v61 = vadd.f32 %v1983_v54, %v1497_v47  ;;  %v1932_v35 = vpop.f32.mrb[19].mxu0  ;;  %v1985_v3 = vpop.f32.mrb[35].mxu1  ;;  %v18912_v36 = vld [vmem:[%s24564_s14 + $0x188] sm:$0xff]   ;;  %v18913_v54 = vld [vmem:[%s24564_s14 + $0x150] sm:$0xff]  }
 0xa6a   :  { %v2317_v44 = vmax.f32 %v1929_v42, 0.0  ;;  %v2319_v41 = vmax.f32 %v1982_v58, 0.0  ;;  %v1933_v51 = vadd.f32 %v1932_v35, %v1493_v43  ;;  %v1986_v45 = vadd.f32 %v1985_v3, %v1501_v49 }
 0xa6b   :  { %v2332_v1 = vmax.f32 %v1931_v48, 0.0  ;;  %v2334_v2 = vmax.f32 %v1984_v61, 0.0  ;;  %v20651_v3 = vrot.slane %v20615_v24, %v20601_v20 }
 0xa6c   :  { %v2333_v6 = vmax.f32 %v1933_v51, 0.0  ;;  %v2335_v62 = vmax.f32 %v1986_v45, 0.0  ;;  %v18915_v45 = vld [vmem:[%s24564_s14 + $0x110] sm:$0xff]  }
 0xa6d   :  { %v2380_v9 = vpack.c.bf16 %v2332_v1, %v2316_v56  ;;  %v2382_v10 = vpack.c.bf16 %v2334_v2, %v2318_v60  ;;  %v18914_v56 = vld [vmem:[%s24564_s14 + $0x1d0] sm:$0xff]  }
 0xa6e   :  { %v1936_v11 = vpop.f32.mrb[20].mxu0  ;;  %v1989_v53 = vpop.f32.mrb[36].mxu1  ;;  %v2381_v12 = vpack.c.bf16 %v2333_v6, %v2317_v44  ;;  %v2383_v13 = vpack.c.bf16 %v2335_v62, %v2319_v41  ;;  %v20655_v44 = vrot.slane %v20615_v24, %v20604_v34  ;;  %v18916_v1 = vld [vmem:[%s24564_s14 + $0x190] sm:$0xff]   ;;  %v18917_v62 = vld [vmem:[%s24564_s14 + $0x158] sm:$0xff]  }
 0xa6f   :  { %v1937_v15 = vadd.f32 %v1936_v11, %v1489_v38  ;;  %v1990_v16 = vadd.f32 %v1989_v53, %v1497_v47  ;;  %v1938_v4 = vpop.f32.mrb[21].mxu0  ;;  %v1991_v17 = vpop.f32.mrb[37].mxu1 }
 0xa70   :  { %v1939_v22 = vadd.f32 %v1938_v4, %v1493_v43  ;;  %v1992_v25 = vadd.f32 %v1991_v17, %v1501_v49  ;;  %v1940_v26 = vpop.f32.mrb[22].mxu0  ;;  %v1993_v50 = vpop.f32.mrb[38].mxu1  ;;  %3468 = vmatprep.mubr.bf16.mxu0 %v2381_v12  ;;  %3517 = vmatprep.mubr.bf16.mxu1 %v2383_v13  ;;  %v18919_v4 = vld [vmem:[%s24564_s14 + $0x118] sm:$0xff]  }
 0xa71   :  { %v2348_v55 = vmax.f32 %v1937_v15, 0.0  ;;  %v2350_v52 = vmax.f32 %v1990_v16, 0.0  ;;  %v1941_v57 = vadd.f32 %v1940_v26, %v1489_v38  ;;  %v1994_v42 = vadd.f32 %v1993_v50, %v1497_v47  ;;  %v1942_v58 = vpop.f32.mrb[23].mxu0  ;;  %v1995_v59 = vpop.f32.mrb[39].mxu1  ;;  %3469 = vmatmul.mubr.bf16.vlgmr.msra.gmra.mrb[48].mxu0 %v2380_v9  ;;  %3518 = vmatmul.mubr.bf16.vlgmr.msra.gmra.mrb[64].mxu1 %v2382_v10  ;;  %v18920_v17 = vld [vmem:[%s24564_s14 + $0x198] sm:$0xff]  }
 0xa72   :  { %v2349_v60 = vmax.f32 %v1939_v22, 0.0  ;;  %v2351_v48 = vmax.f32 %v1992_v25, 0.0  ;;  %v1943_v61 = vadd.f32 %v1942_v58, %v1493_v43  ;;  %v1996_v35 = vadd.f32 %v1995_v59, %v1501_v49  ;;  %17395 = vmatpush3.bf16.msra.mxu0 %v18907_v5  ;;  %17423 = vmatpush3.bf16.msra.mxu1 %v18908_v21  ;;  %v18918_v5 = vld [vmem:[%s24564_s14 + $0x1d8] sm:$0xff]  }
 0xa73   :  { %v2364_v38 = vmax.f32 %v1941_v57, 0.0  ;;  %v2366_v47 = vmax.f32 %v1994_v42, 0.0  ;;  %17396 = vmatprep.subr.bf16.mxu0 %v18909_v8  ;;  %17424 = vmatprep.subr.bf16.mxu1 %v18910_v0  ;;  %v20659_v43 = vrot.slane %v20615_v24, %v20607_v37  ;;  %v20663_v49 = vrot.slane %v20615_v24, %v20610_v40 }
 0xa74   :  { %v2365_v41 = vmax.f32 %v1943_v61, 0.0  ;;  %v2367_v51 = vmax.f32 %v1996_v35, 0.0  ;;  %v18923_v61 = vld [vmem:[%s24564_s14 + $0x120] sm:$0xff]  }
 0xa75   :  { %v2396_v2 = vpack.c.bf16 %v2364_v38, %v2348_v55  ;;  %v2398_v6 = vpack.c.bf16 %v2366_v47, %v2350_v52  ;;  %v18921_v55 = vld [vmem:[%s24564_s14 + $0x160] sm:$0xff]  }
 0xa76   :  { %17397 = vmatpush3.bf16.msra.mxu0 %v18911_v46  ;;  %17425 = vmatpush3.bf16.msra.mxu1 %v18912_v36  ;;  %v2032_v24 = vpop.f32.mrb[24].mxu0  ;;  %v2085_v21 = vpop.f32.mrb[40].mxu1  ;;  %v2397_v9 = vpack.c.bf16 %v2365_v41, %v2349_v60  ;;  %v2399_v10 = vpack.c.bf16 %v2367_v51, %v2351_v48  ;;  %v18922_v52 = vld [vmem:[%s24564_s14 + $0x1e0] sm:$0xff]   ;;  %v18925_v41 = vld [vmem:[%s24564_s14 + $0x168] sm:$0xff]  }
 0xa77   :  { %v2033_v8 = vadd.f32 %v2032_v24, %v20651_v3  ;;  %v2086_v0 = vadd.f32 %v2085_v21, %v20655_v44  ;;  %v2034_v11 = vpop.f32.mrb[25].mxu0  ;;  %v2087_v53 = vpop.f32.mrb[41].mxu1  ;;  %17398 = vmatprep.subr.bf16.mxu0 %v18913_v54  ;;  %17426 = vmatprep.subr.bf16.mxu1 %v18914_v56  ;;  %v18924_v35 = vld [vmem:[%s24564_s14 + $0x1a0] sm:$0xff]   ;;  %v18926_v51 = vld [vmem:[%s24564_s14 + $0x1e8] sm:$0xff]  }
 0xa78   :  { %v2035_v12 = vadd.f32 %v2034_v11, %v20659_v43  ;;  %v2088_v13 = vadd.f32 %v2087_v53, %v20663_v49  ;;  %v2036_v15 = vpop.f32.mrb[26].mxu0  ;;  %v2089_v16 = vpop.f32.mrb[42].mxu1  ;;  %3476 = vmatprep.mubr.bf16.mxu0 %v2397_v9  ;;  %3525 = vmatprep.mubr.bf16.mxu1 %v2399_v10  ;;  %v18927_v53 = vld [vmem:[%s24564_s14 + $0x128] sm:$0xff]  }
 0xa79   :  { %v2320_v22 = vmax.f32 %v2033_v8, 0.0  ;;  %v2322_v25 = vmax.f32 %v2086_v0, 0.0  ;;  %v2037_v26 = vadd.f32 %v2036_v15, %v20651_v3  ;;  %v2090_v50 = vadd.f32 %v2089_v16, %v20655_v44  ;;  %v2038_v46 = vpop.f32.mrb[27].mxu0  ;;  %v2091_v36 = vpop.f32.mrb[43].mxu1  ;;  %3477 = vmatmul.mubr.bf16.gmra.mrb[52].mxu0 %v2396_v2  ;;  %3526 = vmatmul.mubr.bf16.gmra.mrb[68].mxu1 %v2398_v6 }
 0xa7a   :  { %v2321_v57 = vmax.f32 %v2035_v12, 0.0  ;;  %v2323_v42 = vmax.f32 %v2088_v13, 0.0  ;;  %v2039_v58 = vadd.f32 %v2038_v46, %v20659_v43  ;;  %v2092_v59 = vadd.f32 %v2091_v36, %v20663_v49  ;;  %17399 = vmatpush3.bf16.msra.mxu0 %v18915_v45  ;;  %17427 = vmatpush3.bf16.msra.mxu1 %v18916_v1  ;;  %v18928_v12 = vld [vmem:[%s24564_s14 + $0x1a8] sm:$0xff]  }
 0xa7b   :  { %v2336_v54 = vmax.f32 %v2037_v26, 0.0  ;;  %v2338_v56 = vmax.f32 %v2090_v50, 0.0  ;;  %17400 = vmatprep.subr.bf16.mxu0 %v18917_v62  ;;  %17428 = vmatprep.subr.bf16.mxu1 %v18918_v5  ;;  %v20716_v62 = vld [vmem:[%s24567_s13 + $0x8] sm:$0xff]  ;;  %v18930_v26 = vld [vmem:[%s24564_s14 + $0x1f0] sm:$0xff]  }
 0xa7c   :  { %v2337_v60 = vmax.f32 %v2039_v58, 0.0  ;;  %v2339_v48 = vmax.f32 %v2092_v59, 0.0  ;;  %v18931_v59 = vld [vmem:[%s24564_s14 + $0x130] sm:$0xff]  }
 0xa7d   :  { %v20703_v38 = vpack.c.bf16 %v2336_v54, %v2320_v22  ;;  %v20705_v47 = vpack.c.bf16 %v2338_v56, %v2322_v25  ;;  %v18929_v25 = vld [vmem:[%s24564_s14 + $0x170] sm:$0xff]   ;;  %v18933_v56 = vld [vmem:[%s24564_s14 + $0x178] sm:$0xff]  }
 0xa7e   :  { %17401 = vmatpush3.bf16.msra.mxu0 %v18919_v4  ;;  %17429 = vmatpush3.bf16.msra.mxu1 %v18920_v17  ;;  %v2042_v45 = vpop.f32.mrb[28].mxu0  ;;  %v2095_v1 = vpop.f32.mrb[44].mxu1  ;;  %v2385_v2 = vpack.c.bf16 %v2337_v60, %v2321_v57  ;;  %v2387_v6 = vpack.c.bf16 %v2339_v48, %v2323_v42  ;;  %v20744_v57 = vrot.slane %v20716_v62, %v20595_v29  ;;  %v18932_v54 = vld [vmem:[%s24564_s14 + $0x1b0] sm:$0xff]   ;;  %v18934_v60 = vld [vmem:[%s24564_s14 + $0x1f8] sm:$0xff]  }
 0xa7f   :  { %v2043_v5 = vadd.f32 %v2042_v45, %v20651_v3  ;;  %v2096_v24 = vadd.f32 %v2095_v1, %v20655_v44  ;;  %v2044_v21 = vpop.f32.mrb[29].mxu0  ;;  %v2097_v9 = vpop.f32.mrb[45].mxu1  ;;  %17402 = vmatprep.subr.bf16.mxu0 %v18921_v55  ;;  %17430 = vmatprep.subr.bf16.mxu1 %v18922_v52  ;;  %v20740_v52 = vrot.slane %v20716_v62, %v19936_v28 }
 0xa80   :  { %v2045_v10 = vadd.f32 %v2044_v21, %v20659_v43  ;;  %v2098_v8 = vadd.f32 %v2097_v9, %v20663_v49  ;;  %v2046_v0 = vpop.f32.mrb[30].mxu0  ;;  %v2099_v11 = vpop.f32.mrb[46].mxu1  ;;  %3566 = vmatprep.mubr.bf16.mxu0 %v2385_v2  ;;  %3615 = vmatprep.mubr.bf16.mxu1 %v2387_v6 }
 0xa81   :  { %v2352_v13 = vmax.f32 %v2043_v5, 0.0  ;;  %v2354_v15 = vmax.f32 %v2096_v24, 0.0  ;;  %v2047_v16 = vadd.f32 %v2046_v0, %v20651_v3  ;;  %v2100_v4 = vadd.f32 %v2099_v11, %v20655_v44  ;;  %v2048_v17 = vpop.f32.mrb[31].mxu0  ;;  %v2101_v22 = vpop.f32.mrb[47].mxu1  ;;  %v18936_v0 = vld [vmem:[%s24564_s14 + $0x1b8] sm:$0xff]  }
 0xa82   :  { %v2353_v50 = vmax.f32 %v2045_v10, 0.0  ;;  %v2355_v46 = vmax.f32 %v2098_v8, 0.0  ;;  %v2049_v36 = vadd.f32 %v2048_v17, %v20659_v43  ;;  %v2102_v55 = vadd.f32 %v2101_v22, %v20663_v49  ;;  %17403 = vmatpush3.bf16.msra.mxu0 %v18923_v61  ;;  %17431 = vmatpush3.bf16.msra.mxu1 %v18924_v35  ;;  %v18935_v8 = vld [vmem:[%s24564_s14 + $0x138] sm:$0xff]   ;;  %v18938_v17 = vld [vmem:[%s24564_s14 + $0x2c0] sm:$0xff]  }
 0xa83   :  { %v2368_v3 = vmax.f32 %v2047_v16, 0.0  ;;  %v2370_v44 = vmax.f32 %v2100_v4, 0.0  ;;  %17404 = vmatprep.subr.bf16.mxu0 %v18925_v41  ;;  %17432 = vmatprep.subr.bf16.mxu1 %v18926_v51  ;;  %v20748_v43 = vrot.slane %v20716_v62, %v19942_v30  ;;  %v20752_v49 = vrot.slane %v20716_v62, %v20598_v33  ;;  %v18937_v4 = vld [vmem:[%s24564_s14 + $0x240] sm:$0xff]  }
 0xa84   :  { %v2369_v42 = vmax.f32 %v2049_v36, 0.0  ;;  %v2371_v58 = vmax.f32 %v2102_v55, 0.0 }
 0xa85   :  { %v20766_v48 = vpack.c.bf16 %v2368_v3, %v2352_v13  ;;  %v20768_v61 = vpack.c.bf16 %v2370_v44, %v2354_v15 }
 0xa86   :  { %17405 = vmatpush3.bf16.msra.mxu0 %v18927_v53  ;;  %17433 = vmatpush3.bf16.msra.mxu1 %v18928_v12  ;;  %v2138_v35 = vpop.f32.mrb[32].mxu0  ;;  %v2191_v41 = vpop.f32.mrb[48].mxu1  ;;  %v20770_v51 = vpack.c.bf16 %v2369_v42, %v2353_v50  ;;  %v20772_v45 = vpack.c.bf16 %v2371_v58, %v2355_v46  ;;  %v18939_v58 = vld [vmem:[%s24564_s14 + $0x200] sm:$0xff]  }
 0xa87   :  { %v2139_v1 = vadd.f32 %v2138_v35, %v20740_v52  ;;  %v2192_v2 = vadd.f32 %v2191_v41, %v20744_v57  ;;  %v2140_v6 = vpop.f32.mrb[33].mxu0  ;;  %v2193_v5 = vpop.f32.mrb[49].mxu1  ;;  %17406 = vmatprep.subr.bf16.mxu0 %v18929_v25  ;;  %17434 = vmatprep.subr.bf16.mxu1 %v18930_v26  ;;  %v18940_v35 = vld [vmem:[%s24564_s14 + $0x280] sm:$0xff]  }
 0xa88   :  { %v2141_v24 = vadd.f32 %v2140_v6, %v20748_v43  ;;  %v2194_v21 = vadd.f32 %v2193_v5, %v20752_v49  ;;  %v2142_v9 = vpop.f32.mrb[34].mxu0  ;;  %v2195_v10 = vpop.f32.mrb[50].mxu1 }
 0xa89   :  { %v2324_v11 = vmax.f32 %v2139_v1, 0.0  ;;  %v2326_v53 = vmax.f32 %v2192_v2, 0.0  ;;  %v2143_v12 = vadd.f32 %v2142_v9, %v20740_v52  ;;  %v2196_v13 = vadd.f32 %v2195_v10, %v20744_v57  ;;  %v2144_v15 = vpop.f32.mrb[35].mxu0  ;;  %v2197_v16 = vpop.f32.mrb[51].mxu1 }
 0xa8a   :  { %v2325_v22 = vmax.f32 %v2141_v24, 0.0  ;;  %v2327_v25 = vmax.f32 %v2194_v21, 0.0  ;;  %v2145_v26 = vadd.f32 %v2144_v15, %v20748_v43  ;;  %v2198_v50 = vadd.f32 %v2197_v16, %v20752_v49  ;;  %17407 = vmatpush3.bf16.msra.mxu0 %v18931_v59  ;;  %17435 = vmatpush3.bf16.msra.mxu1 %v18932_v54  ;;  %v18943_v16 = vld [vmem:[%s24564_s14 + $0x208] sm:$0xff]  }
 0xa8b   :  { %v2340_v46 = vmax.f32 %v2143_v12, 0.0  ;;  %v2342_v36 = vmax.f32 %v2196_v13, 0.0  ;;  %17408 = vmatprep.subr.bf16.mxu0 %v18933_v56  ;;  %17436 = vmatprep.subr.bf16.mxu1 %v18934_v60  ;;  %v18941_v56 = vld [vmem:[%s24564_s14 + $0x248] sm:$0xff]  }
 0xa8c   :  { %v2341_v55 = vmax.f32 %v2145_v26, 0.0  ;;  %v2343_v3 = vmax.f32 %v2198_v50, 0.0  ;;  %v18942_v60 = vld [vmem:[%s24564_s14 + $0x2c8] sm:$0xff]   ;;  %v20848_v50 = vrot.slane %v20716_v62, %v20607_v37 }
 0xa8d   :  { %v20794_v44 = vpack.c.bf16 %v2340_v46, %v2324_v11  ;;  %v20796_v42 = vpack.c.bf16 %v2342_v36, %v2326_v53  ;;  %v20852_v46 = vrot.slane %v20716_v62, %v20610_v40  ;;  %v18947_v36 = vld [vmem:[%s24564_s14 + $0x210] sm:$0xff]  }
 0xa8e   :  { %17409 = vmatpush3.bf16.msra.mxu0 %v18935_v8  ;;  %17437 = vmatpush3.bf16.msra.mxu1 %v18936_v0  ;;  %v2148_v59 = vpop.f32.mrb[36].mxu0  ;;  %v2201_v54 = vpop.f32.mrb[52].mxu1  ;;  %v20810_v41 = vpack.c.bf16 %v2341_v55, %v2325_v22  ;;  %v20812_v1 = vpack.c.bf16 %v2343_v3, %v2327_v25  ;;  %v18948_v55 = vld [vmem:[%s24564_s14 + $0x290] sm:$0xff]  }
 0xa8f   :  { %v2149_v2 = vadd.f32 %v2148_v59, %v20740_v52  ;;  %v2202_v6 = vadd.f32 %v2201_v54, %v20744_v57  ;;  %v2150_v5 = vpop.f32.mrb[37].mxu0  ;;  %v2203_v24 = vpop.f32.mrb[53].mxu1  ;;  %17450 = vmatprep.subr.bf16.mxu0 %v18937_v4  ;;  %17478 = vmatprep.subr.bf16.mxu1 %v18938_v17  ;;  %v18944_v4 = vld [vmem:[%s24564_s14 + $0x288] sm:$0xff]   ;;  %v18949_v54 = vld [vmem:[%s24564_s14 + $0x258] sm:$0xff]  }
 0xa90   :  { %v2151_v21 = vadd.f32 %v2150_v5, %v20748_v43  ;;  %v2204_v9 = vadd.f32 %v2203_v24, %v20752_v49  ;;  %v2152_v10 = vpop.f32.mrb[38].mxu0  ;;  %v2205_v8 = vpop.f32.mrb[54].mxu1 }
 0xa91   :  { %v2356_v0 = vmax.f32 %v2149_v2, 0.0  ;;  %v2358_v11 = vmax.f32 %v2202_v6, 0.0  ;;  %v2153_v53 = vadd.f32 %v2152_v10, %v20740_v52  ;;  %v2206_v12 = vadd.f32 %v2205_v8, %v20744_v57  ;;  %3567 = vmatmul.mubr.bf16.vlgmr.msra.gmra.mrb[56].mxu0 %v20703_v38  ;;  %3616 = vmatmul.mubr.bf16.vlgmr.msra.gmra.mrb[72].mxu1 %v20705_v47  ;;  %v2154_v13 = vpop.f32.mrb[39].mxu0  ;;  %v2207_v15 = vpop.f32.mrb[55].mxu1  ;;  %v18945_v38 = vld [vmem:[%s24564_s14 + $0x250] sm:$0xff]  }
 0xa92   :  { %v2357_v17 = vmax.f32 %v2151_v21, 0.0  ;;  %v2359_v22 = vmax.f32 %v2204_v9, 0.0  ;;  %v2155_v52 = vadd.f32 %v2154_v13, %v20748_v43  ;;  %v2208_v57 = vadd.f32 %v2207_v15, %v20752_v49  ;;  %3574 = vmatprep.mubr.bf16.mxu0 %v20770_v51  ;;  %3623 = vmatprep.mubr.bf16.mxu1 %v20772_v45  ;;  %v18946_v47 = vld [vmem:[%s24564_s14 + $0x2d0] sm:$0xff]  }
 0xa93   :  { %v2372_v25 = vmax.f32 %v2153_v53, 0.0  ;;  %v2374_v26 = vmax.f32 %v2206_v12, 0.0  ;;  %17451 = vmatpush3.bf16.msra.mxu0 %v18939_v58  ;;  %17479 = vmatpush3.bf16.msra.mxu1 %v18940_v35  ;;  %v20840_v43 = vrot.slane %v20716_v62, %v20601_v20  ;;  %v20844_v49 = vrot.slane %v20716_v62, %v20604_v34  ;;  %v18950_v62 = vld [vmem:[%s24564_s14 + $0x2d8] sm:$0xff]  }
 0xa94   :  { %v2373_v51 = vmax.f32 %v2155_v52, 0.0  ;;  %v2375_v45 = vmax.f32 %v2208_v57, 0.0  ;;  %17452 = vmatprep.subr.bf16.mxu0 %v18941_v56  ;;  %17480 = vmatprep.subr.bf16.mxu1 %v18942_v60 }
 0xa95   :  { %v20860_v3 = vpack.c.bf16 %v2372_v25, %v2356_v0  ;;  %v20862_v58 = vpack.c.bf16 %v2374_v26, %v2358_v11 }
 0xa96   :  { %v2244_v35 = vpop.f32.mrb[40].mxu0  ;;  %v2297_v59 = vpop.f32.mrb[56].mxu1  ;;  %v20870_v56 = vpack.c.bf16 %v2373_v51, %v2357_v17  ;;  %v20872_v60 = vpack.c.bf16 %v2375_v45, %v2359_v22  ;;  %v18956_v45 = vld [vmem:[%s24564_s14 + $0x2a0] sm:$0xff]  }
 0xa97   :  { %17453 = vmatpush3.bf16.msra.mxu0 %v18943_v16  ;;  %17481 = vmatpush3.bf16.msra.mxu1 %v18944_v4  ;;  %v2245_v2 = vadd.f32 %v2244_v35, %v20840_v43  ;;  %v2298_v6 = vadd.f32 %v2297_v59, %v20844_v49  ;;  %v2246_v5 = vpop.f32.mrb[41].mxu0  ;;  %v2299_v24 = vpop.f32.mrb[57].mxu1  ;;  %v18951_v16 = vld [vmem:[%s24564_s14 + $0x218] sm:$0xff]  }
 0xa98   :  { %v2247_v21 = vadd.f32 %v2246_v5, %v20848_v50  ;;  %v2300_v9 = vadd.f32 %v2299_v24, %v20852_v46  ;;  %v2248_v10 = vpop.f32.mrb[42].mxu0  ;;  %v2301_v8 = vpop.f32.mrb[58].mxu1  ;;  %17454 = vmatprep.subr.bf16.mxu0 %v18945_v38  ;;  %17482 = vmatprep.subr.bf16.mxu1 %v18946_v47  ;;  %v18952_v4 = vld [vmem:[%s24564_s14 + $0x298] sm:$0xff]  }
 0xa99   :  { %v2328_v0 = vmax.f32 %v2245_v2, 0.0  ;;  %v2330_v11 = vmax.f32 %v2298_v6, 0.0  ;;  %v2249_v53 = vadd.f32 %v2248_v10, %v20840_v43  ;;  %v2302_v12 = vadd.f32 %v2301_v8, %v20844_v49  ;;  %3575 = vmatmul.mubr.bf16.gmra.mrb[60].mxu0 %v20766_v48  ;;  %3624 = vmatmul.mubr.bf16.gmra.mrb[76].mxu1 %v20768_v61  ;;  %v2250_v13 = vpop.f32.mrb[43].mxu0  ;;  %v2303_v15 = vpop.f32.mrb[59].mxu1  ;;  %v18953_v48 = vld [vmem:[%s24564_s14 + $0x260] sm:$0xff]  }
 0xa9a   :  { %v2329_v17 = vmax.f32 %v2247_v21, 0.0  ;;  %v2331_v22 = vmax.f32 %v2300_v9, 0.0  ;;  %v2251_v52 = vadd.f32 %v2250_v13, %v20848_v50  ;;  %v2304_v57 = vadd.f32 %v2303_v15, %v20852_v46  ;;  %3664 = vmatprep.mubr.bf16.mxu0 %v20810_v41  ;;  %3713 = vmatprep.mubr.bf16.mxu1 %v20812_v1  ;;  %v18954_v61 = vld [vmem:[%s24564_s14 + $0x2e0] sm:$0xff]  }
 0xa9b   :  { %v2344_v38 = vmax.f32 %v2249_v53, 0.0  ;;  %v2346_v47 = vmax.f32 %v2302_v12, 0.0  ;;  %17455 = vmatpush3.bf16.msra.mxu0 %v18947_v36  ;;  %17483 = vmatpush3.bf16.msra.mxu1 %v18948_v55  ;;  %v18955_v1 = vld [vmem:[%s24564_s14 + $0x220] sm:$0xff]   ;;  %v18957_v36 = vld [vmem:[%s24564_s14 + $0x268] sm:$0xff]  }
 0xa9c   :  { %v2345_v25 = vmax.f32 %v2251_v52, 0.0  ;;  %v2347_v26 = vmax.f32 %v2304_v57, 0.0  ;;  %17456 = vmatprep.subr.bf16.mxu0 %v18949_v54  ;;  %17484 = vmatprep.subr.bf16.mxu1 %v18950_v62  ;;  %v18958_v55 = vld [vmem:[%s24564_s14 + $0x2e8] sm:$0xff]  }
 0xa9d   :  { %v20898_v51 = vpack.c.bf16 %v2344_v38, %v2328_v0  ;;  %v20900_v41 = vpack.c.bf16 %v2346_v47, %v2330_v11 }
 0xa9e   :  { %v2254_v35 = vpop.f32.mrb[44].mxu0  ;;  %v2307_v59 = vpop.f32.mrb[60].mxu1  ;;  %v20914_v54 = vpack.c.bf16 %v2345_v25, %v2329_v17  ;;  %v20916_v62 = vpack.c.bf16 %v2347_v26, %v2331_v22 }
 0xa9f   :  { %17457 = vmatpush3.bf16.msra.mxu0 %v18951_v16  ;;  %17485 = vmatpush3.bf16.msra.mxu1 %v18952_v4  ;;  %v2255_v2 = vadd.f32 %v2254_v35, %v20840_v43  ;;  %v2308_v6 = vadd.f32 %v2307_v59, %v20844_v49  ;;  %v2256_v5 = vpop.f32.mrb[45].mxu0  ;;  %v2309_v24 = vpop.f32.mrb[61].mxu1  ;;  %v18959_v16 = vld [vmem:[%s24564_s14 + $0x228] sm:$0xff]  }
 0xaa0   :  { %v2257_v21 = vadd.f32 %v2256_v5, %v20848_v50  ;;  %v2310_v9 = vadd.f32 %v2309_v24, %v20852_v46  ;;  %v2258_v10 = vpop.f32.mrb[46].mxu0  ;;  %v2311_v8 = vpop.f32.mrb[62].mxu1  ;;  %17458 = vmatprep.subr.bf16.mxu0 %v18953_v48  ;;  %17486 = vmatprep.subr.bf16.mxu1 %v18954_v61  ;;  %v18960_v4 = vld [vmem:[%s24564_s14 + $0x2a8] sm:$0xff]   ;;  %v18971_v5 = vld [vmem:[%s24564_s14 + $0x300] sm:$0xff]  }
 0xaa1   :  { %v2360_v0 = vmax.f32 %v2255_v2, 0.0  ;;  %v2362_v11 = vmax.f32 %v2308_v6, 0.0  ;;  %v2259_v53 = vadd.f32 %v2258_v10, %v20840_v43  ;;  %v2312_v12 = vadd.f32 %v2311_v8, %v20844_v49  ;;  %v2260_v13 = vpop.f32.mrb[47].mxu0  ;;  %v2313_v15 = vpop.f32.mrb[63].mxu1  ;;  %v18961_v43 = vld [vmem:[%s24564_s14 + $0x270] sm:$0xff]   ;;  %v18969_v2 = vld [vmem:[%s24564_s14 + $0x340] sm:$0xff]  }
 0xaa2   :  { %v2361_v17 = vmax.f32 %v2257_v21, 0.0  ;;  %v2363_v22 = vmax.f32 %v2310_v9, 0.0  ;;  %v2261_v52 = vadd.f32 %v2260_v13, %v20848_v50  ;;  %v2314_v57 = vadd.f32 %v2313_v15, %v20852_v46  ;;  %v18962_v49 = vld [vmem:[%s24564_s14 + $0x2f0] sm:$0xff]   ;;  %v18970_v6 = vld [vmem:[%s24564_s14 + $0x3c0] sm:$0xff]   ;;  %v18973_v21 = vld [vmem:[%s24564_s14 + $0x348] sm:$0xff]  }
 0xaa3   :  { %v2376_v48 = vmax.f32 %v2259_v53, 0.0  ;;  %v2378_v61 = vmax.f32 %v2312_v12, 0.0  ;;  %17459 = vmatpush3.bf16.msra.mxu0 %v18955_v1  ;;  %17487 = vmatpush3.bf16.msra.mxu1 %v18956_v45  ;;  %v18963_v50 = vld [vmem:[%s24564_s14 + $0x230] sm:$0xff]   ;;  %v18965_v1 = vld [vmem:[%s24564_s14 + $0x278] sm:$0xff]   ;;  %v18972_v24 = vld [vmem:[%s24564_s14 + $0x380] sm:$0xff]  }
 0xaa4   :  { %v2377_v38 = vmax.f32 %v2261_v52, 0.0  ;;  %v2379_v47 = vmax.f32 %v2314_v57, 0.0  ;;  %17460 = vmatprep.subr.bf16.mxu0 %v18957_v36  ;;  %17488 = vmatprep.subr.bf16.mxu1 %v18958_v55  ;;  %v18964_v46 = vld [vmem:[%s24564_s14 + $0x2b0] sm:$0xff]   ;;  %v18966_v45 = vld [vmem:[%s24564_s14 + $0x2f8] sm:$0xff]   ;;  %v18974_v9 = vld [vmem:[%s24564_s14 + $0x3c8] sm:$0xff]  }
 0xaa5   :  { %v20944_v25 = vpack.c.bf16 %v2376_v48, %v2360_v0  ;;  %v20946_v26 = vpack.c.bf16 %v2378_v61, %v2362_v11  ;;  %v18967_v36 = vld [vmem:[%s24564_s14 + $0x238] sm:$0xff]   ;;  %v18975_v10 = vld [vmem:[%s24564_s14 + $0x308] sm:$0xff]   ;;  %v18977_v0 = vld [vmem:[%s24564_s14 + $0x350] sm:$0xff]  }
 0xaa6   :  { %v20954_v35 = vpack.c.bf16 %v2377_v38, %v2361_v17  ;;  %v20956_v59 = vpack.c.bf16 %v2379_v47, %v2363_v22  ;;  %v18968_v55 = vld [vmem:[%s24564_s14 + $0x2b8] sm:$0xff]   ;;  %v18976_v8 = vld [vmem:[%s24564_s14 + $0x388] sm:$0xff]   ;;  %v18985_v13 = vld [vmem:[%s24564_s14 + $0x360] sm:$0xff]  }
 0xaa7   :  { %17461 = vmatpush3.bf16.msra.mxu0 %v18959_v16  ;;  %17489 = vmatpush3.bf16.msra.mxu1 %v18960_v4  ;;  %v18982_v11 = vld [vmem:[%s24564_s14 + $0x3d8] sm:$0xff]   ;;  %v18990_v15 = vld [vmem:[%s24564_s14 + $0x3e8] sm:$0xff]   ;;  %v18993_v17 = vld [vmem:[%s24564_s14 + $0x370] sm:$0xff]  }
 0xaa8   :  { %17462 = vmatprep.subr.bf16.mxu0 %v18961_v43  ;;  %17490 = vmatprep.subr.bf16.mxu1 %v18962_v49  ;;  %v18983_v53 = vld [vmem:[%s24564_s14 + $0x318] sm:$0xff]   ;;  %v18991_v16 = vld [vmem:[%s24564_s14 + $0x328] sm:$0xff]   ;;  %v18994_v22 = vld [vmem:[%s24564_s14 + $0x3f0] sm:$0xff]  }
 0xaa9   :  { %v18984_v12 = vld [vmem:[%s24564_s14 + $0x398] sm:$0xff]   ;;  %v18992_v4 = vld [vmem:[%s24564_s14 + $0x3a8] sm:$0xff]   ;;  %v18995_v52 = vld [vmem:[%s24564_s14 + $0x330] sm:$0xff]  }
 0xaaa   :  { %v18996_v57 = vld [vmem:[%s24564_s14 + $0x3b0] sm:$0xff]   ;;  %v18997_v43 = vld [vmem:[%s24564_s14 + $0x378] sm:$0xff]  }
 0xaab   :  { %17463 = vmatpush3.bf16.msra.mxu0 %v18963_v50  ;;  %17491 = vmatpush3.bf16.msra.mxu1 %v18964_v46  ;;  %v18998_v49 = vld [vmem:[%s24564_s14 + $0x3f8] sm:$0xff]  }
 0xaac   :  { %17464 = vmatprep.subr.bf16.mxu0 %v18965_v1  ;;  %17492 = vmatprep.subr.bf16.mxu1 %v18966_v45  ;;  %v18999_v48 = vld [vmem:[%s24564_s14 + $0x338] sm:$0xff]  }
 0xaad   :  { %v19000_v61 = vld [vmem:[%s24564_s14 + $0x3b8] sm:$0xff]  }
 0xaaf   :  { %17465 = vmatpush3.bf16.msra.mxu0 %v18967_v36  ;;  %17493 = vmatpush3.bf16.msra.mxu1 %v18968_v55 }
 0xab0   :  { %17506 = vmatprep.subr.bf16.mxu0 %v18969_v2  ;;  %17534 = vmatprep.subr.bf16.mxu1 %v18970_v6 }
 0xab2   :  { %3665 = vmatmul.mubr.bf16.vlgmr.msra.gmra.mrb[64].mxu0 %v20794_v44  ;;  %3714 = vmatmul.mubr.bf16.vlgmr.msra.gmra.mrb[80].mxu1 %v20796_v42  ;;  %v18978_v44 = vld [vmem:[%s24564_s14 + $0x3d0] sm:$0xff]  }
 0xab3   :  { %3672 = vmatprep.mubr.bf16.mxu0 %v20870_v56  ;;  %3721 = vmatprep.mubr.bf16.mxu1 %v20872_v60  ;;  %v18979_v42 = vld [vmem:[%s24564_s14 + $0x310] sm:$0xff]   ;;  %v18981_v60 = vld [vmem:[%s24564_s14 + $0x358] sm:$0xff]  }
 0xab4   :  { %17507 = vmatpush3.bf16.msra.mxu0 %v18971_v5  ;;  %17535 = vmatpush3.bf16.msra.mxu1 %v18972_v24  ;;  %v18980_v56 = vld [vmem:[%s24564_s14 + $0x390] sm:$0xff]  }
 0xab5   :  { %17508 = vmatprep.subr.bf16.mxu0 %v18973_v21  ;;  %17536 = vmatprep.subr.bf16.mxu1 %v18974_v9 }
 0xab8   :  { %17509 = vmatpush3.bf16.msra.mxu0 %v18975_v10  ;;  %17537 = vmatpush3.bf16.msra.mxu1 %v18976_v8 }
 0xab9   :  { %17510 = vmatprep.subr.bf16.mxu0 %v18977_v0  ;;  %17538 = vmatprep.subr.bf16.mxu1 %v18978_v44 }
 0xaba   :  { %3673 = vmatmul.mubr.bf16.gmra.mrb[68].mxu0 %v20860_v3  ;;  %3722 = vmatmul.mubr.bf16.gmra.mrb[84].mxu1 %v20862_v58  ;;  %v18986_v3 = vld [vmem:[%s24564_s14 + $0x3e0] sm:$0xff]  }
 0xabb   :  { %3762 = vmatprep.mubr.bf16.mxu0 %v20914_v54  ;;  %3811 = vmatprep.mubr.bf16.mxu1 %v20916_v62  ;;  %v18987_v58 = vld [vmem:[%s24564_s14 + $0x320] sm:$0xff]   ;;  %v18989_v62 = vld [vmem:[%s24564_s14 + $0x368] sm:$0xff]  }
 0xabc   :  { %17511 = vmatpush3.bf16.msra.mxu0 %v18979_v42  ;;  %17539 = vmatpush3.bf16.msra.mxu1 %v18980_v56  ;;  %v18988_v54 = vld [vmem:[%s24564_s14 + $0x3a0] sm:$0xff]  }
 0xabd   :  { %17512 = vmatprep.subr.bf16.mxu0 %v18981_v60  ;;  %17540 = vmatprep.subr.bf16.mxu1 %v18982_v11 }
 0xac0   :  { %17513 = vmatpush3.bf16.msra.mxu0 %v18983_v53  ;;  %17541 = vmatpush3.bf16.msra.mxu1 %v18984_v12 }
 0xac1   :  { %17514 = vmatprep.subr.bf16.mxu0 %v18985_v13  ;;  %17542 = vmatprep.subr.bf16.mxu1 %v18986_v3 }
 0xac4   :  { %17515 = vmatpush3.bf16.msra.mxu0 %v18987_v58  ;;  %17543 = vmatpush3.bf16.msra.mxu1 %v18988_v54 }
 0xac5   :  { %17516 = vmatprep.subr.bf16.mxu0 %v18989_v62  ;;  %17544 = vmatprep.subr.bf16.mxu1 %v18990_v15 }
 0xac8   :  { %17517 = vmatpush3.bf16.msra.mxu0 %v18991_v16  ;;  %17545 = vmatpush3.bf16.msra.mxu1 %v18992_v4 }
 0xac9   :  { %17518 = vmatprep.subr.bf16.mxu0 %v18993_v17  ;;  %17546 = vmatprep.subr.bf16.mxu1 %v18994_v22 }
 0xacc   :  { %17519 = vmatpush3.bf16.msra.mxu0 %v18995_v52  ;;  %17547 = vmatpush3.bf16.msra.mxu1 %v18996_v57 }
 0xacd   :  { %17520 = vmatprep.subr.bf16.mxu0 %v18997_v43  ;;  %17548 = vmatprep.subr.bf16.mxu1 %v18998_v49 }
 0xad0   :  { %17521 = vmatpush3.bf16.msra.mxu0 %v18999_v48  ;;  %17549 = vmatpush3.bf16.msra.mxu1 %v19000_v61 }
 0xad3   :  { %3763 = vmatmul.mubr.bf16.vlgmr.msra.gmra.mrb[72].mxu0 %v20898_v51  ;;  %3812 = vmatmul.mubr.bf16.vlgmr.msra.gmra.mrb[88].mxu1 %v20900_v41 }
 0xad4   :  { %3770 = vmatprep.mubr.bf16.mxu0 %v20954_v35  ;;  %3819 = vmatprep.mubr.bf16.mxu1 %v20956_v59 }
 0xadb   :  { %3771 = vmatmul.mubr.bf16.gmra.mrb[76].mxu0 %v20944_v25  ;;  %3820 = vmatmul.mubr.bf16.gmra.mrb[92].mxu1 %v20946_v26 }
 0xadc   :  { %4019 = vmatprep.mubr.bf16.mxu0 %v19757_v14 }
 0xb44   :  { %v17354_v38 = vpop.f32.mrb[48].mxu0  ;;  %v17382_v47 = vpop.f32.mrb[64].mxu1 }
 0xb45   :  { %v17355_v50 = vpop.f32.mrb[49].mxu0  ;;  %v17383_v46 = vpop.f32.mrb[65].mxu1 }
 0xb46   :  { %v17356_v1 = vadd.f32 %v17355_v50, %v17354_v38  ;;  %v17384_v45 = vadd.f32 %v17383_v46, %v17382_v47  ;;  %v17357_v36 = vpop.f32.mrb[50].mxu0  ;;  %v17385_v51 = vpop.f32.mrb[66].mxu1 }
 0xb47   :  { %v17358_v55 = vpop.f32.mrb[51].mxu0  ;;  %v17386_v41 = vpop.f32.mrb[67].mxu1 }
 0xb48   :  { %v3520_v2 = vadd.f32 %v17384_v45, %v17356_v1  ;;  %v17359_v35 = vadd.f32 %v17358_v55, %v17357_v36  ;;  %v17387_v6 = vadd.f32 %v17386_v41, %v17385_v51 }
 0xb4a   :  { %v3523_v59 = vadd.f32 %v17387_v6, %v17359_v35 }
 0xb4c   :  { %v17360_v5 = vpop.f32.mrb[52].mxu0  ;;  %v17388_v25 = vpop.f32.mrb[68].mxu1 }
 0xb4d   :  { %v17361_v24 = vpop.f32.mrb[53].mxu0  ;;  %v17389_v26 = vpop.f32.mrb[69].mxu1 }
 0xb4e   :  { %v17362_v21 = vadd.f32 %v17361_v24, %v17360_v5  ;;  %v17390_v9 = vadd.f32 %v17389_v26, %v17388_v25  ;;  %v17363_v10 = vpop.f32.mrb[54].mxu0  ;;  %v17391_v8 = vpop.f32.mrb[70].mxu1 }
 0xb4f   :  { %v17364_v0 = vpop.f32.mrb[55].mxu0  ;;  %v17392_v44 = vpop.f32.mrb[71].mxu1 }
 0xb50   :  { %v3528_v42 = vadd.f32 %v17390_v9, %v17362_v21  ;;  %v17365_v56 = vadd.f32 %v17364_v0, %v17363_v10  ;;  %v17393_v60 = vadd.f32 %v17392_v44, %v17391_v8 }
 0xb52   :  { %v3531_v11 = vadd.f32 %v17393_v60, %v17365_v56 }
 0xb64   :  { %v17410_v53 = vpop.f32.mrb[56].mxu0  ;;  %v17438_v12 = vpop.f32.mrb[72].mxu1 }
 0xb65   :  { %v17411_v13 = vpop.f32.mrb[57].mxu0  ;;  %v17439_v3 = vpop.f32.mrb[73].mxu1 }
 0xb66   :  { %v17412_v58 = vadd.f32 %v17411_v13, %v17410_v53  ;;  %v17440_v54 = vadd.f32 %v17439_v3, %v17438_v12  ;;  %v17413_v62 = vpop.f32.mrb[58].mxu0  ;;  %v17441_v15 = vpop.f32.mrb[74].mxu1 }
 0xb67   :  { %v17414_v16 = vpop.f32.mrb[59].mxu0  ;;  %v17442_v4 = vpop.f32.mrb[75].mxu1 }
 0xb68   :  { %v3569_v17 = vadd.f32 %v17412_v58, %v3520_v2  ;;  %v17415_v22 = vadd.f32 %v17414_v16, %v17413_v62  ;;  %v17443_v52 = vadd.f32 %v17442_v4, %v17441_v15 }
 0xb6a   :  { %v3618_v57 = vadd.f32 %v17440_v54, %v3569_v17  ;;  %v3572_v43 = vadd.f32 %v17415_v22, %v3523_v59 }
 0xb6c   :  { %v3621_v49 = vadd.f32 %v17443_v52, %v3572_v43  ;;  %v17416_v48 = vpop.f32.mrb[60].mxu0  ;;  %v17444_v61 = vpop.f32.mrb[76].mxu1 }
 0xb6d   :  { %v17417_v38 = vpop.f32.mrb[61].mxu0  ;;  %v17445_v47 = vpop.f32.mrb[77].mxu1 }
 0xb6e   :  { %v17418_v50 = vadd.f32 %v17417_v38, %v17416_v48  ;;  %v17446_v46 = vadd.f32 %v17445_v47, %v17444_v61  ;;  %v17419_v1 = vpop.f32.mrb[62].mxu0  ;;  %v17447_v45 = vpop.f32.mrb[78].mxu1 }
 0xb6f   :  { %v17420_v36 = vpop.f32.mrb[63].mxu0  ;;  %v17448_v51 = vpop.f32.mrb[79].mxu1 }
 0xb70   :  { %v3577_v55 = vadd.f32 %v17418_v50, %v3528_v42  ;;  %v17421_v41 = vadd.f32 %v17420_v36, %v17419_v1  ;;  %v17449_v35 = vadd.f32 %v17448_v51, %v17447_v45 }
 0xb72   :  { %v3626_v6 = vadd.f32 %v17446_v46, %v3577_v55  ;;  %v3580_v2 = vadd.f32 %v17421_v41, %v3531_v11 }
 0xb74   :  { %v3629_v5 = vadd.f32 %v17449_v35, %v3580_v2 }
 0xb85   :  { %v17466_v25 = vpop.f32.mrb[64].mxu0  ;;  %v17494_v24 = vpop.f32.mrb[80].mxu1 }
 0xb86   :  { %v17467_v59 = vpop.f32.mrb[65].mxu0  ;;  %v17495_v26 = vpop.f32.mrb[81].mxu1 }
 0xb87   :  { %v17468_v21 = vadd.f32 %v17467_v59, %v17466_v25  ;;  %v17496_v9 = vadd.f32 %v17495_v26, %v17494_v24  ;;  %v17469_v10 = vpop.f32.mrb[66].mxu0  ;;  %v17497_v8 = vpop.f32.mrb[82].mxu1 }
 0xb88   :  { %v17470_v0 = vpop.f32.mrb[67].mxu0  ;;  %v17498_v44 = vpop.f32.mrb[83].mxu1 }
 0xb89   :  { %v3667_v56 = vadd.f32 %v17468_v21, %v3618_v57  ;;  %v17471_v60 = vadd.f32 %v17470_v0, %v17469_v10  ;;  %v17499_v53 = vadd.f32 %v17498_v44, %v17497_v8 }
 0xb8b   :  { %v3716_v12 = vadd.f32 %v17496_v9, %v3667_v56  ;;  %v3670_v42 = vadd.f32 %v17471_v60, %v3621_v49 }
 0xb8d   :  { %v3719_v13 = vadd.f32 %v17499_v53, %v3670_v42  ;;  %v17472_v3 = vpop.f32.mrb[68].mxu0  ;;  %v17500_v58 = vpop.f32.mrb[84].mxu1 }
 0xb8e   :  { %v17473_v11 = vpop.f32.mrb[69].mxu0  ;;  %v17501_v54 = vpop.f32.mrb[85].mxu1 }
 0xb8f   :  { %v17474_v62 = vadd.f32 %v17473_v11, %v17472_v3  ;;  %v17502_v15 = vadd.f32 %v17501_v54, %v17500_v58  ;;  %v17475_v16 = vpop.f32.mrb[70].mxu0  ;;  %v17503_v4 = vpop.f32.mrb[86].mxu1 }
 0xb90   :  { %v17476_v17 = vpop.f32.mrb[71].mxu0  ;;  %v17504_v22 = vpop.f32.mrb[87].mxu1 }
 0xb91   :  { %v3675_v52 = vadd.f32 %v17474_v62, %v3626_v6  ;;  %v17477_v43 = vadd.f32 %v17476_v17, %v17475_v16  ;;  %v17505_v48 = vadd.f32 %v17504_v22, %v17503_v4 }
 0xb93   :  { %v3724_v61 = vadd.f32 %v17502_v15, %v3675_v52  ;;  %v3678_v57 = vadd.f32 %v17477_v43, %v3629_v5  ;;  %v15487_v5 = vld [vmem:[%s24568_s15] ss:$0 sm:$0xff] }
 0xb95   :  { %v3727_v38 = vadd.f32 %v17505_v48, %v3678_v57 }
 0xba6   :  { %v17522_v47 = vpop.f32.mrb[72].mxu0  ;;  %v17550_v50 = vpop.f32.mrb[88].mxu1 }
 0xba7   :  { %v17523_v49 = vpop.f32.mrb[73].mxu0  ;;  %v17551_v46 = vpop.f32.mrb[89].mxu1 }
 0xba8   :  { %v17524_v1 = vadd.f32 %v17523_v49, %v17522_v47  ;;  %v17552_v45 = vadd.f32 %v17551_v46, %v17550_v50  ;;  %v17525_v36 = vpop.f32.mrb[74].mxu0  ;;  %v17553_v51 = vpop.f32.mrb[90].mxu1 }
 0xba9   :  { %v17526_v55 = vpop.f32.mrb[75].mxu0  ;;  %v17554_v41 = vpop.f32.mrb[91].mxu1 }
 0xbaa   :  { %v3765_v35 = vadd.f32 %v17524_v1, %v3716_v12  ;;  %v17527_v2 = vadd.f32 %v17526_v55, %v17525_v36  ;;  %v17555_v25 = vadd.f32 %v17554_v41, %v17553_v51 }
 0xbac   :  { %v3814_v24 = vadd.f32 %v17552_v45, %v3765_v35  ;;  %v3768_v6 = vadd.f32 %v17527_v2, %v3719_v13 }
 0xbae   :  { %v3817_v59 = vadd.f32 %v17555_v25, %v3768_v6  ;;  %v17528_v26 = vpop.f32.mrb[76].mxu0  ;;  %v17556_v21 = vpop.f32.mrb[92].mxu1  ;;  %v3828_v9 = vadd.f32 %v3814_v24, %v20308_v23 }
 0xbaf   :  { %v17529_v10 = vpop.f32.mrb[77].mxu0  ;;  %v17557_v8 = vpop.f32.mrb[93].mxu1 }
 0xbb0   :  { %v17530_v0 = vadd.f32 %v17529_v10, %v17528_v26  ;;  %v17558_v44 = vadd.f32 %v17557_v8, %v17556_v21  ;;  %v17531_v56 = vpop.f32.mrb[78].mxu0  ;;  %v17559_v60 = vpop.f32.mrb[94].mxu1  ;;  %v3839_v53 = vadd.f32 %v15487_v5, %v3828_v9  ;;  %v3829_v12 = vadd.f32 %v3817_v59, %v20310_v63  ;;  %v19001_v59 = vld [vmem:[%s24589_s29 + $0x40] ss:$8 sps:$4 sm:$0xff]   ;;  %v19006_v26 = vld [vmem:[%s24589_s29 + $0x54] ss:$8 sps:$4 sm:$0xff]  }
 0xbb1   :  { %v17532_v42 = vpop.f32.mrb[79].mxu0  ;;  %v17560_v13 = vpop.f32.mrb[95].mxu1  ;;  %v19004_v21 = vld [vmem:[%s24589_s29 + $0x50] ss:$8 sps:$4 sm:$0xff]   ;;  %v19009_v9 = vld [vmem:[%s24589_s29 + $0x64] ss:$8 sps:$4 sm:$0xff]  }
 0xbb2   :  { %v3773_v3 = vadd.f32 %v17530_v0, %v3724_v61  ;;  %v17533_v58 = vadd.f32 %v17532_v42, %v17531_v56  ;;  %v17561_v11 = vadd.f32 %v17560_v13, %v17559_v60  ;;  %v3845_v54 = vsel %vm145_vm0, %v3839_v53, 0.0  ;;  %v19007_v10 = vld [vmem:[%s24589_s29 + $0x60] ss:$8 sps:$4 sm:$0xff]   ;;  %v19012_v8 = vld [vmem:[%s24589_s29 + $0x74] ss:$8 sps:$4 sm:$0xff]  }
 0xbb3   :  { %3846 = vadd.xlane.f32.xlu0 %v3845_v54  ;;  %v3840_v62 = vadd.f32 %v15487_v5, %v3829_v12  ;;  %v19010_v0 = vld [vmem:[%s24589_s29 + $0x70] ss:$8 sps:$4 sm:$0xff]  }
 0xbb4   :  { %v3822_v15 = vadd.f32 %v17558_v44, %v3773_v3  ;;  %v3776_v23 = vadd.f32 %v17533_v58, %v3727_v38 }
 0xbb5   :  { %v3848_v16 = vsel %vm145_vm0, %v3840_v62, 0.0 }
 0xbb6   :  { %v3825_v4 = vadd.f32 %v17561_v11, %v3776_v23  ;;  %3849 = vadd.xlane.f32.xlu1 %v3848_v16  ;;  %v3830_v17 = vadd.f32 %v3822_v15, %v20348_v7  ;;  %v15488_v23 = vld [vmem:[%s24569_s16] ss:$0 sm:$0xff] }
 0xbb8   :  { %v3841_v22 = vadd.f32 %v15487_v5, %v3830_v17  ;;  %v3831_v63 = vadd.f32 %v3825_v4, %v20346_v19 }
 0xbba   :  { %v3851_v52 = vsel %vm145_vm0, %v3841_v22, 0.0  ;;  %v3842_v43 = vadd.f32 %v15487_v5, %v3831_v63  ;;  %v19003_v5 = vld [vmem:[%s24589_s29 + $0x44] ss:$8 sps:$4 sm:$0xff]   ;;  %v15489_v63 = vld [vmem:[%s24570_s17] ss:$0 sm:$0xff] }
 0xbbb   :  { %3852 = vadd.xlane.f32.xlu0 %v3851_v52  ;;  %3987 = vmatprep.subr.bf16.mxu0 %v19003_v5 }
 0xbbc   :  { %v3854_v48 = vsel %vm145_vm0, %v3842_v43, 0.0  ;;  %3988 = vmatpush1.bf16.msra.mxu0 %v19001_v59 }
 0xbbd   :  { %3855 = vadd.xlane.f32.xlu1 %v3854_v48  ;;  %3989 = vmatprep.subr.bf16.mxu0 %v19006_v26 }
 0xbc0   :  { %3990 = vmatpush1.bf16.msra.mxu0 %v19004_v21 }
 0xbc1   :  { %3991 = vmatprep.subr.bf16.mxu0 %v19009_v9 }
 0xbc4   :  { %3992 = vmatpush1.bf16.msra.mxu0 %v19007_v10 }
 0xbc5   :  { %3993 = vmatprep.subr.bf16.mxu0 %v19012_v8 }
 0xbc8   :  { %3994 = vmatpush1.bf16.msra.mxu0 %v19010_v0 }
 0xc40   :  { %v3847_v61 = vpop.xlane.xlu0 %3846 }
 0xc41   :  { %v3857_v57 = vmul.f32 0.015625, %v3847_v61 }
 0xc43   :  { %v3861_v47 = vsub.f32 %v3839_v53, %v3857_v57  ;;  %v3850_v38 = vpop.xlane.xlu1 %3849 }
 0xc44   :  { %v3858_v50 = vmul.f32 0.015625, %v3850_v38 }
 0xc45   :  { %v3865_v49 = vmul.f32 %v3861_v47, %v3861_v47 }
 0xc46   :  { %v3862_v46 = vsub.f32 %v3840_v62, %v3858_v50 }
 0xc47   :  { %v3869_v1 = vsel %vm145_vm0, %v3865_v49, 0.0 }
 0xc48   :  { %3870 = vadd.xlane.f32.xlu0 %v3869_v1  ;;  %v3853_v7 = vpop.xlane.xlu0 %3852  ;;  %v3866_v45 = vmul.f32 %v3862_v46, %v3862_v46 }
 0xc49   :  { %v3859_v19 = vmul.f32 0.015625, %v3853_v7 }
 0xc4a   :  { %v3872_v36 = vsel %vm145_vm0, %v3866_v45, 0.0  ;;  %v3856_v51 = vpop.xlane.xlu1 %3855 }
 0xc4b   :  { %v3863_v55 = vsub.f32 %v3841_v22, %v3859_v19  ;;  %3873 = vadd.xlane.f32.xlu1 %v3872_v36  ;;  %v3860_v41 = vmul.f32 0.015625, %v3856_v51  ;;  %v15498_v19 = vld [vmem:[%s24558_s7 + $0x2] sm:$0x3] }
 0xc4c   :  { %v3934_v36 = vrot.slane %v15498_v19, %v19936_v28 }
 0xc4d   :  { %v3864_v35 = vsub.f32 %v3842_v43, %v3860_v41  ;;  %v3867_v2 = vmul.f32 %v3863_v55, %v3863_v55 }
 0xc4f   :  { %v3875_v25 = vsel %vm145_vm0, %v3867_v2, 0.0  ;;  %v3868_v24 = vmul.f32 %v3864_v35, %v3864_v35 }
 0xc50   :  { %3876 = vadd.xlane.f32.xlu0 %v3875_v25 }
 0xc51   :  { %v3878_v6 = vsel %vm145_vm0, %v3868_v24, 0.0 }
 0xc52   :  { %3879 = vadd.xlane.f32.xlu1 %v3878_v6 }
 0xcd5   :  { %v3871_v44 = vpop.xlane.xlu0 %3870 }
 0xcd6   :  { %v3881_v56 = vmul.f32 0.015625, %v3871_v44 }
 0xcd8   :  { %v3885_v60 = vadd.f32 1e-05, %v3881_v56  ;;  %v3874_v53 = vpop.xlane.xlu1 %3873 }
 0xcd9   :  { %v3882_v12 = vmul.f32 0.015625, %v3874_v53 }
 0xcda   :  { %19509 = vrsqrt.f32 %v3885_v60 }
 0xcdb   :  { %v3886_v42 = vadd.f32 1e-05, %v3882_v12 }
 0xcdd   :  { %19511 = vrsqrt.f32 %v3886_v42  ;;  %v3877_v13 = vpop.xlane.xlu0 %3876 }
 0xcde   :  { %v3883_v3 = vmul.f32 0.015625, %v3877_v13 }
 0xcdf   :  { %v3880_v58 = vpop.xlane.xlu1 %3879 }
 0xce0   :  { %v3887_v11 = vadd.f32 1e-05, %v3883_v3  ;;  %v3884_v54 = vmul.f32 0.015625, %v3880_v58 }
 0xce2   :  { %19513 = vrsqrt.f32 %v3887_v11  ;;  %v3888_v62 = vadd.f32 1e-05, %v3884_v54 }
 0xce4   :  { %v19510_v15 = vpop.eup %19509  ;;  %19515 = vrsqrt.f32 %v3888_v62 }
 0xce5   :  { %v3893_v16 = vmul.f32 %v19510_v15, %v3861_v47 }
 0xce7   :  { %v19512_v4 = vpop.eup %19511  ;;  %v3903_v17 = vmul.f32 %v15488_v23, %v3893_v16 }
 0xce8   :  { %v3894_v22 = vmul.f32 %v19512_v4, %v3862_v46 }
 0xce9   :  { %v21120_v48 = vadd.f32 %v15489_v63, %v3903_v17 }
 0xcea   :  { %v3904_v52 = vmul.f32 %v15488_v23, %v3894_v22 }
 0xcec   :  { %v19514_v43 = vpop.eup %19513  ;;  %v21122_v61 = vadd.f32 %v15489_v63, %v3904_v52 }
 0xced   :  { %v3895_v57 = vmul.f32 %v19514_v43, %v3863_v55  ;;  %v3938_v55 = vrot.slane %v15498_v19, %v19942_v30 }
 0xcee   :  { %v19516_v38 = vpop.eup %19515  ;;  %v3917_v50 = vpack.c.bf16 %v21122_v61, %v21120_v48 }
 0xcef   :  { %v3896_v49 = vmul.f32 %v19516_v38, %v3864_v35  ;;  %v3905_v47 = vmul.f32 %v15488_v23, %v3895_v57 }
 0xcf0   :  { %15507 = vmatmul.mubr.msk.bf16.vlgmr.msra.gmra.mrb[80].mxu0 %vm145_vm0, %v3917_v50 }
 0xcf1   :  { %4029 = vmatprep.mubr.bf16.mxu0 %v19757_v14  ;;  %v3906_v46 = vmul.f32 %v15488_v23, %v3896_v49  ;;  %v21128_v1 = vadd.f32 %v15489_v63, %v3905_v47 }
 0xcf3   :  { %v21130_v7 = vadd.f32 %v15489_v63, %v3906_v46 }
 0xcf5   :  { %v3918_v45 = vpack.c.bf16 %v21130_v7, %v21128_v1 }
 0xcf8   :  { %15508 = vmatmul.mubr.msk.bf16.gmra.mrb[84].mxu0 %vm145_vm0, %v3918_v45 }
 0xdc3   :  { %v4021_v51 = vpop.f32.mrb[80].mxu0 }
 0xdc4   :  { %v4023_v41 = vpop.f32.mrb[81].mxu0  ;;  %v4022_v2 = vadd.f32 %v4021_v51, %v3934_v36 }
 0xdc5   :  { %v4025_v35 = vpop.f32.mrb[82].mxu0  ;;  %v4024_v6 = vadd.f32 %v4023_v41, %v3938_v55 }
 0xdc6   :  { %v4026_v25 = vadd.f32 %v4025_v35, %v3934_v36  ;;  %v4027_v24 = vpop.f32.mrb[83].mxu0 }
 0xdc7   :  { %v4028_v5 = vadd.f32 %v4027_v24, %v3938_v55 }
 0xdc8   :  { %v21140_v59 = vpack.c.bf16 %v4026_v25, %v4022_v2 }
 0xdc9   :  { %v21142_v26 = vpack.c.bf16 %v4028_v5, %v4024_v6 }
 0xdca   :  { %4046 = vrot.lane.b32.xlu0 %v21140_v59, %s19759_s24  ;;  %18478 = vmatprep.mubr.msk.bf16.mxu1 %vm332_vm1, %v21140_v59 }
 0xdcb   :  { %v4031_v21 = vpop.f32.mrb[84].mxu0  ;;  %18482 = vmatprep.subr.bf16.mxu0 %v21142_v26 }
 0xdcc   :  { %v4033_v9 = vpop.f32.mrb[85].mxu0  ;;  %18483 = vmatpush3.bf16.msra.mxu0 %v21142_v26  ;;  %v4032_v8 = vadd.f32 %v4031_v21, %v3934_v36 }
 0xdcd   :  { %v4035_v10 = vpop.f32.mrb[86].mxu0  ;;  %v4034_v56 = vadd.f32 %v4033_v9, %v3938_v55 }
 0xdce   :  { %v4036_v0 = vadd.f32 %v4035_v10, %v3934_v36  ;;  %v4037_v44 = vpop.f32.mrb[87].mxu0 }
 0xdcf   :  { %v4038_v60 = vadd.f32 %v4037_v44, %v3938_v55 }
 0xdd0   :  { %v21150_v53 = vpack.c.bf16 %v4036_v0, %v4032_v8 }
 0xdd1   :  { %v21152_v12 = vpack.c.bf16 %v4038_v60, %v4034_v56 }
 0xdd2   :  { %4231 = vrot.lane.b32.xlu0 %v21150_v53, %s19758_s23  ;;  %4048 = vrot.lane.b32.xlu1 %v21150_v53, %s19759_s24 }
 0xdd3   :  { %18484 = vmatprep.subr.bf16.mxu0 %v21152_v12 }
 0xdd4   :  { %18485 = vmatpush3.bf16.msra.mxu0 %v21152_v12 }
 0xdd6   :  { %4227 = vrot.lane.b32.xlu0 %v21150_v53, %s19760_s5  ;;  %4229 = vrot.lane.b32.xlu1 %v21140_v59, %s19758_s23 }
 0xdda   :  { %4543 = vrot.lane.b32.xlu0 %v21150_v53, %s19761_s22  ;;  %4225 = vrot.lane.b32.xlu1 %v21140_v59, %s19760_s5 }
 0xdde   :  { %4539 = vrot.lane.b32.xlu0 %v21150_v53, %s24581_s6  ;;  %4541 = vrot.lane.b32.xlu1 %v21140_v59, %s19761_s22 }
 0xde2   :  { %4537 = vrot.lane.b32.xlu1 %v21140_v59, %s24581_s6 }
 0xe3c   :  { %v4047_v42 = vpop.permute.xlu0 %4046 }
 0xe3d   :  { %18814 = vmatprep.subr.msk.bf16.mxu1 %vm332_vm1, %v4047_v42  ;;  %v4057_v13 = vsel %vm332_vm1, %v4047_v42, 0 }
 0xe3e   :  { %18475 = vmatpush3.bf16.xpose.msra.mxu1 %v4057_v13 }
 0xe44   :  { %v4049_v3 = vpop.permute.xlu1 %4048  ;;  %v4232_v15 = vpop.permute.xlu0 %4231 }
 0xe45   :  { %18815 = vmatprep.subr.msk.bf16.mxu1 %vm332_vm1, %v4049_v3  ;;  %v4060_v58 = vsel %vm332_vm1, %v4049_v3, 0  ;;  %v4243_v23 = vsel %vm332_vm1, %v4232_v15, 0 }
 0xe46   :  { %18477 = vmatpush3.bf16.xpose.msra.mxu1 %v4060_v58 }
 0xe48   :  { %v4230_v11 = vpop.permute.xlu1 %4229  ;;  %v4228_v4 = vpop.permute.xlu0 %4227 }
 0xe49   :  { %18816 = vmatprep.subr.msk.bf16.mxu1 %vm332_vm1, %v4230_v11  ;;  %v4240_v62 = vsel %vm332_vm1, %v4230_v11, 0 }
 0xe4c   :  { %v4226_v54 = vpop.permute.xlu1 %4225  ;;  %v4544_v63 = vpop.permute.xlu0 %4543 }
 0xe4d   :  { %18479 = vmatmul.mubr.msk.bf16.vlgmr.msra.gmra.mrb[96].mxu1 %vm332_vm1, %v21150_v53  ;;  %v4555_v52 = vsel %vm332_vm1, %v4544_v63, 0 }
 0xe4e   :  { %18491 = vmatpush3.bf16.xpose.msra.mxu1 %v4240_v62  ;;  %18494 = vmatprep.mubr.msk.bf16.mxu1 %vm332_vm1, %v4226_v54 }
 0xe4f   :  { %18817 = vmatprep.subr.msk.bf16.mxu1 %vm332_vm1, %v4232_v15 }
 0xe50   :  { %v4542_v16 = vpop.permute.xlu1 %4541  ;;  %v4540_v43 = vpop.permute.xlu0 %4539 }
 0xe51   :  { %v4552_v22 = vsel %vm332_vm1, %v4542_v16, 0 }
 0xe54   :  { %v4538_v17 = vpop.permute.xlu1 %4537 }
 0xe56   :  { %18493 = vmatpush3.bf16.xpose.msra.mxu1 %v4243_v23 }
 0xe57   :  { %18818 = vmatprep.subr.msk.bf16.mxu1 %vm332_vm1, %v4542_v16 }
 0xe5d   :  { %18495 = vmatmul.mubr.msk.bf16.vlgmr.msra.gmra.mrb[100].mxu1 %vm332_vm1, %v4228_v4 }
 0xe5e   :  { %18519 = vmatpush3.bf16.xpose.msra.mxu1 %v4552_v22  ;;  %18522 = vmatprep.mubr.msk.bf16.mxu1 %vm332_vm1, %v4538_v17 }
 0xe5f   :  { %18819 = vmatprep.subr.msk.bf16.mxu1 %vm332_vm1, %v4544_v63 }
 0xe66   :  { %18521 = vmatpush3.bf16.xpose.msra.mxu1 %v4555_v52 }
 0xe6d   :  { %18523 = vmatmul.mubr.msk.bf16.vlgmr.msra.gmra.mrb[104].mxu1 %vm332_vm1, %v4540_v43 }
 0xf20   :  { %v18480_v57 = vpop.f32.mrb[96].mxu1 }
 0xf21   :  { %v4096_v38 = vpop.f32.mrb[97].mxu1  ;;  %v4113_v45 = vmul.f32 0.25, %v18480_v57 }
 0xf22   :  { %v4111_v50 = vmul.f32 0.25, %v4096_v38  ;;  %v18481_v49 = vpop.f32.mrb[98].mxu1 }
 0xf23   :  { %v4114_v47 = vmul.f32 0.25, %v18481_v49  ;;  %v4099_v46 = vpop.f32.mrb[99].mxu1  ;;  %v4117_v2 = vadd.f32 %v4113_v45, %v20020_v39 }
 0xf24   :  { %v4112_v19 = vmul.f32 0.25, %v4099_v46  ;;  %v4115_v36 = vadd.f32 %v4111_v50, %v20013_v18 }
 0xf25   :  { %v4118_v41 = vadd.f32 %v4114_v47, %v20017_v32  ;;  %v4125_v24 = vsel %vm402_vm6, %v4117_v2, -inf }
 0xf26   :  { %v4119_v51 = vsel %vm402_vm6, %v4115_v36, -inf  ;;  %v4116_v55 = vadd.f32 %v4112_v19, %v20015_v31 }
 0xf27   :  { %4120 = vmax.xlane.f32.xlu1 %v4119_v51  ;;  %v4128_v25 = vsel %vm402_vm6, %v4118_v41, -inf }
 0xf28   :  { %v4122_v35 = vsel %vm402_vm6, %v4116_v55, -inf }
 0xf29   :  { %4123 = vmax.xlane.f32.xlu0 %v4122_v35 }
 0xf2b   :  { %4129 = vmax.xlane.f32.xlu1 %v4128_v25 }
 0xf2d   :  { %4126 = vmax.xlane.f32.xlu0 %v4125_v24 }
 0xf30   :  { %v18496_v6 = vpop.f32.mrb[100].mxu1 }
 0xf31   :  { %v4279_v5 = vpop.f32.mrb[101].mxu1  ;;  %v4296_v21 = vmul.f32 0.25, %v18496_v6 }
 0xf32   :  { %v4294_v9 = vmul.f32 0.25, %v4279_v5  ;;  %v18497_v10 = vpop.f32.mrb[102].mxu1 }
 0xf33   :  { %v4282_v8 = vpop.f32.mrb[103].mxu1  ;;  %v4297_v0 = vmul.f32 0.25, %v18497_v10  ;;  %v4300_v13 = vadd.f32 %v4296_v21, %v20020_v39 }
 0xf34   :  { %v4295_v44 = vmul.f32 0.25, %v4282_v8  ;;  %v4298_v56 = vadd.f32 %v4294_v9, %v20013_v18 }
 0xf35   :  { %v4301_v58 = vadd.f32 %v4297_v0, %v20017_v32  ;;  %v4308_v11 = vsel %vm402_vm6, %v4300_v13, -inf }
 0xf36   :  { %v4302_v60 = vsel %vm402_vm6, %v4298_v56, -inf  ;;  %v4299_v42 = vadd.f32 %v4295_v44, %v20015_v31 }
 0xf37   :  { %4303 = vmax.xlane.f32.xlu0 %v4302_v60  ;;  %v4311_v54 = vsel %vm402_vm6, %v4301_v58, -inf }
 0xf38   :  { %v4305_v3 = vsel %vm402_vm6, %v4299_v42, -inf }
 0xf39   :  { %4306 = vmax.xlane.f32.xlu1 %v4305_v3 }
 0xf3b   :  { %4309 = vmax.xlane.f32.xlu0 %v4308_v11 }
 0xf3d   :  { %4312 = vmax.xlane.f32.xlu1 %v4311_v54 }
 0xf40   :  { %v21208_v62 = vpop.f32.mrb[104].mxu1 }
 0xf41   :  { %v21210_v15 = vpop.f32.mrb[105].mxu1 }
 0xf42   :  { %v21212_v23 = vpop.f32.mrb[106].mxu1 }
 0xf43   :  { %v4594_v16 = vpop.f32.mrb[107].mxu1 }
 0xfb4   :  { %v4121_v4 = vpop.xlane.xlu1 %4120 }
 0xfb5   :  { %v4131_v52 = vsub.f32 %v4115_v36, %v4121_v4 }
 0xfb6   :  { %v4124_v17 = vpop.xlane.xlu0 %4123 }
 0xfb7   :  { %v4132_v22 = vsub.f32 %v4116_v55, %v4124_v17  ;;  %v4135_v47 = vmul.f32 1.442695, %v4131_v52  ;;  %v4608_v52 = vmul.f32 0.25, %v21208_v62 }
 0xfb8   :  { %v4130_v63 = vpop.xlane.xlu1 %4129 }
 0xfb9   :  { %v4134_v43 = vsub.f32 %v4118_v41, %v4130_v63  ;;  %v4137_v57 = vmul.f32 1.442695, %v4132_v22  ;;  %v4607_v22 = vmul.f32 0.25, %v4594_v16  ;;  %v4606_v63 = vmul.f32 0.25, %v21210_v15 }
 0xfba   :  { %v4127_v38 = vpop.xlane.xlu0 %4126 }
 0xfbb   :  { %v4141_v50 = vmul.f32 1.442695, %v4134_v43  ;;  %v4133_v49 = vsub.f32 %v4117_v2, %v4127_v38  ;;  %v21261_v43 = vadd.f32 %v4607_v22, %v20015_v31  ;;  %v4609_v38 = vmul.f32 0.25, %v21212_v23 }
 0xfbd   :  { %19517 = vpow2.f32 %v4141_v50  ;;  %v4139_v46 = vmul.f32 1.442695, %v4133_v49  ;;  %v21268_v50 = vadd.f32 %v4608_v52, %v20020_v39 }
 0xfbe   :  { %19519 = vpow2.f32 %v4137_v57  ;;  %v21264_v57 = vadd.f32 %v4606_v63, %v20013_v18 }
 0xfbf   :  { %19521 = vpow2.f32 %v4139_v46  ;;  %v4620_v15 = vsel %vm402_vm6, %v21268_v50, -inf }
 0xfc0   :  { %19523 = vpow2.f32 %v4135_v47  ;;  %v4614_v62 = vsel %vm402_vm6, %v21264_v57, -inf }
 0xfc4   :  { %v4304_v45 = vpop.xlane.xlu0 %4303 }
 0xfc5   :  { %v4314_v19 = vsub.f32 %v4298_v56, %v4304_v45 }
 0xfc6   :  { %v4307_v51 = vpop.xlane.xlu1 %4306 }
 0xfc7   :  { %v21214_v35 = vpop.eup %19517  ;;  %v4315_v2 = vsub.f32 %v4299_v42, %v4307_v51  ;;  %v4318_v6 = vmul.f32 1.442695, %v4314_v19 }
 0xfc8   :  { %v21216_v25 = vpop.eup %19519  ;;  %v4310_v55 = vpop.xlane.xlu0 %4309  ;;  %v4152_v36 = vsel %vm402_vm6, %v21214_v35, 0.0 }
 0xfc9   :  { %v21220_v41 = vpop.eup %19521  ;;  %v4316_v24 = vsub.f32 %v4300_v13, %v4310_v55  ;;  %4153 = vadd.xlane.f32.xlu1 %v4152_v36  ;;  %v4146_v0 = vsel %vm402_vm6, %v21216_v25, 0.0  ;;  %v4320_v44 = vmul.f32 1.442695, %v4315_v2 }
 0xfca   :  { %v4313_v5 = vpop.xlane.xlu1 %4312  ;;  %v4149_v21 = vsel %vm402_vm6, %v21220_v41, 0.0  ;;  %v21224_v9 = vpop.eup %19523 }
 0xfcb   :  { %v4322_v10 = vmul.f32 1.442695, %v4316_v24  ;;  %v4317_v8 = vsub.f32 %v4301_v58, %v4313_v5  ;;  %4150 = vadd.xlane.f32.xlu0 %v4149_v21  ;;  %v4143_v60 = vsel %vm402_vm6, %v21224_v9, 0.0 }
 0xfcd   :  { %19525 = vpow2.f32 %v4322_v10  ;;  %v4324_v56 = vmul.f32 1.442695, %v4317_v8  ;;  %4147 = vadd.xlane.f32.xlu1 %v4146_v0 }
 0xfce   :  { %19527 = vpow2.f32 %v4318_v6 }
 0xfcf   :  { %19529 = vpow2.f32 %v4324_v56  ;;  %4144 = vadd.xlane.f32.xlu0 %v4143_v60 }
 0xfd0   :  { %19531 = vpow2.f32 %v4320_v44 }
 0xfd7   :  { %v21230_v42 = vpop.eup %19525 }
 0xfd8   :  { %v21232_v13 = vpop.eup %19527  ;;  %v4332_v3 = vsel %vm402_vm6, %v21230_v42, 0.0 }
 0xfd9   :  { %v21236_v58 = vpop.eup %19529  ;;  %4333 = vadd.xlane.f32.xlu0 %v4332_v3  ;;  %v4326_v4 = vsel %vm402_vm6, %v21232_v13, 0.0 }
 0xfda   :  { %v4335_v11 = vsel %vm402_vm6, %v21236_v58, 0.0  ;;  %v21240_v54 = vpop.eup %19531 }
 0xfdb   :  { %4336 = vadd.xlane.f32.xlu1 %v4335_v11  ;;  %v4329_v17 = vsel %vm402_vm6, %v21240_v54, 0.0 }
 0xfdd   :  { %4327 = vadd.xlane.f32.xlu0 %v4326_v4 }
 0xfdf   :  { %4330 = vadd.xlane.f32.xlu1 %v4329_v17 }
 0xff0   :  { %4352 = vrot.lane.b32.xlu1 %v21152_v12, %s19760_s5 }
 0xff3   :  { %4350 = vrot.lane.b32.xlu0 %v21142_v26, %s19760_s5 }
 0xff4   :  { %4794 = vrot.lane.b32.xlu1 %v21140_v59, %s24579_s2 }
 0xff7   :  { %4796 = vrot.lane.b32.xlu0 %v21150_v53, %s24579_s2 }
 0xff8   :  { %4790 = vrot.lane.b32.xlu1 %v21140_v59, %s24591_s26  ;;  %v4617_v59 = vsel %vm402_vm6, %v21261_v43, -inf }
 0xffb   :  { %4792 = vrot.lane.b32.xlu0 %v21150_v53, %s24591_s26  ;;  %v21273_v53 = vadd.f32 %v4609_v38, %v20017_v32 }
 0xffd   :  { %v4623_v23 = vsel %vm402_vm6, %v21273_v53, -inf }
0x101a   :  { %4618 = vmax.xlane.f32.xlu0 %v4617_v59 }
0x101c   :  { %4615 = vmax.xlane.f32.xlu1 %v4614_v62 }
0x101e   :  { %4621 = vmax.xlane.f32.xlu0 %v4620_v15 }
0x1020   :  { %4624 = vmax.xlane.f32.xlu1 %v4623_v23 }
0x1056   :  { %v4154_v16 = vpop.xlane.xlu1 %4153 }
0x1058   :  { %v4151_v49 = vpop.xlane.xlu0 %4150 }
0x1059   :  { %19533 = vrcp.f32 %v4151_v49 }
0x105a   :  { %v4148_v47 = vpop.xlane.xlu1 %4147 }
0x105b   :  { %19535 = vrcp.f32 %v4148_v47 }
0x105c   :  { %19537 = vrcp.f32 %v4154_v16  ;;  %v4145_v46 = vpop.xlane.xlu0 %4144 }
0x105d   :  { %19539 = vrcp.f32 %v4145_v46 }
0x1063   :  { %v19534_v45 = vpop.eup %19533 }
0x1064   :  { %v4161_v2 = vmul.f32 %v19534_v45, %v21220_v41 }
0x1065   :  { %v19536_v19 = vpop.eup %19535 }
0x1066   :  { %v19538_v51 = vpop.eup %19537  ;;  %v4334_v55 = vpop.xlane.xlu0 %4333  ;;  %v4160_v5 = vmul.f32 %v19536_v19, %v21216_v25 }
0x1067   :  { %v19540_v36 = vpop.eup %19539  ;;  %v4162_v21 = vmul.f32 %v19538_v51, %v21214_v35 }
0x1068   :  { %v4337_v24 = vpop.xlane.xlu1 %4336  ;;  %v4159_v6 = vmul.f32 %v19540_v36, %v21224_v9 }
0x1069   :  { %19541 = vrcp.f32 %v4337_v24  ;;  %v4164_v0 = vpack.c.bf16 %v4162_v21, %v4161_v2  ;;  %v19014_v21 = vld [vmem:[%s24561_s8 + $0x20] sm:$0xff]  }
0x106a   :  { %v4328_v10 = vpop.xlane.xlu0 %4327  ;;  %v4163_v8 = vpack.c.bf16 %v4160_v5, %v4159_v6  ;;  %v19013_v5 = vld [vmem:[%s24561_s8 + $0x28] sm:$0xff]  }
0x106b   :  { %19543 = vrcp.f32 %v4328_v10 }
0x106c   :  { %19545 = vrcp.f32 %v4334_v55  ;;  %v4331_v44 = vpop.xlane.xlu1 %4330  ;;  %18486 = vmatprep.mubr.msk.bf16.mxu0 %vm402_vm6, %v4163_v8 }
0x106d   :  { %19547 = vrcp.f32 %v4331_v44  ;;  %18487 = vmatmul.mubr.msk.bf16.vlgmr.msra.gmra.mrb[88].mxu0 %vm402_vm6, %v4164_v0 }
0x106e   :  { %v4351_v41 = vpop.permute.xlu0 %4350 }
0x106f   :  { %18498 = vmatprep.subr.bf16.mxu0 %v4351_v41 }
0x1070   :  { %v4353_v56 = vpop.permute.xlu1 %4352  ;;  %18499 = vmatpush3.bf16.msra.mxu0 %v4351_v41 }
0x1071   :  { %18500 = vmatprep.subr.bf16.mxu0 %v4353_v56 }
0x1072   :  { %v4797_v11 = vpop.permute.xlu0 %4796 }
0x1073   :  { %v19542_v25 = vpop.eup %19541  ;;  %v4808_v15 = vsel %vm332_vm1, %v4797_v11, 0 }
0x1074   :  { %v4795_v9 = vpop.permute.xlu1 %4794  ;;  %18501 = vmatpush3.bf16.msra.mxu0 %v4353_v56  ;;  %v4345_v17 = vmul.f32 %v19542_v25, %v21236_v58 }
0x1075   :  { %v19544_v35 = vpop.eup %19543  ;;  %18820 = vmatprep.subr.msk.bf16.mxu1 %vm332_vm1, %v4795_v9  ;;  %v4805_v60 = vsel %vm332_vm1, %v4795_v9, 0  ;;  %18506 = vmatprep.subr.bf16.mxu0 %v19013_v5 }
0x1076   :  { %v19546_v3 = vpop.eup %19545  ;;  %18541 = vmatpush3.bf16.xpose.msra.mxu1 %v4805_v60  ;;  %v4342_v63 = vmul.f32 %v19544_v35, %v21232_v13  ;;  %v4793_v58 = vpop.permute.xlu0 %4792 }
0x1077   :  { %v19548_v4 = vpop.eup %19547  ;;  %18821 = vmatprep.subr.msk.bf16.mxu1 %vm332_vm1, %v4797_v11  ;;  %v4344_v38 = vmul.f32 %v19546_v3, %v21230_v42 }
0x1078   :  { %v4791_v22 = vpop.permute.xlu1 %4790  ;;  %v4343_v52 = vmul.f32 %v19548_v4, %v21240_v54 }
0x1079   :  { %18544 = vmatprep.mubr.msk.bf16.mxu1 %vm332_vm1, %v4791_v22  ;;  %v4347_v62 = vpack.c.bf16 %v4345_v17, %v4344_v38 }
0x107a   :  { %v4346_v59 = vpack.c.bf16 %v4343_v52, %v4342_v63 }
0x107c   :  { %18502 = vmatprep.mubr.msk.bf16.mxu0 %vm402_vm6, %v4346_v59 }
0x107d   :  { %18503 = vmatmul.mubr.msk.bf16.vlgmr.msra.gmra.mrb[92].mxu0 %vm402_vm6, %v4347_v62 }
0x107e   :  { %18543 = vmatpush3.bf16.xpose.msra.mxu1 %v4808_v15  ;;  %18507 = vmatpush3.bf16.msra.mxu0 %v19013_v5 }
0x107f   :  { %18512 = vmatprep.subr.bf16.mxu0 %v19014_v21 }
0x1085   :  { %18545 = vmatmul.mubr.msk.bf16.vlgmr.msra.gmra.mrb[108].mxu1 %vm332_vm1, %v4793_v58 }
0x1086   :  { %5645 = vmatprep.mubr.bf16.mxu1 %v19757_v14 }
0x10a7   :  { %v4619_v13 = vpop.xlane.xlu0 %4618 }
0x10a8   :  { %v4627_v16 = vsub.f32 %v21261_v43, %v4619_v13 }
0x10a9   :  { %v4616_v54 = vpop.xlane.xlu1 %4615 }
0x10aa   :  { %v4626_v42 = vsub.f32 %v21264_v57, %v4616_v54  ;;  %v4632_v51 = vmul.f32 1.442695, %v4627_v16 }
0x10ab   :  { %v4622_v23 = vpop.xlane.xlu0 %4621 }
0x10ac   :  { %v4628_v49 = vsub.f32 %v21268_v50, %v4622_v23  ;;  %v4630_v47 = vmul.f32 1.442695, %v4626_v42 }
0x10ad   :  { %v4625_v46 = vpop.xlane.xlu1 %4624 }
0x10ae   :  { %v4634_v45 = vmul.f32 1.442695, %v4628_v49  ;;  %v4629_v19 = vsub.f32 %v21273_v53, %v4625_v46 }
0x10b0   :  { %19549 = vpow2.f32 %v4634_v45  ;;  %v4636_v55 = vmul.f32 1.442695, %v4629_v19 }
0x10b1   :  { %19551 = vpow2.f32 %v4630_v47 }
0x10b2   :  { %19553 = vpow2.f32 %v4636_v55 }
0x10b3   :  { %19555 = vpow2.f32 %v4632_v51 }
0x10ba   :  { %v21304_v36 = vpop.eup %19549 }
0x10bb   :  { %v19552_v2 = vpop.eup %19551  ;;  %v4644_v57 = vsel %vm402_vm6, %v21304_v36, 0.0 }
0x10bc   :  { %v21308_v43 = vpop.eup %19553  ;;  %4645 = vadd.xlane.f32.xlu0 %v4644_v57  ;;  %v4638_v53 = vsel %vm402_vm6, %v19552_v2, 0.0 }
0x10bd   :  { %v4647_v50 = vsel %vm402_vm6, %v21308_v43, 0.0  ;;  %v19556_v24 = vpop.eup %19555 }
0x10be   :  { %4648 = vadd.xlane.f32.xlu1 %v4647_v50  ;;  %v4641_v6 = vsel %vm402_vm6, %v19556_v24, 0.0 }
0x10c0   :  { %4639 = vadd.xlane.f32.xlu0 %v4638_v53 }
0x10c2   :  { %4642 = vadd.xlane.f32.xlu1 %v4641_v6 }
0x10d3   :  { %4662 = vrot.lane.b32.xlu1 %v21152_v12, %s24581_s6 }
0x10d6   :  { %4660 = vrot.lane.b32.xlu0 %v21142_v26, %s24581_s6 }
0x1140   :  { %v18488_v10 = vpop.f32.mrb[88].mxu0 }
0x1141   :  { %v4205_v8 = vpop.f32.mrb[89].mxu0 }
0x1142   :  { %v18489_v0 = vpop.f32.mrb[90].mxu0 }
0x1143   :  { %v4221_v44 = vpack.c.bf16 %v18489_v0, %v18488_v10  ;;  %v4208_v41 = vpop.f32.mrb[91].mxu0  ;;  %v19015_v0 = vld [vmem:[%s24561_s8 + $0x30] sm:$0xff]  }
0x1144   :  { %v4220_v56 = vpack.c.bf16 %v4208_v41, %v4205_v8 }
0x1149   :  { %v4646_v25 = vpop.xlane.xlu0 %4645 }
0x114b   :  { %v4649_v9 = vpop.xlane.xlu1 %4648 }
0x114d   :  { %v4640_v60 = vpop.xlane.xlu0 %4639 }
0x114f   :  { %v4643_v35 = vpop.xlane.xlu1 %4642 }
0x1150   :  { %v18504_v3 = vpop.f32.mrb[92].mxu0  ;;  %19557 = vrcp.f32 %v4643_v35 }
0x1151   :  { %v4396_v11 = vpop.f32.mrb[93].mxu0  ;;  %19559 = vrcp.f32 %v4640_v60  ;;  %v4661_v52 = vpop.permute.xlu0 %4660 }
0x1152   :  { %v18505_v4 = vpop.f32.mrb[94].mxu0  ;;  %19561 = vrcp.f32 %v4649_v9 }
0x1153   :  { %v4412_v17 = vpack.c.bf16 %v18505_v4, %v18504_v3  ;;  %v4399_v22 = vpop.f32.mrb[95].mxu0  ;;  %19563 = vrcp.f32 %v4646_v25 }
0x1154   :  { %v4411_v63 = vpack.c.bf16 %v4399_v22, %v4396_v11 }
0x1156   :  { %18508 = vmatprep.mubr.msk.bf16.mxu0 %vm332_vm1, %v4411_v63 }
0x1157   :  { %18509 = vmatmul.mubr.msk.bf16.vlgmr.msra.gmra.mrb[96].mxu0 %vm332_vm1, %v4412_v17 }
0x1158   :  { %18513 = vmatpush3.bf16.msra.mxu0 %v19014_v21  ;;  %18514 = vmatprep.mubr.msk.bf16.mxu0 %vm332_vm1, %v4220_v56  ;;  %v18546_v38 = vpop.f32.mrb[108].mxu1  ;;  %v4663_v21 = vpop.permute.xlu1 %4662 }
0x1159   :  { %18526 = vmatprep.subr.bf16.mxu0 %v4661_v52  ;;  %v4844_v59 = vpop.f32.mrb[109].mxu1  ;;  %v4861_v42 = vmul.f32 0.25, %v18546_v38 }
0x115a   :  { %v4859_v62 = vmul.f32 0.25, %v4844_v59  ;;  %v18547_v15 = vpop.f32.mrb[110].mxu1  ;;  %v19558_v58 = vpop.eup %19557 }
0x115b   :  { %v4862_v13 = vmul.f32 0.25, %v18547_v15  ;;  %v4847_v54 = vpop.f32.mrb[111].mxu1  ;;  %v19560_v49 = vpop.eup %19559  ;;  %v4655_v19 = vmul.f32 %v19558_v58, %v19556_v24  ;;  %v4865_v51 = vadd.f32 %v4861_v42, %v20020_v39 }
0x115c   :  { %v4863_v23 = vadd.f32 %v4859_v62, %v20013_v18  ;;  %v4860_v16 = vmul.f32 0.25, %v4847_v54  ;;  %v4654_v57 = vmul.f32 %v19560_v49, %v19552_v2  ;;  %v19562_v50 = vpop.eup %19561 }
0x115d   :  { %v4866_v47 = vadd.f32 %v4862_v13, %v20017_v32  ;;  %v19564_v5 = vpop.eup %19563  ;;  %v4873_v24 = vsel %vm402_vm6, %v4865_v51, -inf  ;;  %v4657_v10 = vmul.f32 %v19562_v50, %v21308_v43 }
0x115e   :  { %v4864_v46 = vadd.f32 %v4860_v16, %v20015_v31  ;;  %v4867_v45 = vsel %vm402_vm6, %v4863_v23, -inf  ;;  %v4658_v6 = vpack.c.bf16 %v4655_v19, %v4654_v57  ;;  %v4656_v2 = vmul.f32 %v19564_v5, %v21304_v36 }
0x115f   :  { %4868 = vmax.xlane.f32.xlu1 %v4867_v45  ;;  %v4876_v53 = vsel %vm402_vm6, %v4866_v47, -inf }
0x1160   :  { %v4870_v55 = vsel %vm402_vm6, %v4864_v46, -inf  ;;  %v4659_v8 = vpack.c.bf16 %v4657_v10, %v4656_v2  ;;  %v19016_v10 = vld [vmem:[%s24561_s8 + $0x38] sm:$0xff]  }
0x1161   :  { %4871 = vmax.xlane.f32.xlu0 %v4870_v55 }
0x1163   :  { %18515 = vmatmul.mubr.msk.bf16.vlgmr.msra.gmra.mrb[96].mxu0 %vm332_vm1, %v4221_v44  ;;  %4877 = vmax.xlane.f32.xlu1 %v4876_v53 }
0x1164   :  { %18527 = vmatpush3.bf16.msra.mxu0 %v4661_v52  ;;  %18530 = vmatprep.mubr.msk.bf16.mxu0 %vm402_vm6, %v4658_v6 }
0x1165   :  { %18528 = vmatprep.subr.bf16.mxu0 %v4663_v21  ;;  %4874 = vmax.xlane.f32.xlu0 %v4873_v24 }
0x1168   :  { %18529 = vmatpush3.bf16.msra.mxu0 %v4663_v21 }
0x1169   :  { %18534 = vmatprep.subr.bf16.mxu0 %v19015_v0 }
0x116b   :  { %18531 = vmatmul.mubr.msk.bf16.vlgmr.msra.gmra.mrb[100].mxu0 %vm402_vm6, %v4659_v8 }
0x116c   :  { %18535 = vmatpush3.bf16.msra.mxu0 %v19015_v0 }
0x11ec   :  { %v4869_v44 = vpop.xlane.xlu1 %4868 }
0x11ed   :  { %v4879_v9 = vsub.f32 %v4863_v23, %v4869_v44 }
0x11ee   :  { %v4872_v41 = vpop.xlane.xlu0 %4871 }
0x11ef   :  { %v4880_v56 = vsub.f32 %v4864_v46, %v4872_v41  ;;  %v4883_v11 = vmul.f32 1.442695, %v4879_v9 }
0x11f0   :  { %v4878_v25 = vpop.xlane.xlu1 %4877 }
0x11f1   :  { %v4882_v43 = vsub.f32 %v4866_v47, %v4878_v25  ;;  %v4885_v35 = vmul.f32 1.442695, %v4880_v56  ;;  %v15546_v25 = vld [vmem:[%s24562_s9 + $0x1] ss:$0 sm:$0xff] }
0x11f2   :  { %v4875_v60 = vpop.xlane.xlu0 %4874 }
0x11f3   :  { %v4889_v3 = vmul.f32 1.442695, %v4882_v43  ;;  %v4881_v36 = vsub.f32 %v4865_v51, %v4875_v60 }
0x11f5   :  { %19565 = vpow2.f32 %v4889_v3  ;;  %v4887_v4 = vmul.f32 1.442695, %v4881_v36 }
0x11f6   :  { %19567 = vpow2.f32 %v4885_v35 }
0x11f7   :  { %19569 = vpow2.f32 %v4887_v4 }
0x11f8   :  { %19571 = vpow2.f32 %v4883_v11 }
0x11ff   :  { %v19566_v17 = vpop.eup %19565 }
0x1200   :  { %v19568_v22 = vpop.eup %19567  ;;  %v4900_v63 = vsel %vm402_vm6, %v19566_v17, 0.0 }
0x1201   :  { %v19570_v52 = vpop.eup %19569  ;;  %4901 = vadd.xlane.f32.xlu1 %v4900_v63  ;;  %v4894_v62 = vsel %vm402_vm6, %v19568_v22, 0.0 }
0x1202   :  { %v4897_v38 = vsel %vm402_vm6, %v19570_v52, 0.0  ;;  %v19572_v59 = vpop.eup %19571 }
0x1203   :  { %4898 = vadd.xlane.f32.xlu0 %v4897_v38  ;;  %v4891_v15 = vsel %vm402_vm6, %v19572_v59, 0.0 }
0x1205   :  { %4895 = vadd.xlane.f32.xlu1 %v4894_v62 }
0x1207   :  { %4892 = vadd.xlane.f32.xlu0 %v4891_v15 }
0x1216   :  { %4915 = vrot.lane.b32.xlu1 %v21152_v12, %s24591_s26 }
0x121d   :  { %4913 = vrot.lane.b32.xlu0 %v21142_v26, %s24591_s26 }
0x123e   :  { %v18532_v58 = vpop.f32.mrb[100].mxu0 }
0x123f   :  { %v4706_v13 = vpop.f32.mrb[101].mxu0 }
0x1240   :  { %v18533_v54 = vpop.f32.mrb[102].mxu0 }
0x1241   :  { %v4722_v42 = vpack.c.bf16 %v18533_v54, %v18532_v58  ;;  %v4709_v23 = vpop.f32.mrb[103].mxu0 }
0x1242   :  { %v4721_v16 = vpack.c.bf16 %v4709_v23, %v4706_v13 }
0x1244   :  { %18536 = vmatprep.mubr.msk.bf16.mxu0 %vm332_vm1, %v4721_v16 }
0x1245   :  { %18537 = vmatmul.mubr.msk.bf16.vlgmr.msra.gmra.mrb[96].mxu0 %vm332_vm1, %v4722_v42 }
0x128e   :  { %v4902_v49 = vpop.xlane.xlu1 %4901 }
0x1290   :  { %v4899_v47 = vpop.xlane.xlu0 %4898 }
0x1291   :  { %19573 = vrcp.f32 %v4899_v47 }
0x1292   :  { %v4896_v46 = vpop.xlane.xlu1 %4895 }
0x1293   :  { %19575 = vrcp.f32 %v4896_v46 }
0x1294   :  { %19577 = vrcp.f32 %v4902_v49  ;;  %v4893_v12 = vpop.xlane.xlu0 %4892 }
0x1295   :  { %19579 = vrcp.f32 %v4893_v12 }
0x1296   :  { %v4916_v26 = vpop.permute.xlu1 %4915 }
0x1298   :  { %v4914_v45 = vpop.permute.xlu0 %4913 }
0x1299   :  { %18548 = vmatprep.subr.bf16.mxu0 %v4914_v45 }
0x129a   :  { %18549 = vmatpush3.bf16.msra.mxu0 %v4914_v45 }
0x129b   :  { %18550 = vmatprep.subr.bf16.mxu0 %v4916_v26  ;;  %v19574_v19 = vpop.eup %19573 }
0x129c   :  { %v4909_v50 = vmul.f32 %v19574_v19, %v19570_v52 }
0x129d   :  { %v19576_v51 = vpop.eup %19575 }
0x129e   :  { %v19578_v55 = vpop.eup %19577  ;;  %18551 = vmatpush3.bf16.msra.mxu0 %v4916_v26  ;;  %v4908_v6 = vmul.f32 %v19576_v51, %v19568_v22 }
0x129f   :  { %v19580_v57 = vpop.eup %19579  ;;  %v4910_v5 = vmul.f32 %v19578_v55, %v19566_v17  ;;  %18556 = vmatprep.subr.bf16.mxu0 %v19016_v10 }
0x12a0   :  { %v4907_v53 = vmul.f32 %v19580_v57, %v19572_v59 }
0x12a1   :  { %v4912_v24 = vpack.c.bf16 %v4910_v5, %v4909_v50  ;;  %v15551_v50 = vld [vmem:[%s24563_s12 + $0x200] sm:$0xff] }
0x12a2   :  { %v4911_v21 = vpack.c.bf16 %v4908_v6, %v4907_v53  ;;  %v15559_v53 = vld [vmem:[%s24563_s12 + $0x240] sm:$0xff]  ;;  %v15552_v6 = vld [vmem:[%s24563_s12 + $0x208] sm:$0xff] }
0x12a3   :  { %v15618_v5 = vcombine.high %v15551_v50, %v15559_v53 }
0x12a4   :  { %18552 = vmatprep.mubr.msk.bf16.mxu0 %vm402_vm6, %v4911_v21  ;;  %v15560_v21 = vld [vmem:[%s24563_s12 + $0x248] sm:$0xff] }
0x12a5   :  { %18553 = vmatmul.mubr.msk.bf16.vlgmr.msra.gmra.mrb[104].mxu0 %vm402_vm6, %v4912_v24  ;;  %v15617_v24 = vcombine.low %v15551_v50, %v15559_v53  ;;  %5613 = vmatprep.subr.bf16.mxu1 %v15618_v5 }
0x12a6   :  { %18557 = vmatpush3.bf16.msra.mxu0 %v19016_v10  ;;  %v15619_v10 = vcombine.low %v15552_v6, %v15560_v21 }
0x12a7   :  { %5614 = vmatpush1.bf16.msra.mxu1 %v15617_v24 }
0x1378   :  { %v18554_v2 = vpop.f32.mrb[104].mxu0 }
0x1379   :  { %v4959_v8 = vpop.f32.mrb[105].mxu0 }
0x137a   :  { %v18555_v0 = vpop.f32.mrb[106].mxu0 }
0x137b   :  { %v4975_v44 = vpack.c.bf16 %v18555_v0, %v18554_v2  ;;  %v4962_v41 = vpop.f32.mrb[107].mxu0  ;;  %v15620_v2 = vcombine.high %v15552_v6, %v15560_v21  ;;  %v15575_v0 = vld [vmem:[%s24563_s12 + $0x2c0] sm:$0xff] }
0x137c   :  { %v4974_v56 = vpack.c.bf16 %v4962_v41, %v4959_v8  ;;  %v15567_v8 = vld [vmem:[%s24563_s12 + $0x280] sm:$0xff] }
0x137d   :  { %5666 = vmatprep.subr.bf16.mxu0 %v15620_v2  ;;  %v15634_v41 = vcombine.high %v15567_v8, %v15575_v0  ;;  %v15549_v2 = vld [vmem:[%s24565_s10 + $0x1] ss:$0 sm:$0xff] }
0x137e   :  { %18558 = vmatprep.mubr.msk.bf16.mxu0 %vm332_vm1, %v4974_v56  ;;  %v15576_v56 = vld [vmem:[%s24563_s12 + $0x2c8] sm:$0xff] }
0x137f   :  { %18559 = vmatmul.mubr.msk.bf16.vlgmr.msra.gmra.mrb[96].mxu0 %vm332_vm1, %v4975_v44  ;;  %v15568_v44 = vld [vmem:[%s24563_s12 + $0x288] sm:$0xff]  ;;  %5615 = vmatprep.subr.bf16.mxu1 %v15634_v41 }
0x1380   :  { %5698 = vmatprep.mubr.bf16.mxu0 %v19757_v14  ;;  %5667 = vmatpush1.bf16.msra.mxu0 %v15619_v10 }
0x1452   :  { %v18560_v9 = vpop.f32.mrb[96].mxu0 }
0x1453   :  { %v5024_v43 = vpop.f32.mrb[97].mxu0  ;;  %v5053_v11 = vadd.f32 %v18560_v9, %v15546_v25  ;;  %v15635_v9 = vcombine.low %v15568_v44, %v15576_v56 }
0x1454   :  { %v5051_v35 = vadd.f32 %v15546_v25, %v5024_v43  ;;  %v18561_v60 = vpop.f32.mrb[98].mxu0  ;;  %v15636_v43 = vcombine.high %v15568_v44, %v15576_v56  ;;  %v15550_v56 = vld [vmem:[%s24566_s11 + $0x1] ss:$0 sm:$0xff] }
0x1455   :  { %v5054_v3 = vadd.f32 %v18561_v60, %v15546_v25  ;;  %v5027_v36 = vpop.f32.mrb[99].mxu0  ;;  %v5057_v38 = vadd.f32 %v5053_v11, %v21128_v1  ;;  %v15591_v60 = vld [vmem:[%s24563_s12 + $0x340] sm:$0xff]  ;;  %v15592_v11 = vld [vmem:[%s24563_s12 + $0x348] sm:$0xff] }
0x1456   :  { %v5055_v4 = vadd.f32 %v5051_v35, %v21120_v48  ;;  %v5052_v17 = vadd.f32 %v15546_v25, %v5027_v36  ;;  %v15633_v25 = vcombine.low %v15567_v8, %v15575_v0  ;;  %5668 = vmatprep.subr.bf16.mxu0 %v15636_v43  ;;  %v15583_v35 = vld [vmem:[%s24563_s12 + $0x300] sm:$0xff] }
0x1457   :  { %v5058_v22 = vadd.f32 %v5054_v3, %v21130_v7  ;;  %v5069_v15 = vsel %vm145_vm0, %v5057_v38, 0.0  ;;  %v15584_v3 = vld [vmem:[%s24563_s12 + $0x308] sm:$0xff]  ;;  %5669 = vmatpush1.bf16.msra.mxu0 %v15635_v9  ;;  %v15650_v36 = vcombine.high %v15583_v35, %v15591_v60  ;;  %v15569_v9 = vld [vmem:[%s24563_s12 + $0x290] sm:$0xff] }
0x1458   :  { %v5056_v63 = vadd.f32 %v5052_v17, %v21122_v61  ;;  %v5063_v52 = vsel %vm145_vm0, %v5055_v4, 0.0  ;;  %5616 = vmatpush1.bf16.msra.mxu1 %v15633_v25  ;;  %v15651_v17 = vcombine.low %v15584_v3, %v15592_v11 }
0x1459   :  { %5064 = vadd.xlane.f32.xlu1 %v5063_v52  ;;  %v5072_v62 = vsel %vm145_vm0, %v5058_v22, 0.0  ;;  %5617 = vmatprep.subr.bf16.mxu1 %v15650_v36  ;;  %v15607_v52 = vld [vmem:[%s24563_s12 + $0x3c0] sm:$0xff] }
0x145a   :  { %v5066_v59 = vsel %vm145_vm0, %v5056_v63, 0.0 }
0x145b   :  { %5067 = vadd.xlane.f32.xlu0 %v5066_v59 }
0x145d   :  { %5073 = vadd.xlane.f32.xlu1 %v5072_v62  ;;  %v15608_v62 = vld [vmem:[%s24563_s12 + $0x3c8] sm:$0xff] }
0x145f   :  { %5070 = vadd.xlane.f32.xlu0 %v5069_v15 }
0x14e6   :  { %v5065_v48 = vpop.xlane.xlu1 %5064 }
0x14e7   :  { %v5075_v58 = vmul.f32 0.015625, %v5065_v48 }
0x14e8   :  { %v5068_v13 = vpop.xlane.xlu0 %5067 }
0x14e9   :  { %v21372_v7 = vsub.f32 %v5055_v4, %v5075_v58  ;;  %v5076_v61 = vmul.f32 0.015625, %v5068_v13  ;;  %v15649_v4 = vcombine.low %v15583_v35, %v15591_v60  ;;  %v15553_v13 = vld [vmem:[%s24563_s12 + $0x210] sm:$0xff] }
0x14ea   :  { %v5074_v54 = vpop.xlane.xlu1 %5073  ;;  %v15577_v35 = vld [vmem:[%s24563_s12 + $0x2d0] sm:$0xff] }
0x14eb   :  { %v21374_v42 = vsub.f32 %v5056_v63, %v5076_v61  ;;  %v5078_v23 = vmul.f32 0.015625, %v5074_v54  ;;  %v5083_v1 = vmul.f32 %v21372_v7, %v21372_v7  ;;  %5618 = vmatpush1.bf16.msra.mxu1 %v15649_v4  ;;  %v15599_v63 = vld [vmem:[%s24563_s12 + $0x380] sm:$0xff]  ;;  %v15561_v61 = vld [vmem:[%s24563_s12 + $0x250] sm:$0xff]  ;;  %v15554_v54 = vld [vmem:[%s24563_s12 + $0x218] sm:$0xff] }
0x14ec   :  { %v5071_v16 = vpop.xlane.xlu0 %5070  ;;  %v15666_v59 = vcombine.high %v15599_v63, %v15607_v52  ;;  %v15665_v15 = vcombine.low %v15599_v63, %v15607_v52  ;;  %v15638_v63 = vcombine.high %v15569_v9, %v15577_v35 }
0x14ed   :  { %v21378_v49 = vsub.f32 %v5058_v22, %v5078_v23  ;;  %v5077_v47 = vmul.f32 0.015625, %v5071_v16  ;;  %v5087_v46 = vsel %vm145_vm0, %v5083_v1, 0.0  ;;  %v5084_v12 = vmul.f32 %v21374_v42, %v21374_v42  ;;  %v15562_v1 = vld [vmem:[%s24563_s12 + $0x258] sm:$0xff] }
0x14ee   :  { %5088 = vadd.xlane.f32.xlu0 %v5087_v46  ;;  %v15652_v22 = vcombine.high %v15584_v3, %v15592_v11  ;;  %5619 = vmatprep.subr.bf16.mxu1 %v15666_v59  ;;  %v15622_v23 = vcombine.high %v15553_v13, %v15561_v61  ;;  %v15621_v16 = vcombine.low %v15553_v13, %v15561_v61  ;;  %v15593_v59 = vld [vmem:[%s24563_s12 + $0x350] sm:$0xff] }
0x14ef   :  { %v21383_v45 = vsub.f32 %v5057_v38, %v5077_v47  ;;  %v5090_v26 = vsel %vm145_vm0, %v5084_v12, 0.0  ;;  %v5086_v19 = vmul.f32 %v21378_v49, %v21378_v49  ;;  %v15600_v38 = vld [vmem:[%s24563_s12 + $0x388] sm:$0xff]  ;;  %5620 = vmatpush1.bf16.msra.mxu1 %v15665_v15  ;;  %v15623_v47 = vcombine.low %v15554_v54, %v15562_v1 }
0x14f0   :  { %5091 = vadd.xlane.f32.xlu1 %v5090_v26  ;;  %5670 = vmatprep.subr.bf16.mxu0 %v15652_v22  ;;  %v15667_v48 = vcombine.low %v15600_v38, %v15608_v62  ;;  %v15668_v58 = vcombine.high %v15600_v38, %v15608_v62  ;;  %v15624_v46 = vcombine.high %v15554_v54, %v15562_v1  ;;  %v15585_v38 = vld [vmem:[%s24563_s12 + $0x310] sm:$0xff] }
0x14f1   :  { %v5085_v51 = vmul.f32 %v21383_v45, %v21383_v45  ;;  %v5096_v55 = vsel %vm145_vm0, %v5086_v19, 0.0  ;;  %5671 = vmatpush1.bf16.msra.mxu0 %v15651_v17  ;;  %5719 = vmatprep.subr.bf16.mxu1 %v15622_v23  ;;  %v15637_v15 = vcombine.low %v15569_v9, %v15577_v35  ;;  %v15601_v23 = vld [vmem:[%s24563_s12 + $0x390] sm:$0xff]  ;;  %v15587_v9 = vld [vmem:[%s24563_s12 + $0x320] sm:$0xff]  ;;  %v15588_v35 = vld [vmem:[%s24563_s12 + $0x328] sm:$0xff] }
0x14f2   :  { %5672 = vmatprep.subr.bf16.mxu0 %v15668_v58  ;;  %v15654_v58 = vcombine.high %v15585_v38, %v15593_v59  ;;  %v15609_v1 = vld [vmem:[%s24563_s12 + $0x3d0] sm:$0xff] }
0x14f3   :  { %v5093_v57 = vsel %vm145_vm0, %v5085_v51, 0.0 }
0x14f4   :  { %5097 = vadd.xlane.f32.xlu1 %v5096_v55  ;;  %5094 = vadd.xlane.f32.xlu0 %v5093_v57 }
0x14f5   :  { %5673 = vmatpush1.bf16.msra.mxu0 %v15667_v48 }
0x14f6   :  { %5772 = vmatprep.subr.bf16.mxu0 %v15624_v46  ;;  %v15653_v46 = vcombine.low %v15585_v38, %v15593_v59  ;;  %v15612_v38 = vld [vmem:[%s24563_s12 + $0x3e8] sm:$0xff] }
0x157b   :  { %v5089_v12 = vpop.xlane.xlu0 %5088 }
0x157c   :  { %v5099_v26 = vmul.f32 0.015625, %v5089_v12 }
0x157d   :  { %v5092_v19 = vpop.xlane.xlu1 %5091 }
0x157e   :  { %v5103_v51 = vadd.f32 1e-05, %v5099_v26  ;;  %v5100_v55 = vmul.f32 0.015625, %v5092_v19  ;;  %v15670_v19 = vcombine.high %v15601_v23, %v15609_v1 }
0x1580   :  { %19581 = vrsqrt.f32 %v5103_v51  ;;  %v5104_v57 = vadd.f32 1e-05, %v5100_v55  ;;  %v15555_v55 = vld [vmem:[%s24563_s12 + $0x220] sm:$0xff] }
0x1581   :  { %v5098_v50 = vpop.xlane.xlu1 %5097  ;;  %v5095_v53 = vpop.xlane.xlu0 %5094 }
0x1582   :  { %19583 = vrsqrt.f32 %v5104_v57  ;;  %v5102_v6 = vmul.f32 0.015625, %v5098_v50  ;;  %v5101_v5 = vmul.f32 0.015625, %v5095_v53  ;;  %v15563_v57 = vld [vmem:[%s24563_s12 + $0x260] sm:$0xff]  ;;  %v15556_v50 = vld [vmem:[%s24563_s12 + $0x228] sm:$0xff] }
0x1583   :  { %v15564_v53 = vld [vmem:[%s24563_s12 + $0x268] sm:$0xff] }
0x1584   :  { %v5106_v21 = vadd.f32 1e-05, %v5102_v6  ;;  %v5105_v24 = vadd.f32 1e-05, %v5101_v5  ;;  %v15669_v6 = vcombine.low %v15601_v23, %v15609_v1 }
0x1586   :  { %19585 = vrsqrt.f32 %v5106_v21  ;;  %v15626_v21 = vcombine.high %v15555_v55, %v15563_v57 }
0x1587   :  { %19587 = vrsqrt.f32 %v5105_v24  ;;  %v15628_v24 = vcombine.high %v15556_v50, %v15564_v53 }
0x158a   :  { %v19582_v10 = vpop.eup %19581 }
0x158b   :  { %v5111_v8 = vmul.f32 %v19582_v10, %v21372_v7  ;;  %v15570_v7 = vld [vmem:[%s24563_s12 + $0x298] sm:$0xff]  ;;  %v15571_v10 = vld [vmem:[%s24563_s12 + $0x2a0] sm:$0xff] }
0x158c   :  { %v19584_v0 = vpop.eup %19583 }
0x158d   :  { %v5121_v44 = vmul.f32 %v15549_v2, %v5111_v8  ;;  %v5112_v41 = vmul.f32 %v19584_v0, %v21374_v42  ;;  %v15578_v42 = vld [vmem:[%s24563_s12 + $0x2d8] sm:$0xff]  ;;  %v15572_v8 = vld [vmem:[%s24563_s12 + $0x2a8] sm:$0xff] }
0x158e   :  { %v15640_v52 = vcombine.high %v15570_v7, %v15578_v42  ;;  %v15639_v48 = vcombine.low %v15570_v7, %v15578_v42  ;;  %v15580_v0 = vld [vmem:[%s24563_s12 + $0x2e8] sm:$0xff] }
0x158f   :  { %v5122_v25 = vmul.f32 %v15549_v2, %v5112_v41  ;;  %v21472_v3 = vadd.f32 %v15550_v56, %v5121_v44  ;;  %v15625_v44 = vcombine.low %v15555_v55, %v15563_v57  ;;  %v15627_v41 = vcombine.low %v15556_v50, %v15564_v53  ;;  %v15596_v7 = vld [vmem:[%s24563_s12 + $0x368] sm:$0xff] }
0x1590   :  { %v19586_v43 = vpop.eup %19585 }
0x1591   :  { %v19588_v60 = vpop.eup %19587  ;;  %v21474_v36 = vadd.f32 %v15550_v56, %v5122_v25  ;;  %v5114_v11 = vmul.f32 %v19586_v43, %v21378_v49  ;;  %v15586_v49 = vld [vmem:[%s24563_s12 + $0x318] sm:$0xff]  ;;  %v15644_v25 = vcombine.high %v15572_v8, %v15580_v0  ;;  %v15595_v43 = vld [vmem:[%s24563_s12 + $0x360] sm:$0xff] }
0x1592   :  { %v5113_v4 = vmul.f32 %v19588_v60, %v21383_v45  ;;  %v15594_v45 = vld [vmem:[%s24563_s12 + $0x358] sm:$0xff]  ;;  %v15643_v60 = vcombine.low %v15572_v8, %v15580_v0  ;;  %v15657_v59 = vcombine.low %v15587_v9, %v15595_v43 }
0x1593   :  { %v21480_v17 = vpack.c.bf16 %v21474_v36, %v21472_v3  ;;  %v5124_v22 = vmul.f32 %v15549_v2, %v5114_v11  ;;  %v15656_v54 = vcombine.high %v15586_v49, %v15594_v45  ;;  %v15655_v12 = vcombine.low %v15586_v49, %v15594_v45 }
0x1594   :  { %v5123_v62 = vmul.f32 %v15549_v2, %v5113_v4  ;;  %v15579_v2 = vld [vmem:[%s24563_s12 + $0x2e0] sm:$0xff]  ;;  %v15658_v11 = vcombine.high %v15587_v9, %v15595_v43  ;;  %v15660_v4 = vcombine.high %v15588_v35, %v15596_v7 }
0x1595   :  { %15681 = vmatmul.mubr.msk.bf16.vlgmr.msra.gmra.mrb[112].mxu1 %vm145_vm0, %v21480_v17  ;;  %15683 = vmatmul.mubr.msk.bf16.vlgmr.msra.gmra.mrb[108].mxu0 %vm145_vm0, %v21480_v17  ;;  %v21498_v13 = vadd.f32 %v15550_v56, %v5124_v22  ;;  %v15641_v42 = vcombine.low %v15571_v10, %v15579_v2  ;;  %v15603_v22 = vld [vmem:[%s24563_s12 + $0x3a0] sm:$0xff] }
0x1596   :  { %5720 = vmatpush1.bf16.msra.mxu1 %v15621_v16  ;;  %5773 = vmatpush1.bf16.msra.mxu0 %v15623_v47  ;;  %v21500_v61 = vadd.f32 %v15550_v56, %v5123_v62  ;;  %v15602_v16 = vld [vmem:[%s24563_s12 + $0x398] sm:$0xff]  ;;  %v15642_v56 = vcombine.high %v15571_v10, %v15579_v2  ;;  %v15659_v62 = vcombine.low %v15588_v35, %v15596_v7 }
0x1597   :  { %5721 = vmatprep.subr.bf16.mxu1 %v15638_v63  ;;  %5774 = vmatprep.subr.bf16.mxu0 %v15640_v52  ;;  %v15610_v47 = vld [vmem:[%s24563_s12 + $0x3d8] sm:$0xff]  ;;  %v15611_v63 = vld [vmem:[%s24563_s12 + $0x3e0] sm:$0xff]  ;;  %v15604_v52 = vld [vmem:[%s24563_s12 + $0x3a8] sm:$0xff] }
0x1598   :  { %5655 = vmatprep.mubr.bf16.mxu1 %v19757_v14  ;;  %5708 = vmatprep.mubr.bf16.mxu0 %v19757_v14  ;;  %v21518_v26 = vpack.c.bf16 %v21498_v13, %v21500_v61  ;;  %v15672_v51 = vcombine.high %v15602_v16, %v15610_v47  ;;  %v15671_v5 = vcombine.low %v15602_v16, %v15610_v47 }
0x1599   :  { %v15674_v49 = vcombine.high %v15603_v22, %v15611_v63  ;;  %v15676_v45 = vcombine.high %v15604_v52, %v15612_v38  ;;  %v15673_v23 = vcombine.low %v15603_v22, %v15611_v63  ;;  %v15675_v1 = vcombine.low %v15604_v52, %v15612_v38  ;;  %v19019_v22 = vld [vmem:[%s24564_s14 + $0x400] sm:$0xff]   ;;  %v19021_v52 = vld [vmem:[%s24564_s14 + $0x448] sm:$0xff]  }
0x159a   :  { %5722 = vmatpush1.bf16.msra.mxu1 %v15637_v15  ;;  %5775 = vmatpush1.bf16.msra.mxu0 %v15639_v48  ;;  %v15557_v15 = vld [vmem:[%s24563_s12 + $0x230] sm:$0xff]  ;;  %v19020_v63 = vld [vmem:[%s24564_s14 + $0x480] sm:$0xff]   ;;  %v19022_v38 = vld [vmem:[%s24564_s14 + $0x4c8] sm:$0xff]  }
0x159b   :  { %5723 = vmatprep.subr.bf16.mxu1 %v15654_v58  ;;  %5776 = vmatprep.subr.bf16.mxu0 %v15656_v54  ;;  %v15565_v48 = vld [vmem:[%s24563_s12 + $0x270] sm:$0xff]  ;;  %v15558_v58 = vld [vmem:[%s24563_s12 + $0x238] sm:$0xff] }
0x159c   :  { %v15566_v54 = vld [vmem:[%s24563_s12 + $0x278] sm:$0xff]  ;;  %v15630_v16 = vcombine.high %v15557_v15, %v15565_v48  ;;  %v15629_v55 = vcombine.low %v15557_v15, %v15565_v48  ;;  %v19028_v15 = vld [vmem:[%s24564_s14 + $0x490] sm:$0xff]  }
0x159d   :  { %15682 = vmatmul.mubr.msk.bf16.gmra.mrb[116].mxu1 %vm145_vm0, %v21518_v26  ;;  %15684 = vmatmul.mubr.msk.bf16.gmra.mrb[112].mxu0 %vm145_vm0, %v21518_v26  ;;  %v15632_v47 = vcombine.high %v15558_v58, %v15566_v54  ;;  %v15631_v57 = vcombine.low %v15558_v58, %v15566_v54  ;;  %v19029_v48 = vld [vmem:[%s24564_s14 + $0x458] sm:$0xff]  }
0x159e   :  { %5724 = vmatpush1.bf16.msra.mxu1 %v15653_v46  ;;  %5777 = vmatpush1.bf16.msra.mxu0 %v15655_v12  ;;  %v15573_v46 = vld [vmem:[%s24563_s12 + $0x2b0] sm:$0xff]  ;;  %v19030_v58 = vld [vmem:[%s24564_s14 + $0x4d8] sm:$0xff]  }
0x159f   :  { %5725 = vmatprep.subr.bf16.mxu1 %v15670_v19  ;;  %5778 = vmatprep.subr.bf16.mxu0 %v15672_v51  ;;  %v15581_v12 = vld [vmem:[%s24563_s12 + $0x2f0] sm:$0xff]  ;;  %v15574_v19 = vld [vmem:[%s24563_s12 + $0x2b8] sm:$0xff] }
0x15a0   :  { %5751 = vmatprep.mubr.bf16.mxu1 %v19757_v14  ;;  %5804 = vmatprep.mubr.bf16.mxu0 %v19757_v14  ;;  %v15582_v51 = vld [vmem:[%s24563_s12 + $0x2f8] sm:$0xff]  ;;  %v15646_v50 = vcombine.high %v15573_v46, %v15581_v12  ;;  %v15645_v10 = vcombine.low %v15573_v46, %v15581_v12  ;;  %v19037_v46 = vld [vmem:[%s24564_s14 + $0x468] sm:$0xff]  }
0x15a1   :  { %v15648_v53 = vcombine.high %v15574_v19, %v15582_v51  ;;  %v15647_v2 = vcombine.low %v15574_v19, %v15582_v51  ;;  %v19031_v54 = vld [vmem:[%s24564_s14 + $0x418] sm:$0xff]   ;;  %v19038_v12 = vld [vmem:[%s24564_s14 + $0x4e8] sm:$0xff]  }
0x15a2   :  { %5726 = vmatpush1.bf16.msra.mxu1 %v15669_v6  ;;  %5779 = vmatpush1.bf16.msra.mxu0 %v15671_v5  ;;  %v15589_v6 = vld [vmem:[%s24563_s12 + $0x330] sm:$0xff]  ;;  %v19039_v19 = vld [vmem:[%s24564_s14 + $0x428] sm:$0xff]  }
0x15a3   :  { %5825 = vmatprep.subr.bf16.mxu1 %v15626_v21  ;;  %5878 = vmatprep.subr.bf16.mxu0 %v15628_v24  ;;  %v15597_v5 = vld [vmem:[%s24563_s12 + $0x370] sm:$0xff]  ;;  %v15590_v21 = vld [vmem:[%s24563_s12 + $0x338] sm:$0xff]  ;;  %v19040_v51 = vld [vmem:[%s24564_s14 + $0x4a8] sm:$0xff]  }
0x15a4   :  { %v15598_v24 = vld [vmem:[%s24563_s12 + $0x378] sm:$0xff]  ;;  %v15662_v8 = vcombine.high %v15589_v6, %v15597_v5  ;;  %v15661_v9 = vcombine.low %v15589_v6, %v15597_v5 }
0x15a5   :  { %15685 = vmatmul.mubr.msk.bf16.vlgmr.msra.gmra.mrb[120].mxu1 %vm145_vm0, %v21480_v17  ;;  %15687 = vmatmul.mubr.msk.bf16.vlgmr.msra.gmra.mrb[116].mxu0 %vm145_vm0, %v21480_v17  ;;  %v15664_v0 = vcombine.high %v15590_v21, %v15598_v24  ;;  %v15663_v43 = vcombine.low %v15590_v21, %v15598_v24  ;;  %v19045_v6 = vld [vmem:[%s24564_s14 + $0x478] sm:$0xff]  }
0x15a6   :  { %5826 = vmatpush1.bf16.msra.mxu1 %v15625_v44  ;;  %5879 = vmatpush1.bf16.msra.mxu0 %v15627_v41  ;;  %v15605_v44 = vld [vmem:[%s24563_s12 + $0x3b0] sm:$0xff]  ;;  %v19046_v5 = vld [vmem:[%s24564_s14 + $0x4f8] sm:$0xff]  }
0x15a7   :  { %5827 = vmatprep.subr.bf16.mxu1 %v15642_v56  ;;  %5880 = vmatprep.subr.bf16.mxu0 %v15644_v25  ;;  %v15613_v41 = vld [vmem:[%s24563_s12 + $0x3f0] sm:$0xff]  ;;  %v15606_v56 = vld [vmem:[%s24563_s12 + $0x3b8] sm:$0xff] }
0x15a8   :  { %5761 = vmatprep.mubr.bf16.mxu1 %v19757_v14  ;;  %5814 = vmatprep.mubr.bf16.mxu0 %v19757_v14  ;;  %v15614_v25 = vld [vmem:[%s24563_s12 + $0x3f8] sm:$0xff]  ;;  %v15678_v35 = vcombine.high %v15605_v44, %v15613_v41 }
0x15a9   :  { %v15680_v7 = vcombine.high %v15606_v56, %v15614_v25  ;;  %v19047_v21 = vld [vmem:[%s24564_s14 + $0x438] sm:$0xff]  }
0x15aa   :  { %5828 = vmatpush1.bf16.msra.mxu1 %v15641_v42  ;;  %5881 = vmatpush1.bf16.msra.mxu0 %v15643_v60  ;;  %v15677_v42 = vcombine.low %v15605_v44, %v15613_v41  ;;  %v15679_v60 = vcombine.low %v15606_v56, %v15614_v25  ;;  %v19048_v24 = vld [vmem:[%s24564_s14 + $0x4b8] sm:$0xff]  }
0x15ab   :  { %5829 = vmatprep.subr.bf16.mxu1 %v15658_v11  ;;  %5882 = vmatprep.subr.bf16.mxu0 %v15660_v4  ;;  %v19017_v11 = vld [vmem:[%s24564_s14 + $0x440] sm:$0xff]  }
0x15ac   :  { %v19018_v4 = vld [vmem:[%s24564_s14 + $0x4c0] sm:$0xff]  }
0x15ad   :  { %15686 = vmatmul.mubr.msk.bf16.gmra.mrb[124].mxu1 %vm145_vm0, %v21518_v26  ;;  %15688 = vmatmul.mubr.msk.bf16.gmra.mrb[120].mxu0 %vm145_vm0, %v21518_v26 }
0x15ae   :  { %5830 = vmatpush1.bf16.msra.mxu1 %v15657_v59  ;;  %5883 = vmatpush1.bf16.msra.mxu0 %v15659_v62  ;;  %v19023_v59 = vld [vmem:[%s24564_s14 + $0x408] sm:$0xff]  }
0x15af   :  { %5831 = vmatprep.subr.bf16.mxu1 %v15674_v49  ;;  %5884 = vmatprep.subr.bf16.mxu0 %v15676_v45  ;;  %v19024_v62 = vld [vmem:[%s24564_s14 + $0x488] sm:$0xff]   ;;  %v19026_v49 = vld [vmem:[%s24564_s14 + $0x4d0] sm:$0xff]  }
0x15b0   :  { %5857 = vmatprep.mubr.bf16.mxu1 %v19757_v14  ;;  %5910 = vmatprep.mubr.bf16.mxu0 %v19757_v14  ;;  %v19027_v45 = vld [vmem:[%s24564_s14 + $0x410] sm:$0xff]  }
0x15b2   :  { %5832 = vmatpush1.bf16.msra.mxu1 %v15673_v23  ;;  %5885 = vmatpush1.bf16.msra.mxu0 %v15675_v1  ;;  %v19032_v23 = vld [vmem:[%s24564_s14 + $0x498] sm:$0xff]   ;;  %v19033_v1 = vld [vmem:[%s24564_s14 + $0x460] sm:$0xff]  }
0x15b3   :  { %5931 = vmatprep.subr.bf16.mxu1 %v15630_v16  ;;  %5984 = vmatprep.subr.bf16.mxu0 %v15632_v47  ;;  %v19035_v16 = vld [vmem:[%s24564_s14 + $0x420] sm:$0xff]  }
0x15b4   :  { %v19036_v47 = vld [vmem:[%s24564_s14 + $0x4a0] sm:$0xff]  }
0x15b5   :  { %15689 = vmatmul.mubr.msk.bf16.vlgmr.msra.gmra.mrb[128].mxu1 %vm145_vm0, %v21480_v17  ;;  %15691 = vmatmul.mubr.msk.bf16.vlgmr.msra.gmra.mrb[124].mxu0 %vm145_vm0, %v21480_v17 }
0x15b6   :  { %5932 = vmatpush1.bf16.msra.mxu1 %v15629_v55  ;;  %5985 = vmatpush1.bf16.msra.mxu0 %v15631_v57  ;;  %v19041_v55 = vld [vmem:[%s24564_s14 + $0x470] sm:$0xff]  }
0x15b7   :  { %5933 = vmatprep.subr.bf16.mxu1 %v15646_v50  ;;  %5986 = vmatprep.subr.bf16.mxu0 %v15648_v53  ;;  %v19042_v57 = vld [vmem:[%s24564_s14 + $0x4f0] sm:$0xff]  }
0x15b8   :  { %5867 = vmatprep.mubr.bf16.mxu1 %v19757_v14  ;;  %5920 = vmatprep.mubr.bf16.mxu0 %v19757_v14  ;;  %v19043_v50 = vld [vmem:[%s24564_s14 + $0x430] sm:$0xff]  }
0x15b9   :  { %v19044_v53 = vld [vmem:[%s24564_s14 + $0x4b0] sm:$0xff]  }
0x15ba   :  { %5934 = vmatpush1.bf16.msra.mxu1 %v15645_v10  ;;  %5987 = vmatpush1.bf16.msra.mxu0 %v15647_v2  ;;  %v19049_v10 = vld [vmem:[%s24564_s14 + $0x540] sm:$0xff]  }
0x15bb   :  { %5935 = vmatprep.subr.bf16.mxu1 %v15662_v8  ;;  %5988 = vmatprep.subr.bf16.mxu0 %v15664_v0  ;;  %v19050_v2 = vld [vmem:[%s24564_s14 + $0x5c0] sm:$0xff]   ;;  %v21761_v8 = vld [vmem:[%s24567_s13 + $0x10] sm:$0xff] }
0x15bc   :  { %v5210_v0 = vrot.slane %v21761_v8, %v19936_v28  ;;  %v5218_v44 = vrot.slane %v21761_v8, %v20595_v29  ;;  %v5214_v41 = vrot.slane %v21761_v8, %v19942_v30  ;;  %v5222_v56 = vrot.slane %v21761_v8, %v20598_v33 }
0x15bd   :  { %15690 = vmatmul.mubr.msk.bf16.gmra.mrb[132].mxu1 %vm145_vm0, %v21518_v26  ;;  %15692 = vmatmul.mubr.msk.bf16.gmra.mrb[128].mxu0 %vm145_vm0, %v21518_v26 }
0x15be   :  { %5936 = vmatpush1.bf16.msra.mxu1 %v15661_v9  ;;  %5989 = vmatpush1.bf16.msra.mxu0 %v15663_v43 }
0x15bf   :  { %5937 = vmatprep.subr.bf16.mxu1 %v15678_v35  ;;  %5990 = vmatprep.subr.bf16.mxu0 %v15680_v7 }
0x15c0   :  { %5963 = vmatprep.mubr.bf16.mxu1 %v19757_v14  ;;  %6016 = vmatprep.mubr.bf16.mxu0 %v19757_v14 }
0x15c2   :  { %5938 = vmatpush1.bf16.msra.mxu1 %v15677_v42  ;;  %5991 = vmatpush1.bf16.msra.mxu0 %v15679_v60 }
0x15c3   :  { %17606 = vmatprep.subr.bf16.mxu1 %v19017_v11  ;;  %17634 = vmatprep.subr.bf16.mxu0 %v19018_v4 }
0x15c5   :  { %15693 = vmatmul.mubr.msk.bf16.vlgmr.msra.gmra.mrb[136].mxu1 %vm145_vm0, %v21480_v17  ;;  %15695 = vmatmul.mubr.msk.bf16.vlgmr.msra.gmra.mrb[132].mxu0 %vm145_vm0, %v21480_v17  ;;  %v19025_v17 = vld [vmem:[%s24564_s14 + $0x450] sm:$0xff]  }
0x15c6   :  { %5973 = vmatprep.mubr.bf16.mxu1 %v19757_v14  ;;  %6026 = vmatprep.mubr.bf16.mxu0 %v19757_v14 }
0x15c7   :  { %17607 = vmatpush3.bf16.msra.mxu1 %v19019_v22  ;;  %17635 = vmatpush3.bf16.msra.mxu0 %v19020_v63 }
0x15c8   :  { %17608 = vmatprep.subr.bf16.mxu1 %v19021_v52  ;;  %17636 = vmatprep.subr.bf16.mxu0 %v19022_v38 }
0x15cb   :  { %17609 = vmatpush3.bf16.msra.mxu1 %v19023_v59  ;;  %17637 = vmatpush3.bf16.msra.mxu0 %v19024_v62 }
0x15cc   :  { %17610 = vmatprep.subr.bf16.mxu1 %v19025_v17  ;;  %17638 = vmatprep.subr.bf16.mxu0 %v19026_v49 }
0x15cd   :  { %15694 = vmatmul.mubr.msk.bf16.gmra.mrb[140].mxu1 %vm145_vm0, %v21518_v26  ;;  %15696 = vmatmul.mubr.msk.bf16.gmra.mrb[136].mxu0 %vm145_vm0, %v21518_v26  ;;  %v19034_v26 = vld [vmem:[%s24564_s14 + $0x4e0] sm:$0xff]  }
0x15cf   :  { %17611 = vmatpush3.bf16.msra.mxu1 %v19027_v45  ;;  %17639 = vmatpush3.bf16.msra.mxu0 %v19028_v15 }
0x15d0   :  { %17612 = vmatprep.subr.bf16.mxu1 %v19029_v48  ;;  %17640 = vmatprep.subr.bf16.mxu0 %v19030_v58 }
0x15d3   :  { %17613 = vmatpush3.bf16.msra.mxu1 %v19031_v54  ;;  %17641 = vmatpush3.bf16.msra.mxu0 %v19032_v23 }
0x15d4   :  { %17614 = vmatprep.subr.bf16.mxu1 %v19033_v1  ;;  %17642 = vmatprep.subr.bf16.mxu0 %v19034_v26 }
0x15d7   :  { %17615 = vmatpush3.bf16.msra.mxu1 %v19035_v16  ;;  %17643 = vmatpush3.bf16.msra.mxu0 %v19036_v47 }
0x15d8   :  { %17616 = vmatprep.subr.bf16.mxu1 %v19037_v46  ;;  %17644 = vmatprep.subr.bf16.mxu0 %v19038_v12 }
0x15db   :  { %17617 = vmatpush3.bf16.msra.mxu1 %v19039_v19  ;;  %17645 = vmatpush3.bf16.msra.mxu0 %v19040_v51  ;;  %v19051_v51 = vld [vmem:[%s24564_s14 + $0x500] sm:$0xff]  }
0x15dc   :  { %17618 = vmatprep.subr.bf16.mxu1 %v19041_v55  ;;  %17646 = vmatprep.subr.bf16.mxu0 %v19042_v57  ;;  %v19052_v55 = vld [vmem:[%s24564_s14 + $0x580] sm:$0xff]  }
0x15df   :  { %17619 = vmatpush3.bf16.msra.mxu1 %v19043_v50  ;;  %17647 = vmatpush3.bf16.msra.mxu0 %v19044_v53 }
0x15e0   :  { %17620 = vmatprep.subr.bf16.mxu1 %v19045_v6  ;;  %17648 = vmatprep.subr.bf16.mxu0 %v19046_v5  ;;  %v19053_v5 = vld [vmem:[%s24564_s14 + $0x548] sm:$0xff]  }
0x15e3   :  { %17621 = vmatpush3.bf16.msra.mxu1 %v19047_v21  ;;  %17649 = vmatpush3.bf16.msra.mxu0 %v19048_v24  ;;  %v19054_v21 = vld [vmem:[%s24564_s14 + $0x5c8] sm:$0xff]   ;;  %v21785_v24 = vrot.slane %v21761_v8, %v20601_v20 }
0x15e4   :  { %17662 = vmatprep.subr.bf16.mxu1 %v19049_v10  ;;  %17690 = vmatprep.subr.bf16.mxu0 %v19050_v2 }
0x1668   :  { %v5647_v25 = vpop.f32.mrb[112].mxu1  ;;  %v5700_v9 = vpop.f32.mrb[108].mxu0 }
0x1669   :  { %v5648_v43 = vadd.f32 %v5647_v25, %v5210_v0  ;;  %v5701_v35 = vadd.f32 %v5700_v9, %v5218_v44  ;;  %v5649_v7 = vpop.f32.mrb[113].mxu1  ;;  %v5702_v42 = vpop.f32.mrb[109].mxu0 }
0x166a   :  { %v5650_v60 = vadd.f32 %v5649_v7, %v5214_v41  ;;  %v5703_v11 = vadd.f32 %v5702_v42, %v5222_v56  ;;  %v5651_v4 = vpop.f32.mrb[114].mxu1  ;;  %v5704_v22 = vpop.f32.mrb[110].mxu0 }
0x166b   :  { %v5652_v63 = vadd.f32 %v5651_v4, %v5210_v0  ;;  %v5705_v52 = vadd.f32 %v5704_v22, %v5218_v44  ;;  %v5653_v38 = vpop.f32.mrb[115].mxu1  ;;  %v5706_v59 = vpop.f32.mrb[111].mxu0  ;;  %v6037_v49 = vmax.f32 %v5648_v43, 0.0  ;;  %v6039_v45 = vmax.f32 %v5701_v35, 0.0 }
0x166c   :  { %v5654_v62 = vadd.f32 %v5653_v38, %v5214_v41  ;;  %v5707_v17 = vadd.f32 %v5706_v59, %v5222_v56  ;;  %v6038_v58 = vmax.f32 %v5650_v60, 0.0  ;;  %v6040_v54 = vmax.f32 %v5703_v11, 0.0 }
0x166d   :  { %v6053_v15 = vmax.f32 %v5652_v63, 0.0  ;;  %v6055_v48 = vmax.f32 %v5705_v52, 0.0  ;;  %v21789_v43 = vrot.slane %v21761_v8, %v20604_v34  ;;  %v21793_v11 = vrot.slane %v21761_v8, %v20607_v37  ;;  %v19055_v63 = vld [vmem:[%s24564_s14 + $0x508] sm:$0xff]  }
0x166e   :  { %v6054_v23 = vmax.f32 %v5654_v62, 0.0  ;;  %v6056_v1 = vmax.f32 %v5707_v17, 0.0 }
0x166f   :  { %v6101_v26 = vpack.c.bf16 %v6053_v15, %v6037_v49  ;;  %v6103_v16 = vpack.c.bf16 %v6055_v48, %v6039_v45 }
0x1670   :  { %v6102_v47 = vpack.c.bf16 %v6054_v23, %v6038_v58  ;;  %v6104_v46 = vpack.c.bf16 %v6056_v1, %v6040_v54  ;;  %v5657_v12 = vpop.f32.mrb[116].mxu1  ;;  %v5710_v19 = vpop.f32.mrb[112].mxu0 }
0x1671   :  { %v5658_v57 = vadd.f32 %v5657_v12, %v5210_v0  ;;  %v5711_v50 = vadd.f32 %v5710_v19, %v5218_v44  ;;  %v5659_v53 = vpop.f32.mrb[117].mxu1  ;;  %v5712_v6 = vpop.f32.mrb[113].mxu0 }
0x1672   :  { %v5660_v10 = vadd.f32 %v5659_v53, %v5214_v41  ;;  %v5713_v2 = vadd.f32 %v5712_v6, %v5222_v56  ;;  %v5661_v25 = vpop.f32.mrb[118].mxu1  ;;  %v5714_v9 = vpop.f32.mrb[114].mxu0  ;;  %7190 = vmatprep.mubr.bf16.mxu1 %v6102_v47  ;;  %7239 = vmatprep.mubr.bf16.mxu0 %v6104_v46 }
0x1673   :  { %v5662_v35 = vadd.f32 %v5661_v25, %v5210_v0  ;;  %v5715_v7 = vadd.f32 %v5714_v9, %v5218_v44  ;;  %v5663_v42 = vpop.f32.mrb[119].mxu1  ;;  %v5716_v60 = vpop.f32.mrb[115].mxu0  ;;  %7191 = vmatmul.mubr.bf16.vlgmr.msra.gmra.mrb[144].mxu1 %v6101_v26  ;;  %7240 = vmatmul.mubr.bf16.vlgmr.msra.gmra.mrb[140].mxu0 %v6103_v16  ;;  %v19056_v0 = vld [vmem:[%s24564_s14 + $0x588] sm:$0xff]   ;;  %v21803_v44 = vrot.slane %v21761_v8, %v20610_v40  ;;  %v6069_v52 = vmax.f32 %v5658_v57, 0.0  ;;  %v19059_v26 = vld [vmem:[%s24564_s14 + $0x510] sm:$0xff]  }
0x1674   :  { %v5664_v4 = vadd.f32 %v5663_v42, %v5214_v41  ;;  %v5717_v22 = vadd.f32 %v5716_v60, %v5222_v56  ;;  %17663 = vmatpush3.bf16.msra.mxu1 %v19051_v51  ;;  %17691 = vmatpush3.bf16.msra.mxu0 %v19052_v55  ;;  %v6071_v38 = vmax.f32 %v5711_v50, 0.0  ;;  %v19057_v41 = vld [vmem:[%s24564_s14 + $0x550] sm:$0xff]   ;;  %v6070_v17 = vmax.f32 %v5660_v10, 0.0  ;;  %v19061_v51 = vld [vmem:[%s24564_s14 + $0x558] sm:$0xff]  }
0x1675   :  { %v6085_v59 = vmax.f32 %v5662_v35, 0.0  ;;  %v6087_v62 = vmax.f32 %v5715_v7, 0.0  ;;  %17664 = vmatprep.subr.bf16.mxu1 %v19053_v5  ;;  %17692 = vmatprep.subr.bf16.mxu0 %v19054_v21  ;;  %v19058_v56 = vld [vmem:[%s24564_s14 + $0x5d0] sm:$0xff]   ;;  %v6072_v49 = vmax.f32 %v5713_v2, 0.0  ;;  %v19062_v55 = vld [vmem:[%s24564_s14 + $0x5d8] sm:$0xff]  }
0x1676   :  { %v6086_v45 = vmax.f32 %v5664_v4, 0.0  ;;  %v6088_v15 = vmax.f32 %v5717_v22, 0.0  ;;  %v19060_v16 = vld [vmem:[%s24564_s14 + $0x590] sm:$0xff]   ;;  %v19063_v35 = vld [vmem:[%s24564_s14 + $0x518] sm:$0xff]  }
0x1677   :  { %v6117_v8 = vpack.c.bf16 %v6085_v59, %v6069_v52  ;;  %v6119_v48 = vpack.c.bf16 %v6087_v62, %v6071_v38  ;;  %v19064_v7 = vld [vmem:[%s24564_s14 + $0x598] sm:$0xff]  }
0x1678   :  { %v6118_v58 = vpack.c.bf16 %v6086_v45, %v6070_v17  ;;  %v6120_v54 = vpack.c.bf16 %v6088_v15, %v6072_v49  ;;  %17665 = vmatpush3.bf16.msra.mxu1 %v19055_v63  ;;  %17693 = vmatpush3.bf16.msra.mxu0 %v19056_v0  ;;  %v5753_v23 = vpop.f32.mrb[120].mxu1  ;;  %v5806_v1 = vpop.f32.mrb[116].mxu0  ;;  %v19065_v63 = vld [vmem:[%s24564_s14 + $0x560] sm:$0xff]   ;;  %v21850_v17 = vld [vmem:[%s24567_s13 + $0x18] sm:$0xff] }
0x1679   :  { %v5754_v47 = vadd.f32 %v5753_v23, %v21785_v24  ;;  %v5807_v46 = vadd.f32 %v5806_v1, %v21789_v43  ;;  %v5755_v12 = vpop.f32.mrb[121].mxu1  ;;  %v5808_v19 = vpop.f32.mrb[117].mxu0  ;;  %17666 = vmatprep.subr.bf16.mxu1 %v19057_v41  ;;  %17694 = vmatprep.subr.bf16.mxu0 %v19058_v56  ;;  %v19066_v0 = vld [vmem:[%s24564_s14 + $0x5e0] sm:$0xff]  }
0x167a   :  { %v5756_v57 = vadd.f32 %v5755_v12, %v21793_v11  ;;  %v5809_v50 = vadd.f32 %v5808_v19, %v21803_v44  ;;  %v5757_v53 = vpop.f32.mrb[122].mxu1  ;;  %v5810_v6 = vpop.f32.mrb[118].mxu0  ;;  %7198 = vmatprep.mubr.bf16.mxu1 %v6118_v58  ;;  %7247 = vmatprep.mubr.bf16.mxu0 %v6120_v54  ;;  %v19068_v58 = vld [vmem:[%s24564_s14 + $0x5a0] sm:$0xff]  }
0x167b   :  { %v5758_v5 = vadd.f32 %v5757_v53, %v21785_v24  ;;  %v5811_v21 = vadd.f32 %v5810_v6, %v21789_v43  ;;  %v5759_v10 = vpop.f32.mrb[123].mxu1  ;;  %v5812_v2 = vpop.f32.mrb[119].mxu0  ;;  %7199 = vmatmul.mubr.bf16.gmra.mrb[148].mxu1 %v6117_v8  ;;  %7248 = vmatmul.mubr.bf16.gmra.mrb[144].mxu0 %v6119_v48  ;;  %v6041_v42 = vmax.f32 %v5754_v47, 0.0  ;;  %v6043_v60 = vmax.f32 %v5807_v46, 0.0  ;;  %v19067_v48 = vld [vmem:[%s24564_s14 + $0x520] sm:$0xff]   ;;  %v19070_v47 = vld [vmem:[%s24564_s14 + $0x5e8] sm:$0xff]  }
0x167c   :  { %v5760_v25 = vadd.f32 %v5759_v10, %v21793_v11  ;;  %v5813_v9 = vadd.f32 %v5812_v2, %v21803_v44  ;;  %17667 = vmatpush3.bf16.msra.mxu1 %v19059_v26  ;;  %17695 = vmatpush3.bf16.msra.mxu0 %v19060_v16  ;;  %v6042_v52 = vmax.f32 %v5756_v57, 0.0  ;;  %v6044_v38 = vmax.f32 %v5809_v50, 0.0  ;;  %v19069_v16 = vld [vmem:[%s24564_s14 + $0x568] sm:$0xff]  }
0x167d   :  { %v6057_v4 = vmax.f32 %v5758_v5, 0.0  ;;  %v6059_v22 = vmax.f32 %v5811_v21, 0.0  ;;  %17668 = vmatprep.subr.bf16.mxu1 %v19061_v51  ;;  %17696 = vmatprep.subr.bf16.mxu0 %v19062_v55  ;;  %v21870_v55 = vrot.slane %v21850_v17, %v19936_v28  ;;  %v21876_v5 = vrot.slane %v21850_v17, %v20595_v29 }
0x167e   :  { %v6058_v59 = vmax.f32 %v5760_v25, 0.0  ;;  %v6060_v62 = vmax.f32 %v5813_v9, 0.0  ;;  %v21880_v21 = vrot.slane %v21850_v17, %v19942_v30  ;;  %v21892_v25 = vrot.slane %v21850_v17, %v20598_v33 }
0x167f   :  { %v21843_v41 = vpack.c.bf16 %v6057_v4, %v6041_v42  ;;  %v21845_v56 = vpack.c.bf16 %v6059_v22, %v6043_v60  ;;  %v19074_v42 = vld [vmem:[%s24564_s14 + $0x5f0] sm:$0xff]  }
0x1680   :  { %v6106_v49 = vpack.c.bf16 %v6058_v59, %v6042_v52  ;;  %v6108_v45 = vpack.c.bf16 %v6060_v62, %v6044_v38  ;;  %17669 = vmatpush3.bf16.msra.mxu1 %v19063_v35  ;;  %17697 = vmatpush3.bf16.msra.mxu0 %v19064_v7  ;;  %v5763_v15 = vpop.f32.mrb[124].mxu1  ;;  %v5816_v8 = vpop.f32.mrb[120].mxu0 }
0x1681   :  { %v5764_v54 = vadd.f32 %v5763_v15, %v21785_v24  ;;  %v5817_v23 = vadd.f32 %v5816_v8, %v21789_v43  ;;  %v5765_v1 = vpop.f32.mrb[125].mxu1  ;;  %v5818_v26 = vpop.f32.mrb[121].mxu0  ;;  %17670 = vmatprep.subr.bf16.mxu1 %v19065_v63  ;;  %17698 = vmatprep.subr.bf16.mxu0 %v19066_v0  ;;  %v19076_v15 = vld [vmem:[%s24564_s14 + $0x5b0] sm:$0xff]  }
0x1682   :  { %v5766_v46 = vadd.f32 %v5765_v1, %v21793_v11  ;;  %v5819_v12 = vadd.f32 %v5818_v26, %v21803_v44  ;;  %v5767_v19 = vpop.f32.mrb[126].mxu1  ;;  %v5820_v51 = vpop.f32.mrb[122].mxu0  ;;  %7288 = vmatprep.mubr.bf16.mxu1 %v6106_v49  ;;  %7337 = vmatprep.mubr.bf16.mxu0 %v6108_v45  ;;  %v19075_v45 = vld [vmem:[%s24564_s14 + $0x530] sm:$0xff]   ;;  %v19078_v1 = vld [vmem:[%s24564_s14 + $0x5f8] sm:$0xff]  }
0x1683   :  { %v5768_v57 = vadd.f32 %v5767_v19, %v21785_v24  ;;  %v5821_v50 = vadd.f32 %v5820_v51, %v21789_v43  ;;  %v5769_v53 = vpop.f32.mrb[127].mxu1  ;;  %v5822_v6 = vpop.f32.mrb[123].mxu0  ;;  %v19071_v24 = vld [vmem:[%s24564_s14 + $0x528] sm:$0xff]   ;;  %v6073_v9 = vmax.f32 %v5764_v54, 0.0  ;;  %v6075_v35 = vmax.f32 %v5817_v23, 0.0  ;;  %v19077_v23 = vld [vmem:[%s24564_s14 + $0x578] sm:$0xff]  }
0x1684   :  { %v5770_v10 = vadd.f32 %v5769_v53, %v21793_v11  ;;  %v5823_v2 = vadd.f32 %v5822_v6, %v21803_v44  ;;  %17671 = vmatpush3.bf16.msra.mxu1 %v19067_v48  ;;  %17699 = vmatpush3.bf16.msra.mxu0 %v19068_v58  ;;  %v19072_v43 = vld [vmem:[%s24564_s14 + $0x5a8] sm:$0xff]   ;;  %v19073_v44 = vld [vmem:[%s24564_s14 + $0x570] sm:$0xff]   ;;  %v6074_v60 = vmax.f32 %v5766_v46, 0.0  ;;  %v6076_v4 = vmax.f32 %v5819_v12, 0.0  ;;  %v19079_v6 = vld [vmem:[%s24564_s14 + $0x538] sm:$0xff]  }
0x1685   :  { %v6089_v7 = vmax.f32 %v5768_v57, 0.0  ;;  %v6091_v11 = vmax.f32 %v5821_v50, 0.0  ;;  %17672 = vmatprep.subr.bf16.mxu1 %v19069_v16  ;;  %17700 = vmatprep.subr.bf16.mxu0 %v19070_v47 }
0x1686   :  { %v6090_v22 = vmax.f32 %v5770_v10, 0.0  ;;  %v6092_v63 = vmax.f32 %v5823_v2, 0.0  ;;  %v19080_v10 = vld [vmem:[%s24564_s14 + $0x5b8] sm:$0xff]  }
0x1687   :  { %v21900_v0 = vpack.c.bf16 %v6089_v7, %v6073_v9  ;;  %v21902_v52 = vpack.c.bf16 %v6091_v11, %v6075_v35  ;;  %v19081_v35 = vld [vmem:[%s24564_s14 + $0x640] sm:$0xff]  }
0x1688   :  { %v21904_v38 = vpack.c.bf16 %v6090_v22, %v6074_v60  ;;  %v21906_v59 = vpack.c.bf16 %v6092_v63, %v6076_v4  ;;  %17673 = vmatpush3.bf16.msra.mxu1 %v19071_v24  ;;  %17701 = vmatpush3.bf16.msra.mxu0 %v19072_v43  ;;  %v5859_v62 = vpop.f32.mrb[128].mxu1  ;;  %v5912_v49 = vpop.f32.mrb[124].mxu0  ;;  %v19082_v7 = vld [vmem:[%s24564_s14 + $0x6c0] sm:$0xff]  }
0x1689   :  { %v5860_v8 = vadd.f32 %v5859_v62, %v21870_v55  ;;  %v5913_v48 = vadd.f32 %v5912_v49, %v21876_v5  ;;  %v5861_v58 = vpop.f32.mrb[129].mxu1  ;;  %v5914_v54 = vpop.f32.mrb[125].mxu0  ;;  %17674 = vmatprep.subr.bf16.mxu1 %v19073_v44  ;;  %17702 = vmatprep.subr.bf16.mxu0 %v19074_v42 }
0x168a   :  { %v5862_v26 = vadd.f32 %v5861_v58, %v21880_v21  ;;  %v5915_v16 = vadd.f32 %v5914_v54, %v21892_v25  ;;  %v5863_v47 = vpop.f32.mrb[130].mxu1  ;;  %v5916_v46 = vpop.f32.mrb[126].mxu0  ;;  %v19083_v54 = vld [vmem:[%s24564_s14 + $0x600] sm:$0xff]  }
0x168b   :  { %v5864_v12 = vadd.f32 %v5863_v47, %v21870_v55  ;;  %v5917_v19 = vadd.f32 %v5916_v46, %v21876_v5  ;;  %v5865_v51 = vpop.f32.mrb[131].mxu1  ;;  %v5918_v57 = vpop.f32.mrb[127].mxu0  ;;  %v6045_v2 = vmax.f32 %v5860_v8, 0.0  ;;  %v6047_v24 = vmax.f32 %v5913_v48, 0.0  ;;  %v19085_v46 = vld [vmem:[%s24564_s14 + $0x648] sm:$0xff]  }
0x168c   :  { %v5866_v50 = vadd.f32 %v5865_v51, %v21880_v21  ;;  %v5919_v53 = vadd.f32 %v5918_v57, %v21892_v25  ;;  %17675 = vmatpush3.bf16.msra.mxu1 %v19075_v45  ;;  %17703 = vmatpush3.bf16.msra.mxu0 %v19076_v15  ;;  %v6046_v11 = vmax.f32 %v5862_v26, 0.0  ;;  %v6048_v44 = vmax.f32 %v5915_v16, 0.0 }
0x168d   :  { %v6061_v43 = vmax.f32 %v5864_v12, 0.0  ;;  %v6063_v9 = vmax.f32 %v5917_v19, 0.0  ;;  %17676 = vmatprep.subr.bf16.mxu1 %v19077_v23  ;;  %17704 = vmatprep.subr.bf16.mxu0 %v19078_v1  ;;  %v19084_v23 = vld [vmem:[%s24564_s14 + $0x680] sm:$0xff]   ;;  %v19086_v12 = vld [vmem:[%s24564_s14 + $0x6c8] sm:$0xff]   ;;  %v21966_v19 = vrot.slane %v21850_v17, %v20601_v20  ;;  %v21970_v51 = vrot.slane %v21850_v17, %v20604_v34 }
0x168e   :  { %v6062_v42 = vmax.f32 %v5866_v50, 0.0  ;;  %v6064_v60 = vmax.f32 %v5919_v53, 0.0 }
0x168f   :  { %v21940_v4 = vpack.c.bf16 %v6061_v43, %v6045_v2  ;;  %v21942_v22 = vpack.c.bf16 %v6063_v9, %v6047_v24 }
0x1690   :  { %v21944_v63 = vpack.c.bf16 %v6062_v42, %v6046_v11  ;;  %v21946_v62 = vpack.c.bf16 %v6064_v60, %v6048_v44  ;;  %17677 = vmatpush3.bf16.msra.mxu1 %v19079_v6  ;;  %17705 = vmatpush3.bf16.msra.mxu0 %v19080_v10  ;;  %v5869_v49 = vpop.f32.mrb[132].mxu1  ;;  %v5922_v45 = vpop.f32.mrb[128].mxu0  ;;  %v21978_v10 = vrot.slane %v21850_v17, %v20607_v37 }
0x1691   :  { %v5870_v15 = vadd.f32 %v5869_v49, %v21870_v55  ;;  %v5923_v8 = vadd.f32 %v5922_v45, %v21876_v5  ;;  %v5871_v48 = vpop.f32.mrb[133].mxu1  ;;  %v5924_v58 = vpop.f32.mrb[129].mxu0  ;;  %17718 = vmatprep.subr.bf16.mxu1 %v19081_v35  ;;  %17746 = vmatprep.subr.bf16.mxu0 %v19082_v7  ;;  %v19090_v7 = vld [vmem:[%s24564_s14 + $0x6d0] sm:$0xff]  }
0x1692   :  { %v5872_v1 = vadd.f32 %v5871_v48, %v21880_v21  ;;  %v5925_v26 = vadd.f32 %v5924_v58, %v21892_v25  ;;  %v5873_v16 = vpop.f32.mrb[134].mxu1  ;;  %v5926_v47 = vpop.f32.mrb[130].mxu0 }
0x1693   :  { %v5874_v57 = vadd.f32 %v5873_v16, %v21870_v55  ;;  %v5927_v50 = vadd.f32 %v5926_v47, %v21876_v5  ;;  %7289 = vmatmul.mubr.bf16.vlgmr.msra.gmra.mrb[152].mxu1 %v21843_v41  ;;  %7338 = vmatmul.mubr.bf16.vlgmr.msra.gmra.mrb[148].mxu0 %v21845_v56  ;;  %v5875_v53 = vpop.f32.mrb[135].mxu1  ;;  %v5928_v6 = vpop.f32.mrb[131].mxu0  ;;  %v21986_v55 = vrot.slane %v21850_v17, %v20610_v40  ;;  %v6077_v41 = vmax.f32 %v5870_v15, 0.0  ;;  %v19089_v17 = vld [vmem:[%s24564_s14 + $0x650] sm:$0xff]  }
0x1694   :  { %v5876_v2 = vadd.f32 %v5875_v53, %v21880_v21  ;;  %v5929_v24 = vadd.f32 %v5928_v6, %v21892_v25  ;;  %7296 = vmatprep.mubr.bf16.mxu1 %v21904_v38  ;;  %7345 = vmatprep.mubr.bf16.mxu0 %v21906_v59  ;;  %v6079_v56 = vmax.f32 %v5923_v8, 0.0  ;;  %v19087_v21 = vld [vmem:[%s24564_s14 + $0x608] sm:$0xff]   ;;  %v6078_v38 = vmax.f32 %v5872_v1, 0.0 }
0x1695   :  { %v6093_v5 = vmax.f32 %v5874_v57, 0.0  ;;  %v6095_v43 = vmax.f32 %v5927_v50, 0.0  ;;  %17719 = vmatpush3.bf16.msra.mxu1 %v19083_v54  ;;  %17747 = vmatpush3.bf16.msra.mxu0 %v19084_v23  ;;  %v19088_v25 = vld [vmem:[%s24564_s14 + $0x688] sm:$0xff]   ;;  %v6080_v59 = vmax.f32 %v5925_v26, 0.0  ;;  %v19091_v54 = vld [vmem:[%s24564_s14 + $0x610] sm:$0xff]  }
0x1696   :  { %v6094_v9 = vmax.f32 %v5876_v2, 0.0  ;;  %v6096_v35 = vmax.f32 %v5929_v24, 0.0  ;;  %17720 = vmatprep.subr.bf16.mxu1 %v19085_v46  ;;  %17748 = vmatprep.subr.bf16.mxu0 %v19086_v12  ;;  %v19092_v23 = vld [vmem:[%s24564_s14 + $0x690] sm:$0xff]   ;;  %v19093_v46 = vld [vmem:[%s24564_s14 + $0x658] sm:$0xff]  }
0x1697   :  { %v22000_v11 = vpack.c.bf16 %v6093_v5, %v6077_v41  ;;  %v22002_v44 = vpack.c.bf16 %v6095_v43, %v6079_v56  ;;  %v19094_v12 = vld [vmem:[%s24564_s14 + $0x6d8] sm:$0xff]  }
0x1698   :  { %v22004_v42 = vpack.c.bf16 %v6094_v9, %v6078_v38  ;;  %v22006_v60 = vpack.c.bf16 %v6096_v35, %v6080_v59  ;;  %v5965_v49 = vpop.f32.mrb[136].mxu1  ;;  %v6018_v45 = vpop.f32.mrb[132].mxu0  ;;  %v19098_v59 = vld [vmem:[%s24564_s14 + $0x6e0] sm:$0xff]  }
0x1699   :  { %17721 = vmatpush3.bf16.msra.mxu1 %v19087_v21  ;;  %17749 = vmatpush3.bf16.msra.mxu0 %v19088_v25  ;;  %v5966_v15 = vadd.f32 %v5965_v49, %v21966_v19  ;;  %v6019_v8 = vadd.f32 %v6018_v45, %v21970_v51  ;;  %v5967_v48 = vpop.f32.mrb[137].mxu1  ;;  %v6020_v58 = vpop.f32.mrb[133].mxu0 }
0x169a   :  { %v5968_v1 = vadd.f32 %v5967_v48, %v21978_v10  ;;  %v6021_v26 = vadd.f32 %v6020_v58, %v21986_v55  ;;  %v5969_v16 = vpop.f32.mrb[138].mxu1  ;;  %v6022_v47 = vpop.f32.mrb[134].mxu0  ;;  %17722 = vmatprep.subr.bf16.mxu1 %v19089_v17  ;;  %17750 = vmatprep.subr.bf16.mxu0 %v19090_v7 }
0x169b   :  { %v5970_v57 = vadd.f32 %v5969_v16, %v21966_v19  ;;  %v6023_v50 = vadd.f32 %v6022_v47, %v21970_v51  ;;  %7297 = vmatmul.mubr.bf16.gmra.mrb[156].mxu1 %v21900_v0  ;;  %7346 = vmatmul.mubr.bf16.gmra.mrb[152].mxu0 %v21902_v52  ;;  %v5971_v53 = vpop.f32.mrb[139].mxu1  ;;  %v6024_v6 = vpop.f32.mrb[135].mxu0  ;;  %v6049_v41 = vmax.f32 %v5966_v15, 0.0  ;;  %v6051_v56 = vmax.f32 %v6019_v8, 0.0  ;;  %v19095_v0 = vld [vmem:[%s24564_s14 + $0x618] sm:$0xff]  }
0x169c   :  { %v5972_v2 = vadd.f32 %v5971_v53, %v21978_v10  ;;  %v6025_v24 = vadd.f32 %v6024_v6, %v21986_v55  ;;  %7386 = vmatprep.mubr.bf16.mxu1 %v21944_v63  ;;  %7435 = vmatprep.mubr.bf16.mxu0 %v21946_v62  ;;  %v19096_v52 = vld [vmem:[%s24564_s14 + $0x698] sm:$0xff]   ;;  %v6050_v21 = vmax.f32 %v5968_v1, 0.0  ;;  %v6052_v25 = vmax.f32 %v6021_v26, 0.0  ;;  %v19097_v62 = vld [vmem:[%s24564_s14 + $0x660] sm:$0xff]  }
0x169d   :  { %v6065_v5 = vmax.f32 %v5970_v57, 0.0  ;;  %v6067_v43 = vmax.f32 %v6023_v50, 0.0  ;;  %17723 = vmatpush3.bf16.msra.mxu1 %v19091_v54  ;;  %17751 = vmatpush3.bf16.msra.mxu0 %v19092_v23  ;;  %v19099_v54 = vld [vmem:[%s24564_s14 + $0x620] sm:$0xff]  }
0x169e   :  { %v6066_v38 = vmax.f32 %v5972_v2, 0.0  ;;  %v6068_v63 = vmax.f32 %v6025_v24, 0.0  ;;  %17724 = vmatprep.subr.bf16.mxu1 %v19093_v46  ;;  %17752 = vmatprep.subr.bf16.mxu0 %v19094_v12  ;;  %v19100_v23 = vld [vmem:[%s24564_s14 + $0x6a0] sm:$0xff]   ;;  %v19101_v46 = vld [vmem:[%s24564_s14 + $0x668] sm:$0xff]  }
0x169f   :  { %v22044_v9 = vpack.c.bf16 %v6065_v5, %v6049_v41  ;;  %v22046_v35 = vpack.c.bf16 %v6067_v43, %v6051_v56  ;;  %v19102_v12 = vld [vmem:[%s24564_s14 + $0x6e8] sm:$0xff]  }
0x16a0   :  { %v22048_v17 = vpack.c.bf16 %v6066_v38, %v6050_v21  ;;  %v22050_v7 = vpack.c.bf16 %v6068_v63, %v6052_v25  ;;  %v5975_v49 = vpop.f32.mrb[140].mxu1  ;;  %v6028_v45 = vpop.f32.mrb[136].mxu0  ;;  %v19106_v25 = vld [vmem:[%s24564_s14 + $0x6f0] sm:$0xff]  }
0x16a1   :  { %17725 = vmatpush3.bf16.msra.mxu1 %v19095_v0  ;;  %17753 = vmatpush3.bf16.msra.mxu0 %v19096_v52  ;;  %v5976_v15 = vadd.f32 %v5975_v49, %v21966_v19  ;;  %v6029_v8 = vadd.f32 %v6028_v45, %v21970_v51  ;;  %v5977_v48 = vpop.f32.mrb[141].mxu1  ;;  %v6030_v58 = vpop.f32.mrb[137].mxu0  ;;  %v19103_v0 = vld [vmem:[%s24564_s14 + $0x628] sm:$0xff]   ;;  %v19107_v49 = vld [vmem:[%s24564_s14 + $0x630] sm:$0xff]  }
0x16a2   :  { %v5978_v1 = vadd.f32 %v5977_v48, %v21978_v10  ;;  %v6031_v26 = vadd.f32 %v6030_v58, %v21986_v55  ;;  %v5979_v16 = vpop.f32.mrb[142].mxu1  ;;  %v6032_v47 = vpop.f32.mrb[138].mxu0  ;;  %17726 = vmatprep.subr.bf16.mxu1 %v19097_v62  ;;  %17754 = vmatprep.subr.bf16.mxu0 %v19098_v59  ;;  %v19108_v45 = vld [vmem:[%s24564_s14 + $0x6b0] sm:$0xff]   ;;  %v19111_v48 = vld [vmem:[%s24564_s14 + $0x638] sm:$0xff]  }
0x16a3   :  { %v5980_v57 = vadd.f32 %v5979_v16, %v21966_v19  ;;  %v6033_v50 = vadd.f32 %v6032_v47, %v21970_v51  ;;  %v5981_v53 = vpop.f32.mrb[143].mxu1  ;;  %v6034_v6 = vpop.f32.mrb[139].mxu0  ;;  %v6081_v41 = vmax.f32 %v5976_v15, 0.0  ;;  %v6083_v56 = vmax.f32 %v6029_v8, 0.0  ;;  %v19104_v19 = vld [vmem:[%s24564_s14 + $0x6a8] sm:$0xff]   ;;  %v19109_v15 = vld [vmem:[%s24564_s14 + $0x678] sm:$0xff]  }
0x16a4   :  { %v5982_v2 = vadd.f32 %v5981_v53, %v21978_v10  ;;  %v6035_v24 = vadd.f32 %v6034_v6, %v21986_v55  ;;  %v6082_v51 = vmax.f32 %v5978_v1, 0.0  ;;  %v6084_v52 = vmax.f32 %v6031_v26, 0.0  ;;  %v19105_v55 = vld [vmem:[%s24564_s14 + $0x670] sm:$0xff]   ;;  %v19110_v8 = vld [vmem:[%s24564_s14 + $0x6f8] sm:$0xff]   ;;  %v19115_v1 = vld [vmem:[%s24564_s14 + $0x700] sm:$0xff]  }
0x16a5   :  { %v6097_v5 = vmax.f32 %v5980_v57, 0.0  ;;  %v6099_v43 = vmax.f32 %v6033_v50, 0.0  ;;  %17727 = vmatpush3.bf16.msra.mxu1 %v19099_v54  ;;  %17755 = vmatpush3.bf16.msra.mxu0 %v19100_v23  ;;  %v19112_v58 = vld [vmem:[%s24564_s14 + $0x6b8] sm:$0xff]   ;;  %v19113_v54 = vld [vmem:[%s24564_s14 + $0x740] sm:$0xff]   ;;  %v19117_v16 = vld [vmem:[%s24564_s14 + $0x748] sm:$0xff]  }
0x16a6   :  { %v6098_v21 = vmax.f32 %v5982_v2, 0.0  ;;  %v6100_v10 = vmax.f32 %v6035_v24, 0.0  ;;  %17728 = vmatprep.subr.bf16.mxu1 %v19101_v46  ;;  %17756 = vmatprep.subr.bf16.mxu0 %v19102_v12  ;;  %v19114_v23 = vld [vmem:[%s24564_s14 + $0x7c0] sm:$0xff]   ;;  %v19118_v47 = vld [vmem:[%s24564_s14 + $0x7c8] sm:$0xff]   ;;  %v19125_v57 = vld [vmem:[%s24564_s14 + $0x758] sm:$0xff]  }
0x16a7   :  { %v22084_v38 = vpack.c.bf16 %v6097_v5, %v6081_v41  ;;  %v22086_v63 = vpack.c.bf16 %v6099_v43, %v6083_v56  ;;  %v19116_v26 = vld [vmem:[%s24564_s14 + $0x780] sm:$0xff]   ;;  %v19119_v46 = vld [vmem:[%s24564_s14 + $0x708] sm:$0xff]   ;;  %v19126_v50 = vld [vmem:[%s24564_s14 + $0x7d8] sm:$0xff]  }
0x16a8   :  { %v22088_v62 = vpack.c.bf16 %v6098_v21, %v6082_v51  ;;  %v22090_v59 = vpack.c.bf16 %v6100_v10, %v6084_v52  ;;  %v19120_v12 = vld [vmem:[%s24564_s14 + $0x788] sm:$0xff]   ;;  %v19127_v53 = vld [vmem:[%s24564_s14 + $0x718] sm:$0xff]   ;;  %v19137_v5 = vld [vmem:[%s24564_s14 + $0x770] sm:$0xff]  }
0x16a9   :  { %17729 = vmatpush3.bf16.msra.mxu1 %v19103_v0  ;;  %17757 = vmatpush3.bf16.msra.mxu0 %v19104_v19  ;;  %v19128_v6 = vld [vmem:[%s24564_s14 + $0x798] sm:$0xff]   ;;  %v19133_v2 = vld [vmem:[%s24564_s14 + $0x768] sm:$0xff]   ;;  %v19138_v43 = vld [vmem:[%s24564_s14 + $0x7f0] sm:$0xff]  }
0x16aa   :  { %17730 = vmatprep.subr.bf16.mxu1 %v19105_v55  ;;  %17758 = vmatprep.subr.bf16.mxu0 %v19106_v25  ;;  %v19134_v24 = vld [vmem:[%s24564_s14 + $0x7e8] sm:$0xff]   ;;  %v19139_v0 = vld [vmem:[%s24564_s14 + $0x730] sm:$0xff]   ;;  %v19141_v51 = vld [vmem:[%s24564_s14 + $0x778] sm:$0xff]  }
0x16ab   :  { %v19135_v41 = vld [vmem:[%s24564_s14 + $0x728] sm:$0xff]   ;;  %v19140_v19 = vld [vmem:[%s24564_s14 + $0x7b0] sm:$0xff]   ;;  %v19142_v52 = vld [vmem:[%s24564_s14 + $0x7f8] sm:$0xff]  }
0x16ac   :  { %v19136_v56 = vld [vmem:[%s24564_s14 + $0x7a8] sm:$0xff]   ;;  %v19143_v21 = vld [vmem:[%s24564_s14 + $0x738] sm:$0xff]  }
0x16ad   :  { %17731 = vmatpush3.bf16.msra.mxu1 %v19107_v49  ;;  %17759 = vmatpush3.bf16.msra.mxu0 %v19108_v45  ;;  %v19144_v10 = vld [vmem:[%s24564_s14 + $0x7b8] sm:$0xff]  }
0x16ae   :  { %17732 = vmatprep.subr.bf16.mxu1 %v19109_v15  ;;  %17760 = vmatprep.subr.bf16.mxu0 %v19110_v8 }
0x16b1   :  { %17733 = vmatpush3.bf16.msra.mxu1 %v19111_v48  ;;  %17761 = vmatpush3.bf16.msra.mxu0 %v19112_v58 }
0x16b2   :  { %17774 = vmatprep.subr.bf16.mxu1 %v19113_v54  ;;  %17802 = vmatprep.subr.bf16.mxu0 %v19114_v23 }
0x16b4   :  { %7387 = vmatmul.mubr.bf16.vlgmr.msra.gmra.mrb[160].mxu1 %v21940_v4  ;;  %7436 = vmatmul.mubr.bf16.vlgmr.msra.gmra.mrb[156].mxu0 %v21942_v22  ;;  %v19121_v4 = vld [vmem:[%s24564_s14 + $0x750] sm:$0xff]  }
0x16b5   :  { %7394 = vmatprep.mubr.bf16.mxu1 %v22004_v42  ;;  %7443 = vmatprep.mubr.bf16.mxu0 %v22006_v60  ;;  %v19122_v22 = vld [vmem:[%s24564_s14 + $0x7d0] sm:$0xff]  }
0x16b6   :  { %17775 = vmatpush3.bf16.msra.mxu1 %v19115_v1  ;;  %17803 = vmatpush3.bf16.msra.mxu0 %v19116_v26  ;;  %v19123_v42 = vld [vmem:[%s24564_s14 + $0x710] sm:$0xff]  }
0x16b7   :  { %17776 = vmatprep.subr.bf16.mxu1 %v19117_v16  ;;  %17804 = vmatprep.subr.bf16.mxu0 %v19118_v47  ;;  %v19124_v60 = vld [vmem:[%s24564_s14 + $0x790] sm:$0xff]  }
0x16ba   :  { %17777 = vmatpush3.bf16.msra.mxu1 %v19119_v46  ;;  %17805 = vmatpush3.bf16.msra.mxu0 %v19120_v12 }
0x16bb   :  { %17778 = vmatprep.subr.bf16.mxu1 %v19121_v4  ;;  %17806 = vmatprep.subr.bf16.mxu0 %v19122_v22 }
0x16bc   :  { %7395 = vmatmul.mubr.bf16.gmra.mrb[164].mxu1 %v22000_v11  ;;  %7444 = vmatmul.mubr.bf16.gmra.mrb[160].mxu0 %v22002_v44  ;;  %v19129_v11 = vld [vmem:[%s24564_s14 + $0x760] sm:$0xff]  }
0x16bd   :  { %7484 = vmatprep.mubr.bf16.mxu1 %v22048_v17  ;;  %7533 = vmatprep.mubr.bf16.mxu0 %v22050_v7  ;;  %v19130_v44 = vld [vmem:[%s24564_s14 + $0x7e0] sm:$0xff]  }
0x16be   :  { %17779 = vmatpush3.bf16.msra.mxu1 %v19123_v42  ;;  %17807 = vmatpush3.bf16.msra.mxu0 %v19124_v60  ;;  %v19131_v17 = vld [vmem:[%s24564_s14 + $0x720] sm:$0xff]  }
0x16bf   :  { %17780 = vmatprep.subr.bf16.mxu1 %v19125_v57  ;;  %17808 = vmatprep.subr.bf16.mxu0 %v19126_v50  ;;  %v19132_v7 = vld [vmem:[%s24564_s14 + $0x7a0] sm:$0xff]  }
0x16c2   :  { %17781 = vmatpush3.bf16.msra.mxu1 %v19127_v53  ;;  %17809 = vmatpush3.bf16.msra.mxu0 %v19128_v6 }
0x16c3   :  { %17782 = vmatprep.subr.bf16.mxu1 %v19129_v11  ;;  %17810 = vmatprep.subr.bf16.mxu0 %v19130_v44 }
0x16c6   :  { %17783 = vmatpush3.bf16.msra.mxu1 %v19131_v17  ;;  %17811 = vmatpush3.bf16.msra.mxu0 %v19132_v7 }
0x16c7   :  { %17784 = vmatprep.subr.bf16.mxu1 %v19133_v2  ;;  %17812 = vmatprep.subr.bf16.mxu0 %v19134_v24 }
0x16ca   :  { %17785 = vmatpush3.bf16.msra.mxu1 %v19135_v41  ;;  %17813 = vmatpush3.bf16.msra.mxu0 %v19136_v56 }
0x16cb   :  { %17786 = vmatprep.subr.bf16.mxu1 %v19137_v5  ;;  %17814 = vmatprep.subr.bf16.mxu0 %v19138_v43 }
0x16ce   :  { %17787 = vmatpush3.bf16.msra.mxu1 %v19139_v0  ;;  %17815 = vmatpush3.bf16.msra.mxu0 %v19140_v19 }
0x16cf   :  { %17788 = vmatprep.subr.bf16.mxu1 %v19141_v51  ;;  %17816 = vmatprep.subr.bf16.mxu0 %v19142_v52 }
0x16d2   :  { %17789 = vmatpush3.bf16.msra.mxu1 %v19143_v21  ;;  %17817 = vmatpush3.bf16.msra.mxu0 %v19144_v10 }
0x16d5   :  { %7485 = vmatmul.mubr.bf16.vlgmr.msra.gmra.mrb[168].mxu1 %v22044_v9  ;;  %7534 = vmatmul.mubr.bf16.vlgmr.msra.gmra.mrb[164].mxu0 %v22046_v35 }
0x16d6   :  { %7492 = vmatprep.mubr.bf16.mxu1 %v22088_v62  ;;  %7541 = vmatprep.mubr.bf16.mxu0 %v22090_v59 }
0x16dd   :  { %7493 = vmatmul.mubr.bf16.gmra.mrb[172].mxu1 %v22084_v38  ;;  %7542 = vmatmul.mubr.bf16.gmra.mrb[168].mxu0 %v22086_v63 }
0x16de   :  { %7744 = vmatprep.mubr.bf16.mxu1 %v19757_v14 }
0x1746   :  { %v17622_v55 = vpop.f32.mrb[144].mxu1  ;;  %v17650_v25 = vpop.f32.mrb[140].mxu0 }
0x1747   :  { %v17623_v49 = vpop.f32.mrb[145].mxu1  ;;  %v17651_v45 = vpop.f32.mrb[141].mxu0 }
0x1748   :  { %v17624_v15 = vadd.f32 %v17623_v49, %v17622_v55  ;;  %v17652_v8 = vadd.f32 %v17651_v45, %v17650_v25  ;;  %v17625_v48 = vpop.f32.mrb[146].mxu1  ;;  %v17653_v9 = vpop.f32.mrb[142].mxu0 }
0x1749   :  { %v17626_v58 = vpop.f32.mrb[147].mxu1  ;;  %v17654_v35 = vpop.f32.mrb[143].mxu0 }
0x174a   :  { %v7242_v54 = vadd.f32 %v17652_v8, %v17624_v15  ;;  %v17627_v62 = vadd.f32 %v17626_v58, %v17625_v48  ;;  %v17655_v23 = vadd.f32 %v17654_v35, %v17653_v9 }
0x174c   :  { %v7245_v59 = vadd.f32 %v17655_v23, %v17627_v62 }
0x174e   :  { %v17628_v1 = vpop.f32.mrb[148].mxu1  ;;  %v17656_v38 = vpop.f32.mrb[144].mxu0 }
0x174f   :  { %v17629_v26 = vpop.f32.mrb[149].mxu1  ;;  %v17657_v63 = vpop.f32.mrb[145].mxu0 }
0x1750   :  { %v17630_v16 = vadd.f32 %v17629_v26, %v17628_v1  ;;  %v17658_v47 = vadd.f32 %v17657_v63, %v17656_v38  ;;  %v17631_v46 = vpop.f32.mrb[150].mxu1  ;;  %v17659_v12 = vpop.f32.mrb[146].mxu0 }
0x1751   :  { %v17632_v4 = vpop.f32.mrb[151].mxu1  ;;  %v17660_v22 = vpop.f32.mrb[147].mxu0 }
0x1752   :  { %v7250_v42 = vadd.f32 %v17658_v47, %v17630_v16  ;;  %v17633_v60 = vadd.f32 %v17632_v4, %v17631_v46  ;;  %v17661_v57 = vadd.f32 %v17660_v22, %v17659_v12 }
0x1754   :  { %v7253_v50 = vadd.f32 %v17661_v57, %v17633_v60 }
0x1766   :  { %v17678_v53 = vpop.f32.mrb[152].mxu1  ;;  %v17706_v6 = vpop.f32.mrb[148].mxu0 }
0x1767   :  { %v17679_v11 = vpop.f32.mrb[153].mxu1  ;;  %v17707_v44 = vpop.f32.mrb[149].mxu0 }
0x1768   :  { %v17680_v17 = vadd.f32 %v17679_v11, %v17678_v53  ;;  %v17708_v7 = vadd.f32 %v17707_v44, %v17706_v6  ;;  %v17681_v2 = vpop.f32.mrb[154].mxu1  ;;  %v17709_v24 = vpop.f32.mrb[150].mxu0 }
0x1769   :  { %v17682_v41 = vpop.f32.mrb[155].mxu1  ;;  %v17710_v56 = vpop.f32.mrb[151].mxu0 }
0x176a   :  { %v7291_v5 = vadd.f32 %v17680_v17, %v7242_v54  ;;  %v17683_v43 = vadd.f32 %v17682_v41, %v17681_v2  ;;  %v17711_v0 = vadd.f32 %v17710_v56, %v17709_v24 }
0x176c   :  { %v7340_v19 = vadd.f32 %v17708_v7, %v7291_v5  ;;  %v7294_v51 = vadd.f32 %v17683_v43, %v7245_v59 }
0x176e   :  { %v7343_v52 = vadd.f32 %v17711_v0, %v7294_v51  ;;  %v17684_v21 = vpop.f32.mrb[156].mxu1  ;;  %v17712_v10 = vpop.f32.mrb[152].mxu0 }
0x176f   :  { %v17685_v55 = vpop.f32.mrb[157].mxu1  ;;  %v17713_v25 = vpop.f32.mrb[153].mxu0 }
0x1770   :  { %v17686_v49 = vadd.f32 %v17685_v55, %v17684_v21  ;;  %v17714_v45 = vadd.f32 %v17713_v25, %v17712_v10  ;;  %v17687_v15 = vpop.f32.mrb[158].mxu1  ;;  %v17715_v8 = vpop.f32.mrb[154].mxu0 }
0x1771   :  { %v17688_v48 = vpop.f32.mrb[159].mxu1  ;;  %v17716_v9 = vpop.f32.mrb[155].mxu0 }
0x1772   :  { %v7299_v58 = vadd.f32 %v17686_v49, %v7250_v42  ;;  %v17689_v35 = vadd.f32 %v17688_v48, %v17687_v15  ;;  %v17717_v62 = vadd.f32 %v17716_v9, %v17715_v8 }
0x1774   :  { %v7348_v23 = vadd.f32 %v17714_v45, %v7299_v58  ;;  %v7302_v54 = vadd.f32 %v17689_v35, %v7253_v50 }
0x1776   :  { %v7351_v1 = vadd.f32 %v17717_v62, %v7302_v54 }
0x1787   :  { %v17734_v38 = vpop.f32.mrb[160].mxu1  ;;  %v17762_v26 = vpop.f32.mrb[156].mxu0 }
0x1788   :  { %v17735_v59 = vpop.f32.mrb[161].mxu1  ;;  %v17763_v63 = vpop.f32.mrb[157].mxu0 }
0x1789   :  { %v17736_v16 = vadd.f32 %v17735_v59, %v17734_v38  ;;  %v17764_v47 = vadd.f32 %v17763_v63, %v17762_v26  ;;  %v17737_v46 = vpop.f32.mrb[162].mxu1  ;;  %v17765_v12 = vpop.f32.mrb[158].mxu0 }
0x178a   :  { %v17738_v4 = vpop.f32.mrb[163].mxu1  ;;  %v17766_v22 = vpop.f32.mrb[159].mxu0 }
0x178b   :  { %v7389_v60 = vadd.f32 %v17736_v16, %v7340_v19  ;;  %v17739_v57 = vadd.f32 %v17738_v4, %v17737_v46  ;;  %v17767_v53 = vadd.f32 %v17766_v22, %v17765_v12 }
0x178d   :  { %v7438_v6 = vadd.f32 %v17764_v47, %v7389_v60  ;;  %v7392_v42 = vadd.f32 %v17739_v57, %v7343_v52 }
0x178f   :  { %v7441_v11 = vadd.f32 %v17767_v53, %v7392_v42  ;;  %v17740_v44 = vpop.f32.mrb[164].mxu1  ;;  %v17768_v17 = vpop.f32.mrb[160].mxu0 }
0x1790   :  { %v17741_v50 = vpop.f32.mrb[165].mxu1  ;;  %v17769_v7 = vpop.f32.mrb[161].mxu0 }
0x1791   :  { %v17742_v2 = vadd.f32 %v17741_v50, %v17740_v44  ;;  %v17770_v24 = vadd.f32 %v17769_v7, %v17768_v17  ;;  %v17743_v41 = vpop.f32.mrb[166].mxu1  ;;  %v17771_v56 = vpop.f32.mrb[162].mxu0 }
0x1792   :  { %v17744_v5 = vpop.f32.mrb[167].mxu1  ;;  %v17772_v43 = vpop.f32.mrb[163].mxu0 }
0x1793   :  { %v7397_v0 = vadd.f32 %v17742_v2, %v7348_v23  ;;  %v17745_v51 = vadd.f32 %v17744_v5, %v17743_v41  ;;  %v17773_v21 = vadd.f32 %v17772_v43, %v17771_v56 }
0x1795   :  { %v7446_v10 = vadd.f32 %v17770_v24, %v7397_v0  ;;  %v7400_v19 = vadd.f32 %v17745_v51, %v7351_v1  ;;  %v16082_v1 = vld [vmem:[%s24568_s15 + $0x1] ss:$0 sm:$0xff] }
0x1797   :  { %v7449_v55 = vadd.f32 %v17773_v21, %v7400_v19 }
0x17a8   :  { %v17790_v25 = vpop.f32.mrb[168].mxu1  ;;  %v17818_v49 = vpop.f32.mrb[164].mxu0 }
0x17a9   :  { %v17791_v52 = vpop.f32.mrb[169].mxu1  ;;  %v17819_v45 = vpop.f32.mrb[165].mxu0 }
0x17aa   :  { %v17792_v15 = vadd.f32 %v17791_v52, %v17790_v25  ;;  %v17820_v8 = vadd.f32 %v17819_v45, %v17818_v49  ;;  %v17793_v48 = vpop.f32.mrb[170].mxu1  ;;  %v17821_v9 = vpop.f32.mrb[166].mxu0 }
0x17ab   :  { %v17794_v58 = vpop.f32.mrb[171].mxu1  ;;  %v17822_v35 = vpop.f32.mrb[167].mxu0 }
0x17ac   :  { %v7487_v62 = vadd.f32 %v17792_v15, %v7438_v6  ;;  %v17795_v54 = vadd.f32 %v17794_v58, %v17793_v48  ;;  %v17823_v38 = vadd.f32 %v17822_v35, %v17821_v9 }
0x17ae   :  { %v7536_v26 = vadd.f32 %v17820_v8, %v7487_v62  ;;  %v7490_v23 = vadd.f32 %v17795_v54, %v7441_v11 }
0x17b0   :  { %v7550_v59 = vadd.f32 %v7536_v26, %v21472_v3  ;;  %v7539_v63 = vadd.f32 %v17823_v38, %v7490_v23  ;;  %v17796_v16 = vpop.f32.mrb[172].mxu1  ;;  %v17824_v47 = vpop.f32.mrb[168].mxu0 }
0x17b1   :  { %v17797_v46 = vpop.f32.mrb[173].mxu1  ;;  %v17825_v12 = vpop.f32.mrb[169].mxu0 }
0x17b2   :  { %v7551_v4 = vadd.f32 %v7539_v63, %v21474_v36  ;;  %v17798_v22 = vadd.f32 %v17797_v46, %v17796_v16  ;;  %v17826_v60 = vadd.f32 %v17825_v12, %v17824_v47  ;;  %v17799_v57 = vpop.f32.mrb[174].mxu1  ;;  %v17827_v53 = vpop.f32.mrb[170].mxu0  ;;  %v7562_v6 = vadd.f32 %v16082_v1, %v7550_v59  ;;  %v19145_v59 = vld [vmem:[%s24589_s29 + $0x80] ss:$8 sps:$4 sm:$0xff]   ;;  %v19150_v63 = vld [vmem:[%s24589_s29 + $0x94] ss:$8 sps:$4 sm:$0xff]  }
0x17b3   :  { %v17800_v42 = vpop.f32.mrb[175].mxu1  ;;  %v17828_v11 = vpop.f32.mrb[171].mxu0  ;;  %v19148_v16 = vld [vmem:[%s24589_s29 + $0x90] ss:$8 sps:$4 sm:$0xff]   ;;  %v19153_v47 = vld [vmem:[%s24589_s29 + $0xa4] ss:$8 sps:$4 sm:$0xff]  }
0x17b4   :  { %v7495_v44 = vadd.f32 %v17798_v22, %v7446_v10  ;;  %v17801_v17 = vadd.f32 %v17800_v42, %v17799_v57  ;;  %v17829_v50 = vadd.f32 %v17828_v11, %v17827_v53  ;;  %v7570_v7 = vsel %vm145_vm0, %v7562_v6, 0.0  ;;  %v19151_v46 = vld [vmem:[%s24589_s29 + $0xa0] ss:$8 sps:$4 sm:$0xff]   ;;  %v19156_v12 = vld [vmem:[%s24589_s29 + $0xb4] ss:$8 sps:$4 sm:$0xff]  }
0x17b5   :  { %7571 = vadd.xlane.f32.xlu0 %v7570_v7  ;;  %v7563_v3 = vadd.f32 %v16082_v1, %v7551_v4  ;;  %v19154_v4 = vld [vmem:[%s24589_s29 + $0xb0] ss:$8 sps:$4 sm:$0xff]  }
0x17b6   :  { %v7544_v2 = vadd.f32 %v17826_v60, %v7495_v44  ;;  %v7498_v24 = vadd.f32 %v17801_v17, %v7449_v55 }
0x17b7   :  { %v7573_v41 = vsel %vm145_vm0, %v7563_v3, 0.0 }
0x17b8   :  { %v7552_v36 = vadd.f32 %v7544_v2, %v21500_v61  ;;  %v7547_v56 = vadd.f32 %v17829_v50, %v7498_v24  ;;  %7574 = vadd.xlane.f32.xlu1 %v7573_v41  ;;  %v16085_v24 = vld [vmem:[%s24569_s16 + $0x1] ss:$0 sm:$0xff] }
0x17ba   :  { %v7553_v5 = vadd.f32 %v7547_v56, %v21498_v13  ;;  %v7564_v43 = vadd.f32 %v16082_v1, %v7552_v36 }
0x17bc   :  { %v7576_v0 = vsel %vm145_vm0, %v7564_v43, 0.0  ;;  %v7565_v51 = vadd.f32 %v16082_v1, %v7553_v5  ;;  %v19147_v1 = vld [vmem:[%s24589_s29 + $0x84] ss:$8 sps:$4 sm:$0xff]  }
0x17bd   :  { %7577 = vadd.xlane.f32.xlu0 %v7576_v0  ;;  %7712 = vmatprep.subr.bf16.mxu1 %v19147_v1 }
0x17be   :  { %v7579_v21 = vsel %vm145_vm0, %v7565_v51, 0.0  ;;  %7713 = vmatpush1.bf16.msra.mxu1 %v19145_v59 }
0x17bf   :  { %7580 = vadd.xlane.f32.xlu1 %v7579_v21  ;;  %7714 = vmatprep.subr.bf16.mxu1 %v19150_v63 }
0x17c2   :  { %7715 = vmatpush1.bf16.msra.mxu1 %v19148_v16 }
0x17c3   :  { %7716 = vmatprep.subr.bf16.mxu1 %v19153_v47 }
0x17c6   :  { %7717 = vmatpush1.bf16.msra.mxu1 %v19151_v46 }
0x17c7   :  { %7718 = vmatprep.subr.bf16.mxu1 %v19156_v12 }
0x17ca   :  { %7719 = vmatpush1.bf16.msra.mxu1 %v19154_v4 }
0x1842   :  { %v7572_v10 = vpop.xlane.xlu0 %7571 }
0x1843   :  { %v7582_v19 = vmul.f32 0.015625, %v7572_v10 }
0x1845   :  { %v7586_v25 = vsub.f32 %v7562_v6, %v7582_v19  ;;  %v7575_v55 = vpop.xlane.xlu1 %7574 }
0x1846   :  { %v7583_v49 = vmul.f32 0.015625, %v7575_v55 }
0x1847   :  { %v7590_v52 = vmul.f32 %v7586_v25, %v7586_v25 }
0x1848   :  { %v7587_v45 = vsub.f32 %v7563_v3, %v7583_v49 }
0x1849   :  { %v7594_v61 = vsel %vm145_vm0, %v7590_v52, 0.0 }
0x184a   :  { %7595 = vadd.xlane.f32.xlu0 %v7594_v61  ;;  %v7578_v15 = vpop.xlane.xlu0 %7577  ;;  %v7591_v13 = vmul.f32 %v7587_v45, %v7587_v45 }
0x184b   :  { %v7584_v8 = vmul.f32 0.015625, %v7578_v15 }
0x184c   :  { %v7597_v48 = vsel %vm145_vm0, %v7591_v13, 0.0  ;;  %v7581_v9 = vpop.xlane.xlu1 %7580 }
0x184d   :  { %v7588_v58 = vsub.f32 %v7564_v43, %v7584_v8  ;;  %7598 = vadd.xlane.f32.xlu1 %v7597_v48  ;;  %v7585_v35 = vmul.f32 0.015625, %v7581_v9  ;;  %v16086_v43 = vld [vmem:[%s24570_s17 + $0x1] ss:$0 sm:$0xff]  ;;  %v16095_v8 = vld [vmem:[%s24558_s7 + $0x4] sm:$0x3] }
0x184e   :  { %v7659_v48 = vrot.slane %v16095_v8, %v19936_v28 }
0x184f   :  { %v7589_v62 = vsub.f32 %v7565_v51, %v7585_v35  ;;  %v7592_v54 = vmul.f32 %v7588_v58, %v7588_v58 }
0x1851   :  { %v7600_v38 = vsel %vm145_vm0, %v7592_v54, 0.0  ;;  %v7593_v26 = vmul.f32 %v7589_v62, %v7589_v62 }
0x1852   :  { %7601 = vadd.xlane.f32.xlu0 %v7600_v38 }
0x1853   :  { %v7603_v23 = vsel %vm145_vm0, %v7593_v26, 0.0 }
0x1854   :  { %7604 = vadd.xlane.f32.xlu1 %v7603_v23 }
0x18d7   :  { %v7596_v22 = vpop.xlane.xlu0 %7595 }
0x18d8   :  { %v7606_v60 = vmul.f32 0.015625, %v7596_v22 }
0x18da   :  { %v7610_v57 = vadd.f32 1e-05, %v7606_v60  ;;  %v7599_v53 = vpop.xlane.xlu1 %7598 }
0x18db   :  { %v7607_v6 = vmul.f32 0.015625, %v7599_v53 }
0x18dc   :  { %19589 = vrsqrt.f32 %v7610_v57 }
0x18dd   :  { %v7611_v42 = vadd.f32 1e-05, %v7607_v6 }
0x18df   :  { %19591 = vrsqrt.f32 %v7611_v42  ;;  %v7602_v11 = vpop.xlane.xlu0 %7601 }
0x18e0   :  { %v7608_v44 = vmul.f32 0.015625, %v7602_v11 }
0x18e1   :  { %v7605_v17 = vpop.xlane.xlu1 %7604 }
0x18e2   :  { %v7612_v50 = vadd.f32 1e-05, %v7608_v44  ;;  %v7609_v7 = vmul.f32 0.015625, %v7605_v17 }
0x18e4   :  { %19593 = vrsqrt.f32 %v7612_v50  ;;  %v7613_v3 = vadd.f32 1e-05, %v7609_v7 }
0x18e6   :  { %v19590_v2 = vpop.eup %19589  ;;  %19595 = vrsqrt.f32 %v7613_v3 }
0x18e7   :  { %v7618_v41 = vmul.f32 %v19590_v2, %v7586_v25 }
0x18e9   :  { %v19592_v36 = vpop.eup %19591  ;;  %v7628_v56 = vmul.f32 %v16085_v24, %v7618_v41 }
0x18ea   :  { %v7619_v5 = vmul.f32 %v19592_v36, %v7587_v45 }
0x18eb   :  { %v22266_v21 = vadd.f32 %v16086_v43, %v7628_v56 }
0x18ec   :  { %v7629_v0 = vmul.f32 %v16085_v24, %v7619_v5 }
0x18ee   :  { %v19594_v51 = vpop.eup %19593  ;;  %v22268_v10 = vadd.f32 %v16086_v43, %v7629_v0 }
0x18ef   :  { %v7620_v19 = vmul.f32 %v19594_v51, %v7588_v58  ;;  %v7663_v58 = vrot.slane %v16095_v8, %v19942_v30 }
0x18f0   :  { %v19596_v55 = vpop.eup %19595  ;;  %v7642_v49 = vpack.c.bf16 %v22268_v10, %v22266_v21 }
0x18f1   :  { %v7621_v52 = vmul.f32 %v19596_v55, %v7589_v62  ;;  %v7630_v25 = vmul.f32 %v16085_v24, %v7620_v19 }
0x18f2   :  { %16104 = vmatmul.mubr.msk.bf16.vlgmr.msra.gmra.mrb[176].mxu1 %vm145_vm0, %v7642_v49 }
0x18f3   :  { %7754 = vmatprep.mubr.bf16.mxu1 %v19757_v14  ;;  %v7631_v45 = vmul.f32 %v16085_v24, %v7621_v52  ;;  %v22274_v61 = vadd.f32 %v16086_v43, %v7630_v25 }
0x18f5   :  { %v22276_v15 = vadd.f32 %v16086_v43, %v7631_v45 }
0x18f7   :  { %v7643_v13 = vpack.c.bf16 %v22276_v15, %v22274_v61 }
0x18fa   :  { %16105 = vmatmul.mubr.msk.bf16.gmra.mrb[180].mxu1 %vm145_vm0, %v7643_v13 }
0x19c5   :  { %v7746_v9 = vpop.f32.mrb[176].mxu1 }
0x19c6   :  { %v7748_v35 = vpop.f32.mrb[177].mxu1  ;;  %v7747_v54 = vadd.f32 %v7746_v9, %v7659_v48 }
0x19c7   :  { %v7750_v62 = vpop.f32.mrb[178].mxu1  ;;  %v7749_v23 = vadd.f32 %v7748_v35, %v7663_v58 }
0x19c8   :  { %v7751_v38 = vadd.f32 %v7750_v62, %v7659_v48  ;;  %v7752_v26 = vpop.f32.mrb[179].mxu1 }
0x19c9   :  { %v7753_v1 = vadd.f32 %v7752_v26, %v7663_v58 }
0x19ca   :  { %v22286_v59 = vpack.c.bf16 %v7751_v38, %v7747_v54 }
0x19cb   :  { %v22288_v63 = vpack.c.bf16 %v7753_v1, %v7749_v23 }
0x19cc   :  { %7771 = vrot.lane.b32.xlu0 %v22286_v59, %s19759_s24  ;;  %18566 = vmatprep.mubr.msk.bf16.mxu0 %vm332_vm1, %v22286_v59 }
0x19cd   :  { %v7756_v16 = vpop.f32.mrb[180].mxu1  ;;  %18570 = vmatprep.subr.bf16.mxu1 %v22288_v63 }
0x19ce   :  { %v7758_v47 = vpop.f32.mrb[181].mxu1  ;;  %18571 = vmatpush3.bf16.msra.mxu1 %v22288_v63  ;;  %v7757_v12 = vadd.f32 %v7756_v16, %v7659_v48 }
0x19cf   :  { %v7760_v46 = vpop.f32.mrb[182].mxu1  ;;  %v7759_v60 = vadd.f32 %v7758_v47, %v7663_v58 }
0x19d0   :  { %v7761_v4 = vadd.f32 %v7760_v46, %v7659_v48  ;;  %v7762_v22 = vpop.f32.mrb[183].mxu1 }
0x19d1   :  { %v7763_v57 = vadd.f32 %v7762_v22, %v7663_v58 }
0x19d2   :  { %v22296_v53 = vpack.c.bf16 %v7761_v4, %v7757_v12 }
0x19d3   :  { %v22298_v6 = vpack.c.bf16 %v7763_v57, %v7759_v60 }
0x19d4   :  { %7956 = vrot.lane.b32.xlu0 %v22296_v53, %s19758_s23  ;;  %7773 = vrot.lane.b32.xlu1 %v22296_v53, %s19759_s24 }
0x19d5   :  { %18572 = vmatprep.subr.bf16.mxu1 %v22298_v6 }
0x19d6   :  { %18573 = vmatpush3.bf16.msra.mxu1 %v22298_v6 }
0x19d8   :  { %7952 = vrot.lane.b32.xlu0 %v22296_v53, %s19760_s5  ;;  %7954 = vrot.lane.b32.xlu1 %v22286_v59, %s19758_s23 }
0x19dc   :  { %8268 = vrot.lane.b32.xlu0 %v22296_v53, %s19761_s22  ;;  %7950 = vrot.lane.b32.xlu1 %v22286_v59, %s19760_s5 }
0x19e0   :  { %8264 = vrot.lane.b32.xlu0 %v22296_v53, %s24581_s6  ;;  %8266 = vrot.lane.b32.xlu1 %v22286_v59, %s19761_s22 }
0x19e4   :  { %8262 = vrot.lane.b32.xlu1 %v22286_v59, %s24581_s6 }
0x1a3e   :  { %v7772_v42 = vpop.permute.xlu0 %7771 }
0x1a3f   :  { %18822 = vmatprep.subr.msk.bf16.mxu0 %vm332_vm1, %v7772_v42  ;;  %v7782_v11 = vsel %vm332_vm1, %v7772_v42, 0 }
0x1a40   :  { %18563 = vmatpush3.bf16.xpose.msra.mxu0 %v7782_v11 }
0x1a46   :  { %v7774_v44 = vpop.permute.xlu1 %7773  ;;  %v7957_v2 = vpop.permute.xlu0 %7956 }
0x1a47   :  { %18823 = vmatprep.subr.msk.bf16.mxu0 %vm332_vm1, %v7774_v44  ;;  %v7785_v17 = vsel %vm332_vm1, %v7774_v44, 0  ;;  %v7968_v24 = vsel %vm332_vm1, %v7957_v2, 0 }
0x1a48   :  { %18565 = vmatpush3.bf16.xpose.msra.mxu0 %v7785_v17 }
0x1a4a   :  { %v7955_v50 = vpop.permute.xlu1 %7954  ;;  %v7953_v36 = vpop.permute.xlu0 %7952 }
0x1a4b   :  { %18824 = vmatprep.subr.msk.bf16.mxu0 %vm332_vm1, %v7955_v50  ;;  %v7965_v3 = vsel %vm332_vm1, %v7955_v50, 0 }
0x1a4e   :  { %v7951_v7 = vpop.permute.xlu1 %7950  ;;  %v8269_v43 = vpop.permute.xlu0 %8268 }
0x1a4f   :  { %18567 = vmatmul.mubr.msk.bf16.vlgmr.msra.gmra.mrb[172].mxu0 %vm332_vm1, %v22296_v53  ;;  %v8280_v0 = vsel %vm332_vm1, %v8269_v43, 0 }
0x1a50   :  { %18579 = vmatpush3.bf16.xpose.msra.mxu0 %v7965_v3  ;;  %18582 = vmatprep.mubr.msk.bf16.mxu0 %vm332_vm1, %v7951_v7 }
0x1a51   :  { %18825 = vmatprep.subr.msk.bf16.mxu0 %vm332_vm1, %v7957_v2 }
0x1a52   :  { %v8267_v41 = vpop.permute.xlu1 %8266  ;;  %v8265_v51 = vpop.permute.xlu0 %8264 }
0x1a53   :  { %v8277_v5 = vsel %vm332_vm1, %v8267_v41, 0 }
0x1a56   :  { %v8263_v56 = vpop.permute.xlu1 %8262 }
0x1a58   :  { %18581 = vmatpush3.bf16.xpose.msra.mxu0 %v7968_v24 }
0x1a59   :  { %18826 = vmatprep.subr.msk.bf16.mxu0 %vm332_vm1, %v8267_v41 }
0x1a5f   :  { %18583 = vmatmul.mubr.msk.bf16.vlgmr.msra.gmra.mrb[176].mxu0 %vm332_vm1, %v7953_v36 }
0x1a60   :  { %18607 = vmatpush3.bf16.xpose.msra.mxu0 %v8277_v5  ;;  %18610 = vmatprep.mubr.msk.bf16.mxu0 %vm332_vm1, %v8263_v56 }
0x1a61   :  { %18827 = vmatprep.subr.msk.bf16.mxu0 %vm332_vm1, %v8269_v43 }
0x1a68   :  { %18609 = vmatpush3.bf16.xpose.msra.mxu0 %v8280_v0 }
0x1a6f   :  { %18611 = vmatmul.mubr.msk.bf16.vlgmr.msra.gmra.mrb[180].mxu0 %vm332_vm1, %v8265_v51 }
0x1b22   :  { %v18568_v19 = vpop.f32.mrb[172].mxu0 }
0x1b23   :  { %v7821_v55 = vpop.f32.mrb[173].mxu0  ;;  %v7838_v13 = vmul.f32 0.25, %v18568_v19 }
0x1b24   :  { %v7836_v49 = vmul.f32 0.25, %v7821_v55  ;;  %v18569_v52 = vpop.f32.mrb[174].mxu0 }
0x1b25   :  { %v7839_v25 = vmul.f32 0.25, %v18569_v52  ;;  %v7824_v45 = vpop.f32.mrb[175].mxu0  ;;  %v7842_v62 = vadd.f32 %v7838_v13, %v20020_v39 }
0x1b26   :  { %v7840_v8 = vadd.f32 %v7836_v49, %v20013_v18  ;;  %v7837_v48 = vmul.f32 0.25, %v7824_v45 }
0x1b27   :  { %v7843_v9 = vadd.f32 %v7839_v25, %v20017_v32  ;;  %v7850_v26 = vsel %vm402_vm6, %v7842_v62, -inf }
0x1b28   :  { %v7841_v58 = vadd.f32 %v7837_v48, %v20015_v31  ;;  %v7844_v35 = vsel %vm402_vm6, %v7840_v8, -inf }
0x1b29   :  { %7845 = vmax.xlane.f32.xlu1 %v7844_v35  ;;  %v7853_v38 = vsel %vm402_vm6, %v7843_v9, -inf }
0x1b2a   :  { %v7847_v54 = vsel %vm402_vm6, %v7841_v58, -inf }
0x1b2b   :  { %7848 = vmax.xlane.f32.xlu0 %v7847_v54 }
0x1b2d   :  { %7854 = vmax.xlane.f32.xlu1 %v7853_v38 }
0x1b2f   :  { %7851 = vmax.xlane.f32.xlu0 %v7850_v26 }
0x1b32   :  { %v18584_v23 = vpop.f32.mrb[176].mxu0 }
0x1b33   :  { %v8004_v1 = vpop.f32.mrb[177].mxu0  ;;  %v8021_v16 = vmul.f32 0.25, %v18584_v23 }
0x1b34   :  { %v8019_v47 = vmul.f32 0.25, %v8004_v1  ;;  %v18585_v46 = vpop.f32.mrb[178].mxu0 }
0x1b35   :  { %v8007_v12 = vpop.f32.mrb[179].mxu0  ;;  %v8022_v22 = vmul.f32 0.25, %v18585_v46  ;;  %v8025_v57 = vadd.f32 %v8021_v16, %v20020_v39 }
0x1b36   :  { %v8023_v4 = vadd.f32 %v8019_v47, %v20013_v18  ;;  %v8020_v60 = vmul.f32 0.25, %v8007_v12 }
0x1b37   :  { %v8026_v44 = vadd.f32 %v8022_v22, %v20017_v32  ;;  %v8033_v50 = vsel %vm402_vm6, %v8025_v57, -inf }
0x1b38   :  { %v8024_v42 = vadd.f32 %v8020_v60, %v20015_v31  ;;  %v8027_v11 = vsel %vm402_vm6, %v8023_v4, -inf }
0x1b39   :  { %8028 = vmax.xlane.f32.xlu0 %v8027_v11  ;;  %v8036_v7 = vsel %vm402_vm6, %v8026_v44, -inf }
0x1b3a   :  { %v8030_v17 = vsel %vm402_vm6, %v8024_v42, -inf }
0x1b3b   :  { %8031 = vmax.xlane.f32.xlu1 %v8030_v17 }
0x1b3d   :  { %8034 = vmax.xlane.f32.xlu0 %v8033_v50 }
0x1b3f   :  { %8037 = vmax.xlane.f32.xlu1 %v8036_v7 }
0x1b42   :  { %v22354_v3 = vpop.f32.mrb[180].mxu0 }
0x1b43   :  { %v22356_v2 = vpop.f32.mrb[181].mxu0 }
0x1b44   :  { %v22358_v24 = vpop.f32.mrb[182].mxu0 }
0x1b45   :  { %v8319_v41 = vpop.f32.mrb[183].mxu0 }
0x1bb6   :  { %v7846_v36 = vpop.xlane.xlu1 %7845 }
0x1bb7   :  { %v7856_v0 = vsub.f32 %v7840_v8, %v7846_v36 }
0x1bb8   :  { %v7849_v56 = vpop.xlane.xlu0 %7848 }
0x1bb9   :  { %v7857_v5 = vsub.f32 %v7841_v58, %v7849_v56  ;;  %v7860_v25 = vmul.f32 1.442695, %v7856_v0  ;;  %v8333_v0 = vmul.f32 0.25, %v22354_v3 }
0x1bba   :  { %v7855_v43 = vpop.xlane.xlu1 %7854 }
0x1bbb   :  { %v7859_v51 = vsub.f32 %v7843_v9, %v7855_v43  ;;  %v7862_v19 = vmul.f32 1.442695, %v7857_v5  ;;  %v8332_v5 = vmul.f32 0.25, %v8319_v41  ;;  %v8331_v43 = vmul.f32 0.25, %v22356_v2 }
0x1bbc   :  { %v7852_v55 = vpop.xlane.xlu0 %7851 }
0x1bbd   :  { %v7866_v49 = vmul.f32 1.442695, %v7859_v51  ;;  %v7858_v52 = vsub.f32 %v7842_v62, %v7852_v55  ;;  %v22407_v51 = vadd.f32 %v8332_v5, %v20015_v31  ;;  %v8334_v55 = vmul.f32 0.25, %v22358_v24 }
0x1bbf   :  { %19597 = vpow2.f32 %v7866_v49  ;;  %v7864_v45 = vmul.f32 1.442695, %v7858_v52  ;;  %v22414_v49 = vadd.f32 %v8333_v0, %v20020_v39 }
0x1bc0   :  { %19599 = vpow2.f32 %v7862_v19  ;;  %v22410_v19 = vadd.f32 %v8331_v43, %v20013_v18 }
0x1bc1   :  { %19601 = vpow2.f32 %v7864_v45  ;;  %v8345_v2 = vsel %vm402_vm6, %v22414_v49, -inf }
0x1bc2   :  { %19603 = vpow2.f32 %v7860_v25  ;;  %v8339_v3 = vsel %vm402_vm6, %v22410_v19, -inf }
0x1bc6   :  { %v8029_v13 = vpop.xlane.xlu0 %8028 }
0x1bc7   :  { %v8039_v48 = vsub.f32 %v8023_v4, %v8029_v13 }
0x1bc8   :  { %v8032_v35 = vpop.xlane.xlu1 %8031 }
0x1bc9   :  { %v22360_v54 = vpop.eup %19597  ;;  %v8040_v62 = vsub.f32 %v8024_v42, %v8032_v35  ;;  %v8043_v23 = vmul.f32 1.442695, %v8039_v48 }
0x1bca   :  { %v22362_v38 = vpop.eup %19599  ;;  %v8035_v58 = vpop.xlane.xlu0 %8034  ;;  %v7877_v8 = vsel %vm402_vm6, %v22360_v54, 0.0 }
0x1bcb   :  { %v22366_v9 = vpop.eup %19601  ;;  %v8041_v26 = vsub.f32 %v8025_v57, %v8035_v58  ;;  %7878 = vadd.xlane.f32.xlu1 %v7877_v8  ;;  %v7871_v4 = vsel %vm402_vm6, %v22362_v38, 0.0  ;;  %v8045_v22 = vmul.f32 1.442695, %v8040_v62 }
0x1bcc   :  { %v8038_v1 = vpop.xlane.xlu1 %8037  ;;  %v7874_v16 = vsel %vm402_vm6, %v22366_v9, 0.0  ;;  %v22370_v47 = vpop.eup %19603 }
0x1bcd   :  { %v8047_v46 = vmul.f32 1.442695, %v8041_v26  ;;  %v8042_v12 = vsub.f32 %v8026_v44, %v8038_v1  ;;  %7875 = vadd.xlane.f32.xlu0 %v7874_v16  ;;  %v7868_v57 = vsel %vm402_vm6, %v22370_v47, 0.0 }
0x1bcf   :  { %19605 = vpow2.f32 %v8047_v46  ;;  %v8049_v60 = vmul.f32 1.442695, %v8042_v12  ;;  %7872 = vadd.xlane.f32.xlu1 %v7871_v4 }
0x1bd0   :  { %19607 = vpow2.f32 %v8043_v23 }
0x1bd1   :  { %19609 = vpow2.f32 %v8049_v60  ;;  %7869 = vadd.xlane.f32.xlu0 %v7868_v57 }
0x1bd2   :  { %19611 = vpow2.f32 %v8045_v22 }
0x1bd9   :  { %v22376_v42 = vpop.eup %19605 }
0x1bda   :  { %v22378_v11 = vpop.eup %19607  ;;  %v8057_v44 = vsel %vm402_vm6, %v22376_v42, 0.0 }
0x1bdb   :  { %v22382_v17 = vpop.eup %19609  ;;  %8058 = vadd.xlane.f32.xlu0 %v8057_v44  ;;  %v8051_v36 = vsel %vm402_vm6, %v22378_v11, 0.0 }
0x1bdc   :  { %v8060_v50 = vsel %vm402_vm6, %v22382_v17, 0.0  ;;  %v22386_v7 = vpop.eup %19611 }
0x1bdd   :  { %8061 = vadd.xlane.f32.xlu1 %v8060_v50  ;;  %v8054_v56 = vsel %vm402_vm6, %v22386_v7, 0.0 }
0x1bdf   :  { %8052 = vadd.xlane.f32.xlu0 %v8051_v36 }
0x1be1   :  { %8055 = vadd.xlane.f32.xlu1 %v8054_v56 }
0x1bf2   :  { %8077 = vrot.lane.b32.xlu1 %v22298_v6, %s19760_s5 }
0x1bf5   :  { %8075 = vrot.lane.b32.xlu0 %v22288_v63, %s19760_s5 }
0x1bf6   :  { %8519 = vrot.lane.b32.xlu1 %v22286_v59, %s24592_s30 }
0x1bf9   :  { %8521 = vrot.lane.b32.xlu0 %v22296_v53, %s24592_s30 }
0x1bfa   :  { %8515 = vrot.lane.b32.xlu1 %v22286_v59, %s24591_s26  ;;  %v8342_v59 = vsel %vm402_vm6, %v22407_v51, -inf }
0x1bfd   :  { %8517 = vrot.lane.b32.xlu0 %v22296_v53, %s24591_s26  ;;  %v22419_v53 = vadd.f32 %v8334_v55, %v20017_v32 }
0x1bff   :  { %v8348_v24 = vsel %vm402_vm6, %v22419_v53, -inf }
0x1c1c   :  { %8343 = vmax.xlane.f32.xlu0 %v8342_v59 }
0x1c1e   :  { %8340 = vmax.xlane.f32.xlu1 %v8339_v3 }
0x1c20   :  { %8346 = vmax.xlane.f32.xlu0 %v8345_v2 }
0x1c22   :  { %8349 = vmax.xlane.f32.xlu1 %v8348_v24 }
0x1c58   :  { %v7879_v41 = vpop.xlane.xlu1 %7878 }
0x1c5a   :  { %v7876_v52 = vpop.xlane.xlu0 %7875 }
0x1c5b   :  { %19613 = vrcp.f32 %v7876_v52 }
0x1c5c   :  { %v7873_v25 = vpop.xlane.xlu1 %7872 }
0x1c5d   :  { %19615 = vrcp.f32 %v7873_v25 }
0x1c5e   :  { %19617 = vrcp.f32 %v7879_v41  ;;  %v7870_v45 = vpop.xlane.xlu0 %7869 }
0x1c5f   :  { %19619 = vrcp.f32 %v7870_v45 }
0x1c65   :  { %v19614_v13 = vpop.eup %19613 }
0x1c66   :  { %v7886_v62 = vmul.f32 %v19614_v13, %v22366_v9 }
0x1c67   :  { %v19616_v48 = vpop.eup %19615 }
0x1c68   :  { %v19618_v35 = vpop.eup %19617  ;;  %v8059_v58 = vpop.xlane.xlu0 %8058  ;;  %v7885_v1 = vmul.f32 %v19616_v48, %v22362_v38 }
0x1c69   :  { %v19620_v8 = vpop.eup %19619  ;;  %v7887_v16 = vmul.f32 %v19618_v35, %v22360_v54 }
0x1c6a   :  { %v8062_v26 = vpop.xlane.xlu1 %8061  ;;  %v7884_v23 = vmul.f32 %v19620_v8, %v22370_v47 }
0x1c6b   :  { %19621 = vrcp.f32 %v8062_v26  ;;  %v7889_v4 = vpack.c.bf16 %v7887_v16, %v7886_v62  ;;  %v19158_v16 = vld [vmem:[%s24561_s8 + $0x40] sm:$0xff]  }
0x1c6c   :  { %v8053_v46 = vpop.xlane.xlu0 %8052  ;;  %v7888_v12 = vpack.c.bf16 %v7885_v1, %v7884_v23  ;;  %v19157_v1 = vld [vmem:[%s24561_s8 + $0x48] sm:$0xff]  }
0x1c6d   :  { %19623 = vrcp.f32 %v8053_v46 }
0x1c6e   :  { %19625 = vrcp.f32 %v8059_v58  ;;  %v8056_v22 = vpop.xlane.xlu1 %8055  ;;  %18574 = vmatprep.mubr.msk.bf16.mxu1 %vm402_vm6, %v7888_v12 }
0x1c6f   :  { %19627 = vrcp.f32 %v8056_v22  ;;  %18575 = vmatmul.mubr.msk.bf16.vlgmr.msra.gmra.mrb[184].mxu1 %vm402_vm6, %v7889_v4 }
0x1c70   :  { %v8076_v9 = vpop.permute.xlu0 %8075 }
0x1c71   :  { %18586 = vmatprep.subr.bf16.mxu1 %v8076_v9 }
0x1c72   :  { %v8078_v60 = vpop.permute.xlu1 %8077  ;;  %18587 = vmatpush3.bf16.msra.mxu1 %v8076_v9 }
0x1c73   :  { %18588 = vmatprep.subr.bf16.mxu1 %v8078_v60 }
0x1c74   :  { %v8522_v50 = vpop.permute.xlu0 %8521 }
0x1c75   :  { %v19622_v38 = vpop.eup %19621  ;;  %v8533_v2 = vsel %vm332_vm1, %v8522_v50, 0 }
0x1c76   :  { %v8520_v47 = vpop.permute.xlu1 %8519  ;;  %18589 = vmatpush3.bf16.msra.mxu1 %v8078_v60  ;;  %v8070_v56 = vmul.f32 %v19622_v38, %v22382_v17 }
0x1c77   :  { %v19624_v54 = vpop.eup %19623  ;;  %18828 = vmatprep.subr.msk.bf16.mxu0 %vm332_vm1, %v8520_v47  ;;  %v8530_v57 = vsel %vm332_vm1, %v8520_v47, 0  ;;  %18594 = vmatprep.subr.bf16.mxu1 %v19157_v1 }
0x1c78   :  { %v19626_v44 = vpop.eup %19625  ;;  %18629 = vmatpush3.bf16.xpose.msra.mxu0 %v8530_v57  ;;  %v8067_v43 = vmul.f32 %v19624_v54, %v22378_v11  ;;  %v8518_v17 = vpop.permute.xlu0 %8517 }
0x1c79   :  { %v19628_v36 = vpop.eup %19627  ;;  %18829 = vmatprep.subr.msk.bf16.mxu0 %vm332_vm1, %v8522_v50  ;;  %v8069_v55 = vmul.f32 %v19626_v44, %v22376_v42 }
0x1c7a   :  { %v8516_v5 = vpop.permute.xlu1 %8515  ;;  %v8068_v0 = vmul.f32 %v19628_v36, %v22386_v7 }
0x1c7b   :  { %18632 = vmatprep.mubr.msk.bf16.mxu0 %vm332_vm1, %v8516_v5  ;;  %v8072_v3 = vpack.c.bf16 %v8070_v56, %v8069_v55 }
0x1c7c   :  { %v8071_v59 = vpack.c.bf16 %v8068_v0, %v8067_v43 }
0x1c7e   :  { %18590 = vmatprep.mubr.msk.bf16.mxu1 %vm402_vm6, %v8071_v59 }
0x1c7f   :  { %18591 = vmatmul.mubr.msk.bf16.vlgmr.msra.gmra.mrb[188].mxu1 %vm402_vm6, %v8072_v3 }
0x1c80   :  { %18631 = vmatpush3.bf16.xpose.msra.mxu0 %v8533_v2  ;;  %18595 = vmatpush3.bf16.msra.mxu1 %v19157_v1 }
0x1c81   :  { %18600 = vmatprep.subr.bf16.mxu1 %v19158_v16 }
0x1c87   :  { %18633 = vmatmul.mubr.msk.bf16.vlgmr.msra.gmra.mrb[184].mxu0 %vm332_vm1, %v8518_v17 }
0x1c88   :  { %9370 = vmatprep.mubr.bf16.mxu0 %v19757_v14 }
0x1ca9   :  { %v8344_v11 = vpop.xlane.xlu0 %8343 }
0x1caa   :  { %v8352_v41 = vsub.f32 %v22407_v51, %v8344_v11 }
0x1cab   :  { %v8341_v7 = vpop.xlane.xlu1 %8340 }
0x1cac   :  { %v8351_v42 = vsub.f32 %v22410_v19, %v8341_v7  ;;  %v8357_v35 = vmul.f32 1.442695, %v8352_v41 }
0x1cad   :  { %v8347_v24 = vpop.xlane.xlu0 %8346 }
0x1cae   :  { %v8353_v52 = vsub.f32 %v22414_v49, %v8347_v24  ;;  %v8355_v25 = vmul.f32 1.442695, %v8351_v42 }
0x1caf   :  { %v8350_v45 = vpop.xlane.xlu1 %8349 }
0x1cb0   :  { %v8359_v13 = vmul.f32 1.442695, %v8353_v52  ;;  %v8354_v48 = vsub.f32 %v22419_v53, %v8350_v45 }
0x1cb2   :  { %19629 = vpow2.f32 %v8359_v13  ;;  %v8361_v58 = vmul.f32 1.442695, %v8354_v48 }
0x1cb3   :  { %19631 = vpow2.f32 %v8355_v25 }
0x1cb4   :  { %19633 = vpow2.f32 %v8361_v58 }
0x1cb5   :  { %19635 = vpow2.f32 %v8357_v35 }
0x1cbc   :  { %v22450_v8 = vpop.eup %19629 }
0x1cbd   :  { %v19632_v62 = vpop.eup %19631  ;;  %v8369_v19 = vsel %vm402_vm6, %v22450_v8, 0.0 }
0x1cbe   :  { %v22454_v51 = vpop.eup %19633  ;;  %8370 = vadd.xlane.f32.xlu0 %v8369_v19  ;;  %v8363_v53 = vsel %vm402_vm6, %v19632_v62, 0.0 }
0x1cbf   :  { %v8372_v49 = vsel %vm402_vm6, %v22454_v51, 0.0  ;;  %v19636_v26 = vpop.eup %19635 }
0x1cc0   :  { %8373 = vadd.xlane.f32.xlu1 %v8372_v49  ;;  %v8366_v23 = vsel %vm402_vm6, %v19636_v26, 0.0 }
0x1cc2   :  { %8364 = vadd.xlane.f32.xlu0 %v8363_v53 }
0x1cc4   :  { %8367 = vadd.xlane.f32.xlu1 %v8366_v23 }
0x1cd5   :  { %8387 = vrot.lane.b32.xlu1 %v22298_v6, %s24581_s6 }
0x1cd8   :  { %8385 = vrot.lane.b32.xlu0 %v22288_v63, %s24581_s6 }
0x1d42   :  { %v18576_v46 = vpop.f32.mrb[184].mxu1 }
0x1d43   :  { %v7930_v12 = vpop.f32.mrb[185].mxu1 }
0x1d44   :  { %v18577_v4 = vpop.f32.mrb[186].mxu1 }
0x1d45   :  { %v7946_v22 = vpack.c.bf16 %v18577_v4, %v18576_v46  ;;  %v7933_v9 = vpop.f32.mrb[187].mxu1  ;;  %v19159_v4 = vld [vmem:[%s24561_s8 + $0x50] sm:$0xff]  }
0x1d46   :  { %v7945_v60 = vpack.c.bf16 %v7933_v9, %v7930_v12 }
0x1d4b   :  { %v8371_v38 = vpop.xlane.xlu0 %8370 }
0x1d4d   :  { %v8374_v47 = vpop.xlane.xlu1 %8373 }
0x1d4f   :  { %v8365_v57 = vpop.xlane.xlu0 %8364 }
0x1d51   :  { %v8368_v54 = vpop.xlane.xlu1 %8367 }
0x1d52   :  { %v18592_v44 = vpop.f32.mrb[188].mxu1  ;;  %19637 = vrcp.f32 %v8368_v54 }
0x1d53   :  { %v8121_v50 = vpop.f32.mrb[189].mxu1  ;;  %19639 = vrcp.f32 %v8365_v57  ;;  %v8386_v0 = vpop.permute.xlu0 %8385 }
0x1d54   :  { %v18593_v36 = vpop.f32.mrb[190].mxu1  ;;  %19641 = vrcp.f32 %v8374_v47 }
0x1d55   :  { %v8137_v56 = vpack.c.bf16 %v18593_v36, %v18592_v44  ;;  %v8124_v5 = vpop.f32.mrb[191].mxu1  ;;  %19643 = vrcp.f32 %v8371_v38 }
0x1d56   :  { %v8136_v43 = vpack.c.bf16 %v8124_v5, %v8121_v50 }
0x1d58   :  { %18596 = vmatprep.mubr.msk.bf16.mxu1 %vm332_vm1, %v8136_v43 }
0x1d59   :  { %18597 = vmatmul.mubr.msk.bf16.vlgmr.msra.gmra.mrb[192].mxu1 %vm332_vm1, %v8137_v56 }
0x1d5a   :  { %18601 = vmatpush3.bf16.msra.mxu1 %v19158_v16  ;;  %18602 = vmatprep.mubr.msk.bf16.mxu1 %vm332_vm1, %v7945_v60  ;;  %v18634_v55 = vpop.f32.mrb[184].mxu0  ;;  %v8388_v16 = vpop.permute.xlu1 %8387 }
0x1d5b   :  { %18614 = vmatprep.subr.bf16.mxu1 %v8386_v0  ;;  %v8569_v59 = vpop.f32.mrb[185].mxu0  ;;  %v8586_v42 = vmul.f32 0.25, %v18634_v55 }
0x1d5c   :  { %v8584_v3 = vmul.f32 0.25, %v8569_v59  ;;  %v18635_v2 = vpop.f32.mrb[186].mxu0  ;;  %v19638_v17 = vpop.eup %19637 }
0x1d5d   :  { %v8587_v11 = vmul.f32 0.25, %v18635_v2  ;;  %v8572_v7 = vpop.f32.mrb[187].mxu0  ;;  %v19640_v52 = vpop.eup %19639  ;;  %v8380_v48 = vmul.f32 %v19638_v17, %v19636_v26  ;;  %v8590_v35 = vadd.f32 %v8586_v42, %v20020_v39 }
0x1d5e   :  { %v8588_v24 = vadd.f32 %v8584_v3, %v20013_v18  ;;  %v8585_v41 = vmul.f32 0.25, %v8572_v7  ;;  %v8379_v19 = vmul.f32 %v19640_v52, %v19632_v62  ;;  %v19642_v49 = vpop.eup %19641 }
0x1d5f   :  { %v8591_v25 = vadd.f32 %v8587_v11, %v20017_v32  ;;  %v19644_v1 = vpop.eup %19643  ;;  %v8598_v26 = vsel %vm402_vm6, %v8590_v35, -inf  ;;  %v8382_v46 = vmul.f32 %v19642_v49, %v22454_v51 }
0x1d60   :  { %v8589_v45 = vadd.f32 %v8585_v41, %v20015_v31  ;;  %v8592_v13 = vsel %vm402_vm6, %v8588_v24, -inf  ;;  %v8383_v23 = vpack.c.bf16 %v8380_v48, %v8379_v19  ;;  %v8381_v62 = vmul.f32 %v19644_v1, %v22450_v8 }
0x1d61   :  { %8593 = vmax.xlane.f32.xlu1 %v8592_v13  ;;  %v8601_v53 = vsel %vm402_vm6, %v8591_v25, -inf }
0x1d62   :  { %v8595_v58 = vsel %vm402_vm6, %v8589_v45, -inf  ;;  %v8384_v12 = vpack.c.bf16 %v8382_v46, %v8381_v62  ;;  %v19160_v46 = vld [vmem:[%s24561_s8 + $0x58] sm:$0xff]  }
0x1d63   :  { %8596 = vmax.xlane.f32.xlu0 %v8595_v58 }
0x1d65   :  { %18603 = vmatmul.mubr.msk.bf16.vlgmr.msra.gmra.mrb[192].mxu1 %vm332_vm1, %v7946_v22  ;;  %8602 = vmax.xlane.f32.xlu1 %v8601_v53 }
0x1d66   :  { %18615 = vmatpush3.bf16.msra.mxu1 %v8386_v0  ;;  %18618 = vmatprep.mubr.msk.bf16.mxu1 %vm402_vm6, %v8383_v23 }
0x1d67   :  { %18616 = vmatprep.subr.bf16.mxu1 %v8388_v16  ;;  %8599 = vmax.xlane.f32.xlu0 %v8598_v26 }
0x1d6a   :  { %18617 = vmatpush3.bf16.msra.mxu1 %v8388_v16 }
0x1d6b   :  { %18622 = vmatprep.subr.bf16.mxu1 %v19159_v4 }
0x1d6d   :  { %18619 = vmatmul.mubr.msk.bf16.vlgmr.msra.gmra.mrb[196].mxu1 %vm402_vm6, %v8384_v12 }
0x1d6e   :  { %18623 = vmatpush3.bf16.msra.mxu1 %v19159_v4 }
0x1dee   :  { %v8594_v22 = vpop.xlane.xlu1 %8593 }
0x1def   :  { %v8604_v47 = vsub.f32 %v8588_v24, %v8594_v22 }
0x1df0   :  { %v8597_v9 = vpop.xlane.xlu0 %8596 }
0x1df1   :  { %v8605_v60 = vsub.f32 %v8589_v45, %v8597_v9  ;;  %v8608_v50 = vmul.f32 1.442695, %v8604_v47 }
0x1df2   :  { %v8603_v38 = vpop.xlane.xlu1 %8602 }
0x1df3   :  { %v8607_v51 = vsub.f32 %v8591_v25, %v8603_v38  ;;  %v8610_v54 = vmul.f32 1.442695, %v8605_v60  ;;  %v16143_v38 = vld [vmem:[%s24562_s9 + $0x2] ss:$0 sm:$0xff] }
0x1df4   :  { %v8600_v57 = vpop.xlane.xlu0 %8599 }
0x1df5   :  { %v8614_v44 = vmul.f32 1.442695, %v8607_v51  ;;  %v8606_v8 = vsub.f32 %v8590_v35, %v8600_v57 }
0x1df7   :  { %19645 = vpow2.f32 %v8614_v44  ;;  %v8612_v36 = vmul.f32 1.442695, %v8606_v8 }
0x1df8   :  { %19647 = vpow2.f32 %v8610_v54 }
0x1df9   :  { %19649 = vpow2.f32 %v8612_v36 }
0x1dfa   :  { %19651 = vpow2.f32 %v8608_v50 }
0x1e01   :  { %v19646_v56 = vpop.eup %19645 }
0x1e02   :  { %v19648_v5 = vpop.eup %19647  ;;  %v8625_v43 = vsel %vm402_vm6, %v19646_v56, 0.0 }
0x1e03   :  { %v19650_v0 = vpop.eup %19649  ;;  %8626 = vadd.xlane.f32.xlu1 %v8625_v43  ;;  %v8619_v3 = vsel %vm402_vm6, %v19648_v5, 0.0 }
0x1e04   :  { %v8622_v55 = vsel %vm402_vm6, %v19650_v0, 0.0  ;;  %v19652_v59 = vpop.eup %19651 }
0x1e05   :  { %8623 = vadd.xlane.f32.xlu0 %v8622_v55  ;;  %v8616_v2 = vsel %vm402_vm6, %v19652_v59, 0.0 }
0x1e07   :  { %8620 = vadd.xlane.f32.xlu1 %v8619_v3 }
0x1e09   :  { %8617 = vadd.xlane.f32.xlu0 %v8616_v2 }
0x1e18   :  { %8640 = vrot.lane.b32.xlu1 %v22298_v6, %s24591_s26 }
0x1e1f   :  { %8638 = vrot.lane.b32.xlu0 %v22288_v63, %s24591_s26 }
0x1e40   :  { %v18620_v17 = vpop.f32.mrb[196].mxu1 }
0x1e41   :  { %v8431_v11 = vpop.f32.mrb[197].mxu1 }
0x1e42   :  { %v18621_v7 = vpop.f32.mrb[198].mxu1 }
0x1e43   :  { %v8447_v42 = vpack.c.bf16 %v18621_v7, %v18620_v17  ;;  %v8434_v24 = vpop.f32.mrb[199].mxu1 }
0x1e44   :  { %v8446_v41 = vpack.c.bf16 %v8434_v24, %v8431_v11 }
0x1e46   :  { %18624 = vmatprep.mubr.msk.bf16.mxu1 %vm332_vm1, %v8446_v41 }
0x1e47   :  { %18625 = vmatmul.mubr.msk.bf16.vlgmr.msra.gmra.mrb[192].mxu1 %vm332_vm1, %v8447_v42 }
0x1e90   :  { %v8627_v52 = vpop.xlane.xlu1 %8626 }
0x1e92   :  { %v8624_v25 = vpop.xlane.xlu0 %8623 }
0x1e93   :  { %19653 = vrcp.f32 %v8624_v25 }
0x1e94   :  { %v8621_v45 = vpop.xlane.xlu1 %8620 }
0x1e95   :  { %19655 = vrcp.f32 %v8621_v45 }
0x1e96   :  { %19657 = vrcp.f32 %v8627_v52  ;;  %v8618_v6 = vpop.xlane.xlu0 %8617 }
0x1e97   :  { %19659 = vrcp.f32 %v8618_v6 }
0x1e98   :  { %v8641_v63 = vpop.permute.xlu1 %8640 }
0x1e9a   :  { %v8639_v13 = vpop.permute.xlu0 %8638 }
0x1e9b   :  { %18636 = vmatprep.subr.bf16.mxu1 %v8639_v13 }
0x1e9c   :  { %18637 = vmatpush3.bf16.msra.mxu1 %v8639_v13 }
0x1e9d   :  { %18638 = vmatprep.subr.bf16.mxu1 %v8641_v63  ;;  %v19654_v48 = vpop.eup %19653 }
0x1e9e   :  { %v8634_v49 = vmul.f32 %v19654_v48, %v19650_v0 }
0x1e9f   :  { %v19656_v35 = vpop.eup %19655 }
0x1ea0   :  { %v19658_v58 = vpop.eup %19657  ;;  %18639 = vmatpush3.bf16.msra.mxu1 %v8641_v63  ;;  %v8633_v23 = vmul.f32 %v19656_v35, %v19648_v5 }
0x1ea1   :  { %v19660_v19 = vpop.eup %19659  ;;  %v8635_v1 = vmul.f32 %v19658_v58, %v19646_v56  ;;  %18644 = vmatprep.subr.bf16.mxu1 %v19160_v46 }
0x1ea2   :  { %v8632_v53 = vmul.f32 %v19660_v19, %v19652_v59 }
0x1ea3   :  { %v8637_v26 = vpack.c.bf16 %v8635_v1, %v8634_v49  ;;  %v16148_v49 = vld [vmem:[%s24563_s12 + $0x400] sm:$0xff] }
0x1ea4   :  { %v8636_v16 = vpack.c.bf16 %v8633_v23, %v8632_v53  ;;  %v16156_v53 = vld [vmem:[%s24563_s12 + $0x440] sm:$0xff]  ;;  %v16149_v23 = vld [vmem:[%s24563_s12 + $0x408] sm:$0xff] }
0x1ea5   :  { %v16215_v1 = vcombine.high %v16148_v49, %v16156_v53 }
0x1ea6   :  { %18640 = vmatprep.mubr.msk.bf16.mxu1 %vm402_vm6, %v8636_v16  ;;  %v16157_v16 = vld [vmem:[%s24563_s12 + $0x448] sm:$0xff] }
0x1ea7   :  { %18641 = vmatmul.mubr.msk.bf16.vlgmr.msra.gmra.mrb[200].mxu1 %vm402_vm6, %v8637_v26  ;;  %v16214_v26 = vcombine.low %v16148_v49, %v16156_v53  ;;  %9338 = vmatprep.subr.bf16.mxu0 %v16215_v1 }
0x1ea8   :  { %18645 = vmatpush3.bf16.msra.mxu1 %v19160_v46  ;;  %v16216_v46 = vcombine.low %v16149_v23, %v16157_v16 }
0x1ea9   :  { %9339 = vmatpush1.bf16.msra.mxu0 %v16214_v26 }
0x1f7a   :  { %v18642_v62 = vpop.f32.mrb[200].mxu1 }
0x1f7b   :  { %v8684_v12 = vpop.f32.mrb[201].mxu1 }
0x1f7c   :  { %v18643_v4 = vpop.f32.mrb[202].mxu1 }
0x1f7d   :  { %v8700_v22 = vpack.c.bf16 %v18643_v4, %v18642_v62  ;;  %v8687_v9 = vpop.f32.mrb[203].mxu1  ;;  %v16217_v62 = vcombine.high %v16149_v23, %v16157_v16  ;;  %v16172_v4 = vld [vmem:[%s24563_s12 + $0x4c0] sm:$0xff] }
0x1f7e   :  { %v8699_v60 = vpack.c.bf16 %v8687_v9, %v8684_v12  ;;  %v16164_v12 = vld [vmem:[%s24563_s12 + $0x480] sm:$0xff] }
0x1f7f   :  { %9391 = vmatprep.subr.bf16.mxu1 %v16217_v62  ;;  %v16231_v9 = vcombine.high %v16164_v12, %v16172_v4  ;;  %v16146_v62 = vld [vmem:[%s24565_s10 + $0x2] ss:$0 sm:$0xff] }
0x1f80   :  { %18646 = vmatprep.mubr.msk.bf16.mxu1 %vm332_vm1, %v8699_v60  ;;  %v16173_v60 = vld [vmem:[%s24563_s12 + $0x4c8] sm:$0xff] }
0x1f81   :  { %18647 = vmatmul.mubr.msk.bf16.vlgmr.msra.gmra.mrb[192].mxu1 %vm332_vm1, %v8700_v22  ;;  %v16165_v22 = vld [vmem:[%s24563_s12 + $0x488] sm:$0xff]  ;;  %9340 = vmatprep.subr.bf16.mxu0 %v16231_v9 }
0x1f82   :  { %9423 = vmatprep.mubr.bf16.mxu1 %v19757_v14  ;;  %9392 = vmatpush1.bf16.msra.mxu1 %v16216_v46 }
0x2054   :  { %v18648_v47 = vpop.f32.mrb[192].mxu1 }
0x2055   :  { %v8749_v51 = vpop.f32.mrb[193].mxu1  ;;  %v8778_v50 = vadd.f32 %v18648_v47, %v16143_v38  ;;  %v16232_v47 = vcombine.low %v16165_v22, %v16173_v60 }
0x2056   :  { %v8776_v54 = vadd.f32 %v16143_v38, %v8749_v51  ;;  %v18649_v57 = vpop.f32.mrb[194].mxu1  ;;  %v16233_v51 = vcombine.high %v16165_v22, %v16173_v60  ;;  %v16147_v60 = vld [vmem:[%s24566_s11 + $0x2] ss:$0 sm:$0xff] }
0x2057   :  { %v8779_v44 = vadd.f32 %v18649_v57, %v16143_v38  ;;  %v8752_v8 = vpop.f32.mrb[195].mxu1  ;;  %v8782_v55 = vadd.f32 %v8778_v50, %v22274_v61  ;;  %v16188_v57 = vld [vmem:[%s24563_s12 + $0x540] sm:$0xff]  ;;  %v16189_v50 = vld [vmem:[%s24563_s12 + $0x548] sm:$0xff] }
0x2058   :  { %v8780_v36 = vadd.f32 %v8776_v54, %v22266_v21  ;;  %v8777_v56 = vadd.f32 %v16143_v38, %v8752_v8  ;;  %v16230_v38 = vcombine.low %v16164_v12, %v16172_v4  ;;  %9393 = vmatprep.subr.bf16.mxu1 %v16233_v51  ;;  %v16180_v54 = vld [vmem:[%s24563_s12 + $0x500] sm:$0xff] }
0x2059   :  { %v8783_v5 = vadd.f32 %v8779_v44, %v22276_v15  ;;  %v8794_v2 = vsel %vm145_vm0, %v8782_v55, 0.0  ;;  %v16181_v44 = vld [vmem:[%s24563_s12 + $0x508] sm:$0xff]  ;;  %9394 = vmatpush1.bf16.msra.mxu1 %v16232_v47  ;;  %v16247_v8 = vcombine.high %v16180_v54, %v16188_v57  ;;  %v16166_v47 = vld [vmem:[%s24563_s12 + $0x490] sm:$0xff] }
0x205a   :  { %v8781_v43 = vadd.f32 %v8777_v56, %v22268_v10  ;;  %v8788_v0 = vsel %vm145_vm0, %v8780_v36, 0.0  ;;  %9341 = vmatpush1.bf16.msra.mxu0 %v16230_v38  ;;  %v16248_v56 = vcombine.low %v16181_v44, %v16189_v50 }
0x205b   :  { %8789 = vadd.xlane.f32.xlu1 %v8788_v0  ;;  %v8797_v3 = vsel %vm145_vm0, %v8783_v5, 0.0  ;;  %9342 = vmatprep.subr.bf16.mxu0 %v16247_v8  ;;  %v16204_v0 = vld [vmem:[%s24563_s12 + $0x5c0] sm:$0xff] }
0x205c   :  { %v8791_v59 = vsel %vm145_vm0, %v8781_v43, 0.0 }
0x205d   :  { %8792 = vadd.xlane.f32.xlu0 %v8791_v59 }
0x205f   :  { %8798 = vadd.xlane.f32.xlu1 %v8797_v3  ;;  %v16205_v3 = vld [vmem:[%s24563_s12 + $0x5c8] sm:$0xff] }
0x2061   :  { %8795 = vadd.xlane.f32.xlu0 %v8794_v2 }
0x20e8   :  { %v8790_v21 = vpop.xlane.xlu1 %8789 }
0x20e9   :  { %v8800_v17 = vmul.f32 0.015625, %v8790_v21 }
0x20ea   :  { %v8793_v11 = vpop.xlane.xlu0 %8792 }
0x20eb   :  { %v22518_v15 = vsub.f32 %v8780_v36, %v8800_v17  ;;  %v8801_v10 = vmul.f32 0.015625, %v8793_v11  ;;  %v16246_v36 = vcombine.low %v16180_v54, %v16188_v57  ;;  %v16150_v11 = vld [vmem:[%s24563_s12 + $0x410] sm:$0xff] }
0x20ec   :  { %v8799_v7 = vpop.xlane.xlu1 %8798  ;;  %v16174_v54 = vld [vmem:[%s24563_s12 + $0x4d0] sm:$0xff] }
0x20ed   :  { %v22520_v42 = vsub.f32 %v8781_v43, %v8801_v10  ;;  %v8803_v24 = vmul.f32 0.015625, %v8799_v7  ;;  %v8808_v61 = vmul.f32 %v22518_v15, %v22518_v15  ;;  %9343 = vmatpush1.bf16.msra.mxu0 %v16246_v36  ;;  %v16196_v43 = vld [vmem:[%s24563_s12 + $0x580] sm:$0xff]  ;;  %v16158_v10 = vld [vmem:[%s24563_s12 + $0x450] sm:$0xff]  ;;  %v16151_v7 = vld [vmem:[%s24563_s12 + $0x418] sm:$0xff] }
0x20ee   :  { %v8796_v41 = vpop.xlane.xlu0 %8795  ;;  %v16263_v59 = vcombine.high %v16196_v43, %v16204_v0  ;;  %v16262_v2 = vcombine.low %v16196_v43, %v16204_v0  ;;  %v16235_v43 = vcombine.high %v16166_v47, %v16174_v54 }
0x20ef   :  { %v22524_v52 = vsub.f32 %v8783_v5, %v8803_v24  ;;  %v8802_v25 = vmul.f32 0.015625, %v8796_v41  ;;  %v8812_v45 = vsel %vm145_vm0, %v8808_v61, 0.0  ;;  %v8809_v6 = vmul.f32 %v22520_v42, %v22520_v42  ;;  %v16159_v61 = vld [vmem:[%s24563_s12 + $0x458] sm:$0xff] }
0x20f0   :  { %8813 = vadd.xlane.f32.xlu0 %v8812_v45  ;;  %v16249_v5 = vcombine.high %v16181_v44, %v16189_v50  ;;  %9344 = vmatprep.subr.bf16.mxu0 %v16263_v59  ;;  %v16219_v24 = vcombine.high %v16150_v11, %v16158_v10  ;;  %v16218_v41 = vcombine.low %v16150_v11, %v16158_v10  ;;  %v16190_v59 = vld [vmem:[%s24563_s12 + $0x550] sm:$0xff] }
0x20f1   :  { %v22529_v13 = vsub.f32 %v8782_v55, %v8802_v25  ;;  %v8815_v63 = vsel %vm145_vm0, %v8809_v6, 0.0  ;;  %v8811_v48 = vmul.f32 %v22524_v52, %v22524_v52  ;;  %v16197_v55 = vld [vmem:[%s24563_s12 + $0x588] sm:$0xff]  ;;  %9345 = vmatpush1.bf16.msra.mxu0 %v16262_v2  ;;  %v16220_v25 = vcombine.low %v16151_v7, %v16159_v61 }
0x20f2   :  { %8816 = vadd.xlane.f32.xlu1 %v8815_v63  ;;  %9395 = vmatprep.subr.bf16.mxu1 %v16249_v5  ;;  %v16264_v21 = vcombine.low %v16197_v55, %v16205_v3  ;;  %v16265_v17 = vcombine.high %v16197_v55, %v16205_v3  ;;  %v16221_v45 = vcombine.high %v16151_v7, %v16159_v61  ;;  %v16182_v55 = vld [vmem:[%s24563_s12 + $0x510] sm:$0xff] }
0x20f3   :  { %v8810_v35 = vmul.f32 %v22529_v13, %v22529_v13  ;;  %v8821_v58 = vsel %vm145_vm0, %v8811_v48, 0.0  ;;  %9396 = vmatpush1.bf16.msra.mxu1 %v16248_v56  ;;  %9444 = vmatprep.subr.bf16.mxu0 %v16219_v24  ;;  %v16234_v2 = vcombine.low %v16166_v47, %v16174_v54  ;;  %v16198_v24 = vld [vmem:[%s24563_s12 + $0x590] sm:$0xff]  ;;  %v16184_v47 = vld [vmem:[%s24563_s12 + $0x520] sm:$0xff]  ;;  %v16185_v54 = vld [vmem:[%s24563_s12 + $0x528] sm:$0xff] }
0x20f4   :  { %9397 = vmatprep.subr.bf16.mxu1 %v16265_v17  ;;  %v16251_v17 = vcombine.high %v16182_v55, %v16190_v59  ;;  %v16206_v61 = vld [vmem:[%s24563_s12 + $0x5d0] sm:$0xff] }
0x20f5   :  { %v8818_v19 = vsel %vm145_vm0, %v8810_v35, 0.0 }
0x20f6   :  { %8822 = vadd.xlane.f32.xlu1 %v8821_v58  ;;  %8819 = vadd.xlane.f32.xlu0 %v8818_v19 }
0x20f7   :  { %9398 = vmatpush1.bf16.msra.mxu1 %v16264_v21 }
0x20f8   :  { %9497 = vmatprep.subr.bf16.mxu1 %v16221_v45  ;;  %v16250_v45 = vcombine.low %v16182_v55, %v16190_v59  ;;  %v16209_v55 = vld [vmem:[%s24563_s12 + $0x5e8] sm:$0xff] }
0x217d   :  { %v8814_v6 = vpop.xlane.xlu0 %8813 }
0x217e   :  { %v8824_v63 = vmul.f32 0.015625, %v8814_v6 }
0x217f   :  { %v8817_v48 = vpop.xlane.xlu1 %8816 }
0x2180   :  { %v8828_v35 = vadd.f32 1e-05, %v8824_v63  ;;  %v8825_v58 = vmul.f32 0.015625, %v8817_v48  ;;  %v16267_v48 = vcombine.high %v16198_v24, %v16206_v61 }
0x2182   :  { %19661 = vrsqrt.f32 %v8828_v35  ;;  %v8829_v19 = vadd.f32 1e-05, %v8825_v58  ;;  %v16152_v58 = vld [vmem:[%s24563_s12 + $0x420] sm:$0xff] }
0x2183   :  { %v8823_v49 = vpop.xlane.xlu1 %8822  ;;  %v8820_v53 = vpop.xlane.xlu0 %8819 }
0x2184   :  { %19663 = vrsqrt.f32 %v8829_v19  ;;  %v8827_v23 = vmul.f32 0.015625, %v8823_v49  ;;  %v8826_v1 = vmul.f32 0.015625, %v8820_v53  ;;  %v16160_v19 = vld [vmem:[%s24563_s12 + $0x460] sm:$0xff]  ;;  %v16153_v49 = vld [vmem:[%s24563_s12 + $0x428] sm:$0xff] }
0x2185   :  { %v16161_v53 = vld [vmem:[%s24563_s12 + $0x468] sm:$0xff] }
0x2186   :  { %v8831_v16 = vadd.f32 1e-05, %v8827_v23  ;;  %v8830_v26 = vadd.f32 1e-05, %v8826_v1  ;;  %v16266_v23 = vcombine.low %v16198_v24, %v16206_v61 }
0x2188   :  { %19665 = vrsqrt.f32 %v8831_v16  ;;  %v16223_v16 = vcombine.high %v16152_v58, %v16160_v19 }
0x2189   :  { %19667 = vrsqrt.f32 %v8830_v26  ;;  %v16225_v26 = vcombine.high %v16153_v49, %v16161_v53 }
0x218c   :  { %v19662_v46 = vpop.eup %19661 }
0x218d   :  { %v8836_v12 = vmul.f32 %v19662_v46, %v22518_v15  ;;  %v16167_v15 = vld [vmem:[%s24563_s12 + $0x498] sm:$0xff]  ;;  %v16168_v46 = vld [vmem:[%s24563_s12 + $0x4a0] sm:$0xff] }
0x218e   :  { %v19664_v4 = vpop.eup %19663 }
0x218f   :  { %v8846_v22 = vmul.f32 %v16146_v62, %v8836_v12  ;;  %v8837_v9 = vmul.f32 %v19664_v4, %v22520_v42  ;;  %v16175_v42 = vld [vmem:[%s24563_s12 + $0x4d8] sm:$0xff]  ;;  %v16169_v12 = vld [vmem:[%s24563_s12 + $0x4a8] sm:$0xff] }
0x2190   :  { %v16237_v0 = vcombine.high %v16167_v15, %v16175_v42  ;;  %v16236_v21 = vcombine.low %v16167_v15, %v16175_v42  ;;  %v16177_v4 = vld [vmem:[%s24563_s12 + $0x4e8] sm:$0xff] }
0x2191   :  { %v8847_v38 = vmul.f32 %v16146_v62, %v8837_v9  ;;  %v22618_v44 = vadd.f32 %v16147_v60, %v8846_v22  ;;  %v16222_v22 = vcombine.low %v16152_v58, %v16160_v19  ;;  %v16224_v9 = vcombine.low %v16153_v49, %v16161_v53  ;;  %v16193_v15 = vld [vmem:[%s24563_s12 + $0x568] sm:$0xff] }
0x2192   :  { %v19666_v51 = vpop.eup %19665 }
0x2193   :  { %v19668_v57 = vpop.eup %19667  ;;  %v22620_v8 = vadd.f32 %v16147_v60, %v8847_v38  ;;  %v8839_v50 = vmul.f32 %v19666_v51, %v22524_v52  ;;  %v16183_v52 = vld [vmem:[%s24563_s12 + $0x518] sm:$0xff]  ;;  %v16241_v38 = vcombine.high %v16169_v12, %v16177_v4  ;;  %v16192_v51 = vld [vmem:[%s24563_s12 + $0x560] sm:$0xff] }
0x2194   :  { %v8838_v36 = vmul.f32 %v19668_v57, %v22529_v13  ;;  %v16191_v13 = vld [vmem:[%s24563_s12 + $0x558] sm:$0xff]  ;;  %v16240_v57 = vcombine.low %v16169_v12, %v16177_v4  ;;  %v16254_v59 = vcombine.low %v16184_v47, %v16192_v51 }
0x2195   :  { %v22626_v56 = vpack.c.bf16 %v22620_v8, %v22618_v44  ;;  %v8849_v5 = vmul.f32 %v16146_v62, %v8839_v50  ;;  %v16253_v7 = vcombine.high %v16183_v52, %v16191_v13  ;;  %v16252_v6 = vcombine.low %v16183_v52, %v16191_v13 }
0x2196   :  { %v8848_v3 = vmul.f32 %v16146_v62, %v8838_v36  ;;  %v16176_v62 = vld [vmem:[%s24563_s12 + $0x4e0] sm:$0xff]  ;;  %v16255_v50 = vcombine.high %v16184_v47, %v16192_v51  ;;  %v16257_v36 = vcombine.high %v16185_v54, %v16193_v15 }
0x2197   :  { %16278 = vmatmul.mubr.msk.bf16.vlgmr.msra.gmra.mrb[188].mxu0 %vm145_vm0, %v22626_v56  ;;  %16280 = vmatmul.mubr.msk.bf16.vlgmr.msra.gmra.mrb[204].mxu1 %vm145_vm0, %v22626_v56  ;;  %v22644_v11 = vadd.f32 %v16147_v60, %v8849_v5  ;;  %v16238_v42 = vcombine.low %v16168_v46, %v16176_v62  ;;  %v16200_v5 = vld [vmem:[%s24563_s12 + $0x5a0] sm:$0xff] }
0x2198   :  { %9445 = vmatpush1.bf16.msra.mxu0 %v16218_v41  ;;  %9498 = vmatpush1.bf16.msra.mxu1 %v16220_v25  ;;  %v22646_v10 = vadd.f32 %v16147_v60, %v8848_v3  ;;  %v16199_v41 = vld [vmem:[%s24563_s12 + $0x598] sm:$0xff]  ;;  %v16239_v60 = vcombine.high %v16168_v46, %v16176_v62  ;;  %v16256_v3 = vcombine.low %v16185_v54, %v16193_v15 }
0x2199   :  { %9446 = vmatprep.subr.bf16.mxu0 %v16235_v43  ;;  %9499 = vmatprep.subr.bf16.mxu1 %v16237_v0  ;;  %v16207_v25 = vld [vmem:[%s24563_s12 + $0x5d8] sm:$0xff]  ;;  %v16208_v43 = vld [vmem:[%s24563_s12 + $0x5e0] sm:$0xff]  ;;  %v16201_v0 = vld [vmem:[%s24563_s12 + $0x5a8] sm:$0xff] }
0x219a   :  { %9380 = vmatprep.mubr.bf16.mxu0 %v19757_v14  ;;  %9433 = vmatprep.mubr.bf16.mxu1 %v19757_v14  ;;  %v22664_v63 = vpack.c.bf16 %v22644_v11, %v22646_v10  ;;  %v16269_v35 = vcombine.high %v16199_v41, %v16207_v25  ;;  %v16268_v1 = vcombine.low %v16199_v41, %v16207_v25 }
0x219b   :  { %v16271_v52 = vcombine.high %v16200_v5, %v16208_v43  ;;  %v16273_v13 = vcombine.high %v16201_v0, %v16209_v55  ;;  %v16270_v24 = vcombine.low %v16200_v5, %v16208_v43  ;;  %v16272_v61 = vcombine.low %v16201_v0, %v16209_v55  ;;  %v19163_v5 = vld [vmem:[%s24564_s14 + $0x800] sm:$0xff]   ;;  %v19165_v0 = vld [vmem:[%s24564_s14 + $0x848] sm:$0xff]  }
0x219c   :  { %9447 = vmatpush1.bf16.msra.mxu0 %v16234_v2  ;;  %9500 = vmatpush1.bf16.msra.mxu1 %v16236_v21  ;;  %v16154_v2 = vld [vmem:[%s24563_s12 + $0x430] sm:$0xff]  ;;  %v19164_v43 = vld [vmem:[%s24564_s14 + $0x880] sm:$0xff]   ;;  %v19166_v55 = vld [vmem:[%s24564_s14 + $0x8c8] sm:$0xff]  }
0x219d   :  { %9448 = vmatprep.subr.bf16.mxu0 %v16251_v17  ;;  %9501 = vmatprep.subr.bf16.mxu1 %v16253_v7  ;;  %v16162_v21 = vld [vmem:[%s24563_s12 + $0x470] sm:$0xff]  ;;  %v16155_v17 = vld [vmem:[%s24563_s12 + $0x438] sm:$0xff] }
0x219e   :  { %v16163_v7 = vld [vmem:[%s24563_s12 + $0x478] sm:$0xff]  ;;  %v16227_v41 = vcombine.high %v16154_v2, %v16162_v21  ;;  %v16226_v58 = vcombine.low %v16154_v2, %v16162_v21  ;;  %v19172_v2 = vld [vmem:[%s24564_s14 + $0x890] sm:$0xff]  }
0x219f   :  { %16279 = vmatmul.mubr.msk.bf16.gmra.mrb[192].mxu0 %vm145_vm0, %v22664_v63  ;;  %16281 = vmatmul.mubr.msk.bf16.gmra.mrb[208].mxu1 %vm145_vm0, %v22664_v63  ;;  %v16229_v25 = vcombine.high %v16155_v17, %v16163_v7  ;;  %v16228_v19 = vcombine.low %v16155_v17, %v16163_v7  ;;  %v19173_v21 = vld [vmem:[%s24564_s14 + $0x858] sm:$0xff]  }
0x21a0   :  { %9449 = vmatpush1.bf16.msra.mxu0 %v16250_v45  ;;  %9502 = vmatpush1.bf16.msra.mxu1 %v16252_v6  ;;  %v16170_v45 = vld [vmem:[%s24563_s12 + $0x4b0] sm:$0xff]  ;;  %v19174_v17 = vld [vmem:[%s24564_s14 + $0x8d8] sm:$0xff]  }
0x21a1   :  { %9450 = vmatprep.subr.bf16.mxu0 %v16267_v48  ;;  %9503 = vmatprep.subr.bf16.mxu1 %v16269_v35  ;;  %v16178_v6 = vld [vmem:[%s24563_s12 + $0x4f0] sm:$0xff]  ;;  %v16171_v48 = vld [vmem:[%s24563_s12 + $0x4b8] sm:$0xff] }
0x21a2   :  { %9476 = vmatprep.mubr.bf16.mxu0 %v19757_v14  ;;  %9529 = vmatprep.mubr.bf16.mxu1 %v19757_v14  ;;  %v16179_v35 = vld [vmem:[%s24563_s12 + $0x4f8] sm:$0xff]  ;;  %v16243_v49 = vcombine.high %v16170_v45, %v16178_v6  ;;  %v16242_v46 = vcombine.low %v16170_v45, %v16178_v6  ;;  %v19181_v45 = vld [vmem:[%s24564_s14 + $0x868] sm:$0xff]  }
0x21a3   :  { %v16245_v53 = vcombine.high %v16171_v48, %v16179_v35  ;;  %v16244_v62 = vcombine.low %v16171_v48, %v16179_v35  ;;  %v19175_v7 = vld [vmem:[%s24564_s14 + $0x818] sm:$0xff]   ;;  %v19182_v6 = vld [vmem:[%s24564_s14 + $0x8e8] sm:$0xff]  }
0x21a4   :  { %9451 = vmatpush1.bf16.msra.mxu0 %v16266_v23  ;;  %9504 = vmatpush1.bf16.msra.mxu1 %v16268_v1  ;;  %v16186_v23 = vld [vmem:[%s24563_s12 + $0x530] sm:$0xff]  ;;  %v19183_v48 = vld [vmem:[%s24564_s14 + $0x828] sm:$0xff]  }
0x21a5   :  { %9550 = vmatprep.subr.bf16.mxu0 %v16223_v16  ;;  %9603 = vmatprep.subr.bf16.mxu1 %v16225_v26  ;;  %v16194_v1 = vld [vmem:[%s24563_s12 + $0x570] sm:$0xff]  ;;  %v16187_v16 = vld [vmem:[%s24563_s12 + $0x538] sm:$0xff]  ;;  %v19184_v35 = vld [vmem:[%s24564_s14 + $0x8a8] sm:$0xff]  }
0x21a6   :  { %v16195_v26 = vld [vmem:[%s24563_s12 + $0x578] sm:$0xff]  ;;  %v16259_v12 = vcombine.high %v16186_v23, %v16194_v1  ;;  %v16258_v47 = vcombine.low %v16186_v23, %v16194_v1 }
0x21a7   :  { %16282 = vmatmul.mubr.msk.bf16.vlgmr.msra.gmra.mrb[196].mxu0 %vm145_vm0, %v22626_v56  ;;  %16284 = vmatmul.mubr.msk.bf16.vlgmr.msra.gmra.mrb[212].mxu1 %vm145_vm0, %v22626_v56  ;;  %v16261_v4 = vcombine.high %v16187_v16, %v16195_v26  ;;  %v16260_v51 = vcombine.low %v16187_v16, %v16195_v26  ;;  %v19189_v23 = vld [vmem:[%s24564_s14 + $0x878] sm:$0xff]  }
0x21a8   :  { %9551 = vmatpush1.bf16.msra.mxu0 %v16222_v22  ;;  %9604 = vmatpush1.bf16.msra.mxu1 %v16224_v9  ;;  %v16202_v22 = vld [vmem:[%s24563_s12 + $0x5b0] sm:$0xff]  ;;  %v19190_v1 = vld [vmem:[%s24564_s14 + $0x8f8] sm:$0xff]  }
0x21a9   :  { %9552 = vmatprep.subr.bf16.mxu0 %v16239_v60  ;;  %9605 = vmatprep.subr.bf16.mxu1 %v16241_v38  ;;  %v16210_v9 = vld [vmem:[%s24563_s12 + $0x5f0] sm:$0xff]  ;;  %v16203_v60 = vld [vmem:[%s24563_s12 + $0x5b8] sm:$0xff] }
0x21aa   :  { %9486 = vmatprep.mubr.bf16.mxu0 %v19757_v14  ;;  %9539 = vmatprep.mubr.bf16.mxu1 %v19757_v14  ;;  %v16211_v38 = vld [vmem:[%s24563_s12 + $0x5f8] sm:$0xff]  ;;  %v16275_v54 = vcombine.high %v16202_v22, %v16210_v9 }
0x21ab   :  { %v16277_v15 = vcombine.high %v16203_v60, %v16211_v38  ;;  %v19191_v16 = vld [vmem:[%s24564_s14 + $0x838] sm:$0xff]  }
0x21ac   :  { %9553 = vmatpush1.bf16.msra.mxu0 %v16238_v42  ;;  %9606 = vmatpush1.bf16.msra.mxu1 %v16240_v57  ;;  %v16274_v42 = vcombine.low %v16202_v22, %v16210_v9  ;;  %v16276_v57 = vcombine.low %v16203_v60, %v16211_v38  ;;  %v19192_v26 = vld [vmem:[%s24564_s14 + $0x8b8] sm:$0xff]  }
0x21ad   :  { %9554 = vmatprep.subr.bf16.mxu0 %v16255_v50  ;;  %9607 = vmatprep.subr.bf16.mxu1 %v16257_v36  ;;  %v19161_v50 = vld [vmem:[%s24564_s14 + $0x840] sm:$0xff]  }
0x21ae   :  { %v19162_v36 = vld [vmem:[%s24564_s14 + $0x8c0] sm:$0xff]  }
0x21af   :  { %16283 = vmatmul.mubr.msk.bf16.gmra.mrb[200].mxu0 %vm145_vm0, %v22664_v63  ;;  %16285 = vmatmul.mubr.msk.bf16.gmra.mrb[216].mxu1 %vm145_vm0, %v22664_v63 }
0x21b0   :  { %9555 = vmatpush1.bf16.msra.mxu0 %v16254_v59  ;;  %9608 = vmatpush1.bf16.msra.mxu1 %v16256_v3  ;;  %v19167_v59 = vld [vmem:[%s24564_s14 + $0x808] sm:$0xff]  }
0x21b1   :  { %9556 = vmatprep.subr.bf16.mxu0 %v16271_v52  ;;  %9609 = vmatprep.subr.bf16.mxu1 %v16273_v13  ;;  %v19168_v3 = vld [vmem:[%s24564_s14 + $0x888] sm:$0xff]   ;;  %v19170_v52 = vld [vmem:[%s24564_s14 + $0x8d0] sm:$0xff]  }
0x21b2   :  { %9582 = vmatprep.mubr.bf16.mxu0 %v19757_v14  ;;  %9635 = vmatprep.mubr.bf16.mxu1 %v19757_v14  ;;  %v19171_v13 = vld [vmem:[%s24564_s14 + $0x810] sm:$0xff]  }
0x21b4   :  { %9557 = vmatpush1.bf16.msra.mxu0 %v16270_v24  ;;  %9610 = vmatpush1.bf16.msra.mxu1 %v16272_v61  ;;  %v19176_v24 = vld [vmem:[%s24564_s14 + $0x898] sm:$0xff]   ;;  %v19177_v61 = vld [vmem:[%s24564_s14 + $0x860] sm:$0xff]  }
0x21b5   :  { %9656 = vmatprep.subr.bf16.mxu0 %v16227_v41  ;;  %9709 = vmatprep.subr.bf16.mxu1 %v16229_v25  ;;  %v19179_v41 = vld [vmem:[%s24564_s14 + $0x820] sm:$0xff]  }
0x21b6   :  { %v19180_v25 = vld [vmem:[%s24564_s14 + $0x8a0] sm:$0xff]  }
0x21b7   :  { %16286 = vmatmul.mubr.msk.bf16.vlgmr.msra.gmra.mrb[204].mxu0 %vm145_vm0, %v22626_v56  ;;  %16288 = vmatmul.mubr.msk.bf16.vlgmr.msra.gmra.mrb[220].mxu1 %vm145_vm0, %v22626_v56 }
0x21b8   :  { %9657 = vmatpush1.bf16.msra.mxu0 %v16226_v58  ;;  %9710 = vmatpush1.bf16.msra.mxu1 %v16228_v19  ;;  %v19185_v58 = vld [vmem:[%s24564_s14 + $0x870] sm:$0xff]  }
0x21b9   :  { %9658 = vmatprep.subr.bf16.mxu0 %v16243_v49  ;;  %9711 = vmatprep.subr.bf16.mxu1 %v16245_v53  ;;  %v19186_v19 = vld [vmem:[%s24564_s14 + $0x8f0] sm:$0xff]  }
0x21ba   :  { %9592 = vmatprep.mubr.bf16.mxu0 %v19757_v14  ;;  %9645 = vmatprep.mubr.bf16.mxu1 %v19757_v14  ;;  %v19187_v49 = vld [vmem:[%s24564_s14 + $0x830] sm:$0xff]  }
0x21bb   :  { %v19188_v53 = vld [vmem:[%s24564_s14 + $0x8b0] sm:$0xff]  }
0x21bc   :  { %9659 = vmatpush1.bf16.msra.mxu0 %v16242_v46  ;;  %9712 = vmatpush1.bf16.msra.mxu1 %v16244_v62  ;;  %v19193_v46 = vld [vmem:[%s24564_s14 + $0x940] sm:$0xff]  }
0x21bd   :  { %9660 = vmatprep.subr.bf16.mxu0 %v16259_v12  ;;  %9713 = vmatprep.subr.bf16.mxu1 %v16261_v4  ;;  %v19194_v62 = vld [vmem:[%s24564_s14 + $0x9c0] sm:$0xff]  }
0x21be   :  { %v22907_v12 = vld [vmem:[%s24567_s13 + $0x20] sm:$0xff] }
0x21bf   :  { %16287 = vmatmul.mubr.msk.bf16.gmra.mrb[208].mxu0 %vm145_vm0, %v22664_v63  ;;  %16289 = vmatmul.mubr.msk.bf16.gmra.mrb[224].mxu1 %vm145_vm0, %v22664_v63  ;;  %v8935_v4 = vrot.slane %v22907_v12, %v19936_v28  ;;  %v8943_v22 = vrot.slane %v22907_v12, %v20595_v29  ;;  %v8939_v9 = vrot.slane %v22907_v12, %v19942_v30 }
0x21c0   :  { %9661 = vmatpush1.bf16.msra.mxu0 %v16258_v47  ;;  %9714 = vmatpush1.bf16.msra.mxu1 %v16260_v51  ;;  %v8947_v60 = vrot.slane %v22907_v12, %v20598_v33 }
0x21c1   :  { %9662 = vmatprep.subr.bf16.mxu0 %v16275_v54  ;;  %9715 = vmatprep.subr.bf16.mxu1 %v16277_v15 }
0x21c2   :  { %9688 = vmatprep.mubr.bf16.mxu0 %v19757_v14  ;;  %9741 = vmatprep.mubr.bf16.mxu1 %v19757_v14 }
0x21c4   :  { %9663 = vmatpush1.bf16.msra.mxu0 %v16274_v42  ;;  %9716 = vmatpush1.bf16.msra.mxu1 %v16276_v57 }
0x21c5   :  { %17874 = vmatprep.subr.bf16.mxu0 %v19161_v50  ;;  %17902 = vmatprep.subr.bf16.mxu1 %v19162_v36 }
0x21c7   :  { %16290 = vmatmul.mubr.msk.bf16.vlgmr.msra.gmra.mrb[212].mxu0 %vm145_vm0, %v22626_v56  ;;  %16292 = vmatmul.mubr.msk.bf16.vlgmr.msra.gmra.mrb[228].mxu1 %vm145_vm0, %v22626_v56  ;;  %v19169_v56 = vld [vmem:[%s24564_s14 + $0x850] sm:$0xff]  }
0x21c8   :  { %9698 = vmatprep.mubr.bf16.mxu0 %v19757_v14  ;;  %9751 = vmatprep.mubr.bf16.mxu1 %v19757_v14 }
0x21c9   :  { %17875 = vmatpush3.bf16.msra.mxu0 %v19163_v5  ;;  %17903 = vmatpush3.bf16.msra.mxu1 %v19164_v43 }
0x21ca   :  { %17876 = vmatprep.subr.bf16.mxu0 %v19165_v0  ;;  %17904 = vmatprep.subr.bf16.mxu1 %v19166_v55 }
0x21cd   :  { %17877 = vmatpush3.bf16.msra.mxu0 %v19167_v59  ;;  %17905 = vmatpush3.bf16.msra.mxu1 %v19168_v3 }
0x21ce   :  { %17878 = vmatprep.subr.bf16.mxu0 %v19169_v56  ;;  %17906 = vmatprep.subr.bf16.mxu1 %v19170_v52 }
0x21cf   :  { %16291 = vmatmul.mubr.msk.bf16.gmra.mrb[216].mxu0 %vm145_vm0, %v22664_v63  ;;  %16293 = vmatmul.mubr.msk.bf16.gmra.mrb[232].mxu1 %vm145_vm0, %v22664_v63  ;;  %v19178_v63 = vld [vmem:[%s24564_s14 + $0x8e0] sm:$0xff]  }
0x21d1   :  { %17879 = vmatpush3.bf16.msra.mxu0 %v19171_v13  ;;  %17907 = vmatpush3.bf16.msra.mxu1 %v19172_v2 }
0x21d2   :  { %17880 = vmatprep.subr.bf16.mxu0 %v19173_v21  ;;  %17908 = vmatprep.subr.bf16.mxu1 %v19174_v17 }
0x21d5   :  { %17881 = vmatpush3.bf16.msra.mxu0 %v19175_v7  ;;  %17909 = vmatpush3.bf16.msra.mxu1 %v19176_v24 }
0x21d6   :  { %17882 = vmatprep.subr.bf16.mxu0 %v19177_v61  ;;  %17910 = vmatprep.subr.bf16.mxu1 %v19178_v63 }
0x21d9   :  { %17883 = vmatpush3.bf16.msra.mxu0 %v19179_v41  ;;  %17911 = vmatpush3.bf16.msra.mxu1 %v19180_v25 }
0x21da   :  { %17884 = vmatprep.subr.bf16.mxu0 %v19181_v45  ;;  %17912 = vmatprep.subr.bf16.mxu1 %v19182_v6 }
0x21dd   :  { %17885 = vmatpush3.bf16.msra.mxu0 %v19183_v48  ;;  %17913 = vmatpush3.bf16.msra.mxu1 %v19184_v35  ;;  %v19195_v35 = vld [vmem:[%s24564_s14 + $0x900] sm:$0xff]  }
0x21de   :  { %17886 = vmatprep.subr.bf16.mxu0 %v19185_v58  ;;  %17914 = vmatprep.subr.bf16.mxu1 %v19186_v19  ;;  %v19196_v58 = vld [vmem:[%s24564_s14 + $0x980] sm:$0xff]  }
0x21e1   :  { %17887 = vmatpush3.bf16.msra.mxu0 %v19187_v49  ;;  %17915 = vmatpush3.bf16.msra.mxu1 %v19188_v53 }
0x21e2   :  { %17888 = vmatprep.subr.bf16.mxu0 %v19189_v23  ;;  %17916 = vmatprep.subr.bf16.mxu1 %v19190_v1  ;;  %v19197_v1 = vld [vmem:[%s24564_s14 + $0x948] sm:$0xff]  }
0x21e5   :  { %17889 = vmatpush3.bf16.msra.mxu0 %v19191_v16  ;;  %17917 = vmatpush3.bf16.msra.mxu1 %v19192_v26  ;;  %v19198_v16 = vld [vmem:[%s24564_s14 + $0x9c8] sm:$0xff]   ;;  %v22931_v26 = vrot.slane %v22907_v12, %v20601_v20 }
0x21e6   :  { %17930 = vmatprep.subr.bf16.mxu0 %v19193_v46  ;;  %17958 = vmatprep.subr.bf16.mxu1 %v19194_v62 }
0x226a   :  { %v9372_v38 = vpop.f32.mrb[188].mxu0  ;;  %v9425_v47 = vpop.f32.mrb[204].mxu1 }
0x226b   :  { %v9373_v51 = vadd.f32 %v9372_v38, %v8935_v4  ;;  %v9426_v54 = vadd.f32 %v9425_v47, %v8943_v22  ;;  %v9374_v15 = vpop.f32.mrb[189].mxu0  ;;  %v9427_v42 = vpop.f32.mrb[205].mxu1 }
0x226c   :  { %v9375_v57 = vadd.f32 %v9374_v15, %v8939_v9  ;;  %v9428_v50 = vadd.f32 %v9427_v42, %v8947_v60  ;;  %v9376_v36 = vpop.f32.mrb[190].mxu0  ;;  %v9429_v5 = vpop.f32.mrb[206].mxu1 }
0x226d   :  { %v9377_v43 = vadd.f32 %v9376_v36, %v8935_v4  ;;  %v9430_v0 = vadd.f32 %v9429_v5, %v8943_v22  ;;  %v9378_v55 = vpop.f32.mrb[191].mxu0  ;;  %v9431_v59 = vpop.f32.mrb[207].mxu1  ;;  %v9762_v52 = vmax.f32 %v9373_v51, 0.0  ;;  %v9764_v13 = vmax.f32 %v9426_v54, 0.0 }
0x226e   :  { %v9379_v3 = vadd.f32 %v9378_v55, %v8939_v9  ;;  %v9432_v56 = vadd.f32 %v9431_v59, %v8947_v60  ;;  %v9763_v17 = vmax.f32 %v9375_v57, 0.0  ;;  %v9765_v7 = vmax.f32 %v9428_v50, 0.0 }
0x226f   :  { %v9778_v2 = vmax.f32 %v9377_v43, 0.0  ;;  %v9780_v21 = vmax.f32 %v9430_v0, 0.0  ;;  %v22935_v51 = vrot.slane %v22907_v12, %v20604_v34  ;;  %v22939_v50 = vrot.slane %v22907_v12, %v20607_v37  ;;  %v19199_v43 = vld [vmem:[%s24564_s14 + $0x908] sm:$0xff]  }
0x2270   :  { %v9779_v24 = vmax.f32 %v9379_v3, 0.0  ;;  %v9781_v61 = vmax.f32 %v9432_v56, 0.0 }
0x2271   :  { %v9826_v63 = vpack.c.bf16 %v9778_v2, %v9762_v52  ;;  %v9828_v41 = vpack.c.bf16 %v9780_v21, %v9764_v13 }
0x2272   :  { %v9827_v25 = vpack.c.bf16 %v9779_v24, %v9763_v17  ;;  %v9829_v45 = vpack.c.bf16 %v9781_v61, %v9765_v7  ;;  %v9382_v6 = vpop.f32.mrb[192].mxu0  ;;  %v9435_v48 = vpop.f32.mrb[208].mxu1 }
0x2273   :  { %v9383_v19 = vadd.f32 %v9382_v6, %v8935_v4  ;;  %v9436_v49 = vadd.f32 %v9435_v48, %v8943_v22  ;;  %v9384_v53 = vpop.f32.mrb[193].mxu0  ;;  %v9437_v23 = vpop.f32.mrb[209].mxu1 }
0x2274   :  { %v9385_v46 = vadd.f32 %v9384_v53, %v8939_v9  ;;  %v9438_v62 = vadd.f32 %v9437_v23, %v8947_v60  ;;  %v9386_v38 = vpop.f32.mrb[194].mxu0  ;;  %v9439_v47 = vpop.f32.mrb[210].mxu1  ;;  %10915 = vmatprep.mubr.bf16.mxu0 %v9827_v25  ;;  %10964 = vmatprep.mubr.bf16.mxu1 %v9829_v45 }
0x2275   :  { %v9387_v54 = vadd.f32 %v9386_v38, %v8935_v4  ;;  %v9440_v15 = vadd.f32 %v9439_v47, %v8943_v22  ;;  %v9388_v42 = vpop.f32.mrb[195].mxu0  ;;  %v9441_v57 = vpop.f32.mrb[211].mxu1  ;;  %10916 = vmatmul.mubr.bf16.vlgmr.msra.gmra.mrb[220].mxu0 %v9826_v63  ;;  %10965 = vmatmul.mubr.bf16.vlgmr.msra.gmra.mrb[236].mxu1 %v9828_v41  ;;  %v19200_v4 = vld [vmem:[%s24564_s14 + $0x988] sm:$0xff]   ;;  %v22949_v22 = vrot.slane %v22907_v12, %v20610_v40  ;;  %v9794_v0 = vmax.f32 %v9383_v19, 0.0  ;;  %v19203_v63 = vld [vmem:[%s24564_s14 + $0x910] sm:$0xff]  }
0x2276   :  { %v9389_v36 = vadd.f32 %v9388_v42, %v8939_v9  ;;  %v9442_v5 = vadd.f32 %v9441_v57, %v8947_v60  ;;  %17931 = vmatpush3.bf16.msra.mxu0 %v19195_v35  ;;  %17959 = vmatpush3.bf16.msra.mxu1 %v19196_v58  ;;  %v9796_v55 = vmax.f32 %v9436_v49, 0.0  ;;  %v19201_v9 = vld [vmem:[%s24564_s14 + $0x950] sm:$0xff]   ;;  %v9795_v56 = vmax.f32 %v9385_v46, 0.0  ;;  %v19205_v35 = vld [vmem:[%s24564_s14 + $0x958] sm:$0xff]  }
0x2277   :  { %v9810_v59 = vmax.f32 %v9387_v54, 0.0  ;;  %v9812_v3 = vmax.f32 %v9440_v15, 0.0  ;;  %17932 = vmatprep.subr.bf16.mxu0 %v19197_v1  ;;  %17960 = vmatprep.subr.bf16.mxu1 %v19198_v16  ;;  %v19202_v60 = vld [vmem:[%s24564_s14 + $0x9d0] sm:$0xff]   ;;  %v9797_v52 = vmax.f32 %v9438_v62, 0.0  ;;  %v19206_v58 = vld [vmem:[%s24564_s14 + $0x9d8] sm:$0xff]  }
0x2278   :  { %v9811_v13 = vmax.f32 %v9389_v36, 0.0  ;;  %v9813_v2 = vmax.f32 %v9442_v5, 0.0  ;;  %v19204_v41 = vld [vmem:[%s24564_s14 + $0x990] sm:$0xff]   ;;  %v19207_v54 = vld [vmem:[%s24564_s14 + $0x918] sm:$0xff]  }
0x2279   :  { %v9842_v12 = vpack.c.bf16 %v9810_v59, %v9794_v0  ;;  %v9844_v21 = vpack.c.bf16 %v9812_v3, %v9796_v55  ;;  %v19208_v15 = vld [vmem:[%s24564_s14 + $0x998] sm:$0xff]  }
0x227a   :  { %v9843_v17 = vpack.c.bf16 %v9811_v13, %v9795_v56  ;;  %v9845_v7 = vpack.c.bf16 %v9813_v2, %v9797_v52  ;;  %17933 = vmatpush3.bf16.msra.mxu0 %v19199_v43  ;;  %17961 = vmatpush3.bf16.msra.mxu1 %v19200_v4  ;;  %v9478_v24 = vpop.f32.mrb[196].mxu0  ;;  %v9531_v61 = vpop.f32.mrb[212].mxu1  ;;  %v19209_v43 = vld [vmem:[%s24564_s14 + $0x960] sm:$0xff]   ;;  %v22996_v56 = vld [vmem:[%s24567_s13 + $0x28] sm:$0xff] }
0x227b   :  { %v9479_v25 = vadd.f32 %v9478_v24, %v22931_v26  ;;  %v9532_v45 = vadd.f32 %v9531_v61, %v22935_v51  ;;  %v9480_v6 = vpop.f32.mrb[197].mxu0  ;;  %v9533_v48 = vpop.f32.mrb[213].mxu1  ;;  %17934 = vmatprep.subr.bf16.mxu0 %v19201_v9  ;;  %17962 = vmatprep.subr.bf16.mxu1 %v19202_v60  ;;  %v19210_v4 = vld [vmem:[%s24564_s14 + $0x9e0] sm:$0xff]  }
0x227c   :  { %v9481_v19 = vadd.f32 %v9480_v6, %v22939_v50  ;;  %v9534_v49 = vadd.f32 %v9533_v48, %v22949_v22  ;;  %v9482_v53 = vpop.f32.mrb[198].mxu0  ;;  %v9535_v23 = vpop.f32.mrb[214].mxu1  ;;  %10923 = vmatprep.mubr.bf16.mxu0 %v9843_v17  ;;  %10972 = vmatprep.mubr.bf16.mxu1 %v9845_v7  ;;  %v19212_v17 = vld [vmem:[%s24564_s14 + $0x9a0] sm:$0xff]  }
0x227d   :  { %v9483_v1 = vadd.f32 %v9482_v53, %v22931_v26  ;;  %v9536_v16 = vadd.f32 %v9535_v23, %v22935_v51  ;;  %v9484_v46 = vpop.f32.mrb[199].mxu0  ;;  %v9537_v62 = vpop.f32.mrb[215].mxu1  ;;  %10924 = vmatmul.mubr.bf16.gmra.mrb[224].mxu0 %v9842_v12  ;;  %10973 = vmatmul.mubr.bf16.gmra.mrb[240].mxu1 %v9844_v21  ;;  %v9766_v42 = vmax.f32 %v9479_v25, 0.0  ;;  %v9768_v57 = vmax.f32 %v9532_v45, 0.0  ;;  %v19211_v21 = vld [vmem:[%s24564_s14 + $0x920] sm:$0xff]   ;;  %v19214_v25 = vld [vmem:[%s24564_s14 + $0x9e8] sm:$0xff]  }
0x227e   :  { %v9485_v38 = vadd.f32 %v9484_v46, %v22939_v50  ;;  %v9538_v47 = vadd.f32 %v9537_v62, %v22949_v22  ;;  %17935 = vmatpush3.bf16.msra.mxu0 %v19203_v63  ;;  %17963 = vmatpush3.bf16.msra.mxu1 %v19204_v41  ;;  %v9767_v0 = vmax.f32 %v9481_v19, 0.0  ;;  %v9769_v55 = vmax.f32 %v9534_v49, 0.0  ;;  %v19213_v41 = vld [vmem:[%s24564_s14 + $0x968] sm:$0xff]  }
0x227f   :  { %v9782_v36 = vmax.f32 %v9483_v1, 0.0  ;;  %v9784_v5 = vmax.f32 %v9536_v16, 0.0  ;;  %17936 = vmatprep.subr.bf16.mxu0 %v19205_v35  ;;  %17964 = vmatprep.subr.bf16.mxu1 %v19206_v58  ;;  %v23016_v58 = vrot.slane %v22996_v56, %v19936_v28  ;;  %v23022_v1 = vrot.slane %v22996_v56, %v20595_v29 }
0x2280   :  { %v9783_v59 = vmax.f32 %v9485_v38, 0.0  ;;  %v9785_v3 = vmax.f32 %v9538_v47, 0.0  ;;  %v23026_v16 = vrot.slane %v22996_v56, %v19942_v30  ;;  %v23038_v38 = vrot.slane %v22996_v56, %v20598_v33 }
0x2281   :  { %v22989_v9 = vpack.c.bf16 %v9782_v36, %v9766_v42  ;;  %v22991_v60 = vpack.c.bf16 %v9784_v5, %v9768_v57  ;;  %v19218_v42 = vld [vmem:[%s24564_s14 + $0x9f0] sm:$0xff]  }
0x2282   :  { %v9831_v52 = vpack.c.bf16 %v9783_v59, %v9767_v0  ;;  %v9833_v13 = vpack.c.bf16 %v9785_v3, %v9769_v55  ;;  %17937 = vmatpush3.bf16.msra.mxu0 %v19207_v54  ;;  %17965 = vmatpush3.bf16.msra.mxu1 %v19208_v15  ;;  %v9488_v2 = vpop.f32.mrb[200].mxu0  ;;  %v9541_v12 = vpop.f32.mrb[216].mxu1 }
0x2283   :  { %v9489_v7 = vadd.f32 %v9488_v2, %v22931_v26  ;;  %v9542_v24 = vadd.f32 %v9541_v12, %v22935_v51  ;;  %v9490_v61 = vpop.f32.mrb[201].mxu0  ;;  %v9543_v63 = vpop.f32.mrb[217].mxu1  ;;  %17938 = vmatprep.subr.bf16.mxu0 %v19209_v43  ;;  %17966 = vmatprep.subr.bf16.mxu1 %v19210_v4  ;;  %v19220_v2 = vld [vmem:[%s24564_s14 + $0x9b0] sm:$0xff]  }
0x2284   :  { %v9491_v45 = vadd.f32 %v9490_v61, %v22939_v50  ;;  %v9544_v6 = vadd.f32 %v9543_v63, %v22949_v22  ;;  %v9492_v48 = vpop.f32.mrb[202].mxu0  ;;  %v9545_v35 = vpop.f32.mrb[218].mxu1  ;;  %11013 = vmatprep.mubr.bf16.mxu0 %v9831_v52  ;;  %11062 = vmatprep.mubr.bf16.mxu1 %v9833_v13  ;;  %v19219_v13 = vld [vmem:[%s24564_s14 + $0x930] sm:$0xff]   ;;  %v19222_v61 = vld [vmem:[%s24564_s14 + $0x9f8] sm:$0xff]  }
0x2285   :  { %v9493_v19 = vadd.f32 %v9492_v48, %v22931_v26  ;;  %v9546_v49 = vadd.f32 %v9545_v35, %v22935_v51  ;;  %v9494_v53 = vpop.f32.mrb[203].mxu0  ;;  %v9547_v23 = vpop.f32.mrb[219].mxu1  ;;  %v19215_v26 = vld [vmem:[%s24564_s14 + $0x928] sm:$0xff]   ;;  %v9798_v47 = vmax.f32 %v9489_v7, 0.0  ;;  %v9800_v54 = vmax.f32 %v9542_v24, 0.0  ;;  %v19221_v24 = vld [vmem:[%s24564_s14 + $0x978] sm:$0xff]  }
0x2286   :  { %v9495_v46 = vadd.f32 %v9494_v53, %v22939_v50  ;;  %v9548_v62 = vadd.f32 %v9547_v23, %v22949_v22  ;;  %17939 = vmatpush3.bf16.msra.mxu0 %v19211_v21  ;;  %17967 = vmatpush3.bf16.msra.mxu1 %v19212_v17  ;;  %v19216_v51 = vld [vmem:[%s24564_s14 + $0x9a8] sm:$0xff]   ;;  %v19217_v22 = vld [vmem:[%s24564_s14 + $0x970] sm:$0xff]   ;;  %v9799_v57 = vmax.f32 %v9491_v45, 0.0  ;;  %v9801_v36 = vmax.f32 %v9544_v6, 0.0  ;;  %v19223_v23 = vld [vmem:[%s24564_s14 + $0x938] sm:$0xff]  }
0x2287   :  { %v9814_v15 = vmax.f32 %v9493_v19, 0.0  ;;  %v9816_v50 = vmax.f32 %v9546_v49, 0.0  ;;  %17940 = vmatprep.subr.bf16.mxu0 %v19213_v41  ;;  %17968 = vmatprep.subr.bf16.mxu1 %v19214_v25 }
0x2288   :  { %v9815_v5 = vmax.f32 %v9495_v46, 0.0  ;;  %v9817_v43 = vmax.f32 %v9548_v62, 0.0  ;;  %v19224_v46 = vld [vmem:[%s24564_s14 + $0x9b8] sm:$0xff]  }
0x2289   :  { %v23046_v4 = vpack.c.bf16 %v9814_v15, %v9798_v47  ;;  %v23048_v0 = vpack.c.bf16 %v9816_v50, %v9800_v54  ;;  %v19225_v54 = vld [vmem:[%s24564_s14 + $0xa40] sm:$0xff]  }
0x228a   :  { %v23050_v55 = vpack.c.bf16 %v9815_v5, %v9799_v57  ;;  %v23052_v59 = vpack.c.bf16 %v9817_v43, %v9801_v36  ;;  %17941 = vmatpush3.bf16.msra.mxu0 %v19215_v26  ;;  %17969 = vmatpush3.bf16.msra.mxu1 %v19216_v51  ;;  %v9584_v3 = vpop.f32.mrb[204].mxu0  ;;  %v9637_v52 = vpop.f32.mrb[220].mxu1  ;;  %v19226_v15 = vld [vmem:[%s24564_s14 + $0xac0] sm:$0xff]  }
0x228b   :  { %v9585_v12 = vadd.f32 %v9584_v3, %v23016_v58  ;;  %v9638_v21 = vadd.f32 %v9637_v52, %v23022_v1  ;;  %v9586_v17 = vpop.f32.mrb[205].mxu0  ;;  %v9639_v7 = vpop.f32.mrb[221].mxu1  ;;  %17942 = vmatprep.subr.bf16.mxu0 %v19217_v22  ;;  %17970 = vmatprep.subr.bf16.mxu1 %v19218_v42 }
0x228c   :  { %v9587_v63 = vadd.f32 %v9586_v17, %v23026_v16  ;;  %v9640_v41 = vadd.f32 %v9639_v7, %v23038_v38  ;;  %v9588_v25 = vpop.f32.mrb[206].mxu0  ;;  %v9641_v45 = vpop.f32.mrb[222].mxu1  ;;  %v19227_v7 = vld [vmem:[%s24564_s14 + $0xa00] sm:$0xff]  }
0x228d   :  { %v9589_v6 = vadd.f32 %v9588_v25, %v23016_v58  ;;  %v9642_v48 = vadd.f32 %v9641_v45, %v23022_v1  ;;  %v9590_v35 = vpop.f32.mrb[207].mxu0  ;;  %v9643_v19 = vpop.f32.mrb[223].mxu1  ;;  %v9770_v62 = vmax.f32 %v9585_v12, 0.0  ;;  %v9772_v26 = vmax.f32 %v9638_v21, 0.0  ;;  %v19229_v45 = vld [vmem:[%s24564_s14 + $0xa48] sm:$0xff]  }
0x228e   :  { %v9591_v49 = vadd.f32 %v9590_v35, %v23026_v16  ;;  %v9644_v53 = vadd.f32 %v9643_v19, %v23038_v38  ;;  %17943 = vmatpush3.bf16.msra.mxu0 %v19219_v13  ;;  %17971 = vmatpush3.bf16.msra.mxu1 %v19220_v2  ;;  %v9771_v50 = vmax.f32 %v9587_v63, 0.0  ;;  %v9773_v22 = vmax.f32 %v9640_v41, 0.0 }
0x228f   :  { %v9786_v51 = vmax.f32 %v9589_v6, 0.0  ;;  %v9788_v47 = vmax.f32 %v9642_v48, 0.0  ;;  %17944 = vmatprep.subr.bf16.mxu0 %v19221_v24  ;;  %17972 = vmatprep.subr.bf16.mxu1 %v19222_v61  ;;  %v19228_v24 = vld [vmem:[%s24564_s14 + $0xa80] sm:$0xff]   ;;  %v19230_v6 = vld [vmem:[%s24564_s14 + $0xac8] sm:$0xff]   ;;  %v23112_v48 = vrot.slane %v22996_v56, %v20601_v20  ;;  %v23116_v35 = vrot.slane %v22996_v56, %v20604_v34 }
0x2290   :  { %v9787_v42 = vmax.f32 %v9591_v49, 0.0  ;;  %v9789_v57 = vmax.f32 %v9644_v53, 0.0 }
0x2291   :  { %v23086_v36 = vpack.c.bf16 %v9786_v51, %v9770_v62  ;;  %v23088_v5 = vpack.c.bf16 %v9788_v47, %v9772_v26 }
0x2292   :  { %v23090_v43 = vpack.c.bf16 %v9787_v42, %v9771_v50  ;;  %v23092_v3 = vpack.c.bf16 %v9789_v57, %v9773_v22  ;;  %17945 = vmatpush3.bf16.msra.mxu0 %v19223_v23  ;;  %17973 = vmatpush3.bf16.msra.mxu1 %v19224_v46  ;;  %v9594_v52 = vpop.f32.mrb[208].mxu0  ;;  %v9647_v13 = vpop.f32.mrb[224].mxu1  ;;  %v23124_v46 = vrot.slane %v22996_v56, %v20607_v37 }
0x2293   :  { %v9595_v2 = vadd.f32 %v9594_v52, %v23016_v58  ;;  %v9648_v12 = vadd.f32 %v9647_v13, %v23022_v1  ;;  %v9596_v21 = vpop.f32.mrb[209].mxu0  ;;  %v9649_v17 = vpop.f32.mrb[225].mxu1  ;;  %17986 = vmatprep.subr.bf16.mxu0 %v19225_v54  ;;  %18014 = vmatprep.subr.bf16.mxu1 %v19226_v15  ;;  %v19234_v15 = vld [vmem:[%s24564_s14 + $0xad0] sm:$0xff]  }
0x2294   :  { %v9597_v61 = vadd.f32 %v9596_v21, %v23026_v16  ;;  %v9650_v63 = vadd.f32 %v9649_v17, %v23038_v38  ;;  %v9598_v41 = vpop.f32.mrb[210].mxu0  ;;  %v9651_v25 = vpop.f32.mrb[226].mxu1 }
0x2295   :  { %v9599_v19 = vadd.f32 %v9598_v41, %v23016_v58  ;;  %v9652_v49 = vadd.f32 %v9651_v25, %v23022_v1  ;;  %11014 = vmatmul.mubr.bf16.vlgmr.msra.gmra.mrb[228].mxu0 %v22989_v9  ;;  %11063 = vmatmul.mubr.bf16.vlgmr.msra.gmra.mrb[244].mxu1 %v22991_v60  ;;  %v9600_v53 = vpop.f32.mrb[211].mxu0  ;;  %v9653_v23 = vpop.f32.mrb[227].mxu1  ;;  %v23132_v58 = vrot.slane %v22996_v56, %v20610_v40  ;;  %v9802_v9 = vmax.f32 %v9595_v2, 0.0  ;;  %v19233_v56 = vld [vmem:[%s24564_s14 + $0xa50] sm:$0xff]  }
0x2296   :  { %v9601_v62 = vadd.f32 %v9600_v53, %v23026_v16  ;;  %v9654_v26 = vadd.f32 %v9653_v23, %v23038_v38  ;;  %11021 = vmatprep.mubr.bf16.mxu0 %v23050_v55  ;;  %11070 = vmatprep.mubr.bf16.mxu1 %v23052_v59  ;;  %v9804_v60 = vmax.f32 %v9648_v12, 0.0  ;;  %v19231_v16 = vld [vmem:[%s24564_s14 + $0xa08] sm:$0xff]   ;;  %v9803_v55 = vmax.f32 %v9597_v61, 0.0 }
0x2297   :  { %v9818_v1 = vmax.f32 %v9599_v19, 0.0  ;;  %v9820_v51 = vmax.f32 %v9652_v49, 0.0  ;;  %17987 = vmatpush3.bf16.msra.mxu0 %v19227_v7  ;;  %18015 = vmatpush3.bf16.msra.mxu1 %v19228_v24  ;;  %v19232_v38 = vld [vmem:[%s24564_s14 + $0xa88] sm:$0xff]   ;;  %v9805_v59 = vmax.f32 %v9650_v63, 0.0  ;;  %v19235_v7 = vld [vmem:[%s24564_s14 + $0xa10] sm:$0xff]  }
0x2298   :  { %v9819_v47 = vmax.f32 %v9601_v62, 0.0  ;;  %v9821_v54 = vmax.f32 %v9654_v26, 0.0  ;;  %17988 = vmatprep.subr.bf16.mxu0 %v19229_v45  ;;  %18016 = vmatprep.subr.bf16.mxu1 %v19230_v6  ;;  %v19236_v24 = vld [vmem:[%s24564_s14 + $0xa90] sm:$0xff]   ;;  %v19237_v45 = vld [vmem:[%s24564_s14 + $0xa58] sm:$0xff]  }
0x2299   :  { %v23146_v50 = vpack.c.bf16 %v9818_v1, %v9802_v9  ;;  %v23148_v22 = vpack.c.bf16 %v9820_v51, %v9804_v60  ;;  %v19238_v6 = vld [vmem:[%s24564_s14 + $0xad8] sm:$0xff]  }
0x229a   :  { %v23150_v42 = vpack.c.bf16 %v9819_v47, %v9803_v55  ;;  %v23152_v57 = vpack.c.bf16 %v9821_v54, %v9805_v59  ;;  %v9690_v52 = vpop.f32.mrb[212].mxu0  ;;  %v9743_v13 = vpop.f32.mrb[228].mxu1  ;;  %v19242_v59 = vld [vmem:[%s24564_s14 + $0xae0] sm:$0xff]  }
0x229b   :  { %17989 = vmatpush3.bf16.msra.mxu0 %v19231_v16  ;;  %18017 = vmatpush3.bf16.msra.mxu1 %v19232_v38  ;;  %v9691_v2 = vadd.f32 %v9690_v52, %v23112_v48  ;;  %v9744_v12 = vadd.f32 %v9743_v13, %v23116_v35  ;;  %v9692_v21 = vpop.f32.mrb[213].mxu0  ;;  %v9745_v17 = vpop.f32.mrb[229].mxu1 }
0x229c   :  { %v9693_v61 = vadd.f32 %v9692_v21, %v23124_v46  ;;  %v9746_v63 = vadd.f32 %v9745_v17, %v23132_v58  ;;  %v9694_v41 = vpop.f32.mrb[214].mxu0  ;;  %v9747_v25 = vpop.f32.mrb[230].mxu1  ;;  %17990 = vmatprep.subr.bf16.mxu0 %v19233_v56  ;;  %18018 = vmatprep.subr.bf16.mxu1 %v19234_v15 }
0x229d   :  { %v9695_v19 = vadd.f32 %v9694_v41, %v23112_v48  ;;  %v9748_v49 = vadd.f32 %v9747_v25, %v23116_v35  ;;  %11022 = vmatmul.mubr.bf16.gmra.mrb[232].mxu0 %v23046_v4  ;;  %11071 = vmatmul.mubr.bf16.gmra.mrb[248].mxu1 %v23048_v0  ;;  %v9696_v53 = vpop.f32.mrb[215].mxu0  ;;  %v9749_v23 = vpop.f32.mrb[231].mxu1  ;;  %v9774_v9 = vmax.f32 %v9691_v2, 0.0  ;;  %v9776_v60 = vmax.f32 %v9744_v12, 0.0  ;;  %v19239_v4 = vld [vmem:[%s24564_s14 + $0xa18] sm:$0xff]  }
0x229e   :  { %v9697_v62 = vadd.f32 %v9696_v53, %v23124_v46  ;;  %v9750_v26 = vadd.f32 %v9749_v23, %v23132_v58  ;;  %11111 = vmatprep.mubr.bf16.mxu0 %v23090_v43  ;;  %11160 = vmatprep.mubr.bf16.mxu1 %v23092_v3  ;;  %v19240_v0 = vld [vmem:[%s24564_s14 + $0xa98] sm:$0xff]   ;;  %v9775_v16 = vmax.f32 %v9693_v61, 0.0  ;;  %v9777_v38 = vmax.f32 %v9746_v63, 0.0  ;;  %v19241_v3 = vld [vmem:[%s24564_s14 + $0xa60] sm:$0xff]  }
0x229f   :  { %v9790_v1 = vmax.f32 %v9695_v19, 0.0  ;;  %v9792_v51 = vmax.f32 %v9748_v49, 0.0  ;;  %17991 = vmatpush3.bf16.msra.mxu0 %v19235_v7  ;;  %18019 = vmatpush3.bf16.msra.mxu1 %v19236_v24  ;;  %v19243_v7 = vld [vmem:[%s24564_s14 + $0xa20] sm:$0xff]  }
0x22a0   :  { %v9791_v55 = vmax.f32 %v9697_v62, 0.0  ;;  %v9793_v43 = vmax.f32 %v9750_v26, 0.0  ;;  %17992 = vmatprep.subr.bf16.mxu0 %v19237_v45  ;;  %18020 = vmatprep.subr.bf16.mxu1 %v19238_v6  ;;  %v19244_v24 = vld [vmem:[%s24564_s14 + $0xaa0] sm:$0xff]   ;;  %v19245_v45 = vld [vmem:[%s24564_s14 + $0xa68] sm:$0xff]  }
0x22a1   :  { %v23190_v47 = vpack.c.bf16 %v9790_v1, %v9774_v9  ;;  %v23192_v54 = vpack.c.bf16 %v9792_v51, %v9776_v60  ;;  %v19246_v6 = vld [vmem:[%s24564_s14 + $0xae8] sm:$0xff]  }
0x22a2   :  { %v23194_v56 = vpack.c.bf16 %v9791_v55, %v9775_v16  ;;  %v23196_v15 = vpack.c.bf16 %v9793_v43, %v9777_v38  ;;  %v9700_v52 = vpop.f32.mrb[216].mxu0  ;;  %v9753_v13 = vpop.f32.mrb[232].mxu1  ;;  %v19250_v38 = vld [vmem:[%s24564_s14 + $0xaf0] sm:$0xff]  }
0x22a3   :  { %17993 = vmatpush3.bf16.msra.mxu0 %v19239_v4  ;;  %18021 = vmatpush3.bf16.msra.mxu1 %v19240_v0  ;;  %v9701_v2 = vadd.f32 %v9700_v52, %v23112_v48  ;;  %v9754_v12 = vadd.f32 %v9753_v13, %v23116_v35  ;;  %v9702_v21 = vpop.f32.mrb[217].mxu0  ;;  %v9755_v17 = vpop.f32.mrb[233].mxu1  ;;  %v19247_v4 = vld [vmem:[%s24564_s14 + $0xa28] sm:$0xff]   ;;  %v19251_v52 = vld [vmem:[%s24564_s14 + $0xa30] sm:$0xff]  }
0x22a4   :  { %v9703_v61 = vadd.f32 %v9702_v21, %v23124_v46  ;;  %v9756_v63 = vadd.f32 %v9755_v17, %v23132_v58  ;;  %v9704_v41 = vpop.f32.mrb[218].mxu0  ;;  %v9757_v25 = vpop.f32.mrb[234].mxu1  ;;  %17994 = vmatprep.subr.bf16.mxu0 %v19241_v3  ;;  %18022 = vmatprep.subr.bf16.mxu1 %v19242_v59  ;;  %v19252_v13 = vld [vmem:[%s24564_s14 + $0xab0] sm:$0xff]   ;;  %v19255_v21 = vld [vmem:[%s24564_s14 + $0xa38] sm:$0xff]  }
0x22a5   :  { %v9705_v19 = vadd.f32 %v9704_v41, %v23112_v48  ;;  %v9758_v49 = vadd.f32 %v9757_v25, %v23116_v35  ;;  %v9706_v53 = vpop.f32.mrb[219].mxu0  ;;  %v9759_v23 = vpop.f32.mrb[235].mxu1  ;;  %v9806_v9 = vmax.f32 %v9701_v2, 0.0  ;;  %v9808_v60 = vmax.f32 %v9754_v12, 0.0  ;;  %v19248_v48 = vld [vmem:[%s24564_s14 + $0xaa8] sm:$0xff]   ;;  %v19253_v2 = vld [vmem:[%s24564_s14 + $0xa78] sm:$0xff]  }
0x22a6   :  { %v9707_v62 = vadd.f32 %v9706_v53, %v23124_v46  ;;  %v9760_v26 = vadd.f32 %v9759_v23, %v23132_v58  ;;  %v9807_v35 = vmax.f32 %v9703_v61, 0.0  ;;  %v9809_v0 = vmax.f32 %v9756_v63, 0.0  ;;  %v19249_v58 = vld [vmem:[%s24564_s14 + $0xa70] sm:$0xff]   ;;  %v19254_v12 = vld [vmem:[%s24564_s14 + $0xaf8] sm:$0xff]   ;;  %v19259_v61 = vld [vmem:[%s24564_s14 + $0xb00] sm:$0xff]  }
0x22a7   :  { %v9822_v1 = vmax.f32 %v9705_v19, 0.0  ;;  %v9824_v51 = vmax.f32 %v9758_v49, 0.0  ;;  %17995 = vmatpush3.bf16.msra.mxu0 %v19243_v7  ;;  %18023 = vmatpush3.bf16.msra.mxu1 %v19244_v24  ;;  %v19256_v17 = vld [vmem:[%s24564_s14 + $0xab8] sm:$0xff]   ;;  %v19257_v7 = vld [vmem:[%s24564_s14 + $0xb40] sm:$0xff]   ;;  %v19261_v41 = vld [vmem:[%s24564_s14 + $0xb48] sm:$0xff]  }
0x22a8   :  { %v9823_v16 = vmax.f32 %v9707_v62, 0.0  ;;  %v9825_v46 = vmax.f32 %v9760_v26, 0.0  ;;  %17996 = vmatprep.subr.bf16.mxu0 %v19245_v45  ;;  %18024 = vmatprep.subr.bf16.mxu1 %v19246_v6  ;;  %v19258_v24 = vld [vmem:[%s24564_s14 + $0xbc0] sm:$0xff]   ;;  %v19262_v25 = vld [vmem:[%s24564_s14 + $0xbc8] sm:$0xff]   ;;  %v19269_v19 = vld [vmem:[%s24564_s14 + $0xb58] sm:$0xff]  }
0x22a9   :  { %v23230_v55 = vpack.c.bf16 %v9822_v1, %v9806_v9  ;;  %v23232_v43 = vpack.c.bf16 %v9824_v51, %v9808_v60  ;;  %v19260_v63 = vld [vmem:[%s24564_s14 + $0xb80] sm:$0xff]   ;;  %v19263_v45 = vld [vmem:[%s24564_s14 + $0xb08] sm:$0xff]   ;;  %v19270_v49 = vld [vmem:[%s24564_s14 + $0xbd8] sm:$0xff]  }
0x22aa   :  { %v23234_v3 = vpack.c.bf16 %v9823_v16, %v9807_v35  ;;  %v23236_v59 = vpack.c.bf16 %v9825_v46, %v9809_v0  ;;  %v19264_v6 = vld [vmem:[%s24564_s14 + $0xb88] sm:$0xff]   ;;  %v19271_v53 = vld [vmem:[%s24564_s14 + $0xb18] sm:$0xff]   ;;  %v19281_v1 = vld [vmem:[%s24564_s14 + $0xb70] sm:$0xff]  }
0x22ab   :  { %17997 = vmatpush3.bf16.msra.mxu0 %v19247_v4  ;;  %18025 = vmatpush3.bf16.msra.mxu1 %v19248_v48  ;;  %v19272_v23 = vld [vmem:[%s24564_s14 + $0xb98] sm:$0xff]   ;;  %v19277_v62 = vld [vmem:[%s24564_s14 + $0xb68] sm:$0xff]   ;;  %v19282_v51 = vld [vmem:[%s24564_s14 + $0xbf0] sm:$0xff]  }
0x22ac   :  { %17998 = vmatprep.subr.bf16.mxu0 %v19249_v58  ;;  %18026 = vmatprep.subr.bf16.mxu1 %v19250_v38  ;;  %v19278_v26 = vld [vmem:[%s24564_s14 + $0xbe8] sm:$0xff]   ;;  %v19283_v4 = vld [vmem:[%s24564_s14 + $0xb30] sm:$0xff]   ;;  %v19285_v35 = vld [vmem:[%s24564_s14 + $0xb78] sm:$0xff]  }
0x22ad   :  { %v19279_v9 = vld [vmem:[%s24564_s14 + $0xb28] sm:$0xff]   ;;  %v19284_v48 = vld [vmem:[%s24564_s14 + $0xbb0] sm:$0xff]   ;;  %v19286_v0 = vld [vmem:[%s24564_s14 + $0xbf8] sm:$0xff]  }
0x22ae   :  { %v19280_v60 = vld [vmem:[%s24564_s14 + $0xba8] sm:$0xff]   ;;  %v19287_v16 = vld [vmem:[%s24564_s14 + $0xb38] sm:$0xff]  }
0x22af   :  { %17999 = vmatpush3.bf16.msra.mxu0 %v19251_v52  ;;  %18027 = vmatpush3.bf16.msra.mxu1 %v19252_v13  ;;  %v19288_v46 = vld [vmem:[%s24564_s14 + $0xbb8] sm:$0xff]  }
0x22b0   :  { %18000 = vmatprep.subr.bf16.mxu0 %v19253_v2  ;;  %18028 = vmatprep.subr.bf16.mxu1 %v19254_v12 }
0x22b3   :  { %18001 = vmatpush3.bf16.msra.mxu0 %v19255_v21  ;;  %18029 = vmatpush3.bf16.msra.mxu1 %v19256_v17 }
0x22b4   :  { %18042 = vmatprep.subr.bf16.mxu0 %v19257_v7  ;;  %18070 = vmatprep.subr.bf16.mxu1 %v19258_v24 }
0x22b6   :  { %11112 = vmatmul.mubr.bf16.vlgmr.msra.gmra.mrb[236].mxu0 %v23086_v36  ;;  %11161 = vmatmul.mubr.bf16.vlgmr.msra.gmra.mrb[252].mxu1 %v23088_v5  ;;  %v19265_v36 = vld [vmem:[%s24564_s14 + $0xb50] sm:$0xff]  }
0x22b7   :  { %11119 = vmatprep.mubr.bf16.mxu0 %v23150_v42  ;;  %11168 = vmatprep.mubr.bf16.mxu1 %v23152_v57  ;;  %v19266_v5 = vld [vmem:[%s24564_s14 + $0xbd0] sm:$0xff]  }
0x22b8   :  { %18043 = vmatpush3.bf16.msra.mxu0 %v19259_v61  ;;  %18071 = vmatpush3.bf16.msra.mxu1 %v19260_v63  ;;  %v19267_v42 = vld [vmem:[%s24564_s14 + $0xb10] sm:$0xff]  }
0x22b9   :  { %18044 = vmatprep.subr.bf16.mxu0 %v19261_v41  ;;  %18072 = vmatprep.subr.bf16.mxu1 %v19262_v25  ;;  %v19268_v57 = vld [vmem:[%s24564_s14 + $0xb90] sm:$0xff]  }
0x22bc   :  { %18045 = vmatpush3.bf16.msra.mxu0 %v19263_v45  ;;  %18073 = vmatpush3.bf16.msra.mxu1 %v19264_v6 }
0x22bd   :  { %18046 = vmatprep.subr.bf16.mxu0 %v19265_v36  ;;  %18074 = vmatprep.subr.bf16.mxu1 %v19266_v5 }
0x22be   :  { %11120 = vmatmul.mubr.bf16.gmra.mrb[240].mxu0 %v23146_v50  ;;  %11169 = vmatmul.mubr.bf16.gmra.mrb[0].mxu1 %v23148_v22  ;;  %v19273_v50 = vld [vmem:[%s24564_s14 + $0xb60] sm:$0xff]  }
0x22bf   :  { %11209 = vmatprep.mubr.bf16.mxu0 %v23194_v56  ;;  %11258 = vmatprep.mubr.bf16.mxu1 %v23196_v15  ;;  %v19274_v22 = vld [vmem:[%s24564_s14 + $0xbe0] sm:$0xff]  }
0x22c0   :  { %18047 = vmatpush3.bf16.msra.mxu0 %v19267_v42  ;;  %18075 = vmatpush3.bf16.msra.mxu1 %v19268_v57  ;;  %v19275_v56 = vld [vmem:[%s24564_s14 + $0xb20] sm:$0xff]  }
0x22c1   :  { %18048 = vmatprep.subr.bf16.mxu0 %v19269_v19  ;;  %18076 = vmatprep.subr.bf16.mxu1 %v19270_v49  ;;  %v19276_v15 = vld [vmem:[%s24564_s14 + $0xba0] sm:$0xff]  }
0x22c4   :  { %18049 = vmatpush3.bf16.msra.mxu0 %v19271_v53  ;;  %18077 = vmatpush3.bf16.msra.mxu1 %v19272_v23 }
0x22c5   :  { %18050 = vmatprep.subr.bf16.mxu0 %v19273_v50  ;;  %18078 = vmatprep.subr.bf16.mxu1 %v19274_v22 }
0x22c8   :  { %18051 = vmatpush3.bf16.msra.mxu0 %v19275_v56  ;;  %18079 = vmatpush3.bf16.msra.mxu1 %v19276_v15 }
0x22c9   :  { %18052 = vmatprep.subr.bf16.mxu0 %v19277_v62  ;;  %18080 = vmatprep.subr.bf16.mxu1 %v19278_v26 }
0x22cc   :  { %18053 = vmatpush3.bf16.msra.mxu0 %v19279_v9  ;;  %18081 = vmatpush3.bf16.msra.mxu1 %v19280_v60 }
0x22cd   :  { %18054 = vmatprep.subr.bf16.mxu0 %v19281_v1  ;;  %18082 = vmatprep.subr.bf16.mxu1 %v19282_v51 }
0x22d0   :  { %18055 = vmatpush3.bf16.msra.mxu0 %v19283_v4  ;;  %18083 = vmatpush3.bf16.msra.mxu1 %v19284_v48 }
0x22d1   :  { %18056 = vmatprep.subr.bf16.mxu0 %v19285_v35  ;;  %18084 = vmatprep.subr.bf16.mxu1 %v19286_v0 }
0x22d4   :  { %18057 = vmatpush3.bf16.msra.mxu0 %v19287_v16  ;;  %18085 = vmatpush3.bf16.msra.mxu1 %v19288_v46 }
0x22d7   :  { %11210 = vmatmul.mubr.bf16.vlgmr.msra.gmra.mrb[244].mxu0 %v23190_v47  ;;  %11259 = vmatmul.mubr.bf16.vlgmr.msra.gmra.mrb[4].mxu1 %v23192_v54 }
0x22d8   :  { %11217 = vmatprep.mubr.bf16.mxu0 %v23234_v3  ;;  %11266 = vmatprep.mubr.bf16.mxu1 %v23236_v59 }
0x22df   :  { %11218 = vmatmul.mubr.bf16.gmra.mrb[248].mxu0 %v23230_v55  ;;  %11267 = vmatmul.mubr.bf16.gmra.mrb[8].mxu1 %v23232_v43 }
0x22e0   :  { %11469 = vmatprep.mubr.bf16.mxu0 %v19757_v14 }
0x2348   :  { %v17890_v58 = vpop.f32.mrb[220].mxu0  ;;  %v17918_v38 = vpop.f32.mrb[236].mxu1 }
0x2349   :  { %v17891_v52 = vpop.f32.mrb[221].mxu0  ;;  %v17919_v13 = vpop.f32.mrb[237].mxu1 }
0x234a   :  { %v17892_v2 = vadd.f32 %v17891_v52, %v17890_v58  ;;  %v17920_v12 = vadd.f32 %v17919_v13, %v17918_v38  ;;  %v17893_v21 = vpop.f32.mrb[222].mxu0  ;;  %v17921_v47 = vpop.f32.mrb[238].mxu1 }
0x234b   :  { %v17894_v17 = vpop.f32.mrb[223].mxu0  ;;  %v17922_v54 = vpop.f32.mrb[239].mxu1 }
0x234c   :  { %v10967_v7 = vadd.f32 %v17920_v12, %v17892_v2  ;;  %v17895_v3 = vadd.f32 %v17894_v17, %v17893_v21  ;;  %v17923_v24 = vadd.f32 %v17922_v54, %v17921_v47 }
0x234e   :  { %v10970_v59 = vadd.f32 %v17923_v24, %v17895_v3 }
0x2350   :  { %v17896_v61 = vpop.f32.mrb[224].mxu0  ;;  %v17924_v55 = vpop.f32.mrb[240].mxu1 }
0x2351   :  { %v17897_v63 = vpop.f32.mrb[225].mxu0  ;;  %v17925_v43 = vpop.f32.mrb[241].mxu1 }
0x2352   :  { %v17898_v41 = vadd.f32 %v17897_v63, %v17896_v61  ;;  %v17926_v25 = vadd.f32 %v17925_v43, %v17924_v55  ;;  %v17899_v45 = vpop.f32.mrb[226].mxu0  ;;  %v17927_v6 = vpop.f32.mrb[242].mxu1 }
0x2353   :  { %v17900_v36 = vpop.f32.mrb[227].mxu0  ;;  %v17928_v5 = vpop.f32.mrb[243].mxu1 }
0x2354   :  { %v10975_v42 = vadd.f32 %v17926_v25, %v17898_v41  ;;  %v17901_v57 = vadd.f32 %v17900_v36, %v17899_v45  ;;  %v17929_v19 = vadd.f32 %v17928_v5, %v17927_v6 }
0x2356   :  { %v10978_v49 = vadd.f32 %v17929_v19, %v17901_v57 }
0x2368   :  { %v17946_v53 = vpop.f32.mrb[228].mxu0  ;;  %v17974_v23 = vpop.f32.mrb[244].mxu1 }
0x2369   :  { %v17947_v50 = vpop.f32.mrb[229].mxu0  ;;  %v17975_v22 = vpop.f32.mrb[245].mxu1 }
0x236a   :  { %v17948_v56 = vadd.f32 %v17947_v50, %v17946_v53  ;;  %v17976_v15 = vadd.f32 %v17975_v22, %v17974_v23  ;;  %v17949_v62 = vpop.f32.mrb[230].mxu0  ;;  %v17977_v26 = vpop.f32.mrb[246].mxu1 }
0x236b   :  { %v17950_v9 = vpop.f32.mrb[231].mxu0  ;;  %v17978_v60 = vpop.f32.mrb[247].mxu1 }
0x236c   :  { %v11016_v1 = vadd.f32 %v17948_v56, %v10967_v7  ;;  %v17951_v51 = vadd.f32 %v17950_v9, %v17949_v62  ;;  %v17979_v4 = vadd.f32 %v17978_v60, %v17977_v26 }
0x236e   :  { %v11065_v48 = vadd.f32 %v17976_v15, %v11016_v1  ;;  %v11019_v35 = vadd.f32 %v17951_v51, %v10970_v59 }
0x2370   :  { %v11068_v0 = vadd.f32 %v17979_v4, %v11019_v35  ;;  %v17952_v16 = vpop.f32.mrb[232].mxu0  ;;  %v17980_v46 = vpop.f32.mrb[248].mxu1 }
0x2371   :  { %v17953_v58 = vpop.f32.mrb[233].mxu0  ;;  %v17981_v38 = vpop.f32.mrb[249].mxu1 }
0x2372   :  { %v17954_v52 = vadd.f32 %v17953_v58, %v17952_v16  ;;  %v17982_v13 = vadd.f32 %v17981_v38, %v17980_v46  ;;  %v17955_v2 = vpop.f32.mrb[234].mxu0  ;;  %v17983_v12 = vpop.f32.mrb[250].mxu1 }
0x2373   :  { %v17956_v21 = vpop.f32.mrb[235].mxu0  ;;  %v17984_v47 = vpop.f32.mrb[251].mxu1 }
0x2374   :  { %v11024_v17 = vadd.f32 %v17954_v52, %v10975_v42  ;;  %v17957_v54 = vadd.f32 %v17956_v21, %v17955_v2  ;;  %v17985_v3 = vadd.f32 %v17984_v47, %v17983_v12 }
0x2376   :  { %v11073_v24 = vadd.f32 %v17982_v13, %v11024_v17  ;;  %v11027_v7 = vadd.f32 %v17957_v54, %v10978_v49 }
0x2378   :  { %v11076_v61 = vadd.f32 %v17985_v3, %v11027_v7 }
0x2389   :  { %v18002_v55 = vpop.f32.mrb[236].mxu0  ;;  %v18030_v63 = vpop.f32.mrb[252].mxu1 }
0x238a   :  { %v18003_v59 = vpop.f32.mrb[237].mxu0  ;;  %v18031_v43 = vpop.f32.mrb[253].mxu1 }
0x238b   :  { %v18004_v41 = vadd.f32 %v18003_v59, %v18002_v55  ;;  %v18032_v25 = vadd.f32 %v18031_v43, %v18030_v63  ;;  %v18005_v45 = vpop.f32.mrb[238].mxu0  ;;  %v18033_v6 = vpop.f32.mrb[254].mxu1 }
0x238c   :  { %v18006_v36 = vpop.f32.mrb[239].mxu0  ;;  %v18034_v5 = vpop.f32.mrb[255].mxu1 }
0x238d   :  { %v11114_v57 = vadd.f32 %v18004_v41, %v11065_v48  ;;  %v18007_v19 = vadd.f32 %v18006_v36, %v18005_v45  ;;  %v18035_v53 = vadd.f32 %v18034_v5, %v18033_v6 }
0x238f   :  { %v11163_v23 = vadd.f32 %v18032_v25, %v11114_v57  ;;  %v11117_v42 = vadd.f32 %v18007_v19, %v11068_v0 }
0x2391   :  { %v11166_v50 = vadd.f32 %v18035_v53, %v11117_v42  ;;  %v18008_v22 = vpop.f32.mrb[240].mxu0  ;;  %v18036_v56 = vpop.f32.mrb[0].mxu1 }
0x2392   :  { %v18009_v49 = vpop.f32.mrb[241].mxu0  ;;  %v18037_v15 = vpop.f32.mrb[1].mxu1 }
0x2393   :  { %v18010_v62 = vadd.f32 %v18009_v49, %v18008_v22  ;;  %v18038_v26 = vadd.f32 %v18037_v15, %v18036_v56  ;;  %v18011_v9 = vpop.f32.mrb[242].mxu0  ;;  %v18039_v60 = vpop.f32.mrb[2].mxu1 }
0x2394   :  { %v18012_v1 = vpop.f32.mrb[243].mxu0  ;;  %v18040_v51 = vpop.f32.mrb[3].mxu1 }
0x2395   :  { %v11122_v4 = vadd.f32 %v18010_v62, %v11073_v24  ;;  %v18013_v35 = vadd.f32 %v18012_v1, %v18011_v9  ;;  %v18041_v16 = vadd.f32 %v18040_v51, %v18039_v60 }
0x2397   :  { %v11171_v46 = vadd.f32 %v18038_v26, %v11122_v4  ;;  %v11125_v48 = vadd.f32 %v18013_v35, %v11076_v61  ;;  %v16679_v61 = vld [vmem:[%s24568_s15 + $0x2] ss:$0 sm:$0xff] }
0x2399   :  { %v11174_v58 = vadd.f32 %v18041_v16, %v11125_v48 }
0x23aa   :  { %v18058_v38 = vpop.f32.mrb[244].mxu0  ;;  %v18086_v52 = vpop.f32.mrb[4].mxu1 }
0x23ab   :  { %v18059_v0 = vpop.f32.mrb[245].mxu0  ;;  %v18087_v13 = vpop.f32.mrb[5].mxu1 }
0x23ac   :  { %v18060_v2 = vadd.f32 %v18059_v0, %v18058_v38  ;;  %v18088_v12 = vadd.f32 %v18087_v13, %v18086_v52  ;;  %v18061_v21 = vpop.f32.mrb[246].mxu0  ;;  %v18089_v47 = vpop.f32.mrb[6].mxu1 }
0x23ad   :  { %v18062_v17 = vpop.f32.mrb[247].mxu0  ;;  %v18090_v54 = vpop.f32.mrb[7].mxu1 }
0x23ae   :  { %v11212_v3 = vadd.f32 %v18060_v2, %v11163_v23  ;;  %v18063_v7 = vadd.f32 %v18062_v17, %v18061_v21  ;;  %v18091_v55 = vadd.f32 %v18090_v54, %v18089_v47 }
0x23b0   :  { %v11261_v63 = vadd.f32 %v18088_v12, %v11212_v3  ;;  %v11215_v24 = vadd.f32 %v18063_v7, %v11166_v50 }
0x23b2   :  { %v11275_v59 = vadd.f32 %v11261_v63, %v22618_v44  ;;  %v11264_v43 = vadd.f32 %v18091_v55, %v11215_v24  ;;  %v18064_v41 = vpop.f32.mrb[248].mxu0  ;;  %v18092_v25 = vpop.f32.mrb[8].mxu1 }
0x23b3   :  { %v18065_v45 = vpop.f32.mrb[249].mxu0  ;;  %v18093_v6 = vpop.f32.mrb[9].mxu1 }
0x23b4   :  { %v11276_v36 = vadd.f32 %v11264_v43, %v22620_v8  ;;  %v18066_v5 = vadd.f32 %v18065_v45, %v18064_v41  ;;  %v18094_v57 = vadd.f32 %v18093_v6, %v18092_v25  ;;  %v18067_v19 = vpop.f32.mrb[250].mxu0  ;;  %v18095_v53 = vpop.f32.mrb[10].mxu1  ;;  %v11287_v23 = vadd.f32 %v16679_v61, %v11275_v59  ;;  %v19289_v59 = vld [vmem:[%s24589_s29 + $0xc0] ss:$8 sps:$4 sm:$0xff]   ;;  %v19294_v43 = vld [vmem:[%s24589_s29 + $0xd4] ss:$8 sps:$4 sm:$0xff]  }
0x23b5   :  { %v18068_v42 = vpop.f32.mrb[251].mxu0  ;;  %v18096_v50 = vpop.f32.mrb[11].mxu1  ;;  %v19292_v41 = vld [vmem:[%s24589_s29 + $0xd0] ss:$8 sps:$4 sm:$0xff]   ;;  %v19297_v25 = vld [vmem:[%s24589_s29 + $0xe4] ss:$8 sps:$4 sm:$0xff]  }
0x23b6   :  { %v11220_v22 = vadd.f32 %v18066_v5, %v11171_v46  ;;  %v18069_v56 = vadd.f32 %v18068_v42, %v18067_v19  ;;  %v18097_v49 = vadd.f32 %v18096_v50, %v18095_v53  ;;  %v11295_v15 = vsel %vm145_vm0, %v11287_v23, 0.0  ;;  %v19295_v45 = vld [vmem:[%s24589_s29 + $0xe0] ss:$8 sps:$4 sm:$0xff]   ;;  %v19300_v6 = vld [vmem:[%s24589_s29 + $0xf4] ss:$8 sps:$4 sm:$0xff]  }
0x23b7   :  { %11296 = vadd.xlane.f32.xlu0 %v11295_v15  ;;  %v11288_v44 = vadd.f32 %v16679_v61, %v11276_v36  ;;  %v19298_v36 = vld [vmem:[%s24589_s29 + $0xf0] ss:$8 sps:$4 sm:$0xff]  }
0x23b8   :  { %v11269_v62 = vadd.f32 %v18094_v57, %v11220_v22  ;;  %v11223_v26 = vadd.f32 %v18069_v56, %v11174_v58 }
0x23b9   :  { %v11298_v9 = vsel %vm145_vm0, %v11288_v44, 0.0 }
0x23ba   :  { %v11277_v8 = vadd.f32 %v11269_v62, %v22646_v10  ;;  %v11272_v60 = vadd.f32 %v18097_v49, %v11223_v26  ;;  %11299 = vadd.xlane.f32.xlu1 %v11298_v9  ;;  %v16682_v26 = vld [vmem:[%s24569_s16 + $0x2] ss:$0 sm:$0xff] }
0x23bc   :  { %v11278_v1 = vadd.f32 %v11272_v60, %v22644_v11  ;;  %v11289_v51 = vadd.f32 %v16679_v61, %v11277_v8 }
0x23be   :  { %v11301_v4 = vsel %vm145_vm0, %v11289_v51, 0.0  ;;  %v11290_v35 = vadd.f32 %v16679_v61, %v11278_v1  ;;  %v19291_v61 = vld [vmem:[%s24589_s29 + $0xc4] ss:$8 sps:$4 sm:$0xff]  }
0x23bf   :  { %11302 = vadd.xlane.f32.xlu0 %v11301_v4  ;;  %11437 = vmatprep.subr.bf16.mxu0 %v19291_v61 }
0x23c0   :  { %v11304_v16 = vsel %vm145_vm0, %v11290_v35, 0.0  ;;  %11438 = vmatpush1.bf16.msra.mxu0 %v19289_v59 }
0x23c1   :  { %11305 = vadd.xlane.f32.xlu1 %v11304_v16  ;;  %11439 = vmatprep.subr.bf16.mxu0 %v19294_v43 }
0x23c4   :  { %11440 = vmatpush1.bf16.msra.mxu0 %v19292_v41 }
0x23c5   :  { %11441 = vmatprep.subr.bf16.mxu0 %v19297_v25 }
0x23c8   :  { %11442 = vmatpush1.bf16.msra.mxu0 %v19295_v45 }
0x23c9   :  { %11443 = vmatprep.subr.bf16.mxu0 %v19300_v6 }
0x23cc   :  { %11444 = vmatpush1.bf16.msra.mxu0 %v19298_v36 }
0x2444   :  { %v11297_v46 = vpop.xlane.xlu0 %11296 }
0x2445   :  { %v11307_v48 = vmul.f32 0.015625, %v11297_v46 }
0x2447   :  { %v11311_v38 = vsub.f32 %v11287_v23, %v11307_v48  ;;  %v11300_v58 = vpop.xlane.xlu1 %11299 }
0x2448   :  { %v11308_v52 = vmul.f32 0.015625, %v11300_v58 }
0x2449   :  { %v11315_v0 = vmul.f32 %v11311_v38, %v11311_v38 }
0x244a   :  { %v11312_v13 = vsub.f32 %v11288_v44, %v11308_v52 }
0x244b   :  { %v11319_v10 = vsel %vm145_vm0, %v11315_v0, 0.0 }
0x244c   :  { %11320 = vadd.xlane.f32.xlu0 %v11319_v10  ;;  %v11303_v2 = vpop.xlane.xlu0 %11302  ;;  %v11316_v11 = vmul.f32 %v11312_v13, %v11312_v13 }
0x244d   :  { %v11309_v12 = vmul.f32 0.015625, %v11303_v2 }
0x244e   :  { %v11322_v21 = vsel %vm145_vm0, %v11316_v11, 0.0  ;;  %v11306_v47 = vpop.xlane.xlu1 %11305 }
0x244f   :  { %v11313_v17 = vsub.f32 %v11289_v51, %v11309_v12  ;;  %11323 = vadd.xlane.f32.xlu1 %v11322_v21  ;;  %v11310_v54 = vmul.f32 0.015625, %v11306_v47  ;;  %v16683_v51 = vld [vmem:[%s24570_s17 + $0x2] ss:$0 sm:$0xff]  ;;  %v16692_v12 = vld [vmem:[%s24558_s7 + $0x6] sm:$0x3]  ;;  %s24593_s7 = smov 96  }
0x2450   :  { %v11384_v21 = vrot.slane %v16692_v12, %v19936_v28 }
0x2451   :  { %v11314_v3 = vsub.f32 %v11290_v35, %v11310_v54  ;;  %v11317_v7 = vmul.f32 %v11313_v17, %v11313_v17 }
0x2453   :  { %v11325_v55 = vsel %vm145_vm0, %v11317_v7, 0.0  ;;  %v11318_v63 = vmul.f32 %v11314_v3, %v11314_v3 }
0x2454   :  { %11326 = vadd.xlane.f32.xlu0 %v11325_v55 }
0x2455   :  { %v11328_v24 = vsel %vm145_vm0, %v11318_v63, 0.0 }
0x2456   :  { %11329 = vadd.xlane.f32.xlu1 %v11328_v24 }
0x24d9   :  { %v11321_v5 = vpop.xlane.xlu0 %11320 }
0x24da   :  { %v11331_v57 = vmul.f32 0.015625, %v11321_v5 }
0x24dc   :  { %v11335_v19 = vadd.f32 1e-05, %v11331_v57  ;;  %v11324_v53 = vpop.xlane.xlu1 %11323 }
0x24dd   :  { %v11332_v23 = vmul.f32 0.015625, %v11324_v53 }
0x24de   :  { %19669 = vrsqrt.f32 %v11335_v19 }
0x24df   :  { %v11336_v42 = vadd.f32 1e-05, %v11332_v23 }
0x24e1   :  { %19671 = vrsqrt.f32 %v11336_v42  ;;  %v11327_v50 = vpop.xlane.xlu0 %11326 }
0x24e2   :  { %v11333_v22 = vmul.f32 0.015625, %v11327_v50 }
0x24e3   :  { %v11330_v56 = vpop.xlane.xlu1 %11329 }
0x24e4   :  { %v11337_v49 = vadd.f32 1e-05, %v11333_v22  ;;  %v11334_v15 = vmul.f32 0.015625, %v11330_v56 }
0x24e6   :  { %19673 = vrsqrt.f32 %v11337_v49  ;;  %v11338_v44 = vadd.f32 1e-05, %v11334_v15 }
0x24e8   :  { %v19670_v62 = vpop.eup %19669  ;;  %19675 = vrsqrt.f32 %v11338_v44 }
0x24e9   :  { %v11343_v9 = vmul.f32 %v19670_v62, %v11311_v38 }
0x24eb   :  { %v19672_v8 = vpop.eup %19671  ;;  %v11353_v60 = vmul.f32 %v16682_v26, %v11343_v9 }
0x24ec   :  { %v11344_v1 = vmul.f32 %v19672_v8, %v11312_v13 }
0x24ed   :  { %v23412_v16 = vadd.f32 %v16683_v51, %v11353_v60 }
0x24ee   :  { %v11354_v4 = vmul.f32 %v16682_v26, %v11344_v1 }
0x24f0   :  { %v19674_v35 = vpop.eup %19673  ;;  %v23414_v46 = vadd.f32 %v16683_v51, %v11354_v4 }
0x24f1   :  { %v11345_v48 = vmul.f32 %v19674_v35, %v11313_v17  ;;  %v11388_v17 = vrot.slane %v16692_v12, %v19942_v30 }
0x24f2   :  { %v19676_v58 = vpop.eup %19675  ;;  %v11367_v52 = vpack.c.bf16 %v23414_v46, %v23412_v16 }
0x24f3   :  { %v11355_v0 = vmul.f32 %v16682_v26, %v11345_v48  ;;  %v11346_v38 = vmul.f32 %v19676_v58, %v11314_v3 }
0x24f4   :  { %16701 = vmatmul.mubr.msk.bf16.vlgmr.msra.gmra.mrb[252].mxu0 %vm145_vm0, %v11367_v52 }
0x24f5   :  { %v11356_v13 = vmul.f32 %v16682_v26, %v11346_v38  ;;  %11479 = vmatprep.mubr.bf16.mxu0 %v19757_v14  ;;  %v23420_v10 = vadd.f32 %v16683_v51, %v11355_v0 }
0x24f7   :  { %v23422_v2 = vadd.f32 %v16683_v51, %v11356_v13 }
0x24f9   :  { %v11368_v11 = vpack.c.bf16 %v23422_v2, %v23420_v10 }
0x24fc   :  { %16702 = vmatmul.mubr.msk.bf16.gmra.mrb[0].mxu0 %vm145_vm0, %v11368_v11 }
0x25c7   :  { %v11471_v47 = vpop.f32.mrb[252].mxu0 }
0x25c8   :  { %v11473_v54 = vpop.f32.mrb[253].mxu0  ;;  %v11472_v7 = vadd.f32 %v11471_v47, %v11384_v21 }
0x25c9   :  { %v11475_v3 = vpop.f32.mrb[254].mxu0  ;;  %v11474_v24 = vadd.f32 %v11473_v54, %v11388_v17 }
0x25ca   :  { %v11476_v55 = vadd.f32 %v11475_v3, %v11384_v21  ;;  %v11477_v63 = vpop.f32.mrb[255].mxu0 }
0x25cb   :  { %v11478_v61 = vadd.f32 %v11477_v63, %v11388_v17 }
0x25cc   :  { %v23432_v59 = vpack.c.bf16 %v11476_v55, %v11472_v7 }
0x25cd   :  { %v23434_v43 = vpack.c.bf16 %v11478_v61, %v11474_v24 }
0x25ce   :  { %11496 = vrot.lane.b32.xlu0 %v23432_v59, %s19759_s24  ;;  %18654 = vmatprep.mubr.msk.bf16.mxu1 %vm332_vm1, %v23432_v59 }
0x25cf   :  { %v11481_v41 = vpop.f32.mrb[0].mxu0  ;;  %18658 = vmatprep.subr.bf16.mxu0 %v23434_v43 }
0x25d0   :  { %v11483_v25 = vpop.f32.mrb[1].mxu0  ;;  %18659 = vmatpush3.bf16.msra.mxu0 %v23434_v43  ;;  %v11482_v6 = vadd.f32 %v11481_v41, %v11384_v21 }
0x25d1   :  { %v11485_v45 = vpop.f32.mrb[2].mxu0  ;;  %v11484_v57 = vadd.f32 %v11483_v25, %v11388_v17 }
0x25d2   :  { %v11486_v36 = vadd.f32 %v11485_v45, %v11384_v21  ;;  %v11487_v5 = vpop.f32.mrb[3].mxu0 }
0x25d3   :  { %v11488_v19 = vadd.f32 %v11487_v5, %v11388_v17 }
0x25d4   :  { %v23442_v53 = vpack.c.bf16 %v11486_v36, %v11482_v6 }
0x25d5   :  { %v23444_v23 = vpack.c.bf16 %v11488_v19, %v11484_v57 }
0x25d6   :  { %11681 = vrot.lane.b32.xlu0 %v23442_v53, %s19758_s23  ;;  %11498 = vrot.lane.b32.xlu1 %v23442_v53, %s19759_s24 }
0x25d7   :  { %18660 = vmatprep.subr.bf16.mxu0 %v23444_v23 }
0x25d8   :  { %18661 = vmatpush3.bf16.msra.mxu0 %v23444_v23 }
0x25da   :  { %11677 = vrot.lane.b32.xlu0 %v23442_v53, %s19760_s5  ;;  %11679 = vrot.lane.b32.xlu1 %v23432_v59, %s19758_s23 }
0x25de   :  { %11993 = vrot.lane.b32.xlu0 %v23442_v53, %s19761_s22  ;;  %11675 = vrot.lane.b32.xlu1 %v23432_v59, %s19760_s5 }
0x25e2   :  { %11989 = vrot.lane.b32.xlu0 %v23442_v53, %s24593_s7  ;;  %11991 = vrot.lane.b32.xlu1 %v23432_v59, %s19761_s22 }
0x25e6   :  { %11987 = vrot.lane.b32.xlu1 %v23432_v59, %s24593_s7 }
0x2640   :  { %v11497_v42 = vpop.permute.xlu0 %11496 }
0x2641   :  { %v11507_v50 = vsel %vm332_vm1, %v11497_v42, 0  ;;  %18830 = vmatprep.subr.msk.bf16.mxu1 %vm332_vm1, %v11497_v42 }
0x2642   :  { %18651 = vmatpush3.bf16.xpose.msra.mxu1 %v11507_v50 }
0x2648   :  { %v11499_v22 = vpop.permute.xlu1 %11498  ;;  %v11682_v62 = vpop.permute.xlu0 %11681 }
0x2649   :  { %v11510_v56 = vsel %vm332_vm1, %v11499_v22, 0  ;;  %18831 = vmatprep.subr.msk.bf16.mxu1 %vm332_vm1, %v11499_v22  ;;  %v11693_v26 = vsel %vm332_vm1, %v11682_v62, 0 }
0x264a   :  { %18653 = vmatpush3.bf16.xpose.msra.mxu1 %v11510_v56 }
0x264c   :  { %v11680_v49 = vpop.permute.xlu1 %11679  ;;  %v11678_v8 = vpop.permute.xlu0 %11677 }
0x264d   :  { %18832 = vmatprep.subr.msk.bf16.mxu1 %vm332_vm1, %v11680_v49  ;;  %v11690_v44 = vsel %vm332_vm1, %v11680_v49, 0 }
0x2650   :  { %v11676_v15 = vpop.permute.xlu1 %11675  ;;  %v11994_v51 = vpop.permute.xlu0 %11993 }
0x2651   :  { %18655 = vmatmul.mubr.msk.bf16.vlgmr.msra.gmra.mrb[12].mxu1 %vm332_vm1, %v23442_v53  ;;  %v12005_v4 = vsel %vm332_vm1, %v11994_v51, 0 }
0x2652   :  { %18667 = vmatpush3.bf16.xpose.msra.mxu1 %v11690_v44  ;;  %18670 = vmatprep.mubr.msk.bf16.mxu1 %vm332_vm1, %v11676_v15 }
0x2653   :  { %18833 = vmatprep.subr.msk.bf16.mxu1 %vm332_vm1, %v11682_v62 }
0x2654   :  { %v11992_v9 = vpop.permute.xlu1 %11991  ;;  %v11990_v35 = vpop.permute.xlu0 %11989 }
0x2655   :  { %v12002_v60 = vsel %vm332_vm1, %v11992_v9, 0 }
0x2658   :  { %v11988_v1 = vpop.permute.xlu1 %11987 }
0x265a   :  { %18669 = vmatpush3.bf16.xpose.msra.mxu1 %v11693_v26 }
0x265b   :  { %18834 = vmatprep.subr.msk.bf16.mxu1 %vm332_vm1, %v11992_v9 }
0x2661   :  { %18671 = vmatmul.mubr.msk.bf16.vlgmr.msra.gmra.mrb[16].mxu1 %vm332_vm1, %v11678_v8 }
0x2662   :  { %18695 = vmatpush3.bf16.xpose.msra.mxu1 %v12002_v60  ;;  %18698 = vmatprep.mubr.msk.bf16.mxu1 %vm332_vm1, %v11988_v1 }
0x2663   :  { %18835 = vmatprep.subr.msk.bf16.mxu1 %vm332_vm1, %v11994_v51 }
0x266a   :  { %18697 = vmatpush3.bf16.xpose.msra.mxu1 %v12005_v4 }
0x2671   :  { %18699 = vmatmul.mubr.msk.bf16.vlgmr.msra.gmra.mrb[24].mxu1 %vm332_vm1, %v11990_v35 }
0x2724   :  { %v18656_v48 = vpop.f32.mrb[12].mxu1 }
0x2725   :  { %v11546_v58 = vpop.f32.mrb[13].mxu1  ;;  %v11563_v11 = vmul.f32 0.25, %v18656_v48 }
0x2726   :  { %v11561_v52 = vmul.f32 0.25, %v11546_v58  ;;  %v18657_v0 = vpop.f32.mrb[14].mxu1 }
0x2727   :  { %v11564_v38 = vmul.f32 0.25, %v18657_v0  ;;  %v11549_v13 = vpop.f32.mrb[15].mxu1  ;;  %v11567_v3 = vadd.f32 %v11563_v11, %v20020_v39 }
0x2728   :  { %v11565_v12 = vadd.f32 %v11561_v52, %v20013_v18  ;;  %v11562_v21 = vmul.f32 0.25, %v11549_v13 }
0x2729   :  { %v11568_v47 = vadd.f32 %v11564_v38, %v20017_v32  ;;  %v11575_v63 = vsel %vm402_vm6, %v11567_v3, -inf }
0x272a   :  { %v11566_v17 = vadd.f32 %v11562_v21, %v20015_v31  ;;  %v11569_v54 = vsel %vm402_vm6, %v11565_v12, -inf }
0x272b   :  { %11570 = vmax.xlane.f32.xlu1 %v11569_v54  ;;  %v11578_v55 = vsel %vm402_vm6, %v11568_v47, -inf }
0x272c   :  { %v11572_v7 = vsel %vm402_vm6, %v11566_v17, -inf }
0x272d   :  { %11573 = vmax.xlane.f32.xlu0 %v11572_v7 }
0x272f   :  { %11579 = vmax.xlane.f32.xlu1 %v11578_v55 }
0x2731   :  { %11576 = vmax.xlane.f32.xlu0 %v11575_v63 }
0x2734   :  { %v18672_v24 = vpop.f32.mrb[16].mxu1 }
0x2735   :  { %v11729_v61 = vpop.f32.mrb[17].mxu1  ;;  %v11746_v41 = vmul.f32 0.25, %v18672_v24 }
0x2736   :  { %v11744_v25 = vmul.f32 0.25, %v11729_v61  ;;  %v18673_v45 = vpop.f32.mrb[18].mxu1 }
0x2737   :  { %v11732_v6 = vpop.f32.mrb[19].mxu1  ;;  %v11747_v5 = vmul.f32 0.25, %v18673_v45  ;;  %v11750_v19 = vadd.f32 %v11746_v41, %v20020_v39 }
0x2738   :  { %v11748_v36 = vadd.f32 %v11744_v25, %v20013_v18  ;;  %v11745_v57 = vmul.f32 0.25, %v11732_v6 }
0x2739   :  { %v11751_v22 = vadd.f32 %v11747_v5, %v20017_v32  ;;  %v11758_v49 = vsel %vm402_vm6, %v11750_v19, -inf }
0x273a   :  { %v11749_v42 = vadd.f32 %v11745_v57, %v20015_v31  ;;  %v11752_v50 = vsel %vm402_vm6, %v11748_v36, -inf }
0x273b   :  { %11753 = vmax.xlane.f32.xlu0 %v11752_v50  ;;  %v11761_v15 = vsel %vm402_vm6, %v11751_v22, -inf }
0x273c   :  { %v11755_v56 = vsel %vm402_vm6, %v11749_v42, -inf }
0x273d   :  { %11756 = vmax.xlane.f32.xlu1 %v11755_v56 }
0x273f   :  { %11759 = vmax.xlane.f32.xlu0 %v11758_v49 }
0x2741   :  { %11762 = vmax.xlane.f32.xlu1 %v11761_v15 }
0x2744   :  { %v23500_v44 = vpop.f32.mrb[24].mxu1 }
0x2745   :  { %v23502_v62 = vpop.f32.mrb[25].mxu1 }
0x2746   :  { %v23504_v26 = vpop.f32.mrb[26].mxu1 }
0x2747   :  { %v12044_v9 = vpop.f32.mrb[27].mxu1 }
0x27b8   :  { %v11571_v8 = vpop.xlane.xlu1 %11570 }
0x27b9   :  { %v11581_v4 = vsub.f32 %v11565_v12, %v11571_v8 }
0x27ba   :  { %v11574_v60 = vpop.xlane.xlu0 %11573 }
0x27bb   :  { %v11582_v1 = vsub.f32 %v11566_v17, %v11574_v60  ;;  %v11585_v38 = vmul.f32 1.442695, %v11581_v4  ;;  %v12058_v4 = vmul.f32 0.25, %v23500_v44 }
0x27bc   :  { %v11580_v51 = vpop.xlane.xlu1 %11579 }
0x27bd   :  { %v11584_v35 = vsub.f32 %v11568_v47, %v11580_v51  ;;  %v11587_v48 = vmul.f32 1.442695, %v11582_v1  ;;  %v12057_v1 = vmul.f32 0.25, %v12044_v9  ;;  %v12056_v51 = vmul.f32 0.25, %v23502_v62 }
0x27be   :  { %v11577_v58 = vpop.xlane.xlu0 %11576 }
0x27bf   :  { %v11591_v52 = vmul.f32 1.442695, %v11584_v35  ;;  %v11583_v0 = vsub.f32 %v11567_v3, %v11577_v58  ;;  %v23553_v35 = vadd.f32 %v12057_v1, %v20015_v31  ;;  %v12059_v58 = vmul.f32 0.25, %v23504_v26 }
0x27c1   :  { %19677 = vpow2.f32 %v11591_v52  ;;  %v11589_v13 = vmul.f32 1.442695, %v11583_v0  ;;  %v23560_v52 = vadd.f32 %v12058_v4, %v20020_v39 }
0x27c2   :  { %19679 = vpow2.f32 %v11587_v48  ;;  %v23556_v48 = vadd.f32 %v12056_v51, %v20013_v18 }
0x27c3   :  { %19681 = vpow2.f32 %v11589_v13  ;;  %v12070_v62 = vsel %vm402_vm6, %v23560_v52, -inf }
0x27c4   :  { %19683 = vpow2.f32 %v11585_v38  ;;  %v12064_v44 = vsel %vm402_vm6, %v23556_v48, -inf }
0x27c8   :  { %v11754_v11 = vpop.xlane.xlu0 %11753 }
0x27c9   :  { %v11764_v21 = vsub.f32 %v11748_v36, %v11754_v11 }
0x27ca   :  { %v11757_v54 = vpop.xlane.xlu1 %11756 }
0x27cb   :  { %v23506_v7 = vpop.eup %19677  ;;  %v11765_v3 = vsub.f32 %v11749_v42, %v11757_v54  ;;  %v11768_v24 = vmul.f32 1.442695, %v11764_v21 }
0x27cc   :  { %v23508_v55 = vpop.eup %19679  ;;  %v11760_v17 = vpop.xlane.xlu0 %11759  ;;  %v11602_v12 = vsel %vm402_vm6, %v23506_v7, 0.0 }
0x27cd   :  { %v23512_v47 = vpop.eup %19681  ;;  %v11766_v63 = vsub.f32 %v11750_v19, %v11760_v17  ;;  %11603 = vadd.xlane.f32.xlu1 %v11602_v12  ;;  %v11596_v36 = vsel %vm402_vm6, %v23508_v55, 0.0  ;;  %v11770_v5 = vmul.f32 1.442695, %v11765_v3 }
0x27ce   :  { %v11763_v61 = vpop.xlane.xlu1 %11762  ;;  %v11599_v41 = vsel %vm402_vm6, %v23512_v47, 0.0  ;;  %v23516_v25 = vpop.eup %19683 }
0x27cf   :  { %v11772_v45 = vmul.f32 1.442695, %v11766_v63  ;;  %v11767_v6 = vsub.f32 %v11751_v22, %v11763_v61  ;;  %11600 = vadd.xlane.f32.xlu0 %v11599_v41  ;;  %v11593_v19 = vsel %vm402_vm6, %v23516_v25, 0.0 }
0x27d1   :  { %19685 = vpow2.f32 %v11772_v45  ;;  %v11774_v57 = vmul.f32 1.442695, %v11767_v6  ;;  %11597 = vadd.xlane.f32.xlu1 %v11596_v36 }
0x27d2   :  { %19687 = vpow2.f32 %v11768_v24 }
0x27d3   :  { %19689 = vpow2.f32 %v11774_v57  ;;  %11594 = vadd.xlane.f32.xlu0 %v11593_v19 }
0x27d4   :  { %19691 = vpow2.f32 %v11770_v5 }
0x27db   :  { %v23522_v42 = vpop.eup %19685 }
0x27dc   :  { %v23524_v50 = vpop.eup %19687  ;;  %v11782_v22 = vsel %vm402_vm6, %v23522_v42, 0.0 }
0x27dd   :  { %v23528_v56 = vpop.eup %19689  ;;  %11783 = vadd.xlane.f32.xlu0 %v11782_v22  ;;  %v11776_v8 = vsel %vm402_vm6, %v23524_v50, 0.0 }
0x27de   :  { %v11785_v49 = vsel %vm402_vm6, %v23528_v56, 0.0  ;;  %v23532_v15 = vpop.eup %19691 }
0x27df   :  { %11786 = vadd.xlane.f32.xlu1 %v11785_v49  ;;  %v11779_v60 = vsel %vm402_vm6, %v23532_v15, 0.0 }
0x27e1   :  { %11777 = vadd.xlane.f32.xlu0 %v11776_v8 }
0x27e3   :  { %11780 = vadd.xlane.f32.xlu1 %v11779_v60 }
0x27f4   :  { %11802 = vrot.lane.b32.xlu1 %v23444_v23, %s19760_s5 }
0x27f7   :  { %11800 = vrot.lane.b32.xlu0 %v23434_v43, %s19760_s5 }
0x27f8   :  { %12244 = vrot.lane.b32.xlu1 %v23432_v59, %s24592_s30 }
0x27fb   :  { %12246 = vrot.lane.b32.xlu0 %v23442_v53, %s24592_s30 }
0x27fc   :  { %12240 = vrot.lane.b32.xlu1 %v23432_v59, %s24591_s26  ;;  %v12067_v59 = vsel %vm402_vm6, %v23553_v35, -inf }
0x27ff   :  { %12242 = vrot.lane.b32.xlu0 %v23442_v53, %s24591_s26  ;;  %v23565_v53 = vadd.f32 %v12059_v58, %v20017_v32 }
0x2801   :  { %v12073_v26 = vsel %vm402_vm6, %v23565_v53, -inf }
0x281e   :  { %12068 = vmax.xlane.f32.xlu0 %v12067_v59 }
0x2820   :  { %12065 = vmax.xlane.f32.xlu1 %v12064_v44 }
0x2822   :  { %12071 = vmax.xlane.f32.xlu0 %v12070_v62 }
0x2824   :  { %12074 = vmax.xlane.f32.xlu1 %v12073_v26 }
0x285a   :  { %v11604_v9 = vpop.xlane.xlu1 %11603 }
0x285c   :  { %v11601_v0 = vpop.xlane.xlu0 %11600 }
0x285d   :  { %19693 = vrcp.f32 %v11601_v0 }
0x285e   :  { %v11598_v38 = vpop.xlane.xlu1 %11597 }
0x285f   :  { %19695 = vrcp.f32 %v11598_v38 }
0x2860   :  { %19697 = vrcp.f32 %v11604_v9  ;;  %v11595_v13 = vpop.xlane.xlu0 %11594 }
0x2861   :  { %19699 = vrcp.f32 %v11595_v13 }
0x2867   :  { %v19694_v11 = vpop.eup %19693 }
0x2868   :  { %v11611_v3 = vmul.f32 %v19694_v11, %v23512_v47 }
0x2869   :  { %v19696_v21 = vpop.eup %19695 }
0x286a   :  { %v19698_v54 = vpop.eup %19697  ;;  %v11784_v17 = vpop.xlane.xlu0 %11783  ;;  %v11610_v61 = vmul.f32 %v19696_v21, %v23508_v55 }
0x286b   :  { %v19700_v12 = vpop.eup %19699  ;;  %v11612_v41 = vmul.f32 %v19698_v54, %v23506_v7 }
0x286c   :  { %v11787_v63 = vpop.xlane.xlu1 %11786  ;;  %v11609_v24 = vmul.f32 %v19700_v12, %v23516_v25 }
0x286d   :  { %19701 = vrcp.f32 %v11787_v63  ;;  %v11614_v36 = vpack.c.bf16 %v11612_v41, %v11611_v3  ;;  %v19302_v41 = vld [vmem:[%s24561_s8 + $0x60] sm:$0xff]  }
0x286e   :  { %v11778_v45 = vpop.xlane.xlu0 %11777  ;;  %v11613_v6 = vpack.c.bf16 %v11610_v61, %v11609_v24  ;;  %v19301_v61 = vld [vmem:[%s24561_s8 + $0x68] sm:$0xff]  }
0x286f   :  { %19703 = vrcp.f32 %v11778_v45 }
0x2870   :  { %19705 = vrcp.f32 %v11784_v17  ;;  %v11781_v5 = vpop.xlane.xlu1 %11780  ;;  %18662 = vmatprep.mubr.msk.bf16.mxu0 %vm402_vm6, %v11613_v6 }
0x2871   :  { %19707 = vrcp.f32 %v11781_v5  ;;  %18663 = vmatmul.mubr.msk.bf16.vlgmr.msra.gmra.mrb[4].mxu0 %vm402_vm6, %v11614_v36 }
0x2872   :  { %v11801_v47 = vpop.permute.xlu0 %11800 }
0x2873   :  { %18674 = vmatprep.subr.bf16.mxu0 %v11801_v47 }
0x2874   :  { %v11803_v57 = vpop.permute.xlu1 %11802  ;;  %18675 = vmatpush3.bf16.msra.mxu0 %v11801_v47 }
0x2875   :  { %18676 = vmatprep.subr.bf16.mxu0 %v11803_v57 }
0x2876   :  { %v12247_v49 = vpop.permute.xlu0 %12246 }
0x2877   :  { %v19702_v55 = vpop.eup %19701  ;;  %v12258_v62 = vsel %vm332_vm1, %v12247_v49, 0 }
0x2878   :  { %v12245_v25 = vpop.permute.xlu1 %12244  ;;  %18677 = vmatpush3.bf16.msra.mxu0 %v11803_v57  ;;  %v11795_v60 = vmul.f32 %v19702_v55, %v23528_v56 }
0x2879   :  { %v19704_v7 = vpop.eup %19703  ;;  %v12255_v19 = vsel %vm332_vm1, %v12245_v25, 0  ;;  %18836 = vmatprep.subr.msk.bf16.mxu1 %vm332_vm1, %v12245_v25  ;;  %18682 = vmatprep.subr.bf16.mxu0 %v19301_v61 }
0x287a   :  { %v19706_v22 = vpop.eup %19705  ;;  %18717 = vmatpush3.bf16.xpose.msra.mxu1 %v12255_v19  ;;  %v11792_v51 = vmul.f32 %v19704_v7, %v23524_v50  ;;  %v12243_v56 = vpop.permute.xlu0 %12242 }
0x287b   :  { %v19708_v8 = vpop.eup %19707  ;;  %18837 = vmatprep.subr.msk.bf16.mxu1 %vm332_vm1, %v12247_v49  ;;  %v11794_v58 = vmul.f32 %v19706_v22, %v23522_v42 }
0x287c   :  { %v12241_v1 = vpop.permute.xlu1 %12240  ;;  %v11793_v4 = vmul.f32 %v19708_v8, %v23532_v15 }
0x287d   :  { %18720 = vmatprep.mubr.msk.bf16.mxu1 %vm332_vm1, %v12241_v1  ;;  %v11797_v44 = vpack.c.bf16 %v11795_v60, %v11794_v58 }
0x287e   :  { %v11796_v59 = vpack.c.bf16 %v11793_v4, %v11792_v51 }
0x2880   :  { %18678 = vmatprep.mubr.msk.bf16.mxu0 %vm402_vm6, %v11796_v59 }
0x2881   :  { %18679 = vmatmul.mubr.msk.bf16.vlgmr.msra.gmra.mrb[8].mxu0 %vm402_vm6, %v11797_v44 }
0x2882   :  { %18719 = vmatpush3.bf16.xpose.msra.mxu1 %v12258_v62  ;;  %18683 = vmatpush3.bf16.msra.mxu0 %v19301_v61  ;;  %v19303_v61 = vld [vmem:[%s24561_s8 + $0x70] sm:$0xff]  }
0x2883   :  { %18688 = vmatprep.subr.bf16.mxu0 %v19302_v41 }
0x2889   :  { %18721 = vmatmul.mubr.msk.bf16.vlgmr.msra.gmra.mrb[28].mxu1 %vm332_vm1, %v12243_v56 }
0x288a   :  { %13095 = vmatprep.mubr.bf16.mxu1 %v19757_v14 }
0x28ab   :  { %v12069_v50 = vpop.xlane.xlu0 %12068 }
0x28ac   :  { %v12077_v9 = vsub.f32 %v23553_v35, %v12069_v50 }
0x28ad   :  { %v12066_v15 = vpop.xlane.xlu1 %12065 }
0x28ae   :  { %v12076_v42 = vsub.f32 %v23556_v48, %v12066_v15  ;;  %v12082_v54 = vmul.f32 1.442695, %v12077_v9 }
0x28af   :  { %v12072_v26 = vpop.xlane.xlu0 %12071 }
0x28b0   :  { %v12078_v0 = vsub.f32 %v23560_v52, %v12072_v26  ;;  %v12080_v38 = vmul.f32 1.442695, %v12076_v42 }
0x28b1   :  { %v12075_v13 = vpop.xlane.xlu1 %12074 }
0x28b2   :  { %v12084_v11 = vmul.f32 1.442695, %v12078_v0  ;;  %v12079_v21 = vsub.f32 %v23565_v53, %v12075_v13 }
0x28b4   :  { %19709 = vpow2.f32 %v12084_v11  ;;  %v12086_v17 = vmul.f32 1.442695, %v12079_v21 }
0x28b5   :  { %19711 = vpow2.f32 %v12080_v38 }
0x28b6   :  { %19713 = vpow2.f32 %v12086_v17 }
0x28b7   :  { %19715 = vpow2.f32 %v12082_v54 }
0x28be   :  { %v23596_v12 = vpop.eup %19709 }
0x28bf   :  { %v19712_v3 = vpop.eup %19711  ;;  %v12094_v48 = vsel %vm402_vm6, %v23596_v12, 0.0 }
0x28c0   :  { %v23600_v35 = vpop.eup %19713  ;;  %12095 = vadd.xlane.f32.xlu0 %v12094_v48  ;;  %v12088_v53 = vsel %vm402_vm6, %v19712_v3, 0.0 }
0x28c1   :  { %v12097_v52 = vsel %vm402_vm6, %v23600_v35, 0.0  ;;  %v19716_v63 = vpop.eup %19715 }
0x28c2   :  { %12098 = vadd.xlane.f32.xlu1 %v12097_v52  ;;  %v12091_v24 = vsel %vm402_vm6, %v19716_v63, 0.0 }
0x28c4   :  { %12089 = vadd.xlane.f32.xlu0 %v12088_v53 }
0x28c6   :  { %12092 = vadd.xlane.f32.xlu1 %v12091_v24 }
0x28d7   :  { %12112 = vrot.lane.b32.xlu1 %v23444_v23, %s24593_s7 }
0x28da   :  { %12110 = vrot.lane.b32.xlu0 %v23434_v43, %s24593_s7 }
0x2944   :  { %v18664_v45 = vpop.f32.mrb[4].mxu0 }
0x2945   :  { %v11655_v6 = vpop.f32.mrb[5].mxu0 }
0x2946   :  { %v18665_v36 = vpop.f32.mrb[6].mxu0 }
0x2947   :  { %v11671_v5 = vpack.c.bf16 %v18665_v36, %v18664_v45  ;;  %v11658_v47 = vpop.f32.mrb[7].mxu0 }
0x2948   :  { %v11670_v57 = vpack.c.bf16 %v11658_v47, %v11655_v6 }
0x294d   :  { %v12096_v55 = vpop.xlane.xlu0 %12095 }
0x294f   :  { %v12099_v25 = vpop.xlane.xlu1 %12098 }
0x2951   :  { %v12090_v19 = vpop.xlane.xlu0 %12089 }
0x2953   :  { %v12093_v7 = vpop.xlane.xlu1 %12092 }
0x2954   :  { %v18680_v22 = vpop.f32.mrb[8].mxu0  ;;  %19717 = vrcp.f32 %v12093_v7 }
0x2955   :  { %v11846_v49 = vpop.f32.mrb[9].mxu0  ;;  %19719 = vrcp.f32 %v12090_v19  ;;  %v12111_v4 = vpop.permute.xlu0 %12110 }
0x2956   :  { %v18681_v8 = vpop.f32.mrb[10].mxu0  ;;  %19721 = vrcp.f32 %v12099_v25 }
0x2957   :  { %v11862_v60 = vpack.c.bf16 %v18681_v8, %v18680_v22  ;;  %v11849_v1 = vpop.f32.mrb[11].mxu0  ;;  %19723 = vrcp.f32 %v12096_v55  ;;  %v12113_v24 = vpop.permute.xlu1 %12112 }
0x2958   :  { %v11861_v51 = vpack.c.bf16 %v11849_v1, %v11846_v49 }
0x295a   :  { %18684 = vmatprep.mubr.msk.bf16.mxu0 %vm332_vm1, %v11861_v51 }
0x295b   :  { %18685 = vmatmul.mubr.msk.bf16.vlgmr.msra.gmra.mrb[12].mxu0 %vm332_vm1, %v11862_v60 }
0x295c   :  { %18689 = vmatpush3.bf16.msra.mxu0 %v19302_v41  ;;  %18690 = vmatprep.mubr.msk.bf16.mxu0 %vm332_vm1, %v11670_v57  ;;  %v18722_v58 = vpop.f32.mrb[28].mxu1 }
0x295d   :  { %18702 = vmatprep.subr.bf16.mxu0 %v12111_v4  ;;  %v12294_v59 = vpop.f32.mrb[29].mxu1  ;;  %v12311_v42 = vmul.f32 0.25, %v18722_v58 }
0x295e   :  { %v12309_v44 = vmul.f32 0.25, %v12294_v59  ;;  %v18723_v62 = vpop.f32.mrb[30].mxu1  ;;  %v19718_v56 = vpop.eup %19717 }
0x295f   :  { %v12312_v50 = vmul.f32 0.25, %v18723_v62  ;;  %v12297_v15 = vpop.f32.mrb[31].mxu1  ;;  %v19720_v0 = vpop.eup %19719  ;;  %v12105_v21 = vmul.f32 %v19718_v56, %v19716_v63  ;;  %v12315_v54 = vadd.f32 %v12311_v42, %v20020_v39 }
0x2960   :  { %v12313_v26 = vadd.f32 %v12309_v44, %v20013_v18  ;;  %v12310_v9 = vmul.f32 0.25, %v12297_v15  ;;  %v12104_v48 = vmul.f32 %v19720_v0, %v19712_v3  ;;  %v19722_v52 = vpop.eup %19721 }
0x2961   :  { %v12316_v38 = vadd.f32 %v12312_v50, %v20017_v32  ;;  %v19724_v32 = vpop.eup %19723  ;;  %v12107_v39 = vmul.f32 %v19722_v52, %v23600_v35 }
0x2962   :  { %v12314_v13 = vadd.f32 %v12310_v9, %v20015_v31  ;;  %v12317_v11 = vsel %vm402_vm6, %v12313_v26, -inf  ;;  %v12108_v18 = vpack.c.bf16 %v12105_v21, %v12104_v48  ;;  %v12323_v31 = vsel %vm402_vm6, %v12315_v54, -inf }
0x2963   :  { %12318 = vmax.xlane.f32.xlu1 %v12317_v11  ;;  %v12326_v53 = vsel %vm402_vm6, %v12316_v38, -inf  ;;  %v12106_v3 = vmul.f32 %v19724_v32, %v23596_v12 }
0x2964   :  { %v12320_v17 = vsel %vm402_vm6, %v12314_v13, -inf }
0x2965   :  { %12321 = vmax.xlane.f32.xlu0 %v12320_v17  ;;  %v12109_v63 = vpack.c.bf16 %v12107_v39, %v12106_v3 }
0x2967   :  { %18691 = vmatmul.mubr.msk.bf16.vlgmr.msra.gmra.mrb[12].mxu0 %vm332_vm1, %v11671_v5  ;;  %12327 = vmax.xlane.f32.xlu1 %v12326_v53 }
0x2968   :  { %18703 = vmatpush3.bf16.msra.mxu0 %v12111_v4  ;;  %18706 = vmatprep.mubr.msk.bf16.mxu0 %vm402_vm6, %v12108_v18  ;;  %v19304_v18 = vld [vmem:[%s24561_s8 + $0x78] sm:$0xff]  }
0x2969   :  { %18704 = vmatprep.subr.bf16.mxu0 %v12113_v24  ;;  %12324 = vmax.xlane.f32.xlu0 %v12323_v31 }
0x296c   :  { %18705 = vmatpush3.bf16.msra.mxu0 %v12113_v24 }
0x296d   :  { %18710 = vmatprep.subr.bf16.mxu0 %v19303_v61 }
0x296f   :  { %18707 = vmatmul.mubr.msk.bf16.vlgmr.msra.gmra.mrb[16].mxu0 %vm402_vm6, %v12109_v63 }
0x2970   :  { %18711 = vmatpush3.bf16.msra.mxu0 %v19303_v61  ;;  %v16740_v61 = vld [vmem:[%s24562_s9 + $0x3] ss:$0 sm:$0xff] }
0x29f0   :  { %v12319_v41 = vpop.xlane.xlu1 %12318 }
0x29f1   :  { %v12329_v5 = vsub.f32 %v12313_v26, %v12319_v41 }
0x29f2   :  { %v12322_v45 = vpop.xlane.xlu0 %12321 }
0x29f3   :  { %v12330_v6 = vsub.f32 %v12314_v13, %v12322_v45  ;;  %v12333_v25 = vmul.f32 1.442695, %v12329_v5 }
0x29f4   :  { %v12328_v36 = vpop.xlane.xlu1 %12327 }
0x29f5   :  { %v12332_v35 = vsub.f32 %v12316_v38, %v12328_v36  ;;  %v12335_v47 = vmul.f32 1.442695, %v12330_v6 }
0x29f6   :  { %v12325_v57 = vpop.xlane.xlu0 %12324 }
0x29f7   :  { %v12339_v55 = vmul.f32 1.442695, %v12332_v35  ;;  %v12331_v12 = vsub.f32 %v12315_v54, %v12325_v57 }
0x29f9   :  { %19725 = vpow2.f32 %v12339_v55  ;;  %v12337_v7 = vmul.f32 1.442695, %v12331_v12 }
0x29fa   :  { %19727 = vpow2.f32 %v12335_v47 }
0x29fb   :  { %19729 = vpow2.f32 %v12337_v7 }
0x29fc   :  { %19731 = vpow2.f32 %v12333_v25 }
0x2a03   :  { %v19726_v19 = vpop.eup %19725 }
0x2a04   :  { %v19728_v22 = vpop.eup %19727  ;;  %v12350_v49 = vsel %vm402_vm6, %v19726_v19, 0.0 }
0x2a05   :  { %v19730_v8 = vpop.eup %19729  ;;  %12351 = vadd.xlane.f32.xlu1 %v12350_v49  ;;  %v12344_v51 = vsel %vm402_vm6, %v19728_v22, 0.0 }
0x2a06   :  { %v12347_v60 = vsel %vm402_vm6, %v19730_v8, 0.0  ;;  %v19732_v1 = vpop.eup %19731 }
0x2a07   :  { %12348 = vadd.xlane.f32.xlu0 %v12347_v60  ;;  %v12341_v4 = vsel %vm402_vm6, %v19732_v1, 0.0 }
0x2a09   :  { %12345 = vadd.xlane.f32.xlu1 %v12344_v51 }
0x2a0b   :  { %12342 = vadd.xlane.f32.xlu0 %v12341_v4 }
0x2a1a   :  { %12365 = vrot.lane.b32.xlu1 %v23444_v23, %s24591_s26 }
0x2a21   :  { %12363 = vrot.lane.b32.xlu0 %v23434_v43, %s24591_s26 }
0x2a42   :  { %v18708_v58 = vpop.f32.mrb[16].mxu0 }
0x2a43   :  { %v12156_v59 = vpop.f32.mrb[17].mxu0 }
0x2a44   :  { %v18709_v44 = vpop.f32.mrb[18].mxu0 }
0x2a45   :  { %v12172_v62 = vpack.c.bf16 %v18709_v44, %v18708_v58  ;;  %v12159_v56 = vpop.f32.mrb[19].mxu0 }
0x2a46   :  { %v12171_v50 = vpack.c.bf16 %v12159_v56, %v12156_v59 }
0x2a48   :  { %18712 = vmatprep.mubr.msk.bf16.mxu0 %vm332_vm1, %v12171_v50 }
0x2a49   :  { %18713 = vmatmul.mubr.msk.bf16.vlgmr.msra.gmra.mrb[12].mxu0 %vm332_vm1, %v12172_v62 }
0x2a92   :  { %v12352_v15 = vpop.xlane.xlu1 %12351 }
0x2a94   :  { %v12349_v42 = vpop.xlane.xlu0 %12348 }
0x2a95   :  { %19733 = vrcp.f32 %v12349_v42 }
0x2a96   :  { %v12346_v26 = vpop.xlane.xlu1 %12345 }
0x2a97   :  { %19735 = vrcp.f32 %v12346_v26 }
0x2a98   :  { %19737 = vrcp.f32 %v12352_v15  ;;  %v12343_v23 = vpop.xlane.xlu0 %12342 }
0x2a99   :  { %19739 = vrcp.f32 %v12343_v23 }
0x2a9a   :  { %v12366_v43 = vpop.permute.xlu1 %12365 }
0x2a9c   :  { %v12364_v9 = vpop.permute.xlu0 %12363 }
0x2a9d   :  { %18724 = vmatprep.subr.bf16.mxu0 %v12364_v9 }
0x2a9e   :  { %18725 = vmatpush3.bf16.msra.mxu0 %v12364_v9 }
0x2a9f   :  { %18726 = vmatprep.subr.bf16.mxu0 %v12366_v43  ;;  %v19734_v0 = vpop.eup %19733 }
0x2aa0   :  { %v12359_v21 = vmul.f32 %v19734_v0, %v19730_v8  ;;  %v16745_v0 = vld [vmem:[%s24563_s12 + $0x600] sm:$0xff] }
0x2aa1   :  { %v19736_v38 = vpop.eup %19735 }
0x2aa2   :  { %v19738_v13 = vpop.eup %19737  ;;  %18727 = vmatpush3.bf16.msra.mxu0 %v12366_v43  ;;  %v12358_v17 = vmul.f32 %v19736_v38, %v19728_v22  ;;  %v16753_v38 = vld [vmem:[%s24563_s12 + $0x640] sm:$0xff] }
0x2aa3   :  { %v19740_v11 = vpop.eup %19739  ;;  %v12360_v48 = vmul.f32 %v19738_v13, %v19726_v19  ;;  %18732 = vmatprep.subr.bf16.mxu0 %v19304_v18  ;;  %v16746_v13 = vld [vmem:[%s24563_s12 + $0x608] sm:$0xff] }
0x2aa4   :  { %v12357_v54 = vmul.f32 %v19740_v11, %v19732_v1  ;;  %v16812_v11 = vcombine.high %v16745_v0, %v16753_v38 }
0x2aa5   :  { %v12362_v53 = vpack.c.bf16 %v12360_v48, %v12359_v21  ;;  %v16754_v21 = vld [vmem:[%s24563_s12 + $0x648] sm:$0xff] }
0x2aa6   :  { %v12361_v52 = vpack.c.bf16 %v12358_v17, %v12357_v54  ;;  %v16811_v54 = vcombine.low %v16745_v0, %v16753_v38  ;;  %v16813_v17 = vcombine.low %v16746_v13, %v16754_v21  ;;  %v16814_v48 = vcombine.high %v16746_v13, %v16754_v21  ;;  %13063 = vmatprep.subr.bf16.mxu1 %v16812_v11  ;;  %v16743_v11 = vld [vmem:[%s24565_s10 + $0x3] ss:$0 sm:$0xff] }
0x2aa8   :  { %18728 = vmatprep.mubr.msk.bf16.mxu0 %vm402_vm6, %v12361_v52  ;;  %13064 = vmatpush1.bf16.msra.mxu1 %v16811_v54  ;;  %v16761_v52 = vld [vmem:[%s24563_s12 + $0x680] sm:$0xff] }
0x2aa9   :  { %18729 = vmatmul.mubr.msk.bf16.vlgmr.msra.gmra.mrb[20].mxu0 %vm402_vm6, %v12362_v53  ;;  %v16769_v53 = vld [vmem:[%s24563_s12 + $0x6c0] sm:$0xff] }
0x2aaa   :  { %18733 = vmatpush3.bf16.msra.mxu0 %v19304_v18  ;;  %v16762_v18 = vld [vmem:[%s24563_s12 + $0x688] sm:$0xff] }
0x2aab   :  { %13116 = vmatprep.subr.bf16.mxu0 %v16814_v48 }
0x2b7c   :  { %v18730_v32 = vpop.f32.mrb[20].mxu0 }
0x2b7d   :  { %v12409_v24 = vpop.f32.mrb[21].mxu0 }
0x2b7e   :  { %v18731_v31 = vpop.f32.mrb[22].mxu0 }
0x2b7f   :  { %v12425_v39 = vpack.c.bf16 %v18731_v31, %v18730_v32  ;;  %v12412_v3 = vpop.f32.mrb[23].mxu0  ;;  %v16828_v32 = vcombine.high %v16761_v52, %v16769_v53  ;;  %v16827_v31 = vcombine.low %v16761_v52, %v16769_v53  ;;  %v16744_v52 = vld [vmem:[%s24566_s11 + $0x3] ss:$0 sm:$0xff] }
0x2b80   :  { %v12424_v63 = vpack.c.bf16 %v12412_v3, %v12409_v24  ;;  %v16770_v24 = vld [vmem:[%s24563_s12 + $0x6c8] sm:$0xff] }
0x2b81   :  { %v16830_v3 = vcombine.high %v16762_v18, %v16770_v24  ;;  %13065 = vmatprep.subr.bf16.mxu1 %v16828_v32 }
0x2b82   :  { %18734 = vmatprep.mubr.msk.bf16.mxu0 %vm332_vm1, %v12424_v63  ;;  %13066 = vmatpush1.bf16.msra.mxu1 %v16827_v31  ;;  %v16777_v63 = vld [vmem:[%s24563_s12 + $0x700] sm:$0xff] }
0x2b83   :  { %18735 = vmatmul.mubr.msk.bf16.vlgmr.msra.gmra.mrb[12].mxu0 %vm332_vm1, %v12425_v39  ;;  %v16829_v39 = vcombine.low %v16762_v18, %v16770_v24  ;;  %v16763_v18 = vld [vmem:[%s24563_s12 + $0x690] sm:$0xff] }
0x2b84   :  { %13148 = vmatprep.mubr.bf16.mxu0 %v19757_v14  ;;  %13117 = vmatpush1.bf16.msra.mxu0 %v16813_v17  ;;  %v16771_v24 = vld [vmem:[%s24563_s12 + $0x6d0] sm:$0xff] }
0x2b85   :  { %13118 = vmatprep.subr.bf16.mxu0 %v16830_v3 }
0x2b88   :  { %13119 = vmatpush1.bf16.msra.mxu0 %v16829_v39 }
0x2c56   :  { %v18736_v41 = vpop.f32.mrb[12].mxu0 }
0x2c57   :  { %v12474_v45 = vpop.f32.mrb[13].mxu0  ;;  %v12503_v47 = vadd.f32 %v18736_v41, %v16740_v61  ;;  %v16778_v41 = vld [vmem:[%s24563_s12 + $0x708] sm:$0xff] }
0x2c58   :  { %v12501_v6 = vadd.f32 %v16740_v61, %v12474_v45  ;;  %v18737_v36 = vpop.f32.mrb[14].mxu0 }
0x2c59   :  { %v12504_v5 = vadd.f32 %v18737_v36, %v16740_v61  ;;  %v12477_v35 = vpop.f32.mrb[15].mxu0  ;;  %v12507_v19 = vadd.f32 %v12503_v47, %v23420_v10  ;;  %v16793_v47 = vld [vmem:[%s24563_s12 + $0x780] sm:$0xff] }
0x2c5a   :  { %v12505_v57 = vadd.f32 %v12501_v6, %v23412_v16  ;;  %v12502_v55 = vadd.f32 %v16740_v61, %v12477_v35  ;;  %v16785_v61 = vld [vmem:[%s24563_s12 + $0x740] sm:$0xff]  ;;  %v16786_v6 = vld [vmem:[%s24563_s12 + $0x748] sm:$0xff] }
0x2c5b   :  { %v12508_v12 = vadd.f32 %v12504_v5, %v23422_v2  ;;  %v12519_v8 = vsel %vm145_vm0, %v12507_v19, 0.0  ;;  %v16844_v45 = vcombine.high %v16777_v63, %v16785_v61  ;;  %v16843_v36 = vcombine.low %v16777_v63, %v16785_v61 }
0x2c5c   :  { %v12506_v25 = vadd.f32 %v12502_v55, %v23414_v46  ;;  %v12513_v7 = vsel %vm145_vm0, %v12505_v57, 0.0  ;;  %v16845_v5 = vcombine.low %v16778_v41, %v16786_v6  ;;  %v16846_v35 = vcombine.high %v16778_v41, %v16786_v6  ;;  %v16794_v55 = vld [vmem:[%s24563_s12 + $0x788] sm:$0xff] }
0x2c5d   :  { %12514 = vadd.xlane.f32.xlu1 %v12513_v7  ;;  %v12522_v49 = vsel %vm145_vm0, %v12508_v12, 0.0  ;;  %13067 = vmatprep.subr.bf16.mxu1 %v16844_v45  ;;  %v16832_v6 = vcombine.high %v16763_v18, %v16771_v24 }
0x2c5e   :  { %v12516_v22 = vsel %vm145_vm0, %v12506_v25, 0.0  ;;  %13120 = vmatprep.subr.bf16.mxu0 %v16846_v35  ;;  %13068 = vmatpush1.bf16.msra.mxu1 %v16843_v36  ;;  %v16787_v35 = vld [vmem:[%s24563_s12 + $0x750] sm:$0xff] }
0x2c5f   :  { %12517 = vadd.xlane.f32.xlu0 %v12516_v22  ;;  %13121 = vmatpush1.bf16.msra.mxu0 %v16845_v5  ;;  %v16779_v5 = vld [vmem:[%s24563_s12 + $0x710] sm:$0xff] }
0x2c61   :  { %12523 = vadd.xlane.f32.xlu1 %v12522_v49  ;;  %v16747_v49 = vld [vmem:[%s24563_s12 + $0x610] sm:$0xff] }
0x2c63   :  { %12520 = vadd.xlane.f32.xlu0 %v12519_v8  ;;  %v16755_v8 = vld [vmem:[%s24563_s12 + $0x650] sm:$0xff] }
0x2cea   :  { %v12515_v16 = vpop.xlane.xlu1 %12514 }
0x2ceb   :  { %v12525_v60 = vmul.f32 0.015625, %v12515_v16  ;;  %v16748_v16 = vld [vmem:[%s24563_s12 + $0x618] sm:$0xff] }
0x2cec   :  { %v12518_v1 = vpop.xlane.xlu0 %12517 }
0x2ced   :  { %v23664_v2 = vsub.f32 %v12505_v57, %v12525_v60  ;;  %v12526_v46 = vmul.f32 0.015625, %v12518_v1  ;;  %v16801_v57 = vld [vmem:[%s24563_s12 + $0x7c0] sm:$0xff]  ;;  %v16816_v60 = vcombine.high %v16747_v49, %v16755_v8  ;;  %v16756_v1 = vld [vmem:[%s24563_s12 + $0x658] sm:$0xff] }
0x2cee   :  { %v12524_v51 = vpop.xlane.xlu1 %12523  ;;  %v16859_v7 = vcombine.low %v16793_v47, %v16801_v57 }
0x2cef   :  { %v23666_v4 = vsub.f32 %v12506_v25, %v12526_v46  ;;  %v12528_v58 = vmul.f32 0.015625, %v12524_v51  ;;  %v12533_v10 = vmul.f32 %v23664_v2, %v23664_v2  ;;  %v16802_v25 = vld [vmem:[%s24563_s12 + $0x7c8] sm:$0xff]  ;;  %v16815_v46 = vcombine.low %v16747_v49, %v16755_v8  ;;  %v16803_v49 = vld [vmem:[%s24563_s12 + $0x7d0] sm:$0xff]  ;;  %v16796_v8 = vld [vmem:[%s24563_s12 + $0x798] sm:$0xff] }
0x2cf0   :  { %v12521_v59 = vpop.xlane.xlu0 %12520  ;;  %v16862_v22 = vcombine.high %v16794_v55, %v16802_v25  ;;  %v16817_v51 = vcombine.low %v16748_v16, %v16756_v1 }
0x2cf1   :  { %v23670_v44 = vsub.f32 %v12508_v12, %v12528_v58  ;;  %v12527_v62 = vmul.f32 0.015625, %v12521_v59  ;;  %v12537_v56 = vsel %vm145_vm0, %v12533_v10, 0.0  ;;  %v12534_v50 = vmul.f32 %v23666_v4, %v23666_v4 }
0x2cf2   :  { %12538 = vadd.xlane.f32.xlu0 %v12537_v56  ;;  %v16860_v12 = vcombine.high %v16793_v47, %v16801_v57  ;;  %13122 = vmatprep.subr.bf16.mxu0 %v16862_v22  ;;  %v16818_v58 = vcombine.high %v16748_v16, %v16756_v1  ;;  %v16831_v57 = vcombine.low %v16763_v18, %v16771_v24  ;;  %v16795_v22 = vld [vmem:[%s24563_s12 + $0x790] sm:$0xff]  ;;  %v16804_v16 = vld [vmem:[%s24563_s12 + $0x7d8] sm:$0xff] }
0x2cf3   :  { %v23675_v15 = vsub.f32 %v12507_v19, %v12527_v62  ;;  %v12540_v42 = vsel %vm145_vm0, %v12534_v50, 0.0  ;;  %v12536_v26 = vmul.f32 %v23670_v44, %v23670_v44  ;;  %v16861_v19 = vcombine.low %v16794_v55, %v16802_v25 }
0x2cf4   :  { %12541 = vadd.xlane.f32.xlu1 %v12540_v42  ;;  %13069 = vmatprep.subr.bf16.mxu1 %v16860_v12  ;;  %v16848_v12 = vcombine.high %v16779_v5, %v16787_v35 }
0x2cf5   :  { %v12535_v23 = vmul.f32 %v23675_v15, %v23675_v15  ;;  %v12546_v9 = vsel %vm145_vm0, %v12536_v26, 0.0  ;;  %13070 = vmatpush1.bf16.msra.mxu1 %v16859_v7  ;;  %13123 = vmatpush1.bf16.msra.mxu0 %v16861_v19 }
0x2cf6   :  { %13169 = vmatprep.subr.bf16.mxu1 %v16816_v60  ;;  %13222 = vmatprep.subr.bf16.mxu0 %v16818_v58  ;;  %v16847_v60 = vcombine.low %v16779_v5, %v16787_v35  ;;  %v16866_v58 = vcombine.high %v16796_v8, %v16804_v16  ;;  %v16751_v35 = vld [vmem:[%s24563_s12 + $0x630] sm:$0xff] }
0x2cf7   :  { %v12543_v43 = vsel %vm145_vm0, %v12535_v23, 0.0 }
0x2cf8   :  { %12547 = vadd.xlane.f32.xlu1 %v12546_v9  ;;  %12544 = vadd.xlane.f32.xlu0 %v12543_v43 }
0x2d7f   :  { %v12539_v10 = vpop.xlane.xlu0 %12538 }
0x2d80   :  { %v12549_v59 = vmul.f32 0.015625, %v12539_v10  ;;  %v16749_v10 = vld [vmem:[%s24563_s12 + $0x620] sm:$0xff] }
0x2d81   :  { %v12542_v62 = vpop.xlane.xlu1 %12541 }
0x2d82   :  { %v12553_v56 = vadd.f32 1e-05, %v12549_v59  ;;  %v12550_v50 = vmul.f32 0.015625, %v12542_v62  ;;  %v16757_v59 = vld [vmem:[%s24563_s12 + $0x660] sm:$0xff]  ;;  %v16750_v62 = vld [vmem:[%s24563_s12 + $0x628] sm:$0xff] }
0x2d84   :  { %19741 = vrsqrt.f32 %v12553_v56  ;;  %v12554_v42 = vadd.f32 1e-05, %v12550_v50  ;;  %v16758_v56 = vld [vmem:[%s24563_s12 + $0x668] sm:$0xff]  ;;  %v16863_v50 = vcombine.low %v16795_v22, %v16803_v49 }
0x2d85   :  { %v12548_v26 = vpop.xlane.xlu1 %12547  ;;  %v12545_v23 = vpop.xlane.xlu0 %12544 }
0x2d86   :  { %19743 = vrsqrt.f32 %v12554_v42  ;;  %v12552_v9 = vmul.f32 0.015625, %v12548_v26  ;;  %v12551_v43 = vmul.f32 0.015625, %v12545_v23  ;;  %v16865_v42 = vcombine.low %v16796_v8, %v16804_v16  ;;  %v16768_v8 = vld [vmem:[%s24563_s12 + $0x6b8] sm:$0xff] }
0x2d87   :  { %v16820_v26 = vcombine.high %v16749_v10, %v16757_v59  ;;  %v16822_v23 = vcombine.high %v16750_v62, %v16758_v56  ;;  %v16776_v16 = vld [vmem:[%s24563_s12 + $0x6f8] sm:$0xff] }
0x2d88   :  { %v12556_v0 = vadd.f32 1e-05, %v12552_v9  ;;  %v12555_v38 = vadd.f32 1e-05, %v12551_v43  ;;  %v16765_v9 = vld [vmem:[%s24563_s12 + $0x6a0] sm:$0xff] }
0x2d89   :  { %v16773_v43 = vld [vmem:[%s24563_s12 + $0x6e0] sm:$0xff] }
0x2d8a   :  { %19745 = vrsqrt.f32 %v12556_v0  ;;  %v16766_v0 = vld [vmem:[%s24563_s12 + $0x6a8] sm:$0xff]  ;;  %v16835_v18 = vcombine.low %v16765_v9, %v16773_v43 }
0x2d8b   :  { %19747 = vrsqrt.f32 %v12555_v38  ;;  %v16774_v38 = vld [vmem:[%s24563_s12 + $0x6e8] sm:$0xff] }
0x2d8e   :  { %v19742_v13 = vpop.eup %19741 }
0x2d8f   :  { %v12561_v21 = vmul.f32 %v19742_v13, %v23664_v2  ;;  %v16764_v2 = vld [vmem:[%s24563_s12 + $0x698] sm:$0xff]  ;;  %v16819_v13 = vcombine.low %v16749_v10, %v16757_v59  ;;  %v16783_v10 = vld [vmem:[%s24563_s12 + $0x730] sm:$0xff] }
0x2d90   :  { %v19744_v54 = vpop.eup %19743  ;;  %v16791_v59 = vld [vmem:[%s24563_s12 + $0x770] sm:$0xff] }
0x2d91   :  { %v12571_v17 = vmul.f32 %v16743_v11, %v12561_v21  ;;  %v12562_v48 = vmul.f32 %v19744_v54, %v23666_v4  ;;  %v16772_v4 = vld [vmem:[%s24563_s12 + $0x6d8] sm:$0xff]  ;;  %v16836_v21 = vcombine.high %v16765_v9, %v16773_v43  ;;  %v16838_v54 = vcombine.high %v16766_v0, %v16774_v38  ;;  %v16799_v9 = vld [vmem:[%s24563_s12 + $0x7b0] sm:$0xff] }
0x2d92   :  { %v16834_v36 = vcombine.high %v16764_v2, %v16772_v4  ;;  %v16833_v55 = vcombine.low %v16764_v2, %v16772_v4  ;;  %v16797_v4 = vld [vmem:[%s24563_s12 + $0x7a0] sm:$0xff]  ;;  %v16807_v43 = vld [vmem:[%s24563_s12 + $0x7f0] sm:$0xff] }
0x2d93   :  { %v12572_v53 = vmul.f32 %v16743_v11, %v12562_v48  ;;  %v23764_v39 = vadd.f32 %v16744_v52, %v12571_v17  ;;  %v16781_v17 = vld [vmem:[%s24563_s12 + $0x720] sm:$0xff] }
0x2d94   :  { %v19746_v32 = vpop.eup %19745  ;;  %v16789_v48 = vld [vmem:[%s24563_s12 + $0x760] sm:$0xff] }
0x2d95   :  { %v19748_v31 = vpop.eup %19747  ;;  %v23766_v3 = vadd.f32 %v16744_v52, %v12572_v53  ;;  %v12564_v63 = vmul.f32 %v19746_v32, %v23670_v44  ;;  %v16780_v44 = vld [vmem:[%s24563_s12 + $0x718] sm:$0xff]  ;;  %v16790_v53 = vld [vmem:[%s24563_s12 + $0x768] sm:$0xff]  ;;  %v16837_v32 = vcombine.low %v16766_v0, %v16774_v38  ;;  %v16852_v24 = vcombine.high %v16781_v17, %v16789_v48 }
0x2d96   :  { %v12563_v61 = vmul.f32 %v19748_v31, %v23675_v15  ;;  %v16788_v15 = vld [vmem:[%s24563_s12 + $0x758] sm:$0xff]  ;;  %v16805_v31 = vld [vmem:[%s24563_s12 + $0x7e0] sm:$0xff] }
0x2d97   :  { %v23772_v41 = vpack.c.bf16 %v23766_v3, %v23764_v39  ;;  %v12574_v45 = vmul.f32 %v16743_v11, %v12564_v63  ;;  %v16850_v19 = vcombine.high %v16780_v44, %v16788_v15  ;;  %v16849_v1 = vcombine.low %v16780_v44, %v16788_v15  ;;  %v16798_v63 = vld [vmem:[%s24563_s12 + $0x7a8] sm:$0xff]  ;;  %v16752_v44 = vld [vmem:[%s24563_s12 + $0x638] sm:$0xff] }
0x2d98   :  { %v12573_v47 = vmul.f32 %v16743_v11, %v12563_v61  ;;  %v16821_v11 = vcombine.low %v16750_v62, %v16758_v56  ;;  %v16806_v61 = vld [vmem:[%s24563_s12 + $0x7e8] sm:$0xff]  ;;  %v16760_v15 = vld [vmem:[%s24563_s12 + $0x678] sm:$0xff] }
0x2d99   :  { %16875 = vmatmul.mubr.msk.bf16.vlgmr.msra.gmra.mrb[20].mxu1 %vm145_vm0, %v23772_v41  ;;  %16877 = vmatmul.mubr.msk.bf16.vlgmr.msra.gmra.mrb[24].mxu0 %vm145_vm0, %v23772_v41  ;;  %v23790_v25 = vadd.f32 %v16744_v52, %v12574_v45  ;;  %v16851_v45 = vcombine.low %v16781_v17, %v16789_v48  ;;  %v16870_v5 = vcombine.high %v16798_v63, %v16806_v61  ;;  %v16784_v62 = vld [vmem:[%s24563_s12 + $0x738] sm:$0xff] }
0x2d9a   :  { %13170 = vmatpush1.bf16.msra.mxu1 %v16815_v46  ;;  %13223 = vmatpush1.bf16.msra.mxu0 %v16817_v51  ;;  %v23792_v7 = vadd.f32 %v16744_v52, %v12573_v47  ;;  %v16864_v51 = vcombine.high %v16795_v22, %v16803_v49  ;;  %v16782_v52 = vld [vmem:[%s24563_s12 + $0x728] sm:$0xff]  ;;  %v16759_v47 = vld [vmem:[%s24563_s12 + $0x670] sm:$0xff]  ;;  %v16792_v56 = vld [vmem:[%s24563_s12 + $0x778] sm:$0xff]  ;;  %v16871_v17 = vcombine.low %v16799_v9, %v16807_v43 }
0x2d9b   :  { %13171 = vmatprep.subr.bf16.mxu1 %v16832_v6  ;;  %13224 = vmatprep.subr.bf16.mxu0 %v16834_v36  ;;  %v16854_v2 = vcombine.high %v16782_v52, %v16790_v53  ;;  %v16853_v6 = vcombine.low %v16782_v52, %v16790_v53  ;;  %v16868_v36 = vcombine.high %v16797_v4, %v16805_v31  ;;  %v16767_v22 = vld [vmem:[%s24563_s12 + $0x6b0] sm:$0xff]  ;;  %v16800_v0 = vld [vmem:[%s24563_s12 + $0x7b8] sm:$0xff]  ;;  %v19305_v52 = vld [vmem:[%s24564_s14 + $0xc40] sm:$0xff]  }
0x2d9c   :  { %13105 = vmatprep.mubr.bf16.mxu1 %v19757_v14  ;;  %13158 = vmatprep.mubr.bf16.mxu0 %v19757_v14  ;;  %v23810_v46 = vpack.c.bf16 %v23790_v25, %v23792_v7  ;;  %v16775_v49 = vld [vmem:[%s24563_s12 + $0x6f0] sm:$0xff]  ;;  %v16808_v38 = vld [vmem:[%s24563_s12 + $0x7f8] sm:$0xff]  ;;  %v19306_v53 = vld [vmem:[%s24564_s14 + $0xcc0] sm:$0xff]  }
0x2d9d   :  { %v16873_v48 = vcombine.low %v16800_v0, %v16808_v38 }
0x2d9e   :  { %13172 = vmatpush1.bf16.msra.mxu1 %v16831_v57  ;;  %13225 = vmatpush1.bf16.msra.mxu0 %v16833_v55  ;;  %v16867_v57 = vcombine.low %v16797_v4, %v16805_v31  ;;  %v16869_v55 = vcombine.low %v16798_v63, %v16806_v61  ;;  %v19311_v4 = vld [vmem:[%s24564_s14 + $0xc08] sm:$0xff]   ;;  %v19315_v63 = vld [vmem:[%s24564_s14 + $0xc10] sm:$0xff]  }
0x2d9f   :  { %13173 = vmatprep.subr.bf16.mxu1 %v16848_v12  ;;  %13226 = vmatprep.subr.bf16.mxu0 %v16850_v19  ;;  %v16824_v12 = vcombine.high %v16751_v35, %v16759_v47  ;;  %v16826_v19 = vcombine.high %v16752_v44, %v16760_v15  ;;  %v19312_v31 = vld [vmem:[%s24564_s14 + $0xc88] sm:$0xff]   ;;  %v19316_v61 = vld [vmem:[%s24564_s14 + $0xc90] sm:$0xff]  }
0x2da1   :  { %16876 = vmatmul.mubr.msk.bf16.gmra.mrb[32].mxu1 %vm145_vm0, %v23810_v46  ;;  %16878 = vmatmul.mubr.msk.bf16.gmra.mrb[28].mxu0 %vm145_vm0, %v23810_v46 }
0x2da2   :  { %13174 = vmatpush1.bf16.msra.mxu1 %v16847_v60  ;;  %13227 = vmatpush1.bf16.msra.mxu0 %v16849_v1  ;;  %v16823_v60 = vcombine.low %v16751_v35, %v16759_v47  ;;  %v16825_v1 = vcombine.low %v16752_v44, %v16760_v15  ;;  %v19321_v35 = vld [vmem:[%s24564_s14 + $0xc60] sm:$0xff]   ;;  %v19325_v15 = vld [vmem:[%s24564_s14 + $0xc68] sm:$0xff]  }
0x2da3   :  { %13175 = vmatprep.subr.bf16.mxu1 %v16864_v51  ;;  %13228 = vmatprep.subr.bf16.mxu0 %v16866_v58  ;;  %v16840_v51 = vcombine.high %v16767_v22, %v16775_v49  ;;  %v16842_v58 = vcombine.high %v16768_v8, %v16776_v16  ;;  %v19323_v47 = vld [vmem:[%s24564_s14 + $0xc20] sm:$0xff]  }
0x2da4   :  { %13201 = vmatprep.mubr.bf16.mxu1 %v19757_v14  ;;  %13254 = vmatprep.mubr.bf16.mxu0 %v19757_v14  ;;  %v19324_v44 = vld [vmem:[%s24564_s14 + $0xca0] sm:$0xff]  }
0x2da6   :  { %13176 = vmatpush1.bf16.msra.mxu1 %v16863_v50  ;;  %13229 = vmatpush1.bf16.msra.mxu0 %v16865_v42  ;;  %v16839_v50 = vcombine.low %v16767_v22, %v16775_v49  ;;  %v16841_v42 = vcombine.low %v16768_v8, %v16776_v16  ;;  %v19330_v22 = vld [vmem:[%s24564_s14 + $0xcf0] sm:$0xff]   ;;  %v19333_v16 = vld [vmem:[%s24564_s14 + $0xc78] sm:$0xff]  }
0x2da7   :  { %13275 = vmatprep.subr.bf16.mxu1 %v16820_v26  ;;  %13328 = vmatprep.subr.bf16.mxu0 %v16822_v23  ;;  %v16856_v26 = vcombine.high %v16783_v10, %v16791_v59  ;;  %v16858_v23 = vcombine.high %v16784_v62, %v16792_v56  ;;  %v19331_v49 = vld [vmem:[%s24564_s14 + $0xc30] sm:$0xff]  }
0x2da8   :  { %v19332_v8 = vld [vmem:[%s24564_s14 + $0xcb0] sm:$0xff]  }
0x2da9   :  { %16879 = vmatmul.mubr.msk.bf16.vlgmr.msra.gmra.mrb[36].mxu1 %vm145_vm0, %v23772_v41  ;;  %16881 = vmatmul.mubr.msk.bf16.vlgmr.msra.gmra.mrb[32].mxu0 %vm145_vm0, %v23772_v41 }
0x2daa   :  { %13276 = vmatpush1.bf16.msra.mxu1 %v16819_v13  ;;  %13329 = vmatpush1.bf16.msra.mxu0 %v16821_v11  ;;  %v16855_v13 = vcombine.low %v16783_v10, %v16791_v59  ;;  %v16857_v11 = vcombine.low %v16784_v62, %v16792_v56  ;;  %v19338_v10 = vld [vmem:[%s24564_s14 + $0xdc0] sm:$0xff]   ;;  %v24053_v59 = vld [vmem:[%s24567_s13 + $0x30] sm:$0xff] }
0x2dab   :  { %13277 = vmatprep.subr.bf16.mxu1 %v16836_v21  ;;  %13330 = vmatprep.subr.bf16.mxu0 %v16838_v54  ;;  %v16872_v21 = vcombine.high %v16799_v9, %v16807_v43  ;;  %v16874_v54 = vcombine.high %v16800_v0, %v16808_v38  ;;  %v12660_v62 = vrot.slane %v24053_v59, %v19936_v28 }
0x2dac   :  { %13211 = vmatprep.mubr.bf16.mxu1 %v19757_v14  ;;  %13264 = vmatprep.mubr.bf16.mxu0 %v19757_v14  ;;  %v12668_v56 = vrot.slane %v24053_v59, %v20595_v29 }
0x2dae   :  { %13278 = vmatpush1.bf16.msra.mxu1 %v16835_v18  ;;  %13331 = vmatpush1.bf16.msra.mxu0 %v16837_v32  ;;  %v19307_v18 = vld [vmem:[%s24564_s14 + $0xc00] sm:$0xff]  }
0x2daf   :  { %13279 = vmatprep.subr.bf16.mxu1 %v16852_v24  ;;  %13332 = vmatprep.subr.bf16.mxu0 %v16854_v2  ;;  %v19308_v32 = vld [vmem:[%s24564_s14 + $0xc80] sm:$0xff]   ;;  %v19309_v24 = vld [vmem:[%s24564_s14 + $0xc48] sm:$0xff]  }
0x2db0   :  { %v19310_v2 = vld [vmem:[%s24564_s14 + $0xcc8] sm:$0xff]  }
0x2db1   :  { %16880 = vmatmul.mubr.msk.bf16.gmra.mrb[40].mxu1 %vm145_vm0, %v23810_v46  ;;  %16882 = vmatmul.mubr.msk.bf16.gmra.mrb[36].mxu0 %vm145_vm0, %v23810_v46 }
0x2db2   :  { %13280 = vmatpush1.bf16.msra.mxu1 %v16851_v45  ;;  %13333 = vmatpush1.bf16.msra.mxu0 %v16853_v6  ;;  %v19317_v45 = vld [vmem:[%s24564_s14 + $0xc58] sm:$0xff]  }
0x2db3   :  { %13281 = vmatprep.subr.bf16.mxu1 %v16868_v36  ;;  %13334 = vmatprep.subr.bf16.mxu0 %v16870_v5  ;;  %v19318_v6 = vld [vmem:[%s24564_s14 + $0xcd8] sm:$0xff]  }
0x2db4   :  { %13307 = vmatprep.mubr.bf16.mxu1 %v19757_v14  ;;  %13360 = vmatprep.mubr.bf16.mxu0 %v19757_v14  ;;  %v19319_v36 = vld [vmem:[%s24564_s14 + $0xc18] sm:$0xff]  }
0x2db5   :  { %v19320_v5 = vld [vmem:[%s24564_s14 + $0xc98] sm:$0xff]  }
0x2db6   :  { %13282 = vmatpush1.bf16.msra.mxu1 %v16867_v57  ;;  %13335 = vmatpush1.bf16.msra.mxu0 %v16869_v55  ;;  %v19326_v57 = vld [vmem:[%s24564_s14 + $0xce8] sm:$0xff]  }
0x2db7   :  { %13381 = vmatprep.subr.bf16.mxu1 %v16824_v12  ;;  %13434 = vmatprep.subr.bf16.mxu0 %v16826_v19  ;;  %v19327_v55 = vld [vmem:[%s24564_s14 + $0xc28] sm:$0xff]   ;;  %v19329_v19 = vld [vmem:[%s24564_s14 + $0xc70] sm:$0xff]  }
0x2db8   :  { %v19328_v12 = vld [vmem:[%s24564_s14 + $0xca8] sm:$0xff]  }
0x2db9   :  { %16883 = vmatmul.mubr.msk.bf16.vlgmr.msra.gmra.mrb[44].mxu1 %vm145_vm0, %v23772_v41  ;;  %16885 = vmatmul.mubr.msk.bf16.vlgmr.msra.gmra.mrb[40].mxu0 %vm145_vm0, %v23772_v41 }
0x2dba   :  { %13382 = vmatpush1.bf16.msra.mxu1 %v16823_v60  ;;  %13435 = vmatpush1.bf16.msra.mxu0 %v16825_v1  ;;  %v19334_v60 = vld [vmem:[%s24564_s14 + $0xcf8] sm:$0xff]  }
0x2dbb   :  { %13383 = vmatprep.subr.bf16.mxu1 %v16840_v51  ;;  %13436 = vmatprep.subr.bf16.mxu0 %v16842_v58  ;;  %v19335_v1 = vld [vmem:[%s24564_s14 + $0xc38] sm:$0xff]   ;;  %v19337_v58 = vld [vmem:[%s24564_s14 + $0xd40] sm:$0xff]  }
0x2dbc   :  { %13317 = vmatprep.mubr.bf16.mxu1 %v19757_v14  ;;  %13370 = vmatprep.mubr.bf16.mxu0 %v19757_v14  ;;  %v19336_v51 = vld [vmem:[%s24564_s14 + $0xcb8] sm:$0xff]  }
0x2dbe   :  { %13384 = vmatpush1.bf16.msra.mxu1 %v16839_v50  ;;  %13437 = vmatpush1.bf16.msra.mxu0 %v16841_v42  ;;  %v12664_v50 = vrot.slane %v24053_v59, %v19942_v30  ;;  %v12672_v42 = vrot.slane %v24053_v59, %v20598_v33 }
0x2dbf   :  { %13385 = vmatprep.subr.bf16.mxu1 %v16856_v26  ;;  %13438 = vmatprep.subr.bf16.mxu0 %v16858_v23 }
0x2dc1   :  { %16884 = vmatmul.mubr.msk.bf16.gmra.mrb[48].mxu1 %vm145_vm0, %v23810_v46  ;;  %16886 = vmatmul.mubr.msk.bf16.gmra.mrb[44].mxu0 %vm145_vm0, %v23810_v46 }
0x2dc2   :  { %13386 = vmatpush1.bf16.msra.mxu1 %v16855_v13  ;;  %13439 = vmatpush1.bf16.msra.mxu0 %v16857_v11 }
0x2dc3   :  { %13387 = vmatprep.subr.bf16.mxu1 %v16872_v21  ;;  %13440 = vmatprep.subr.bf16.mxu0 %v16874_v54 }
0x2dc4   :  { %13413 = vmatprep.mubr.bf16.mxu1 %v19757_v14  ;;  %13466 = vmatprep.mubr.bf16.mxu0 %v19757_v14 }
0x2dc6   :  { %13388 = vmatpush1.bf16.msra.mxu1 %v16871_v17  ;;  %13441 = vmatpush1.bf16.msra.mxu0 %v16873_v48 }
0x2dc7   :  { %18142 = vmatprep.subr.bf16.mxu1 %v19305_v52  ;;  %18170 = vmatprep.subr.bf16.mxu0 %v19306_v53 }
0x2dc9   :  { %16887 = vmatmul.mubr.msk.bf16.vlgmr.msra.gmra.mrb[52].mxu1 %vm145_vm0, %v23772_v41  ;;  %16889 = vmatmul.mubr.msk.bf16.vlgmr.msra.gmra.mrb[48].mxu0 %vm145_vm0, %v23772_v41  ;;  %v19313_v41 = vld [vmem:[%s24564_s14 + $0xc50] sm:$0xff]  }
0x2dca   :  { %13423 = vmatprep.mubr.bf16.mxu1 %v19757_v14  ;;  %13476 = vmatprep.mubr.bf16.mxu0 %v19757_v14  ;;  %v19314_v14 = vld [vmem:[%s24564_s14 + $0xcd0] sm:$0xff]  }
0x2dcb   :  { %18143 = vmatpush3.bf16.msra.mxu1 %v19307_v18  ;;  %18171 = vmatpush3.bf16.msra.mxu0 %v19308_v32 }
0x2dcc   :  { %18144 = vmatprep.subr.bf16.mxu1 %v19309_v24  ;;  %18172 = vmatprep.subr.bf16.mxu0 %v19310_v2 }
0x2dcf   :  { %18145 = vmatpush3.bf16.msra.mxu1 %v19311_v4  ;;  %18173 = vmatpush3.bf16.msra.mxu0 %v19312_v31 }
0x2dd0   :  { %18146 = vmatprep.subr.bf16.mxu1 %v19313_v41  ;;  %18174 = vmatprep.subr.bf16.mxu0 %v19314_v14 }
0x2dd1   :  { %16888 = vmatmul.mubr.msk.bf16.gmra.mrb[56].mxu1 %vm145_vm0, %v23810_v46  ;;  %16890 = vmatmul.mubr.msk.bf16.gmra.mrb[52].mxu0 %vm145_vm0, %v23810_v46  ;;  %v19322_v46 = vld [vmem:[%s24564_s14 + $0xce0] sm:$0xff]  }
0x2dd3   :  { %18147 = vmatpush3.bf16.msra.mxu1 %v19315_v63  ;;  %18175 = vmatpush3.bf16.msra.mxu0 %v19316_v61 }
0x2dd4   :  { %18148 = vmatprep.subr.bf16.mxu1 %v19317_v45  ;;  %18176 = vmatprep.subr.bf16.mxu0 %v19318_v6 }
0x2dd7   :  { %18149 = vmatpush3.bf16.msra.mxu1 %v19319_v36  ;;  %18177 = vmatpush3.bf16.msra.mxu0 %v19320_v5 }
0x2dd8   :  { %18150 = vmatprep.subr.bf16.mxu1 %v19321_v35  ;;  %18178 = vmatprep.subr.bf16.mxu0 %v19322_v46 }
0x2ddb   :  { %18151 = vmatpush3.bf16.msra.mxu1 %v19323_v47  ;;  %18179 = vmatpush3.bf16.msra.mxu0 %v19324_v44  ;;  %v19339_v47 = vld [vmem:[%s24564_s14 + $0xd00] sm:$0xff]  }
0x2ddc   :  { %18152 = vmatprep.subr.bf16.mxu1 %v19325_v15  ;;  %18180 = vmatprep.subr.bf16.mxu0 %v19326_v57  ;;  %v19340_v44 = vld [vmem:[%s24564_s14 + $0xd80] sm:$0xff]  }
0x2ddf   :  { %18153 = vmatpush3.bf16.msra.mxu1 %v19327_v55  ;;  %18181 = vmatpush3.bf16.msra.mxu0 %v19328_v12 }
0x2de0   :  { %18154 = vmatprep.subr.bf16.mxu1 %v19329_v19  ;;  %18182 = vmatprep.subr.bf16.mxu0 %v19330_v22  ;;  %v19341_v19 = vld [vmem:[%s24564_s14 + $0xd48] sm:$0xff]  }
0x2de1   :  { %v19342_v22 = vld [vmem:[%s24564_s14 + $0xdc8] sm:$0xff]  }
0x2de3   :  { %18155 = vmatpush3.bf16.msra.mxu1 %v19331_v49  ;;  %18183 = vmatpush3.bf16.msra.mxu0 %v19332_v8  ;;  %v24077_v49 = vrot.slane %v24053_v59, %v20601_v20 }
0x2de4   :  { %18156 = vmatprep.subr.bf16.mxu1 %v19333_v16  ;;  %18184 = vmatprep.subr.bf16.mxu0 %v19334_v60 }
0x2de7   :  { %18157 = vmatpush3.bf16.msra.mxu1 %v19335_v1  ;;  %18185 = vmatpush3.bf16.msra.mxu0 %v19336_v51  ;;  %v24081_v51 = vrot.slane %v24053_v59, %v20604_v34 }
0x2de8   :  { %18198 = vmatprep.subr.bf16.mxu1 %v19337_v58  ;;  %18226 = vmatprep.subr.bf16.mxu0 %v19338_v10 }
0x2e6c   :  { %v13097_v26 = vpop.f32.mrb[20].mxu1  ;;  %v13150_v23 = vpop.f32.mrb[24].mxu0 }
0x2e6d   :  { %v13098_v9 = vadd.f32 %v13097_v26, %v12660_v62  ;;  %v13151_v43 = vadd.f32 %v13150_v23, %v12668_v56  ;;  %v13099_v0 = vpop.f32.mrb[21].mxu1  ;;  %v13152_v38 = vpop.f32.mrb[25].mxu0 }
0x2e6e   :  { %v13100_v13 = vadd.f32 %v13099_v0, %v12664_v50  ;;  %v13153_v11 = vadd.f32 %v13152_v38, %v12672_v42  ;;  %v13101_v21 = vpop.f32.mrb[22].mxu1  ;;  %v13154_v54 = vpop.f32.mrb[26].mxu0  ;;  %v19343_v38 = vld [vmem:[%s24564_s14 + $0xd08] sm:$0xff]  }
0x2e6f   :  { %v13102_v17 = vadd.f32 %v13101_v21, %v12660_v62  ;;  %v13155_v48 = vadd.f32 %v13154_v54, %v12668_v56  ;;  %v13103_v52 = vpop.f32.mrb[23].mxu1  ;;  %v13156_v53 = vpop.f32.mrb[27].mxu0  ;;  %v13487_v24 = vmax.f32 %v13098_v9, 0.0  ;;  %v13489_v2 = vmax.f32 %v13151_v43, 0.0 }
0x2e70   :  { %v13104_v18 = vadd.f32 %v13103_v52, %v12664_v50  ;;  %v13157_v32 = vadd.f32 %v13156_v53, %v12672_v42  ;;  %v13488_v41 = vmax.f32 %v13100_v13, 0.0  ;;  %v13490_v14 = vmax.f32 %v13153_v11, 0.0 }
0x2e71   :  { %v13503_v4 = vmax.f32 %v13102_v17, 0.0  ;;  %v13505_v31 = vmax.f32 %v13155_v48, 0.0  ;;  %v24085_v9 = vrot.slane %v24053_v59, %v20607_v37 }
0x2e72   :  { %v13504_v63 = vmax.f32 %v13104_v18, 0.0  ;;  %v13506_v61 = vmax.f32 %v13157_v32, 0.0 }
0x2e73   :  { %v13551_v45 = vpack.c.bf16 %v13503_v4, %v13487_v24  ;;  %v13553_v6 = vpack.c.bf16 %v13505_v31, %v13489_v2  ;;  %v19347_v31 = vld [vmem:[%s24564_s14 + $0xd10] sm:$0xff]  }
0x2e74   :  { %v13552_v36 = vpack.c.bf16 %v13504_v63, %v13488_v41  ;;  %v13554_v5 = vpack.c.bf16 %v13506_v61, %v13490_v14  ;;  %v13107_v35 = vpop.f32.mrb[32].mxu1  ;;  %v13160_v46 = vpop.f32.mrb[28].mxu0  ;;  %v19348_v41 = vld [vmem:[%s24564_s14 + $0xd90] sm:$0xff]  }
0x2e75   :  { %v13108_v15 = vadd.f32 %v13107_v35, %v12660_v62  ;;  %v13161_v57 = vadd.f32 %v13160_v46, %v12668_v56  ;;  %v13109_v55 = vpop.f32.mrb[33].mxu1  ;;  %v13162_v12 = vpop.f32.mrb[29].mxu0 }
0x2e76   :  { %v13110_v8 = vadd.f32 %v13109_v55, %v12664_v50  ;;  %v13163_v16 = vadd.f32 %v13162_v12, %v12672_v42  ;;  %v13111_v60 = vpop.f32.mrb[34].mxu1  ;;  %v13164_v1 = vpop.f32.mrb[30].mxu0  ;;  %14640 = vmatprep.mubr.bf16.mxu1 %v13552_v36  ;;  %14689 = vmatprep.mubr.bf16.mxu0 %v13554_v5  ;;  %v19350_v36 = vld [vmem:[%s24564_s14 + $0xdd8] sm:$0xff]  }
0x2e77   :  { %v13112_v58 = vadd.f32 %v13111_v60, %v12660_v62  ;;  %v13165_v10 = vadd.f32 %v13164_v1, %v12668_v56  ;;  %v13113_v26 = vpop.f32.mrb[35].mxu1  ;;  %v13166_v23 = vpop.f32.mrb[31].mxu0  ;;  %14641 = vmatmul.mubr.bf16.vlgmr.msra.gmra.mrb[60].mxu1 %v13551_v45  ;;  %14690 = vmatmul.mubr.bf16.vlgmr.msra.gmra.mrb[56].mxu0 %v13553_v6  ;;  %v19344_v62 = vld [vmem:[%s24564_s14 + $0xd88] sm:$0xff]   ;;  %v24095_v56 = vrot.slane %v24053_v59, %v20610_v40  ;;  %v13519_v13 = vmax.f32 %v13108_v15, 0.0  ;;  %v19349_v6 = vld [vmem:[%s24564_s14 + $0xd58] sm:$0xff]  }
0x2e78   :  { %v13114_v43 = vadd.f32 %v13113_v26, %v12664_v50  ;;  %v13167_v0 = vadd.f32 %v13166_v23, %v12672_v42  ;;  %18199 = vmatpush3.bf16.msra.mxu1 %v19339_v47  ;;  %18227 = vmatpush3.bf16.msra.mxu0 %v19340_v44  ;;  %v13521_v11 = vmax.f32 %v13161_v57, 0.0  ;;  %v19345_v50 = vld [vmem:[%s24564_s14 + $0xd50] sm:$0xff]   ;;  %v13520_v17 = vmax.f32 %v13110_v8, 0.0  ;;  %v19352_v8 = vld [vmem:[%s24564_s14 + $0xd98] sm:$0xff]   ;;  %v19354_v26 = vld [vmem:[%s24564_s14 + $0xde0] sm:$0xff]  }
0x2e79   :  { %v13535_v21 = vmax.f32 %v13112_v58, 0.0  ;;  %v13537_v54 = vmax.f32 %v13165_v10, 0.0  ;;  %18200 = vmatprep.subr.bf16.mxu1 %v19341_v19  ;;  %18228 = vmatprep.subr.bf16.mxu0 %v19342_v22  ;;  %v19346_v42 = vld [vmem:[%s24564_s14 + $0xdd0] sm:$0xff]   ;;  %v13522_v48 = vmax.f32 %v13163_v16, 0.0  ;;  %v19351_v22 = vld [vmem:[%s24564_s14 + $0xd18] sm:$0xff]   ;;  %v19353_v10 = vld [vmem:[%s24564_s14 + $0xd60] sm:$0xff]  }
0x2e7a   :  { %v13536_v52 = vmax.f32 %v13114_v43, 0.0  ;;  %v13538_v53 = vmax.f32 %v13167_v0, 0.0 }
0x2e7b   :  { %v13567_v59 = vpack.c.bf16 %v13535_v21, %v13519_v13  ;;  %v13569_v18 = vpack.c.bf16 %v13537_v54, %v13521_v11  ;;  %v24142_v11 = vld [vmem:[%s24567_s13 + $0x38] sm:$0xff] }
0x2e7c   :  { %v13568_v32 = vpack.c.bf16 %v13536_v52, %v13520_v17  ;;  %v13570_v24 = vpack.c.bf16 %v13538_v53, %v13522_v48  ;;  %18201 = vmatpush3.bf16.msra.mxu1 %v19343_v38  ;;  %18229 = vmatpush3.bf16.msra.mxu0 %v19344_v62  ;;  %v13203_v2 = vpop.f32.mrb[36].mxu1  ;;  %v13256_v4 = vpop.f32.mrb[32].mxu0  ;;  %v19355_v17 = vld [vmem:[%s24564_s14 + $0xd20] sm:$0xff]  }
0x2e7d   :  { %v13204_v14 = vadd.f32 %v13203_v2, %v24077_v49  ;;  %v13257_v63 = vadd.f32 %v13256_v4, %v24081_v51  ;;  %v13205_v61 = vpop.f32.mrb[37].mxu1  ;;  %v13258_v45 = vpop.f32.mrb[33].mxu0  ;;  %18202 = vmatprep.subr.bf16.mxu1 %v19345_v50  ;;  %18230 = vmatprep.subr.bf16.mxu0 %v19346_v42  ;;  %v19356_v48 = vld [vmem:[%s24564_s14 + $0xda0] sm:$0xff]  }
0x2e7e   :  { %v13206_v5 = vadd.f32 %v13205_v61, %v24085_v9  ;;  %v13259_v35 = vadd.f32 %v13258_v45, %v24095_v56  ;;  %v13207_v46 = vpop.f32.mrb[38].mxu1  ;;  %v13260_v47 = vpop.f32.mrb[34].mxu0  ;;  %14648 = vmatprep.mubr.bf16.mxu1 %v13568_v32  ;;  %14697 = vmatprep.mubr.bf16.mxu0 %v13570_v24  ;;  %v19357_v32 = vld [vmem:[%s24564_s14 + $0xd68] sm:$0xff]  }
0x2e7f   :  { %v13208_v44 = vadd.f32 %v13207_v46, %v24077_v49  ;;  %v13261_v15 = vadd.f32 %v13260_v47, %v24081_v51  ;;  %v13209_v57 = vpop.f32.mrb[39].mxu1  ;;  %v13262_v55 = vpop.f32.mrb[35].mxu0  ;;  %14649 = vmatmul.mubr.bf16.gmra.mrb[64].mxu1 %v13567_v59  ;;  %14698 = vmatmul.mubr.bf16.gmra.mrb[60].mxu0 %v13569_v18  ;;  %v13491_v16 = vmax.f32 %v13204_v14, 0.0  ;;  %v13493_v60 = vmax.f32 %v13257_v63, 0.0  ;;  %v19358_v24 = vld [vmem:[%s24564_s14 + $0xde8] sm:$0xff]  }
0x2e80   :  { %v13210_v12 = vadd.f32 %v13209_v57, %v24085_v9  ;;  %v13263_v19 = vadd.f32 %v13262_v55, %v24095_v56  ;;  %18203 = vmatpush3.bf16.msra.mxu1 %v19347_v31  ;;  %18231 = vmatpush3.bf16.msra.mxu0 %v19348_v41  ;;  %v13492_v23 = vmax.f32 %v13206_v5, 0.0  ;;  %v13494_v43 = vmax.f32 %v13259_v35, 0.0 }
0x2e81   :  { %v13507_v1 = vmax.f32 %v13208_v44, 0.0  ;;  %v13509_v58 = vmax.f32 %v13261_v15, 0.0  ;;  %18204 = vmatprep.subr.bf16.mxu1 %v19349_v6  ;;  %18232 = vmatprep.subr.bf16.mxu0 %v19350_v36  ;;  %v24162_v14 = vrot.slane %v24142_v11, %v19936_v28  ;;  %v24168_v36 = vrot.slane %v24142_v11, %v20595_v29  ;;  %v19359_v28 = vld [vmem:[%s24564_s14 + $0xd28] sm:$0xff]   ;;  %v19362_v44 = vld [vmem:[%s24564_s14 + $0xdf0] sm:$0xff]  }
0x2e82   :  { %v13508_v0 = vmax.f32 %v13210_v12, 0.0  ;;  %v13510_v38 = vmax.f32 %v13263_v19, 0.0  ;;  %v24172_v5 = vrot.slane %v24142_v11, %v19942_v30  ;;  %v24184_v29 = vrot.slane %v24142_v11, %v20598_v33 }
0x2e83   :  { %v24135_v62 = vpack.c.bf16 %v13507_v1, %v13491_v16  ;;  %v24137_v13 = vpack.c.bf16 %v13509_v58, %v13493_v60  ;;  %v19363_v1 = vld [vmem:[%s24564_s14 + $0xd30] sm:$0xff]  }
0x2e84   :  { %v13556_v21 = vpack.c.bf16 %v13508_v0, %v13492_v23  ;;  %v13558_v54 = vpack.c.bf16 %v13510_v38, %v13494_v43  ;;  %18205 = vmatpush3.bf16.msra.mxu1 %v19351_v22  ;;  %18233 = vmatpush3.bf16.msra.mxu0 %v19352_v8  ;;  %v13213_v50 = vpop.f32.mrb[40].mxu1  ;;  %v13266_v42 = vpop.f32.mrb[36].mxu0  ;;  %v19364_v58 = vld [vmem:[%s24564_s14 + $0xdb0] sm:$0xff]   ;;  %v19365_v0 = vld [vmem:[%s24564_s14 + $0xd78] sm:$0xff]  }
0x2e85   :  { %v13214_v52 = vadd.f32 %v13213_v50, %v24077_v49  ;;  %v13267_v53 = vadd.f32 %v13266_v42, %v24081_v51  ;;  %v13215_v59 = vpop.f32.mrb[41].mxu1  ;;  %v13268_v18 = vpop.f32.mrb[37].mxu0  ;;  %18206 = vmatprep.subr.bf16.mxu1 %v19353_v10  ;;  %18234 = vmatprep.subr.bf16.mxu0 %v19354_v26  ;;  %v19366_v38 = vld [vmem:[%s24564_s14 + $0xdf8] sm:$0xff]  }
0x2e86   :  { %v13216_v2 = vadd.f32 %v13215_v59, %v24085_v9  ;;  %v13269_v4 = vadd.f32 %v13268_v18, %v24095_v56  ;;  %v13217_v31 = vpop.f32.mrb[42].mxu1  ;;  %v13270_v41 = vpop.f32.mrb[38].mxu0  ;;  %14738 = vmatprep.mubr.bf16.mxu1 %v13556_v21  ;;  %14787 = vmatprep.mubr.bf16.mxu0 %v13558_v54 }
0x2e87   :  { %v13218_v63 = vadd.f32 %v13217_v31, %v24077_v49  ;;  %v13271_v61 = vadd.f32 %v13270_v41, %v24081_v51  ;;  %v13219_v45 = vpop.f32.mrb[43].mxu1  ;;  %v13272_v6 = vpop.f32.mrb[39].mxu0  ;;  %v19360_v49 = vld [vmem:[%s24564_s14 + $0xda8] sm:$0xff]   ;;  %v13523_v30 = vmax.f32 %v13214_v52, 0.0  ;;  %v13525_v51 = vmax.f32 %v13267_v53, 0.0 }
0x2e88   :  { %v13220_v35 = vadd.f32 %v13219_v45, %v24085_v9  ;;  %v13273_v46 = vadd.f32 %v13272_v6, %v24095_v56  ;;  %18207 = vmatpush3.bf16.msra.mxu1 %v19355_v17  ;;  %18235 = vmatpush3.bf16.msra.mxu0 %v19356_v48  ;;  %v19361_v56 = vld [vmem:[%s24564_s14 + $0xd70] sm:$0xff]   ;;  %v13524_v15 = vmax.f32 %v13216_v2, 0.0  ;;  %v13526_v57 = vmax.f32 %v13269_v4, 0.0 }
0x2e89   :  { %v13539_v47 = vmax.f32 %v13218_v63, 0.0  ;;  %v13541_v9 = vmax.f32 %v13271_v61, 0.0  ;;  %18208 = vmatprep.subr.bf16.mxu1 %v19357_v32  ;;  %18236 = vmatprep.subr.bf16.mxu0 %v19358_v24  ;;  %v19367_v32 = vld [vmem:[%s24564_s14 + $0xd38] sm:$0xff]   ;;  %v19369_v63 = vld [vmem:[%s24564_s14 + $0xe40] sm:$0xff]  }
0x2e8a   :  { %v13540_v55 = vmax.f32 %v13220_v35, 0.0  ;;  %v13542_v12 = vmax.f32 %v13273_v46, 0.0  ;;  %v19368_v24 = vld [vmem:[%s24564_s14 + $0xdb8] sm:$0xff]   ;;  %v19370_v61 = vld [vmem:[%s24564_s14 + $0xec0] sm:$0xff]  }
0x2e8b   :  { %v24192_v33 = vpack.c.bf16 %v13539_v47, %v13523_v30  ;;  %v24194_v19 = vpack.c.bf16 %v13541_v9, %v13525_v51 }
0x2e8c   :  { %v24196_v22 = vpack.c.bf16 %v13540_v55, %v13524_v15  ;;  %v24198_v8 = vpack.c.bf16 %v13542_v12, %v13526_v57  ;;  %18209 = vmatpush3.bf16.msra.mxu1 %v19359_v28  ;;  %18237 = vmatpush3.bf16.msra.mxu0 %v19360_v49  ;;  %v13309_v16 = vpop.f32.mrb[44].mxu1  ;;  %v13362_v60 = vpop.f32.mrb[40].mxu0  ;;  %v19371_v55 = vld [vmem:[%s24564_s14 + $0xe00] sm:$0xff]  }
0x2e8d   :  { %v13310_v10 = vadd.f32 %v13309_v16, %v24162_v14  ;;  %v13363_v26 = vadd.f32 %v13362_v60, %v24168_v36  ;;  %v13311_v23 = vpop.f32.mrb[45].mxu1  ;;  %v13364_v43 = vpop.f32.mrb[41].mxu0  ;;  %18210 = vmatprep.subr.bf16.mxu1 %v19361_v56  ;;  %18238 = vmatprep.subr.bf16.mxu0 %v19362_v44  ;;  %v19372_v12 = vld [vmem:[%s24564_s14 + $0xe80] sm:$0xff]  }
0x2e8e   :  { %v13312_v21 = vadd.f32 %v13311_v23, %v24172_v5  ;;  %v13365_v54 = vadd.f32 %v13364_v43, %v24184_v29  ;;  %v13313_v50 = vpop.f32.mrb[46].mxu1  ;;  %v13366_v42 = vpop.f32.mrb[42].mxu0  ;;  %v24258_v23 = vrot.slane %v24142_v11, %v20601_v20  ;;  %v24262_v43 = vrot.slane %v24142_v11, %v20604_v34 }
0x2e8f   :  { %v13314_v17 = vadd.f32 %v13313_v50, %v24162_v14  ;;  %v13367_v48 = vadd.f32 %v13366_v42, %v24168_v36  ;;  %v13315_v52 = vpop.f32.mrb[47].mxu1  ;;  %v13368_v53 = vpop.f32.mrb[43].mxu0  ;;  %v13495_v2 = vmax.f32 %v13310_v10, 0.0  ;;  %v13497_v4 = vmax.f32 %v13363_v26, 0.0  ;;  %v19373_v10 = vld [vmem:[%s24564_s14 + $0xe48] sm:$0xff]  }
0x2e90   :  { %v13316_v59 = vadd.f32 %v13315_v52, %v24172_v5  ;;  %v13369_v18 = vadd.f32 %v13368_v53, %v24184_v29  ;;  %18211 = vmatpush3.bf16.msra.mxu1 %v19363_v1  ;;  %18239 = vmatpush3.bf16.msra.mxu0 %v19364_v58  ;;  %v13496_v45 = vmax.f32 %v13312_v21, 0.0  ;;  %v13498_v6 = vmax.f32 %v13365_v54, 0.0  ;;  %v19374_v26 = vld [vmem:[%s24564_s14 + $0xec8] sm:$0xff]  }
0x2e91   :  { %v13511_v31 = vmax.f32 %v13314_v17, 0.0  ;;  %v13513_v41 = vmax.f32 %v13367_v48, 0.0  ;;  %18212 = vmatprep.subr.bf16.mxu1 %v19365_v0  ;;  %18240 = vmatprep.subr.bf16.mxu0 %v19366_v38  ;;  %v24270_v50 = vrot.slane %v24142_v11, %v20607_v37  ;;  %v24278_v34 = vrot.slane %v24142_v11, %v20610_v40  ;;  %v19375_v37 = vld [vmem:[%s24564_s14 + $0xe08] sm:$0xff]   ;;  %v19377_v40 = vld [vmem:[%s24564_s14 + $0xe50] sm:$0xff]  }
0x2e92   :  { %v13512_v35 = vmax.f32 %v13316_v59, 0.0  ;;  %v13514_v46 = vmax.f32 %v13369_v18, 0.0  ;;  %v19378_v11 = vld [vmem:[%s24564_s14 + $0xed0] sm:$0xff]  }
0x2e93   :  { %v24232_v28 = vpack.c.bf16 %v13511_v31, %v13495_v2  ;;  %v24234_v49 = vpack.c.bf16 %v13513_v41, %v13497_v4  ;;  %v19379_v41 = vld [vmem:[%s24564_s14 + $0xe10] sm:$0xff]  }
0x2e94   :  { %v24236_v30 = vpack.c.bf16 %v13512_v35, %v13496_v45  ;;  %v24238_v51 = vpack.c.bf16 %v13514_v46, %v13498_v6  ;;  %18213 = vmatpush3.bf16.msra.mxu1 %v19367_v32  ;;  %18241 = vmatpush3.bf16.msra.mxu0 %v19368_v24  ;;  %v13319_v47 = vpop.f32.mrb[48].mxu1  ;;  %v13372_v9 = vpop.f32.mrb[44].mxu0  ;;  %v19381_v46 = vld [vmem:[%s24564_s14 + $0xe58] sm:$0xff]  }
0x2e95   :  { %v13320_v56 = vadd.f32 %v13319_v47, %v24162_v14  ;;  %v13373_v44 = vadd.f32 %v13372_v9, %v24168_v36  ;;  %v13321_v15 = vpop.f32.mrb[49].mxu1  ;;  %v13374_v57 = vpop.f32.mrb[45].mxu0  ;;  %18254 = vmatprep.subr.bf16.mxu1 %v19369_v63  ;;  %18282 = vmatprep.subr.bf16.mxu0 %v19370_v61  ;;  %v19380_v63 = vld [vmem:[%s24564_s14 + $0xe90] sm:$0xff]   ;;  %v19382_v47 = vld [vmem:[%s24564_s14 + $0xed8] sm:$0xff]  }
0x2e96   :  { %v13322_v16 = vadd.f32 %v13321_v15, %v24172_v5  ;;  %v13375_v60 = vadd.f32 %v13374_v57, %v24184_v29  ;;  %v13323_v1 = vpop.f32.mrb[50].mxu1  ;;  %v13376_v58 = vpop.f32.mrb[46].mxu0 }
0x2e97   :  { %v13324_v0 = vadd.f32 %v13323_v1, %v24162_v14  ;;  %v13377_v38 = vadd.f32 %v13376_v58, %v24168_v36  ;;  %14739 = vmatmul.mubr.bf16.vlgmr.msra.gmra.mrb[68].mxu1 %v24135_v62  ;;  %14788 = vmatmul.mubr.bf16.vlgmr.msra.gmra.mrb[64].mxu0 %v24137_v13  ;;  %v13325_v21 = vpop.f32.mrb[51].mxu1  ;;  %v13378_v54 = vpop.f32.mrb[47].mxu0  ;;  %v13527_v62 = vmax.f32 %v13320_v56, 0.0  ;;  %v13529_v13 = vmax.f32 %v13373_v44, 0.0 }
0x2e98   :  { %v13326_v20 = vadd.f32 %v13325_v21, %v24172_v5  ;;  %v13379_v42 = vadd.f32 %v13378_v54, %v24184_v29  ;;  %14746 = vmatprep.mubr.bf16.mxu1 %v24196_v22  ;;  %14795 = vmatprep.mubr.bf16.mxu0 %v24198_v8  ;;  %v19376_v5 = vld [vmem:[%s24564_s14 + $0xe88] sm:$0xff]   ;;  %v13528_v29 = vmax.f32 %v13322_v16, 0.0  ;;  %v13530_v22 = vmax.f32 %v13375_v60, 0.0 }
0x2e99   :  { %v13543_v14 = vmax.f32 %v13324_v0, 0.0  ;;  %v13545_v36 = vmax.f32 %v13377_v38, 0.0  ;;  %18255 = vmatpush3.bf16.msra.mxu1 %v19371_v55  ;;  %18283 = vmatpush3.bf16.msra.mxu0 %v19372_v12  ;;  %v19386_v0 = vld [vmem:[%s24564_s14 + $0xee0] sm:$0xff]  }
0x2e9a   :  { %v13544_v8 = vmax.f32 %v13326_v20, 0.0  ;;  %v13546_v17 = vmax.f32 %v13379_v42, 0.0  ;;  %18256 = vmatprep.subr.bf16.mxu1 %v19373_v10  ;;  %18284 = vmatprep.subr.bf16.mxu0 %v19374_v26 }
0x2e9b   :  { %v24292_v48 = vpack.c.bf16 %v13543_v14, %v13527_v62  ;;  %v24294_v52 = vpack.c.bf16 %v13545_v36, %v13529_v13 }
0x2e9c   :  { %v24296_v53 = vpack.c.bf16 %v13544_v8, %v13528_v29  ;;  %v24298_v59 = vpack.c.bf16 %v13546_v17, %v13530_v22  ;;  %v13415_v18 = vpop.f32.mrb[52].mxu1  ;;  %v13468_v32 = vpop.f32.mrb[48].mxu0  ;;  %v19388_v29 = vld [vmem:[%s24564_s14 + $0xea0] sm:$0xff]  }
0x2e9d   :  { %18257 = vmatpush3.bf16.msra.mxu1 %v19375_v37  ;;  %18285 = vmatpush3.bf16.msra.mxu0 %v19376_v5  ;;  %v13416_v24 = vadd.f32 %v13415_v18, %v24258_v23  ;;  %v13469_v2 = vadd.f32 %v13468_v32, %v24262_v43  ;;  %v13417_v4 = vpop.f32.mrb[53].mxu1  ;;  %v13470_v31 = vpop.f32.mrb[49].mxu0  ;;  %v19387_v5 = vld [vmem:[%s24564_s14 + $0xe20] sm:$0xff]   ;;  %v19390_v18 = vld [vmem:[%s24564_s14 + $0xee8] sm:$0xff]  }
0x2e9e   :  { %v13418_v61 = vadd.f32 %v13417_v4, %v24270_v50  ;;  %v13471_v45 = vadd.f32 %v13470_v31, %v24278_v34  ;;  %v13419_v6 = vpop.f32.mrb[54].mxu1  ;;  %v13472_v35 = vpop.f32.mrb[50].mxu0  ;;  %18258 = vmatprep.subr.bf16.mxu1 %v19377_v40  ;;  %18286 = vmatprep.subr.bf16.mxu0 %v19378_v11  ;;  %v19389_v11 = vld [vmem:[%s24564_s14 + $0xe68] sm:$0xff]  }
0x2e9f   :  { %v13420_v9 = vadd.f32 %v13419_v6, %v24258_v23  ;;  %v13473_v56 = vadd.f32 %v13472_v35, %v24262_v43  ;;  %14747 = vmatmul.mubr.bf16.gmra.mrb[72].mxu1 %v24192_v33  ;;  %14796 = vmatmul.mubr.bf16.gmra.mrb[68].mxu0 %v24194_v19  ;;  %v13421_v44 = vpop.f32.mrb[55].mxu1  ;;  %v13474_v15 = vpop.f32.mrb[51].mxu0  ;;  %v13499_v12 = vmax.f32 %v13416_v24, 0.0  ;;  %v13501_v16 = vmax.f32 %v13469_v2, 0.0  ;;  %v19383_v33 = vld [vmem:[%s24564_s14 + $0xe18] sm:$0xff]   ;;  %v19391_v35 = vld [vmem:[%s24564_s14 + $0xe28] sm:$0xff]  }
0x2ea0   :  { %v13422_v57 = vadd.f32 %v13421_v44, %v24270_v50  ;;  %v13475_v55 = vadd.f32 %v13474_v15, %v24278_v34  ;;  %14836 = vmatprep.mubr.bf16.mxu1 %v24236_v30  ;;  %14885 = vmatprep.mubr.bf16.mxu0 %v24238_v51  ;;  %v19384_v19 = vld [vmem:[%s24564_s14 + $0xe98] sm:$0xff]   ;;  %v13500_v58 = vmax.f32 %v13418_v61, 0.0  ;;  %v13502_v10 = vmax.f32 %v13471_v45, 0.0  ;;  %v19385_v51 = vld [vmem:[%s24564_s14 + $0xe60] sm:$0xff]  }
0x2ea1   :  { %v13515_v60 = vmax.f32 %v13420_v9, 0.0  ;;  %v13517_v1 = vmax.f32 %v13473_v56, 0.0  ;;  %18259 = vmatpush3.bf16.msra.mxu1 %v19379_v41  ;;  %18287 = vmatpush3.bf16.msra.mxu0 %v19380_v63  ;;  %v19394_v9 = vld [vmem:[%s24564_s14 + $0xef0] sm:$0xff]  }
0x2ea2   :  { %v13516_v26 = vmax.f32 %v13422_v57, 0.0  ;;  %v13518_v30 = vmax.f32 %v13475_v55, 0.0  ;;  %18260 = vmatprep.subr.bf16.mxu1 %v19381_v46  ;;  %18288 = vmatprep.subr.bf16.mxu0 %v19382_v47  ;;  %v19395_v55 = vld [vmem:[%s24564_s14 + $0xe30] sm:$0xff]  }
0x2ea3   :  { %v24336_v38 = vpack.c.bf16 %v13515_v60, %v13499_v12  ;;  %v24338_v21 = vpack.c.bf16 %v13517_v1, %v13501_v16  ;;  %v19396_v12 = vld [vmem:[%s24564_s14 + $0xeb0] sm:$0xff]   ;;  %v19397_v16 = vld [vmem:[%s24564_s14 + $0xe78] sm:$0xff]  }
0x2ea4   :  { %v24340_v54 = vpack.c.bf16 %v13516_v26, %v13500_v58  ;;  %v24342_v20 = vpack.c.bf16 %v13518_v30, %v13502_v10  ;;  %v13425_v42 = vpop.f32.mrb[56].mxu1  ;;  %v13478_v62 = vpop.f32.mrb[52].mxu0  ;;  %v19398_v60 = vld [vmem:[%s24564_s14 + $0xef8] sm:$0xff]   ;;  %v19402_v58 = vld [vmem:[%s24564_s14 + $0xfc0] sm:$0xff]   ;;  %v19405_v30 = vld [vmem:[%s24564_s14 + $0xf48] sm:$0xff]  }
0x2ea5   :  { %18261 = vmatpush3.bf16.msra.mxu1 %v19383_v33  ;;  %18289 = vmatpush3.bf16.msra.mxu0 %v19384_v19  ;;  %v13426_v13 = vadd.f32 %v13425_v42, %v24258_v23  ;;  %v13479_v14 = vadd.f32 %v13478_v62, %v24262_v43  ;;  %v13427_v36 = vpop.f32.mrb[57].mxu1  ;;  %v13480_v37 = vpop.f32.mrb[53].mxu0  ;;  %v19399_v1 = vld [vmem:[%s24564_s14 + $0xe38] sm:$0xff]   ;;  %v19401_v19 = vld [vmem:[%s24564_s14 + $0xf40] sm:$0xff]   ;;  %v19408_v42 = vld [vmem:[%s24564_s14 + $0xf88] sm:$0xff]  }
0x2ea6   :  { %v13428_v22 = vadd.f32 %v13427_v36, %v24270_v50  ;;  %v13481_v8 = vadd.f32 %v13480_v37, %v24278_v34  ;;  %v13429_v17 = vpop.f32.mrb[58].mxu1  ;;  %v13482_v40 = vpop.f32.mrb[54].mxu0  ;;  %18262 = vmatprep.subr.bf16.mxu1 %v19385_v51  ;;  %18290 = vmatprep.subr.bf16.mxu0 %v19386_v0  ;;  %v19400_v33 = vld [vmem:[%s24564_s14 + $0xeb8] sm:$0xff]   ;;  %v19403_v10 = vld [vmem:[%s24564_s14 + $0xf00] sm:$0xff]   ;;  %v19406_v51 = vld [vmem:[%s24564_s14 + $0xfc8] sm:$0xff]  }
0x2ea7   :  { %v13430_v32 = vadd.f32 %v13429_v17, %v24258_v23  ;;  %v13483_v24 = vadd.f32 %v13482_v40, %v24262_v43  ;;  %v13431_v2 = vpop.f32.mrb[59].mxu1  ;;  %v13484_v4 = vpop.f32.mrb[55].mxu0  ;;  %v13531_v63 = vmax.f32 %v13426_v13, 0.0  ;;  %v13533_v61 = vmax.f32 %v13479_v14, 0.0  ;;  %v19392_v23 = vld [vmem:[%s24564_s14 + $0xea8] sm:$0xff]   ;;  %v19404_v26 = vld [vmem:[%s24564_s14 + $0xf80] sm:$0xff]  }
0x2ea8   :  { %v13432_v31 = vadd.f32 %v13431_v2, %v24270_v50  ;;  %v13485_v41 = vadd.f32 %v13484_v4, %v24278_v34  ;;  %v13532_v43 = vmax.f32 %v13428_v22, 0.0  ;;  %v13534_v46 = vmax.f32 %v13481_v8, 0.0  ;;  %v19393_v34 = vld [vmem:[%s24564_s14 + $0xe70] sm:$0xff]   ;;  %v19407_v0 = vld [vmem:[%s24564_s14 + $0xf08] sm:$0xff]   ;;  %v19413_v62 = vld [vmem:[%s24564_s14 + $0xf58] sm:$0xff]  }
0x2ea9   :  { %v13547_v45 = vmax.f32 %v13430_v32, 0.0  ;;  %v13549_v6 = vmax.f32 %v13483_v24, 0.0  ;;  %18263 = vmatpush3.bf16.msra.mxu1 %v19387_v5  ;;  %18291 = vmatpush3.bf16.msra.mxu0 %v19388_v29  ;;  %v19414_v13 = vld [vmem:[%s24564_s14 + $0xfd8] sm:$0xff]   ;;  %v19421_v37 = vld [vmem:[%s24564_s14 + $0xf68] sm:$0xff]   ;;  %v19425_v8 = vld [vmem:[%s24564_s14 + $0xf70] sm:$0xff]  }
0x2eaa   :  { %v13548_v47 = vmax.f32 %v13432_v31, 0.0  ;;  %v13550_v50 = vmax.f32 %v13485_v41, 0.0  ;;  %18264 = vmatprep.subr.bf16.mxu1 %v19389_v11  ;;  %18292 = vmatprep.subr.bf16.mxu0 %v19390_v18  ;;  %v19415_v14 = vld [vmem:[%s24564_s14 + $0xf18] sm:$0xff]   ;;  %v19422_v5 = vld [vmem:[%s24564_s14 + $0xfe8] sm:$0xff]   ;;  %v19426_v17 = vld [vmem:[%s24564_s14 + $0xff0] sm:$0xff]  }
0x2eab   :  { %v24376_v56 = vpack.c.bf16 %v13547_v45, %v13531_v63  ;;  %v24378_v44 = vpack.c.bf16 %v13549_v6, %v13533_v61  ;;  %v19416_v36 = vld [vmem:[%s24564_s14 + $0xf98] sm:$0xff]   ;;  %v19423_v29 = vld [vmem:[%s24564_s14 + $0xf28] sm:$0xff]   ;;  %v19427_v40 = vld [vmem:[%s24564_s14 + $0xf30] sm:$0xff]  }
0x2eac   :  { %v24380_v15 = vpack.c.bf16 %v13548_v47, %v13532_v43  ;;  %v24382_v57 = vpack.c.bf16 %v13550_v50, %v13534_v46  ;;  %v19424_v22 = vld [vmem:[%s24564_s14 + $0xfa8] sm:$0xff]   ;;  %v19428_v11 = vld [vmem:[%s24564_s14 + $0xfb0] sm:$0xff]   ;;  %v19429_v18 = vld [vmem:[%s24564_s14 + $0xf78] sm:$0xff]  }
0x2ead   :  { %18265 = vmatpush3.bf16.msra.mxu1 %v19391_v35  ;;  %18293 = vmatpush3.bf16.msra.mxu0 %v19392_v23  ;;  %v19430_v32 = vld [vmem:[%s24564_s14 + $0xff8] sm:$0xff]  }
0x2eae   :  { %18266 = vmatprep.subr.bf16.mxu1 %v19393_v34  ;;  %18294 = vmatprep.subr.bf16.mxu0 %v19394_v9  ;;  %v19431_v24 = vld [vmem:[%s24564_s14 + $0xf38] sm:$0xff]  }
0x2eaf   :  { %v19432_v2 = vld [vmem:[%s24564_s14 + $0xfb8] sm:$0xff]  }
0x2eb1   :  { %18267 = vmatpush3.bf16.msra.mxu1 %v19395_v55  ;;  %18295 = vmatpush3.bf16.msra.mxu0 %v19396_v12 }
0x2eb2   :  { %18268 = vmatprep.subr.bf16.mxu1 %v19397_v16  ;;  %18296 = vmatprep.subr.bf16.mxu0 %v19398_v60 }
0x2eb5   :  { %18269 = vmatpush3.bf16.msra.mxu1 %v19399_v1  ;;  %18297 = vmatpush3.bf16.msra.mxu0 %v19400_v33 }
0x2eb6   :  { %18310 = vmatprep.subr.bf16.mxu1 %v19401_v19  ;;  %18338 = vmatprep.subr.bf16.mxu0 %v19402_v58 }
0x2eb8   :  { %14837 = vmatmul.mubr.bf16.vlgmr.msra.gmra.mrb[76].mxu1 %v24232_v28  ;;  %14886 = vmatmul.mubr.bf16.vlgmr.msra.gmra.mrb[72].mxu0 %v24234_v49  ;;  %v19409_v28 = vld [vmem:[%s24564_s14 + $0xf50] sm:$0xff]  }
0x2eb9   :  { %14844 = vmatprep.mubr.bf16.mxu1 %v24296_v53  ;;  %14893 = vmatprep.mubr.bf16.mxu0 %v24298_v59  ;;  %v19410_v49 = vld [vmem:[%s24564_s14 + $0xfd0] sm:$0xff]  }
0x2eba   :  { %18311 = vmatpush3.bf16.msra.mxu1 %v19403_v10  ;;  %18339 = vmatpush3.bf16.msra.mxu0 %v19404_v26  ;;  %v19411_v53 = vld [vmem:[%s24564_s14 + $0xf10] sm:$0xff]  }
0x2ebb   :  { %18312 = vmatprep.subr.bf16.mxu1 %v19405_v30  ;;  %18340 = vmatprep.subr.bf16.mxu0 %v19406_v51  ;;  %v19412_v59 = vld [vmem:[%s24564_s14 + $0xf90] sm:$0xff]  }
0x2ebe   :  { %18313 = vmatpush3.bf16.msra.mxu1 %v19407_v0  ;;  %18341 = vmatpush3.bf16.msra.mxu0 %v19408_v42 }
0x2ebf   :  { %18314 = vmatprep.subr.bf16.mxu1 %v19409_v28  ;;  %18342 = vmatprep.subr.bf16.mxu0 %v19410_v49 }
0x2ec0   :  { %14845 = vmatmul.mubr.bf16.gmra.mrb[80].mxu1 %v24292_v48  ;;  %14894 = vmatmul.mubr.bf16.gmra.mrb[76].mxu0 %v24294_v52  ;;  %v19417_v48 = vld [vmem:[%s24564_s14 + $0xf60] sm:$0xff]  }
0x2ec1   :  { %14934 = vmatprep.mubr.bf16.mxu1 %v24340_v54  ;;  %14983 = vmatprep.mubr.bf16.mxu0 %v24342_v20  ;;  %v19418_v52 = vld [vmem:[%s24564_s14 + $0xfe0] sm:$0xff]  }
0x2ec2   :  { %18315 = vmatpush3.bf16.msra.mxu1 %v19411_v53  ;;  %18343 = vmatpush3.bf16.msra.mxu0 %v19412_v59  ;;  %v19419_v54 = vld [vmem:[%s24564_s14 + $0xf20] sm:$0xff]  }
0x2ec3   :  { %18316 = vmatprep.subr.bf16.mxu1 %v19413_v62  ;;  %18344 = vmatprep.subr.bf16.mxu0 %v19414_v13  ;;  %v19420_v20 = vld [vmem:[%s24564_s14 + $0xfa0] sm:$0xff]  }
0x2ec6   :  { %18317 = vmatpush3.bf16.msra.mxu1 %v19415_v14  ;;  %18345 = vmatpush3.bf16.msra.mxu0 %v19416_v36 }
0x2ec7   :  { %18318 = vmatprep.subr.bf16.mxu1 %v19417_v48  ;;  %18346 = vmatprep.subr.bf16.mxu0 %v19418_v52 }
0x2eca   :  { %18319 = vmatpush3.bf16.msra.mxu1 %v19419_v54  ;;  %18347 = vmatpush3.bf16.msra.mxu0 %v19420_v20 }
0x2ecb   :  { %18320 = vmatprep.subr.bf16.mxu1 %v19421_v37  ;;  %18348 = vmatprep.subr.bf16.mxu0 %v19422_v5 }
0x2ece   :  { %18321 = vmatpush3.bf16.msra.mxu1 %v19423_v29  ;;  %18349 = vmatpush3.bf16.msra.mxu0 %v19424_v22 }
0x2ecf   :  { %18322 = vmatprep.subr.bf16.mxu1 %v19425_v8  ;;  %18350 = vmatprep.subr.bf16.mxu0 %v19426_v17 }
0x2ed2   :  { %18323 = vmatpush3.bf16.msra.mxu1 %v19427_v40  ;;  %18351 = vmatpush3.bf16.msra.mxu0 %v19428_v11 }
0x2ed3   :  { %18324 = vmatprep.subr.bf16.mxu1 %v19429_v18  ;;  %18352 = vmatprep.subr.bf16.mxu0 %v19430_v32 }
0x2ed6   :  { %18325 = vmatpush3.bf16.msra.mxu1 %v19431_v24  ;;  %18353 = vmatpush3.bf16.msra.mxu0 %v19432_v2 }
0x2ed9   :  { %14935 = vmatmul.mubr.bf16.vlgmr.msra.gmra.mrb[84].mxu1 %v24336_v38  ;;  %14984 = vmatmul.mubr.bf16.vlgmr.msra.gmra.mrb[80].mxu0 %v24338_v21 }
0x2eda   :  { %14942 = vmatprep.mubr.bf16.mxu1 %v24380_v15  ;;  %14991 = vmatprep.mubr.bf16.mxu0 %v24382_v57 }
0x2ee1   :  { %14943 = vmatmul.mubr.bf16.gmra.mrb[88].mxu1 %v24376_v56  ;;  %14992 = vmatmul.mubr.bf16.gmra.mrb[84].mxu0 %v24378_v44 }
0x2f4a   :  { %v18158_v4 = vpop.f32.mrb[60].mxu1  ;;  %v18186_v31 = vpop.f32.mrb[56].mxu0 }
0x2f4b   :  { %v18159_v41 = vpop.f32.mrb[61].mxu1  ;;  %v18187_v63 = vpop.f32.mrb[57].mxu0 }
0x2f4c   :  { %v18160_v61 = vadd.f32 %v18159_v41, %v18158_v4  ;;  %v18188_v45 = vadd.f32 %v18187_v63, %v18186_v31  ;;  %v18161_v6 = vpop.f32.mrb[62].mxu1  ;;  %v18189_v35 = vpop.f32.mrb[58].mxu0 }
0x2f4d   :  { %v18162_v23 = vpop.f32.mrb[63].mxu1  ;;  %v18190_v38 = vpop.f32.mrb[59].mxu0 }
0x2f4e   :  { %v14692_v43 = vadd.f32 %v18188_v45, %v18160_v61  ;;  %v18163_v21 = vadd.f32 %v18162_v23, %v18161_v6  ;;  %v18191_v46 = vadd.f32 %v18190_v38, %v18189_v35 }
0x2f50   :  { %v14695_v47 = vadd.f32 %v18191_v46, %v18163_v21 }
0x2f52   :  { %v18164_v50 = vpop.f32.mrb[64].mxu1  ;;  %v18192_v34 = vpop.f32.mrb[60].mxu0 }
0x2f53   :  { %v18165_v9 = vpop.f32.mrb[65].mxu1  ;;  %v18193_v56 = vpop.f32.mrb[61].mxu0 }
0x2f54   :  { %v18166_v15 = vadd.f32 %v18165_v9, %v18164_v50  ;;  %v18194_v44 = vadd.f32 %v18193_v56, %v18192_v34  ;;  %v18167_v57 = vpop.f32.mrb[66].mxu1  ;;  %v18195_v55 = vpop.f32.mrb[62].mxu0 }
0x2f55   :  { %v18168_v12 = vpop.f32.mrb[67].mxu1  ;;  %v18196_v16 = vpop.f32.mrb[63].mxu0 }
0x2f56   :  { %v14700_v60 = vadd.f32 %v18194_v44, %v18166_v15  ;;  %v18169_v1 = vadd.f32 %v18168_v12, %v18167_v57  ;;  %v18197_v33 = vadd.f32 %v18196_v16, %v18195_v55 }
0x2f58   :  { %v14703_v19 = vadd.f32 %v18197_v33, %v18169_v1 }
0x2f6a   :  { %v18214_v58 = vpop.f32.mrb[68].mxu1  ;;  %v18242_v10 = vpop.f32.mrb[64].mxu0 }
0x2f6b   :  { %v18215_v26 = vpop.f32.mrb[69].mxu1  ;;  %v18243_v30 = vpop.f32.mrb[65].mxu0 }
0x2f6c   :  { %v18216_v51 = vadd.f32 %v18215_v26, %v18214_v58  ;;  %v18244_v0 = vadd.f32 %v18243_v30, %v18242_v10  ;;  %v18217_v42 = vpop.f32.mrb[70].mxu1  ;;  %v18245_v28 = vpop.f32.mrb[66].mxu0 }
0x2f6d   :  { %v18218_v49 = vpop.f32.mrb[71].mxu1  ;;  %v18246_v53 = vpop.f32.mrb[67].mxu0 }
0x2f6e   :  { %v14741_v59 = vadd.f32 %v18216_v51, %v14692_v43  ;;  %v18219_v62 = vadd.f32 %v18218_v49, %v18217_v42  ;;  %v18247_v13 = vadd.f32 %v18246_v53, %v18245_v28 }
0x2f70   :  { %v14790_v14 = vadd.f32 %v18244_v0, %v14741_v59  ;;  %v14744_v36 = vadd.f32 %v18219_v62, %v14695_v47 }
0x2f72   :  { %v14793_v48 = vadd.f32 %v18247_v13, %v14744_v36  ;;  %v18220_v52 = vpop.f32.mrb[72].mxu1  ;;  %v18248_v54 = vpop.f32.mrb[68].mxu0 }
0x2f73   :  { %v18221_v20 = vpop.f32.mrb[73].mxu1  ;;  %v18249_v37 = vpop.f32.mrb[69].mxu0 }
0x2f74   :  { %v18222_v5 = vadd.f32 %v18221_v20, %v18220_v52  ;;  %v18250_v29 = vadd.f32 %v18249_v37, %v18248_v54  ;;  %v18223_v22 = vpop.f32.mrb[74].mxu1  ;;  %v18251_v8 = vpop.f32.mrb[70].mxu0 }
0x2f75   :  { %v18224_v17 = vpop.f32.mrb[75].mxu1  ;;  %v18252_v40 = vpop.f32.mrb[71].mxu0 }
0x2f76   :  { %v14749_v11 = vadd.f32 %v18222_v5, %v14700_v60  ;;  %v18225_v18 = vadd.f32 %v18224_v17, %v18223_v22  ;;  %v18253_v32 = vadd.f32 %v18252_v40, %v18251_v8  ;;  %v17276_v5 = vld [vmem:[%s24568_s15 + $0x3] ss:$0 sm:$0xff] }
0x2f78   :  { %v14798_v24 = vadd.f32 %v18250_v29, %v14749_v11  ;;  %v14752_v2 = vadd.f32 %v18225_v18, %v14703_v19 }
0x2f7a   :  { %v14801_v4 = vadd.f32 %v18253_v32, %v14752_v2 }
0x2f8b   :  { %v18270_v31 = vpop.f32.mrb[76].mxu1  ;;  %v18298_v41 = vpop.f32.mrb[72].mxu0 }
0x2f8c   :  { %v18271_v63 = vpop.f32.mrb[77].mxu1  ;;  %v18299_v61 = vpop.f32.mrb[73].mxu0 }
0x2f8d   :  { %v18272_v45 = vadd.f32 %v18271_v63, %v18270_v31  ;;  %v18300_v6 = vadd.f32 %v18299_v61, %v18298_v41  ;;  %v18273_v35 = vpop.f32.mrb[78].mxu1  ;;  %v18301_v23 = vpop.f32.mrb[74].mxu0 }
0x2f8e   :  { %v18274_v38 = vpop.f32.mrb[79].mxu1  ;;  %v18302_v43 = vpop.f32.mrb[75].mxu0 }
0x2f8f   :  { %v14839_v21 = vadd.f32 %v18272_v45, %v14790_v14  ;;  %v18275_v46 = vadd.f32 %v18274_v38, %v18273_v35  ;;  %v18303_v47 = vadd.f32 %v18302_v43, %v18301_v23 }
0x2f91   :  { %v14888_v50 = vadd.f32 %v18300_v6, %v14839_v21  ;;  %v14842_v34 = vadd.f32 %v18275_v46, %v14793_v48 }
0x2f93   :  { %v14891_v9 = vadd.f32 %v18303_v47, %v14842_v34  ;;  %v18276_v56 = vpop.f32.mrb[80].mxu1  ;;  %v18304_v15 = vpop.f32.mrb[76].mxu0 }
0x2f94   :  { %v18277_v44 = vpop.f32.mrb[81].mxu1  ;;  %v18305_v57 = vpop.f32.mrb[77].mxu0 }
0x2f95   :  { %v18278_v55 = vadd.f32 %v18277_v44, %v18276_v56  ;;  %v18306_v12 = vadd.f32 %v18305_v57, %v18304_v15  ;;  %v18279_v16 = vpop.f32.mrb[82].mxu1  ;;  %v18307_v60 = vpop.f32.mrb[78].mxu0 }
0x2f96   :  { %v18280_v1 = vpop.f32.mrb[83].mxu1  ;;  %v18308_v33 = vpop.f32.mrb[79].mxu0 }
0x2f97   :  { %v14847_v19 = vadd.f32 %v18278_v55, %v14798_v24  ;;  %v18281_v58 = vadd.f32 %v18280_v1, %v18279_v16  ;;  %v18309_v10 = vadd.f32 %v18308_v33, %v18307_v60 }
0x2f99   :  { %v14896_v26 = vadd.f32 %v18306_v12, %v14847_v19  ;;  %v14850_v30 = vadd.f32 %v18281_v58, %v14801_v4 }
0x2f9b   :  { %v14899_v51 = vadd.f32 %v18309_v10, %v14850_v30 }
0x2fac   :  { %v18326_v0 = vpop.f32.mrb[84].mxu1  ;;  %v18354_v42 = vpop.f32.mrb[80].mxu0 }
0x2fad   :  { %v18327_v28 = vpop.f32.mrb[85].mxu1  ;;  %v18355_v49 = vpop.f32.mrb[81].mxu0 }
0x2fae   :  { %v18328_v53 = vadd.f32 %v18327_v28, %v18326_v0  ;;  %v18356_v59 = vadd.f32 %v18355_v49, %v18354_v42  ;;  %v18329_v62 = vpop.f32.mrb[86].mxu1  ;;  %v18357_v13 = vpop.f32.mrb[82].mxu0  ;;  %v19766_v28 = vmov 0.0   ;;  %v19433_v49 = vld [vmem:[%s24571_s18] sm:$0xff]  }
0x2faf   :  { %v18330_v14 = vpop.f32.mrb[87].mxu1  ;;  %v18358_v36 = vpop.f32.mrb[83].mxu0  ;;  %18738 = vmatprep.subr.bf16.mxu1 %v19766_v28  ;;  %18746 = vmatprep.subr.bf16.mxu0 %v19766_v28 }
0x2fb0   :  { %v14937_v48 = vadd.f32 %v18328_v53, %v14888_v50  ;;  %v18331_v52 = vadd.f32 %v18330_v14, %v18329_v62  ;;  %v18359_v54 = vadd.f32 %v18358_v36, %v18357_v13  ;;  %18742 = vmatprep.mubr.msk.bf16.mxu1 %vm19767_vm7, %v19766_v28  ;;  %18754 = vmatprep.mubr.msk.bf16.mxu0 %vm19767_vm7, %v19766_v28  ;;  %v19434_v53 = vld [vmem:[%s24571_s18 + $0x8] sm:$0xff]  }
0x2fb1   :  { %18747 = vmatpush3.bf16.msra.mxu0 %v19433_v49 }
0x2fb2   :  { %v14986_v20 = vadd.f32 %v18356_v59, %v14937_v48  ;;  %v14940_v37 = vadd.f32 %v18331_v52, %v14891_v9  ;;  %18748 = vmatprep.subr.bf16.mxu0 %v19766_v28  ;;  %v19435_v59 = vld [vmem:[%s24571_s18 + $0x10] sm:$0xff]  }
0x2fb4   :  { %v15000_v29 = vadd.f32 %v14986_v20, %v23764_v39  ;;  %v14989_v22 = vadd.f32 %v18359_v54, %v14940_v37  ;;  %v18332_v8 = vpop.f32.mrb[88].mxu1  ;;  %v18360_v17 = vpop.f32.mrb[84].mxu0 }
0x2fb5   :  { %v18333_v40 = vpop.f32.mrb[89].mxu1  ;;  %v18361_v11 = vpop.f32.mrb[85].mxu0  ;;  %18749 = vmatpush3.bf16.msra.mxu0 %v19434_v53 }
0x2fb6   :  { %v15001_v18 = vadd.f32 %v14989_v22, %v23766_v3  ;;  %v18334_v32 = vadd.f32 %v18333_v40, %v18332_v8  ;;  %v18362_v24 = vadd.f32 %v18361_v11, %v18360_v17  ;;  %v18335_v2 = vpop.f32.mrb[90].mxu1  ;;  %v18363_v4 = vpop.f32.mrb[86].mxu0  ;;  %v15012_v31 = vadd.f32 %v17276_v5, %v15000_v29  ;;  %18750 = vmatprep.subr.bf16.mxu0 %v19766_v28  ;;  %v17279_v40 = vld [vmem:[%s24569_s16 + $0x3] ss:$0 sm:$0xff] }
0x2fb7   :  { %v18336_v41 = vpop.f32.mrb[91].mxu1  ;;  %v18364_v63 = vpop.f32.mrb[87].mxu0 }
0x2fb8   :  { %v14945_v61 = vadd.f32 %v18334_v32, %v14896_v26  ;;  %v18337_v45 = vadd.f32 %v18336_v41, %v18335_v2  ;;  %v18365_v6 = vadd.f32 %v18364_v63, %v18363_v4  ;;  %v15020_v35 = vsel %vm145_vm0, %v15012_v31, 0.0 }
0x2fb9   :  { %15021 = vadd.xlane.f32.xlu0 %v15020_v35  ;;  %v15013_v39 = vadd.f32 %v17276_v5, %v15001_v18  ;;  %18751 = vmatpush3.bf16.msra.mxu0 %v19435_v59 }
0x2fba   :  { %v14994_v23 = vadd.f32 %v18362_v24, %v14945_v61  ;;  %v14948_v38 = vadd.f32 %v18337_v45, %v14899_v51  ;;  %18752 = vmatprep.subr.bf16.mxu0 %v19766_v28  ;;  %v17280_v24 = vld [vmem:[%s24570_s17 + $0x3] ss:$0 sm:$0xff]  ;;  %v17281_v61 = vld [vmem:[%s24572_s3] ss:$0 sm:$0xff] }
0x2fbb   :  { %v15023_v43 = vsel %vm145_vm0, %v15013_v39, 0.0  ;;  %vm15099_vm8 = vcmp.eq.s32.totalorder %v17281_v61, %v19933_v27 }
0x2fbc   :  { %v15002_v3 = vadd.f32 %v14994_v23, %v23792_v7  ;;  %v14997_v21 = vadd.f32 %v18365_v6, %v14948_v38  ;;  %15024 = vadd.xlane.f32.xlu1 %v15023_v43  ;;  %v15100_v38 = vsel %vm15099_vm8, 0.0625, %v19766_v28 }
0x2fbe   :  { %v15003_v46 = vadd.f32 %v14997_v21, %v23790_v25  ;;  %v15014_v47 = vadd.f32 %v17276_v5, %v15002_v3 }
0x2fc0   :  { %v15026_v50 = vsel %vm145_vm0, %v15014_v47, 0.0  ;;  %v15015_v34 = vadd.f32 %v17276_v5, %v15003_v46  ;;  %v15101_v46 = vpack.c.bf16 %v15100_v38, %v15100_v38 }
0x2fc1   :  { %15027 = vadd.xlane.f32.xlu0 %v15026_v50 }
0x2fc2   :  { %v15029_v9 = vsel %vm145_vm0, %v15015_v34, 0.0 }
0x2fc3   :  { %15030 = vadd.xlane.f32.xlu1 %v15029_v9 }
0x3046   :  { %v15022_v56 = vpop.xlane.xlu0 %15021 }
0x3047   :  { %v15032_v15 = vmul.f32 0.015625, %v15022_v56 }
0x3049   :  { %v15036_v44 = vsub.f32 %v15012_v31, %v15032_v15  ;;  %v15025_v57 = vpop.xlane.xlu1 %15024 }
0x304a   :  { %v15033_v55 = vmul.f32 0.015625, %v15025_v57 }
0x304b   :  { %v15040_v12 = vmul.f32 %v15036_v44, %v15036_v44 }
0x304c   :  { %v15037_v16 = vsub.f32 %v15013_v39, %v15033_v55 }
0x304d   :  { %v15044_v7 = vsel %vm145_vm0, %v15040_v12, 0.0 }
0x304e   :  { %15045 = vadd.xlane.f32.xlu0 %v15044_v7  ;;  %v15028_v60 = vpop.xlane.xlu0 %15027  ;;  %v15041_v25 = vmul.f32 %v15037_v16, %v15037_v16 }
0x304f   :  { %v15034_v1 = vmul.f32 0.015625, %v15028_v60 }
0x3050   :  { %v15047_v33 = vsel %vm145_vm0, %v15041_v25, 0.0  ;;  %v15031_v19 = vpop.xlane.xlu1 %15030 }
0x3051   :  { %v15038_v58 = vsub.f32 %v15014_v47, %v15034_v1  ;;  %15048 = vadd.xlane.f32.xlu1 %v15047_v33  ;;  %v15035_v10 = vmul.f32 0.015625, %v15031_v19  ;;  %v19436_v47 = vld [vmem:[%s24571_s18 + $0x18] sm:$0xff]  }
0x3052   :  { %18753 = vmatpush3.bf16.msra.mxu0 %v19436_v47 }
0x3053   :  { %v15039_v26 = vsub.f32 %v15015_v34, %v15035_v10  ;;  %v15042_v30 = vmul.f32 %v15038_v58, %v15038_v58 }
0x3055   :  { %v15050_v51 = vsel %vm145_vm0, %v15042_v30, 0.0  ;;  %v15043_v0 = vmul.f32 %v15039_v26, %v15039_v26 }
0x3056   :  { %15051 = vadd.xlane.f32.xlu0 %v15050_v51 }
0x3057   :  { %v15053_v42 = vsel %vm145_vm0, %v15043_v0, 0.0 }
0x3058   :  { %15054 = vadd.xlane.f32.xlu1 %v15053_v42 }
0x30db   :  { %v15046_v62 = vpop.xlane.xlu0 %15045 }
0x30dc   :  { %v15056_v13 = vmul.f32 0.015625, %v15046_v62 }
0x30de   :  { %v15060_v14 = vadd.f32 1e-05, %v15056_v13  ;;  %v15049_v36 = vpop.xlane.xlu1 %15048 }
0x30df   :  { %v15057_v48 = vmul.f32 0.015625, %v15049_v36 }
0x30e0   :  { %19749 = vrsqrt.f32 %v15060_v14 }
0x30e1   :  { %v15061_v52 = vadd.f32 1e-05, %v15057_v48 }
0x30e3   :  { %19751 = vrsqrt.f32 %v15061_v52  ;;  %v15052_v54 = vpop.xlane.xlu0 %15051 }
0x30e4   :  { %v15058_v20 = vmul.f32 0.015625, %v15052_v54 }
0x30e5   :  { %v15055_v37 = vpop.xlane.xlu1 %15054 }
0x30e6   :  { %v15062_v5 = vadd.f32 1e-05, %v15058_v20  ;;  %v15059_v29 = vmul.f32 0.015625, %v15055_v37 }
0x30e8   :  { %19753 = vrsqrt.f32 %v15062_v5  ;;  %v15063_v22 = vadd.f32 1e-05, %v15059_v29 }
0x30ea   :  { %v19750_v8 = vpop.eup %19749  ;;  %19755 = vrsqrt.f32 %v15063_v22 }
0x30eb   :  { %v15068_v17 = vmul.f32 %v19750_v8, %v15036_v44 }
0x30ed   :  { %v19752_v11 = vpop.eup %19751  ;;  %v15078_v32 = vmul.f32 %v17279_v40, %v15068_v17 }
0x30ee   :  { %v15069_v18 = vmul.f32 %v19752_v11, %v15037_v16 }
0x30ef   :  { %v15088_v31 = vadd.f32 %v17280_v24, %v15078_v32 }
0x30f0   :  { %v15079_v2 = vmul.f32 %v17279_v40, %v15069_v18 }
0x30f2   :  { %v19754_v4 = vpop.eup %19753  ;;  %v15089_v41 = vadd.f32 %v17280_v24, %v15079_v2 }
0x30f3   :  { %v15070_v63 = vmul.f32 %v19754_v4, %v15038_v58 }
0x30f4   :  { %v19756_v45 = vpop.eup %19755  ;;  %v15102_v6 = vpack.c.bf16 %v15089_v41, %v15088_v31 }
0x30f5   :  { %v15071_v35 = vmul.f32 %v19756_v45, %v15039_v26  ;;  %v15080_v39 = vmul.f32 %v17279_v40, %v15070_v63 }
0x30f6   :  { %18739 = vmatpush3.bf16.msra.mxu1 %v15102_v6 }
0x30f7   :  { %18740 = vmatprep.subr.bf16.mxu1 %v19766_v28  ;;  %v15081_v23 = vmul.f32 %v17279_v40, %v15071_v35  ;;  %v15090_v43 = vadd.f32 %v17280_v24, %v15080_v39 }
0x30f9   :  { %v15091_v3 = vadd.f32 %v17280_v24, %v15081_v23 }
0x30fb   :  { %v15103_v21 = vpack.c.bf16 %v15091_v3, %v15090_v43 }
0x30fd   :  { %18741 = vmatpush3.bf16.msra.mxu1 %v15103_v21 }
0x3100   :  { %18743 = vmatmul.mubr.msk.bf16.vlgmr.msra.gmra.mrb[92].mxu1 %vm402_vm6, %v15101_v46 }
0x31d3   :  { %v15141_v50 = vpop.f32.mrb[92].mxu1 }
0x31d4   :  { %v15147_v34 = vpack.c.bf16 %v15141_v50, %v15141_v50  ;;  %v18744_v9 = vpop.f32.mrb[93].mxu1 }
0x31d5   :  { %v15144_v27 = vpop.f32.mrb[94].mxu1 }
0x31d6   :  { %v18745_v56 = vpop.f32.mrb[95].mxu1  ;;  %18755 = vmatmul.mubr.msk.bf16.vlgmr.msra.gmra.mrb[88].mxu0 %vm145_vm0, %v15147_v34 }
0x32a9   :  { %v15217_v15 = vpop.f32.mrb[88].mxu0 }
0x32aa   :  { %15223 = vst [vmem:[%s24573_s19] sm:$0x3] %v15217_v15  ;;  %v18756_v44 = vpop.f32.mrb[89].mxu0 }
0x32ab   :  { %v15220_v57 = vpop.f32.mrb[90].mxu0 }
0x32ac   :  { %v18757_v55 = vpop.f32.mrb[91].mxu0 }

</bundles_post_ra>
